<compile_context>
chip_gen: v7x
topology: tpu7x:2x2x1
jax: 0.10.0
libtpu: 0.0.40
codegen_flags: <defaults>
</compile_context>

<pallas_src>
import functools

import jax
import jax.numpy as jnp
from jax.experimental import pallas as pl
from jax.experimental.pallas import tpu as pltpu

EPS = 1e-5  # PyTorch BatchNorm2d default


def _round_up(x, m):
    return (x + m - 1) // m * m


def _conv_bn_relu_kernel(x_ref, w_ref, gamma_ref, beta_ref, o_ref,
                         lhs_ref, ycache_ref, sum_ref, sumsq_ref,
                         scale_ref, shift_ref,
                         *, H, W, KH, KW, CIN_P, M_TOTAL, CACHE_Y):
    """Fused Conv2d + BatchNorm2d(train) + ReLU via packed implicit GEMM.

    Grid = (phase, image-block), iterated phase-major (last axis fastest):
      phase 0: build the packed im2col slab in VMEM scratch, ONE MXU matmul with
               K = KH*KW*CIN_P, accumulate global per-channel sum / sum-of-squares,
               cache the f32 conv output in VMEM (if CACHE_Y).  On the last block
               fold (mean, inv_std, gamma, beta) into per-channel scale/shift.
      phase 1: read cached conv output (or recompute), apply y*scale + shift, ReLU.

    x_ref:      (B, Hp, Wp, CIN_P)         bf16, spatially pre-padded NHWC images
    w_ref:      (KH*KW*CIN_P, Cout_p)      bf16, tap-packed weights (resident)
    gamma/beta: (1, Cout_p)                f32  (resident)
    o_ref:      (B, H*W, Cout_p)           f32
    """
    phase = pl.program_id(0)
    blk = pl.program_id(1)
    last_blk = pl.num_programs(1) - 1
    b_img = x_ref.shape[0]
    hw = H * W
    cout_p = o_ref.shape[-1]

    def conv_block():
        # One shifted-copy pass builds the (B*H*W, KH*KW*CIN_P) slab; taps are packed
        # into the contraction dim so a single dot feeds the MXU with K = KH*KW*CIN_P
        # instead of KH*KW tiny K=CIN_P dots (and the MXU accumulates internally).
        for ki in range(KH):
            for kj in range(KW):
                tap = ki * KW + kj
                for bb in range(b_img):
                    patch = x_ref[bb, ki:ki + H, kj:kj + W, :]        # (H, W, CIN_P) bf16
                    lhs_ref[bb * hw:(bb + 1) * hw,
                            tap * CIN_P:(tap + 1) * CIN_P] = patch.reshape(hw, CIN_P)
        return jnp.dot(lhs_ref[...], w_ref[...],
                       preferred_element_type=jnp.float32)             # (B*H*W, Cout_p) f32

    @pl.when(jnp.logical_and(phase == 0, blk == 0))
    def _init():
        sum_ref[...] = jnp.zeros_like(sum_ref)
        sumsq_ref[...] = jnp.zeros_like(sumsq_ref)

    @pl.when(phase == 0)
    def _stats():
        y = conv_block()
        sum_ref[...] += jnp.sum(y, axis=0, keepdims=True)
        sumsq_ref[...] += jnp.sum(y * y, axis=0, keepdims=True)
        if CACHE_Y:
            ycache_ref[blk] = y

    @pl.when(jnp.logical_and(phase == 0, blk == last_blk))
    def _finalize_stats():
        inv_m = 1.0 / M_TOTAL
        mean = sum_ref[...] * inv_m
        # Biased variance (what PyTorch normalizes with).  Single-pass E[y^2]-mean^2
        # in f32 can lose precision for very large M / activation magnitudes; the
        # max(...,0) guards the tiny-negative cancellation case.
        var = jnp.maximum(sumsq_ref[...] * inv_m - mean * mean, 0.0)
        inv_std = jax.lax.rsqrt(var + EPS)
        scale = gamma_ref[...] * inv_std
        scale_ref[...] = scale
        shift_ref[...] = beta_ref[...] - mean * scale

    @pl.when(phase == 1)
    def _apply():
        y = ycache_ref[blk] if CACHE_Y else conv_block()
        scale = scale_ref[...]
        shift = shift_ref[...]
        for bb in range(b_img):
            o_ref[bb] = jnp.maximum(y[bb * hw:(bb + 1) * hw, :] * scale + shift, 0.0)


def conv_bn_relu(x_nchw, weight, bias, gamma, beta, *, padding):
    """Fused Conv2d(stride=1) + BatchNorm2d(training-mode stats) + ReLU.

    x_nchw: (N, inC, H, W); weight: (outC, inC, kh, kw); bias/gamma/beta: (outC,)
    returns: (N, outC, H, W) float32
    """
    # A per-channel constant added before training-mode BatchNorm is exactly
    # cancelled by the mean subtraction, so the conv bias is dropped entirely.
    del bias
    n, in_c, h, w = x_nchw.shape
    out_c, _, kh, kw = weight.shape
    hp, wp = h + 2 * padding, w + 2 * padding
    cin_p = _round_up(in_c, 8)        # sublane-friendly per-tap channel width
    cout_p = _round_up(out_c, 128)    # lane-dense output-channel slab
    k_packed = kh * kw * cin_p        # packed contraction dim

    # ---- choose images-per-block B and whether to cache the conv output in VMEM.
    # Conservative working budget that fits v7x's 64 MiB VMEM with headroom.
    # TODO(synk): query pltpu.get_tpu_info() and raise toward ~96 MiB on v5e/v6e.
    budget = 40 * 1024 * 1024

    def block_bytes(b):
        x_blk = b * hp * wp * cin_p * 2 * 2       # bf16 input block, double buffered
        o_blk = b * h * w * cout_p * 4 * 2        # f32 output block, double buffered
        slab = b * h * w * k_packed * 2           # bf16 im2col scratch
        return x_blk + o_blk + slab

    b_img = 1
    for d in range(n, 0, -1):
        if n % d == 0 and block_bytes(d) <= budget // 2:
            b_img = d
            break
    nblk = n // b_img
    m_blk = b_img * h * w

    ycache_bytes = n * h * w * cout_p * 4
    cache_y = ycache_bytes <= budget - block_bytes(b_img)
    # TODO(synk): on v7x prefer a bf16 y-cache (or cache a sub-batch) when tight.
    ycache_shape = (nblk, m_blk, cout_p) if cache_y else (1, 8, 128)

    # ---- layout prep (once, in the wrapper).
    # NCHW -> NHWC, spatial pad once (vs. a kh*kw im2col blow-up in HBM), channel pad, bf16.
    x = jnp.transpose(x_nchw, (0, 2, 3, 1)).astype(jnp.float32)
    x = jnp.pad(x, ((0, 0), (padding, padding), (padding, padding), (0, cin_p - in_c)))
    x = x.astype(jnp.bfloat16)

    # (outC, inC, kh, kw) -> tap-packed (kh*kw*Cin_p, Cout_p) bf16; row order matches
    # the kernel's slab packing (tap = ki*KW + kj, then channel).
    w_t = jnp.transpose(weight.astype(jnp.float32), (2, 3, 1, 0))      # (kh, kw, inC, outC)
    w_t = jnp.pad(w_t, ((0, 0), (0, 0), (0, cin_p - in_c), (0, cout_p - out_c)))
    w_packed = w_t.reshape(k_packed, cout_p).astype(jnp.bfloat16)

    g_row = jnp.pad(gamma.astype(jnp.float32).reshape(1, out_c), ((0, 0), (0, cout_p - out_c)))
    b_row = jnp.pad(beta.astype(jnp.float32).reshape(1, out_c), ((0, 0), (0, cout_p - out_c)))

    m_total = n * h * w
    kernel = functools.partial(
        _conv_bn_relu_kernel, H=h, W=w, KH=kh, KW=kw, CIN_P=cin_p,
        M_TOTAL=float(m_total), CACHE_Y=cache_y)

    conv_passes = 1 if cache_y else 2

    out_flat = pl.pallas_call(
        kernel,
        out_shape=jax.ShapeDtypeStruct((n, h * w, cout_p), jnp.float32),
        # TODO(synk): emit bf16 output for extra VMEM/HBM headroom on v7x; kept f32
        # to match the module's output dtype.
        grid_spec=pltpu.PrefetchScalarGridSpec(
            num_scalar_prefetch=0,
            # (phase, image-block): phase 0 = global BN stats (+ y cache), phase 1 = apply.
            grid=(2, nblk),
            in_specs=[
                pl.BlockSpec((b_img, hp, wp, cin_p), lambda p, i: (i, 0, 0, 0)),
                pl.BlockSpec((k_packed, cout_p), lambda p, i: (0, 0)),
                pl.BlockSpec((1, cout_p), lambda p, i: (0, 0)),
                pl.BlockSpec((1, cout_p), lambda p, i: (0, 0)),
            ],
            # Parking trick (documented, relies on grid order): phase 0 never writes
            # o_ref, so its output block index stays at 0; the first block actually
            # written (phase 1, i=0) is also 0, so an unwritten buffer is never flushed.
            out_specs=pl.BlockSpec((b_img, h * w, cout_p), lambda p, i: (p * i, 0, 0)),
            scratch_shapes=[
                pltpu.VMEM((m_blk, k_packed), jnp.bfloat16),   # packed im2col slab
                pltpu.VMEM(ycache_shape, jnp.float32),         # conv-output cache (or dummy)
                pltpu.VMEM((1, cout_p), jnp.float32),          # sum
                pltpu.VMEM((1, cout_p), jnp.float32),          # sumsq
                pltpu.VMEM((1, cout_p), jnp.float32),          # scale
                pltpu.VMEM((1, cout_p), jnp.float32),          # shift
            ],
        ),
        compiler_params=pltpu.CompilerParams(
            # Both axes carry sequential state (global stat accumulation, phase ordering).
            # TODO(synk): on v7x, shard the image axis across the 2 TensorCores with a
            # cross-core partial-stats combine instead of a single sequential chain.
            dimension_semantics=("arbitrary", "arbitrary"),
            vmem_limit_bytes=64 * 1024 * 1024,
        ),
        cost_estimate=pl.CostEstimate(
            flops=conv_passes * 2 * m_total * k_packed * cout_p,
            transcendentals=cout_p,
            bytes_accessed=(conv_passes * x.size * 2 + w_packed.size * 2
                            + m_total * cout_p * 4),
        ),
    )(x, w_packed, g_row, b_row)

    # (N, H*W, Cout_p) -> slice real channels -> NCHW.
    out = out_flat[:, :, :out_c].reshape(n, h, w, out_c)
    return jnp.transpose(out, (0, 3, 1, 2))


def _reference(x_nchw, weight, bias, gamma, beta, *, padding):
    """Pure-JAX reference (Conv2d + training-mode BatchNorm2d + ReLU)."""
    y = jax.lax.conv_general_dilated(
        x_nchw.astype(jnp.float32), weight.astype(jnp.float32),
        window_strides=(1, 1), padding=[(padding, padding), (padding, padding)],
        dimension_numbers=("NCHW", "OIHW", "NCHW"),
    ) + bias.reshape(1, -1, 1, 1)
    mean = jnp.mean(y, axis=(0, 2, 3), keepdims=True)
    var = jnp.mean((y - mean) ** 2, axis=(0, 2, 3), keepdims=True)
    yn = (y - mean) * jax.lax.rsqrt(var + EPS)
    yn = yn * gamma.reshape(1, -1, 1, 1) + beta.reshape(1, -1, 1, 1)
    return jnp.maximum(yn, 0.0)


if __name__ == "__main__":
    # Module config: conv(inC=4, outC=8, kernel_size=3, padding=1, momentum=0.1).
    # TODO(synk): momentum / running_mean / running_var state updates are not produced;
    # they do not affect the training-mode forward activation.
    N, inC, H, W = 2, 4, 16, 16
    outC, K, PAD = 8, 3, 1

    key = jax.random.PRNGKey(0)
    kx, kw_, kb = jax.random.split(key, 3)

    x = jax.random.normal(kx, (N, inC, H, W), dtype=jnp.float32)
    fan_in = inC * K * K
    bound = 1.0 / (fan_in ** 0.5)
    weight = jax.random.uniform(kw_, (outC, inC, K, K), jnp.float32, -bound, bound)
    bias = jax.random.uniform(kb, (outC,), jnp.float32, -bound, bound)
    gamma = jnp.ones((outC,), jnp.float32)   # BatchNorm2d default init
    beta = jnp.zeros((outC,), jnp.float32)

    run = jax.jit(functools.partial(conv_bn_relu, padding=PAD))
    out = jax.block_until_ready(run(x, weight, bias, gamma, beta))

    # Compare against a reference that applies the same bf16 input/weight quantization
    # the kernel uses on the MXU, isolating kernel correctness from the intended cast.
    xq = x.astype(jnp.bfloat16).astype(jnp.float32)
    wq = weight.astype(jnp.bfloat16).astype(jnp.float32)
    ref = _reference(xq, wq, bias, gamma, beta, padding=PAD)

    assert out.shape == (N, outC, H, W)
    assert jnp.allclose(out, ref, atol=5e-3, rtol=5e-3), float(jnp.max(jnp.abs(out - ref)))

    print("KERNEL_OK")
</pallas_src>

<mosaic_0001>
module attributes {stable_mosaic.version = 11 : i64} {
  func.func @_conv_bn_relu_kernel(%arg0: i32, %arg1: i32, %arg2: memref<2x18x18x8xbf16, #tpu.memory_space<vmem>>, %arg3: memref<72x128xbf16, #tpu.memory_space<vmem>>, %arg4: memref<1x128xf32, #tpu.memory_space<vmem>>, %arg5: memref<1x128xf32, #tpu.memory_space<vmem>>, %arg6: memref<2x256x128xf32, #tpu.memory_space<vmem>>, %arg7: memref<512x72xbf16, #tpu.memory_space<vmem>>, %arg8: memref<1x512x128xf32, #tpu.memory_space<vmem>>, %arg9: memref<1x128xf32, #tpu.memory_space<vmem>>, %arg10: memref<1x128xf32, #tpu.memory_space<vmem>>, %arg11: memref<1x128xf32, #tpu.memory_space<vmem>>, %arg12: memref<1x128xf32, #tpu.memory_space<vmem>>) attributes {dimension_semantics = [#tpu.dimension_semantics<arbitrary>, #tpu.dimension_semantics<arbitrary>], iteration_bounds = array<i64: 2, 1>, scalar_prefetch = 0 : i64, scratch_operands = 6 : i64, tpu.core_type = #tpu.core_type<tc>, window_params = [{transform_indices = @transform_0, window_bounds = array<i64: 2, 18, 18, 8>}, {pipeline_mode = #tpu.pipeline_mode<synchronous>, transform_indices = @transform_1, window_bounds = array<i64: 72, 128>}, {pipeline_mode = #tpu.pipeline_mode<synchronous>, transform_indices = @transform_2, window_bounds = array<i64: 1, 128>}, {pipeline_mode = #tpu.pipeline_mode<synchronous>, transform_indices = @transform_3, window_bounds = array<i64: 1, 128>}, {transform_indices = @transform_4, window_bounds = array<i64: 2, 256, 128>}]} {
    %c0_i32 = arith.constant 0 : i32
    %0 = arith.cmpi eq, %arg0, %c0_i32 : i32
    %c0_i32_0 = arith.constant 0 : i32
    %1 = arith.cmpi eq, %arg1, %c0_i32_0 : i32
    %2 = arith.andi %0, %1 : i1
    %3 = arith.extui %2 : i1 to i32
    %c0_i32_1 = arith.constant 0 : i32
    %4 = arith.cmpi ne, %3, %c0_i32_1 : i32
    scf.if %4 {
      %cst = arith.constant 0.000000e+00 : f32
      %16 = vector.broadcast %cst : f32 to vector<1x128xf32>
      %c0 = arith.constant 0 : index
      %c0_8 = arith.constant 0 : index
      %17 = vector.load %arg9[%c0, %c0_8] : memref<1x128xf32, #tpu.memory_space<vmem>>, vector<1x128xf32>
      tpu.vector_store %arg9[%c0, %c0_8], %16 {strides = array<i32>} : memref<1x128xf32, #tpu.memory_space<vmem>>, vector<1x128xf32>,
      %cst_9 = arith.constant 0.000000e+00 : f32
      %18 = vector.broadcast %cst_9 : f32 to vector<1x128xf32>
      %c0_10 = arith.constant 0 : index
      %c0_11 = arith.constant 0 : index
      %19 = vector.load %arg10[%c0_10, %c0_11] : memref<1x128xf32, #tpu.memory_space<vmem>>, vector<1x128xf32>
      tpu.vector_store %arg10[%c0_10, %c0_11], %18 {strides = array<i32>} : memref<1x128xf32, #tpu.memory_space<vmem>>, vector<1x128xf32>,
    } else {
    }
    %c0_i32_2 = arith.constant 0 : i32
    %5 = arith.cmpi eq, %arg0, %c0_i32_2 : i32
    %6 = arith.extui %5 : i1 to i32
    %c0_i32_3 = arith.constant 0 : i32
    %7 = arith.cmpi ne, %6, %c0_i32_3 : i32
    scf.if %7 {
      %c0 = arith.constant 0 : index
      %c0_8 = arith.constant 0 : index
      %c0_9 = arith.constant 0 : index
      %c0_10 = arith.constant 0 : index
      %16 = vector.load %arg2[%c0, %c0_8, %c0_9, %c0_10] : memref<2x18x18x8xbf16, #tpu.memory_space<vmem>>, vector<1x16x16x8xbf16>
      %17 = vector.shape_cast %16 : vector<1x16x16x8xbf16> to vector<16x16x8xbf16>
      %18 = vector.shape_cast %17 : vector<16x16x8xbf16> to vector<256x8xbf16>
      %c0_11 = arith.constant 0 : index
      %c0_12 = arith.constant 0 : index
      %19 = vector.load %arg7[%c0_11, %c0_12] : memref<512x72xbf16, #tpu.memory_space<vmem>>, vector<256x8xbf16>
      tpu.vector_store %arg7[%c0_11, %c0_12], %18 {strides = array<i32>} : memref<512x72xbf16, #tpu.memory_space<vmem>>, vector<256x8xbf16>,
      %c1 = arith.constant 1 : index
      %c0_13 = arith.constant 0 : index
      %c0_14 = arith.constant 0 : index
      %c0_15 = arith.constant 0 : index
      %20 = vector.load %arg2[%c1, %c0_13, %c0_14, %c0_15] : memref<2x18x18x8xbf16, #tpu.memory_space<vmem>>, vector<1x16x16x8xbf16>
      %21 = vector.shape_cast %20 : vector<1x16x16x8xbf16> to vector<16x16x8xbf16>
      %22 = vector.shape_cast %21 : vector<16x16x8xbf16> to vector<256x8xbf16>
      %c256 = arith.constant 256 : index
      %c0_16 = arith.constant 0 : index
      %23 = vector.load %arg7[%c256, %c0_16] : memref<512x72xbf16, #tpu.memory_space<vmem>>, vector<256x8xbf16>
      tpu.vector_store %arg7[%c256, %c0_16], %22 {strides = array<i32>} : memref<512x72xbf16, #tpu.memory_space<vmem>>, vector<256x8xbf16>,
      %c0_17 = arith.constant 0 : index
      %c0_18 = arith.constant 0 : index
      %c1_19 = arith.constant 1 : index
      %c0_20 = arith.constant 0 : index
      %24 = vector.load %arg2[%c0_17, %c0_18, %c1_19, %c0_20] : memref<2x18x18x8xbf16, #tpu.memory_space<vmem>>, vector<1x16x16x8xbf16>
      %25 = vector.shape_cast %24 : vector<1x16x16x8xbf16> to vector<16x16x8xbf16>
      %26 = vector.shape_cast %25 : vector<16x16x8xbf16> to vector<256x8xbf16>
      %c0_21 = arith.constant 0 : index
      %c8 = arith.constant 8 : index
      %27 = vector.load %arg7[%c0_21, %c8] : memref<512x72xbf16, #tpu.memory_space<vmem>>, vector<256x8xbf16>
      tpu.vector_store %arg7[%c0_21, %c8], %26 {strides = array<i32>} : memref<512x72xbf16, #tpu.memory_space<vmem>>, vector<256x8xbf16>,
      %c1_22 = arith.constant 1 : index
      %c0_23 = arith.constant 0 : index
      %c1_24 = arith.constant 1 : index
      %c0_25 = arith.constant 0 : index
      %28 = vector.load %arg2[%c1_22, %c0_23, %c1_24, %c0_25] : memref<2x18x18x8xbf16, #tpu.memory_space<vmem>>, vector<1x16x16x8xbf16>
      %29 = vector.shape_cast %28 : vector<1x16x16x8xbf16> to vector<16x16x8xbf16>
      %30 = vector.shape_cast %29 : vector<16x16x8xbf16> to vector<256x8xbf16>
      %c256_26 = arith.constant 256 : index
      %c8_27 = arith.constant 8 : index
      %31 = vector.load %arg7[%c256_26, %c8_27] : memref<512x72xbf16, #tpu.memory_space<vmem>>, vector<256x8xbf16>
      tpu.vector_store %arg7[%c256_26, %c8_27], %30 {strides = array<i32>} : memref<512x72xbf16, #tpu.memory_space<vmem>>, vector<256x8xbf16>,
      %c0_28 = arith.constant 0 : index
      %c0_29 = arith.constant 0 : index
      %c2 = arith.constant 2 : index
      %c0_30 = arith.constant 0 : index
      %32 = vector.load %arg2[%c0_28, %c0_29, %c2, %c0_30] : memref<2x18x18x8xbf16, #tpu.memory_space<vmem>>, vector<1x16x16x8xbf16>
      %33 = vector.shape_cast %32 : vector<1x16x16x8xbf16> to vector<16x16x8xbf16>
      %34 = vector.shape_cast %33 : vector<16x16x8xbf16> to vector<256x8xbf16>
      %c0_31 = arith.constant 0 : index
      %c16 = arith.constant 16 : index
      %35 = vector.load %arg7[%c0_31, %c16] : memref<512x72xbf16, #tpu.memory_space<vmem>>, vector<256x8xbf16>
      tpu.vector_store %arg7[%c0_31, %c16], %34 {strides = array<i32>} : memref<512x72xbf16, #tpu.memory_space<vmem>>, vector<256x8xbf16>,
      %c1_32 = arith.constant 1 : index
      %c0_33 = arith.constant 0 : index
      %c2_34 = arith.constant 2 : index
      %c0_35 = arith.constant 0 : index
      %36 = vector.load %arg2[%c1_32, %c0_33, %c2_34, %c0_35] : memref<2x18x18x8xbf16, #tpu.memory_space<vmem>>, vector<1x16x16x8xbf16>
      %37 = vector.shape_cast %36 : vector<1x16x16x8xbf16> to vector<16x16x8xbf16>
      %38 = vector.shape_cast %37 : vector<16x16x8xbf16> to vector<256x8xbf16>
      %c256_36 = arith.constant 256 : index
      %c16_37 = arith.constant 16 : index
      %39 = vector.load %arg7[%c256_36, %c16_37] : memref<512x72xbf16, #tpu.memory_space<vmem>>, vector<256x8xbf16>
      tpu.vector_store %arg7[%c256_36, %c16_37], %38 {strides = array<i32>} : memref<512x72xbf16, #tpu.memory_space<vmem>>, vector<256x8xbf16>,
      %c0_38 = arith.constant 0 : index
      %c1_39 = arith.constant 1 : index
      %c0_40 = arith.constant 0 : index
      %c0_41 = arith.constant 0 : index
      %40 = vector.load %arg2[%c0_38, %c1_39, %c0_40, %c0_41] : memref<2x18x18x8xbf16, #tpu.memory_space<vmem>>, vector<1x16x16x8xbf16>
      %41 = vector.shape_cast %40 : vector<1x16x16x8xbf16> to vector<16x16x8xbf16>
      %42 = vector.shape_cast %41 : vector<16x16x8xbf16> to vector<256x8xbf16>
      %c0_42 = arith.constant 0 : index
      %c24 = arith.constant 24 : index
      %43 = vector.load %arg7[%c0_42, %c24] : memref<512x72xbf16, #tpu.memory_space<vmem>>, vector<256x8xbf16>
      tpu.vector_store %arg7[%c0_42, %c24], %42 {strides = array<i32>} : memref<512x72xbf16, #tpu.memory_space<vmem>>, vector<256x8xbf16>,
      %c1_43 = arith.constant 1 : index
      %c1_44 = arith.constant 1 : index
      %c0_45 = arith.constant 0 : index
      %c0_46 = arith.constant 0 : index
      %44 = vector.load %arg2[%c1_43, %c1_44, %c0_45, %c0_46] : memref<2x18x18x8xbf16, #tpu.memory_space<vmem>>, vector<1x16x16x8xbf16>
      %45 = vector.shape_cast %44 : vector<1x16x16x8xbf16> to vector<16x16x8xbf16>
      %46 = vector.shape_cast %45 : vector<16x16x8xbf16> to vector<256x8xbf16>
      %c256_47 = arith.constant 256 : index
      %c24_48 = arith.constant 24 : index
      %47 = vector.load %arg7[%c256_47, %c24_48] : memref<512x72xbf16, #tpu.memory_space<vmem>>, vector<256x8xbf16>
      tpu.vector_store %arg7[%c256_47, %c24_48], %46 {strides = array<i32>} : memref<512x72xbf16, #tpu.memory_space<vmem>>, vector<256x8xbf16>,
      %c0_49 = arith.constant 0 : index
      %c1_50 = arith.constant 1 : index
      %c1_51 = arith.constant 1 : index
      %c0_52 = arith.constant 0 : index
      %48 = vector.load %arg2[%c0_49, %c1_50, %c1_51, %c0_52] : memref<2x18x18x8xbf16, #tpu.memory_space<vmem>>, vector<1x16x16x8xbf16>
      %49 = vector.shape_cast %48 : vector<1x16x16x8xbf16> to vector<16x16x8xbf16>
      %50 = vector.shape_cast %49 : vector<16x16x8xbf16> to vector<256x8xbf16>
      %c0_53 = arith.constant 0 : index
      %c32 = arith.constant 32 : index
      %51 = vector.load %arg7[%c0_53, %c32] : memref<512x72xbf16, #tpu.memory_space<vmem>>, vector<256x8xbf16>
      tpu.vector_store %arg7[%c0_53, %c32], %50 {strides = array<i32>} : memref<512x72xbf16, #tpu.memory_space<vmem>>, vector<256x8xbf16>,
      %c1_54 = arith.constant 1 : index
      %c1_55 = arith.constant 1 : index
      %c1_56 = arith.constant 1 : index
      %c0_57 = arith.constant 0 : index
      %52 = vector.load %arg2[%c1_54, %c1_55, %c1_56, %c0_57] : memref<2x18x18x8xbf16, #tpu.memory_space<vmem>>, vector<1x16x16x8xbf16>
      %53 = vector.shape_cast %52 : vector<1x16x16x8xbf16> to vector<16x16x8xbf16>
      %54 = vector.shape_cast %53 : vector<16x16x8xbf16> to vector<256x8xbf16>
      %c256_58 = arith.constant 256 : index
      %c32_59 = arith.constant 32 : index
      %55 = vector.load %arg7[%c256_58, %c32_59] : memref<512x72xbf16, #tpu.memory_space<vmem>>, vector<256x8xbf16>
      tpu.vector_store %arg7[%c256_58, %c32_59], %54 {strides = array<i32>} : memref<512x72xbf16, #tpu.memory_space<vmem>>, vector<256x8xbf16>,
      %c0_60 = arith.constant 0 : index
      %c1_61 = arith.constant 1 : index
      %c2_62 = arith.constant 2 : index
      %c0_63 = arith.constant 0 : index
      %56 = vector.load %arg2[%c0_60, %c1_61, %c2_62, %c0_63] : memref<2x18x18x8xbf16, #tpu.memory_space<vmem>>, vector<1x16x16x8xbf16>
      %57 = vector.shape_cast %56 : vector<1x16x16x8xbf16> to vector<16x16x8xbf16>
      %58 = vector.shape_cast %57 : vector<16x16x8xbf16> to vector<256x8xbf16>
      %c0_64 = arith.constant 0 : index
      %c40 = arith.constant 40 : index
      %59 = vector.load %arg7[%c0_64, %c40] : memref<512x72xbf16, #tpu.memory_space<vmem>>, vector<256x8xbf16>
      tpu.vector_store %arg7[%c0_64, %c40], %58 {strides = array<i32>} : memref<512x72xbf16, #tpu.memory_space<vmem>>, vector<256x8xbf16>,
      %c1_65 = arith.constant 1 : index
      %c1_66 = arith.constant 1 : index
      %c2_67 = arith.constant 2 : index
      %c0_68 = arith.constant 0 : index
      %60 = vector.load %arg2[%c1_65, %c1_66, %c2_67, %c0_68] : memref<2x18x18x8xbf16, #tpu.memory_space<vmem>>, vector<1x16x16x8xbf16>
      %61 = vector.shape_cast %60 : vector<1x16x16x8xbf16> to vector<16x16x8xbf16>
      %62 = vector.shape_cast %61 : vector<16x16x8xbf16> to vector<256x8xbf16>
      %c256_69 = arith.constant 256 : index
      %c40_70 = arith.constant 40 : index
      %63 = vector.load %arg7[%c256_69, %c40_70] : memref<512x72xbf16, #tpu.memory_space<vmem>>, vector<256x8xbf16>
      tpu.vector_store %arg7[%c256_69, %c40_70], %62 {strides = array<i32>} : memref<512x72xbf16, #tpu.memory_space<vmem>>, vector<256x8xbf16>,
      %c0_71 = arith.constant 0 : index
      %c2_72 = arith.constant 2 : index
      %c0_73 = arith.constant 0 : index
      %c0_74 = arith.constant 0 : index
      %64 = vector.load %arg2[%c0_71, %c2_72, %c0_73, %c0_74] : memref<2x18x18x8xbf16, #tpu.memory_space<vmem>>, vector<1x16x16x8xbf16>
      %65 = vector.shape_cast %64 : vector<1x16x16x8xbf16> to vector<16x16x8xbf16>
      %66 = vector.shape_cast %65 : vector<16x16x8xbf16> to vector<256x8xbf16>
      %c0_75 = arith.constant 0 : index
      %c48 = arith.constant 48 : index
      %67 = vector.load %arg7[%c0_75, %c48] : memref<512x72xbf16, #tpu.memory_space<vmem>>, vector<256x8xbf16>
      tpu.vector_store %arg7[%c0_75, %c48], %66 {strides = array<i32>} : memref<512x72xbf16, #tpu.memory_space<vmem>>, vector<256x8xbf16>,
      %c1_76 = arith.constant 1 : index
      %c2_77 = arith.constant 2 : index
      %c0_78 = arith.constant 0 : index
      %c0_79 = arith.constant 0 : index
      %68 = vector.load %arg2[%c1_76, %c2_77, %c0_78, %c0_79] : memref<2x18x18x8xbf16, #tpu.memory_space<vmem>>, vector<1x16x16x8xbf16>
      %69 = vector.shape_cast %68 : vector<1x16x16x8xbf16> to vector<16x16x8xbf16>
      %70 = vector.shape_cast %69 : vector<16x16x8xbf16> to vector<256x8xbf16>
      %c256_80 = arith.constant 256 : index
      %c48_81 = arith.constant 48 : index
      %71 = vector.load %arg7[%c256_80, %c48_81] : memref<512x72xbf16, #tpu.memory_space<vmem>>, vector<256x8xbf16>
      tpu.vector_store %arg7[%c256_80, %c48_81], %70 {strides = array<i32>} : memref<512x72xbf16, #tpu.memory_space<vmem>>, vector<256x8xbf16>,
      %c0_82 = arith.constant 0 : index
      %c2_83 = arith.constant 2 : index
      %c1_84 = arith.constant 1 : index
      %c0_85 = arith.constant 0 : index
      %72 = vector.load %arg2[%c0_82, %c2_83, %c1_84, %c0_85] : memref<2x18x18x8xbf16, #tpu.memory_space<vmem>>, vector<1x16x16x8xbf16>
      %73 = vector.shape_cast %72 : vector<1x16x16x8xbf16> to vector<16x16x8xbf16>
      %74 = vector.shape_cast %73 : vector<16x16x8xbf16> to vector<256x8xbf16>
      %c0_86 = arith.constant 0 : index
      %c56 = arith.constant 56 : index
      %75 = vector.load %arg7[%c0_86, %c56] : memref<512x72xbf16, #tpu.memory_space<vmem>>, vector<256x8xbf16>
      tpu.vector_store %arg7[%c0_86, %c56], %74 {strides = array<i32>} : memref<512x72xbf16, #tpu.memory_space<vmem>>, vector<256x8xbf16>,
      %c1_87 = arith.constant 1 : index
      %c2_88 = arith.constant 2 : index
      %c1_89 = arith.constant 1 : index
      %c0_90 = arith.constant 0 : index
      %76 = vector.load %arg2[%c1_87, %c2_88, %c1_89, %c0_90] : memref<2x18x18x8xbf16, #tpu.memory_space<vmem>>, vector<1x16x16x8xbf16>
      %77 = vector.shape_cast %76 : vector<1x16x16x8xbf16> to vector<16x16x8xbf16>
      %78 = vector.shape_cast %77 : vector<16x16x8xbf16> to vector<256x8xbf16>
      %c256_91 = arith.constant 256 : index
      %c56_92 = arith.constant 56 : index
      %79 = vector.load %arg7[%c256_91, %c56_92] : memref<512x72xbf16, #tpu.memory_space<vmem>>, vector<256x8xbf16>
      tpu.vector_store %arg7[%c256_91, %c56_92], %78 {strides = array<i32>} : memref<512x72xbf16, #tpu.memory_space<vmem>>, vector<256x8xbf16>,
      %c0_93 = arith.constant 0 : index
      %c2_94 = arith.constant 2 : index
      %c2_95 = arith.constant 2 : index
      %c0_96 = arith.constant 0 : index
      %80 = vector.load %arg2[%c0_93, %c2_94, %c2_95, %c0_96] : memref<2x18x18x8xbf16, #tpu.memory_space<vmem>>, vector<1x16x16x8xbf16>
      %81 = vector.shape_cast %80 : vector<1x16x16x8xbf16> to vector<16x16x8xbf16>
      %82 = vector.shape_cast %81 : vector<16x16x8xbf16> to vector<256x8xbf16>
      %c0_97 = arith.constant 0 : index
      %c64 = arith.constant 64 : index
      %83 = vector.load %arg7[%c0_97, %c64] : memref<512x72xbf16, #tpu.memory_space<vmem>>, vector<256x8xbf16>
      tpu.vector_store %arg7[%c0_97, %c64], %82 {strides = array<i32>} : memref<512x72xbf16, #tpu.memory_space<vmem>>, vector<256x8xbf16>,
      %c1_98 = arith.constant 1 : index
      %c2_99 = arith.constant 2 : index
      %c2_100 = arith.constant 2 : index
      %c0_101 = arith.constant 0 : index
      %84 = vector.load %arg2[%c1_98, %c2_99, %c2_100, %c0_101] : memref<2x18x18x8xbf16, #tpu.memory_space<vmem>>, vector<1x16x16x8xbf16>
      %85 = vector.shape_cast %84 : vector<1x16x16x8xbf16> to vector<16x16x8xbf16>
      %86 = vector.shape_cast %85 : vector<16x16x8xbf16> to vector<256x8xbf16>
      %c256_102 = arith.constant 256 : index
      %c64_103 = arith.constant 64 : index
      %87 = vector.load %arg7[%c256_102, %c64_103] : memref<512x72xbf16, #tpu.memory_space<vmem>>, vector<256x8xbf16>
      tpu.vector_store %arg7[%c256_102, %c64_103], %86 {strides = array<i32>} : memref<512x72xbf16, #tpu.memory_space<vmem>>, vector<256x8xbf16>,
      %c0_104 = arith.constant 0 : index
      %c0_105 = arith.constant 0 : index
      %88 = vector.load %arg7[%c0_104, %c0_105] : memref<512x72xbf16, #tpu.memory_space<vmem>>, vector<512x72xbf16>
      %c0_106 = arith.constant 0 : index
      %c0_107 = arith.constant 0 : index
      %89 = vector.load %arg3[%c0_106, %c0_107] : memref<72x128xbf16, #tpu.memory_space<vmem>>, vector<72x128xbf16>
      %cst = arith.constant dense<0.000000e+00> : vector<512x128xf32>
      %90 = tpu.matmul %88, %89, %cst {dimension_numbers = #tpu.dot_dimension_numbers<[1], [0], [0], [1], [0, 0, 1, 1], [], []>} : vector<512x72xbf16>, vector<72x128xbf16>, vector<512x128xf32> -> vector<512x128xf32>
      %c0_108 = arith.constant 0 : index
      %c0_109 = arith.constant 0 : index
      %91 = vector.load %arg9[%c0_108, %c0_109] : memref<1x128xf32, #tpu.memory_space<vmem>>, vector<1x128xf32>
      %cst_110 = arith.constant dense<0.000000e+00> : vector<128xf32>
      %92 = vector.multi_reduction <add>, %90, %cst_110 [0] : vector<512x128xf32> to vector<128xf32>
      %93 = vector.shape_cast %92 : vector<128xf32> to vector<1x128xf32>
      %94 = arith.addf %91, %93 : vector<1x128xf32>
      %c0_111 = arith.constant 0 : index
      %c0_112 = arith.constant 0 : index
      %95 = vector.load %arg9[%c0_111, %c0_112] : memref<1x128xf32, #tpu.memory_space<vmem>>, vector<1x128xf32>
      tpu.vector_store %arg9[%c0_111, %c0_112], %94 {strides = array<i32>} : memref<1x128xf32, #tpu.memory_space<vmem>>, vector<1x128xf32>,
      %c0_113 = arith.constant 0 : index
      %c0_114 = arith.constant 0 : index
      %96 = vector.load %arg10[%c0_113, %c0_114] : memref<1x128xf32, #tpu.memory_space<vmem>>, vector<1x128xf32>
      %97 = arith.mulf %90, %90 : vector<512x128xf32>
      %cst_115 = arith.constant dense<0.000000e+00> : vector<128xf32>
      %98 = vector.multi_reduction <add>, %97, %cst_115 [0] : vector<512x128xf32> to vector<128xf32>
      %99 = vector.shape_cast %98 : vector<128xf32> to vector<1x128xf32>
      %100 = arith.addf %96, %99 : vector<1x128xf32>
      %c0_116 = arith.constant 0 : index
      %c0_117 = arith.constant 0 : index
      %101 = vector.load %arg10[%c0_116, %c0_117] : memref<1x128xf32, #tpu.memory_space<vmem>>, vector<1x128xf32>
      tpu.vector_store %arg10[%c0_116, %c0_117], %100 {strides = array<i32>} : memref<1x128xf32, #tpu.memory_space<vmem>>, vector<1x128xf32>,
      %102 = arith.index_cast %arg1 : i32 to index
      %c0_118 = arith.constant 0 : index
      %c0_119 = arith.constant 0 : index
      %103 = vector.load %arg8[%102, %c0_118, %c0_119] : memref<1x512x128xf32, #tpu.memory_space<vmem>>, vector<1x512x128xf32>
      %104 = vector.shape_cast %103 : vector<1x512x128xf32> to vector<512x128xf32>
      %105 = vector.shape_cast %90 : vector<512x128xf32> to vector<1x512x128xf32>
      tpu.vector_store %arg8[%102, %c0_118, %c0_119], %105 {strides = array<i32>} : memref<1x512x128xf32, #tpu.memory_space<vmem>>, vector<1x512x128xf32>,
    } else {
    }
    %c0_i32_4 = arith.constant 0 : i32
    %8 = arith.cmpi eq, %arg0, %c0_i32_4 : i32
    %c0_i32_5 = arith.constant 0 : i32
    %9 = arith.cmpi eq, %arg1, %c0_i32_5 : i32
    %10 = arith.andi %8, %9 : i1
    %11 = arith.extui %10 : i1 to i32
    %c0_i32_6 = arith.constant 0 : i32
    %12 = arith.cmpi ne, %11, %c0_i32_6 : i32
    scf.if %12 {
      %c0 = arith.constant 0 : index
      %c0_8 = arith.constant 0 : index
      %16 = vector.load %arg9[%c0, %c0_8] : memref<1x128xf32, #tpu.memory_space<vmem>>, vector<1x128xf32>
      %cst = arith.constant 0.001953125 : f32
      %17 = vector.broadcast %cst : f32 to vector<1x128xf32>
      %18 = arith.mulf %16, %17 : vector<1x128xf32>
      %c0_9 = arith.constant 0 : index
      %c0_10 = arith.constant 0 : index
      %19 = vector.load %arg10[%c0_9, %c0_10] : memref<1x128xf32, #tpu.memory_space<vmem>>, vector<1x128xf32>
      %cst_11 = arith.constant 0.001953125 : f32
      %20 = vector.broadcast %cst_11 : f32 to vector<1x128xf32>
      %21 = arith.mulf %19, %20 : vector<1x128xf32>
      %22 = arith.mulf %18, %18 : vector<1x128xf32>
      %23 = arith.subf %21, %22 : vector<1x128xf32>
      %cst_12 = arith.constant 0.000000e+00 : f32
      %24 = vector.broadcast %cst_12 : f32 to vector<1x128xf32>
      %25 = arith.maximumf %23, %24 : vector<1x128xf32>
      %cst_13 = arith.constant 9.99999974E-6 : f32
      %26 = vector.broadcast %cst_13 : f32 to vector<1x128xf32>
      %27 = arith.addf %25, %26 : vector<1x128xf32>
      %28 = math.rsqrt %27 : vector<1x128xf32>
      %c0_14 = arith.constant 0 : index
      %c0_15 = arith.constant 0 : index
      %29 = vector.load %arg4[%c0_14, %c0_15] : memref<1x128xf32, #tpu.memory_space<vmem>>, vector<1x128xf32>
      %30 = arith.mulf %29, %28 : vector<1x128xf32>
      %c0_16 = arith.constant 0 : index
      %c0_17 = arith.constant 0 : index
      %31 = vector.load %arg11[%c0_16, %c0_17] : memref<1x128xf32, #tpu.memory_space<vmem>>, vector<1x128xf32>
      tpu.vector_store %arg11[%c0_16, %c0_17], %30 {strides = array<i32>} : memref<1x128xf32, #tpu.memory_space<vmem>>, vector<1x128xf32>,
      %c0_18 = arith.constant 0 : index
      %c0_19 = arith.constant 0 : index
      %32 = vector.load %arg5[%c0_18, %c0_19] : memref<1x128xf32, #tpu.memory_space<vmem>>, vector<1x128xf32>
      %33 = arith.mulf %18, %30 : vector<1x128xf32>
      %34 = arith.subf %32, %33 : vector<1x128xf32>
      %c0_20 = arith.constant 0 : index
      %c0_21 = arith.constant 0 : index
      %35 = vector.load %arg12[%c0_20, %c0_21] : memref<1x128xf32, #tpu.memory_space<vmem>>, vector<1x128xf32>
      tpu.vector_store %arg12[%c0_20, %c0_21], %34 {strides = array<i32>} : memref<1x128xf32, #tpu.memory_space<vmem>>, vector<1x128xf32>,
    } else {
    }
    %c1_i32 = arith.constant 1 : i32
    %13 = arith.cmpi eq, %arg0, %c1_i32 : i32
    %14 = arith.extui %13 : i1 to i32
    %c0_i32_7 = arith.constant 0 : i32
    %15 = arith.cmpi ne, %14, %c0_i32_7 : i32
    scf.if %15 {
      %16 = arith.index_cast %arg1 : i32 to index
      %c0 = arith.constant 0 : index
      %c0_8 = arith.constant 0 : index
      %17 = vector.load %arg8[%16, %c0, %c0_8] : memref<1x512x128xf32, #tpu.memory_space<vmem>>, vector<1x512x128xf32>
      %18 = vector.shape_cast %17 : vector<1x512x128xf32> to vector<512x128xf32>
      %c0_9 = arith.constant 0 : index
      %c0_10 = arith.constant 0 : index
      %19 = vector.load %arg11[%c0_9, %c0_10] : memref<1x128xf32, #tpu.memory_space<vmem>>, vector<1x128xf32>
      %c0_11 = arith.constant 0 : index
      %c0_12 = arith.constant 0 : index
      %20 = vector.load %arg12[%c0_11, %c0_12] : memref<1x128xf32, #tpu.memory_space<vmem>>, vector<1x128xf32>
      %21 = vector.extract_strided_slice %18 {offsets = [0, 0], sizes = [256, 128], strides = [1, 1]} : vector<512x128xf32> to vector<256x128xf32>
      %22 = vector.broadcast %19 : vector<1x128xf32> to vector<256x128xf32>
      %23 = arith.mulf %21, %22 : vector<256x128xf32>
      %24 = vector.broadcast %20 : vector<1x128xf32> to vector<256x128xf32>
      %25 = arith.addf %23, %24 : vector<256x128xf32>
      %cst = arith.constant 0.000000e+00 : f32
      %26 = vector.broadcast %cst : f32 to vector<256x128xf32>
      %27 = arith.maximumf %25, %26 : vector<256x128xf32>
      %c0_13 = arith.constant 0 : index
      %c0_14 = arith.constant 0 : index
      %c0_15 = arith.constant 0 : index
      %28 = vector.load %arg6[%c0_13, %c0_14, %c0_15] : memref<2x256x128xf32, #tpu.memory_space<vmem>>, vector<1x256x128xf32>
      %29 = vector.shape_cast %28 : vector<1x256x128xf32> to vector<256x128xf32>
      %30 = vector.shape_cast %27 : vector<256x128xf32> to vector<1x256x128xf32>
      tpu.vector_store %arg6[%c0_13, %c0_14, %c0_15], %30 {strides = array<i32>} : memref<2x256x128xf32, #tpu.memory_space<vmem>>, vector<1x256x128xf32>,
      %31 = vector.extract_strided_slice %18 {offsets = [256, 0], sizes = [256, 128], strides = [1, 1]} : vector<512x128xf32> to vector<256x128xf32>
      %32 = vector.broadcast %19 : vector<1x128xf32> to vector<256x128xf32>
      %33 = arith.mulf %31, %32 : vector<256x128xf32>
      %34 = vector.broadcast %20 : vector<1x128xf32> to vector<256x128xf32>
      %35 = arith.addf %33, %34 : vector<256x128xf32>
      %cst_16 = arith.constant 0.000000e+00 : f32
      %36 = vector.broadcast %cst_16 : f32 to vector<256x128xf32>
      %37 = arith.maximumf %35, %36 : vector<256x128xf32>
      %c1 = arith.constant 1 : index
      %c0_17 = arith.constant 0 : index
      %c0_18 = arith.constant 0 : index
      %38 = vector.load %arg6[%c1, %c0_17, %c0_18] : memref<2x256x128xf32, #tpu.memory_space<vmem>>, vector<1x256x128xf32>
      %39 = vector.shape_cast %38 : vector<1x256x128xf32> to vector<256x128xf32>
      %40 = vector.shape_cast %37 : vector<256x128xf32> to vector<1x256x128xf32>
      tpu.vector_store %arg6[%c1, %c0_17, %c0_18], %40 {strides = array<i32>} : memref<2x256x128xf32, #tpu.memory_space<vmem>>, vector<1x256x128xf32>,
    } else {
    }
    return
  }
  func.func @transform_0(%arg0: i32, %arg1: i32) -> (i32, i32, i32, i32) {
    %c0_i32 = arith.constant 0 : i32
    %c0_i32_0 = arith.constant 0 : i32
    %c0_i32_1 = arith.constant 0 : i32
    %c0_i32_2 = arith.constant 0 : i32
    return %arg1, %c0_i32, %c0_i32_0, %c0_i32_1 : i32, i32, i32, i32
  }
  func.func @transform_1(%arg0: i32, %arg1: i32) -> (i32, i32) {
    %c0_i32 = arith.constant 0 : i32
    %c0_i32_0 = arith.constant 0 : i32
    %c0_i32_1 = arith.constant 0 : i32
    return %c0_i32, %c0_i32_0 : i32, i32
  }
  func.func @transform_2(%arg0: i32, %arg1: i32) -> (i32, i32) {
    %c0_i32 = arith.constant 0 : i32
    %c0_i32_0 = arith.constant 0 : i32
    %c0_i32_1 = arith.constant 0 : i32
    return %c0_i32, %c0_i32_0 : i32, i32
  }
  func.func @transform_3(%arg0: i32, %arg1: i32) -> (i32, i32) {
    %c0_i32 = arith.constant 0 : i32
    %c0_i32_0 = arith.constant 0 : i32
    %c0_i32_1 = arith.constant 0 : i32
    return %c0_i32, %c0_i32_0 : i32, i32
  }
  func.func @transform_4(%arg0: i32, %arg1: i32) -> (i32, i32, i32) {
    %0 = arith.muli %arg0, %arg1 : i32
    %c0_i32 = arith.constant 0 : i32
    %c0_i32_0 = arith.constant 0 : i32
    %c0_i32_1 = arith.constant 0 : i32
    return %0, %c0_i32, %c0_i32_0 : i32, i32, i32
  }
}

</mosaic_0001>

<bundles_post_ra>
// kernel: conv_bn_relu.1
= control target key start
LH: loop header
LB: loop body
LE: loop exit
PB: predicated region body
PF: predicated region fallthrough
CT: control target
= control target key end

     0   :  { %9 = vsyncpa [#allocation9], 0  ;;  %s10779_s0 = inlined_call_operand.hbm [shape: bf16[2,18,18,8], index: 0, kind: input, shape index: {}]   ;;  %s10780_s1 = inlined_call_operand.hbm [shape: bf16[72,128], index: 1, kind: input, shape index: {}]   ;;  %s10781_s2 = inlined_call_operand.hbm [shape: f32[1,128], index: 2, kind: input, shape index: {}]   ;;  %s10782_s3 = inlined_call_operand.hbm [shape: f32[1,128], index: 3, kind: input, shape index: {}]   ;;  %s10783_s4 = inlined_call_operand.hbm [shape: f32[2,256,128], index: 4, kind: output, shape index: {}]  }
   0x1   :  { %10 = vsyncpa [#allocation12], 0 }
   0x2   :  { %11 = vsyncpa [#allocation15], 0 }
   0x3   :  { %12 = vsyncpa [#allocation10], 0 }
   0x4   :  { %14 = vsyncpa [#allocation10 + $0x1], 0  ;;  %s8689_s15 = smov 0   ;;  %s8691_s16 = smov 0  }
   0x5   :  { %s8693_s17 = smov 0  }
   0x6 LB: > { %s7677_s18 = sadd.s32 4294967295, %s8644_s17   ;;  %s7678_s19 = sadd.s32 4294967294, %s8644_s17   ;;  %s8644_s17 = sphi %s8693_s17, %s20_s17   ;;  %s8640_s16 = sphi %s8691_s16, %s10831_s16   ;;  %s8636_s15 = sphi %s8689_s15, %s10830_s15  }
   0x7   : > { %p7679_p0 = scmp.ge.s32.totalorder %s8644_s17, 1  ;;  %p154_p1 = scmp.lt.s32.totalorder %s8644_s17, 3 }
   0x8   : > { %p8710_p2 = scmp.eq.s32.totalorder %s7677_s18, 0  ;;  %s8646_s22 = smov [#allocation11]  }
   0x9   : > { %p8714_p3 = pnand %p7679_p0, %p154_p1  ;;  %s183_s23 = sshll.u32 %s8646_s22, 4  ;;  %s184_s23 = int_to_ptr.vmem [resolvable:$true] %s183_s23 }
   0xa   : > { %s10793_s20 = scalar_select %p8710_p2, 1, 0 }
   0xb   : > { %s10794_s21 = scalar_select %p8714_p3, 1, 0 }
   0xc   : > { %p8295_p4 = pneg %p8714_p3  ;;  %s32_s25 = sadd.s32 1, %s8640_s16 }
   0xd   : > { %p8727_p6 = scmp.ge.s32.totalorder %s32_s25, 2  ;;  %s8468_s29 = scalar_lea.hbm %s10780_s1, 576 }
   0xe   : > { %p8722_p5 = pnand %p8710_p2, %p8295_p4  ;;  %p8469_p7 = scmp.ne.s32.totalorder %s10780_s1, %s8468_s29 }
   0xf   : > { %s10796_s26 = scalar_select %p8727_p6, 1, 0 }
  0x10   : > { %p8739_p8 = pneg %p8722_p5  ;;  %p8475_p11 = scmp.lt.u32.totalorder %s8468_s29, %s10780_s1 }
  0x12   : > { %p8471_p9 = pnand %p8739_p8, %p8469_p7 }
  0x14   : > { %p8472_p10 = pneg %p8471_p9 }
  0x16   : > { %p8477_p12 = pnand %p8475_p11, %p8472_p10 }
  0x18   : > { %8480 = shalt.err (!%p8477_p12)
}
  0x19   : > { %s8481_s9 = scalar_lea.vmem %s184_s23, 576  ;;  %p8489_p4 = scmp.lt.s32.totalorder %s184_s23, %s184_s23 }
  0x1a   : > { %p8482_p13 = scmp.ne.s32.totalorder %s184_s23, %s8481_s9  ;;  %p8490_p2 = scmp.lt.s32.totalorder %s8481_s9, %s8481_s9 }
  0x1c   : > { %p8484_p0 = pnand %p8482_p13, %p8739_p8  ;;  %p8491_p3 = por %p8490_p2, %p8489_p4 }
  0x1e   : > { %p8485_p1 = pneg %p8484_p0 }
  0x20   : > { %p8492_p6 = pnand %p8491_p3, %p8485_p1 }
  0x22   : > { %8495 = shalt.err (!%p8492_p6)
}
  0x23   : > { %s8647_s10 = smov 64   ;;  %s8648_s11 = smov 4  }
  0x24   : > { %8301 = dma.hbm_to_vmem [thread:$0]  (!%p8722_p5), %s10780_s1, 576, %s184_s23, [#allocation12], %s8647_s10, %s8647_s10, %s8648_s11  }
  0x25   : > { %p10798_p7 = scmp.ne.s32.totalorder %s10796_s26, 0  ;;  %s8649_s14 = smov [#allocation8]  }
  0x26   : > { %s170_s22 = sshll.u32 %s8649_s14, 4  ;;  %s8650_s27 = smov [#allocation13]   ;;  %s171_s22 = int_to_ptr.vmem [resolvable:$true] %s170_s22 }
  0x27   : > { %s10833_s25 = smov (%p10798_p7, %s32_s25), 0  ;;  %s197_s28 = sshll.u32 %s8650_s27, 4  ;;  %s198_s28 = int_to_ptr.vmem [resolvable:$true] %s197_s28 }
  0x28   : > { %s8496_s5 = scalar_lea.hbm %s10779_s0, 6912 }
  0x29   : > { %p8497_p2 = scmp.ne.s32.totalorder %s10779_s0, %s8496_s5  ;;  %p8503_p9 = scmp.lt.u32.totalorder %s8496_s5, %s10779_s0 }
  0x2b   : > { %p8499_p3 = pnand %p8497_p2, %p8739_p8 }
  0x2d   : > { %p8500_p6 = pneg %p8499_p3 }
  0x2f   : > { %p8505_p10 = pnand %p8503_p9, %p8500_p6 }
  0x31   : > { %8508 = shalt.err (!%p8505_p10)
}
  0x32   : > { %s8509_s9 = scalar_lea.vmem %s171_s22, 6912  ;;  %p8517_p0 = scmp.lt.s32.totalorder %s171_s22, %s171_s22 }
  0x33   : > { %p8510_p11 = scmp.ne.s32.totalorder %s171_s22, %s8509_s9  ;;  %p8518_p1 = scmp.lt.s32.totalorder %s8509_s9, %s8509_s9 }
  0x35   : > { %p8512_p12 = pnand %p8510_p11, %p8739_p8  ;;  %p8519_p4 = por %p8518_p1, %p8517_p0 }
  0x37   : > { %p8513_p13 = pneg %p8512_p12 }
  0x39   : > { %p8520_p7 = pnand %p8519_p4, %p8513_p13 }
  0x3b   : > { %8523 = shalt.err (!%p8520_p7)
}
  0x3c   : > { %8298 = dma.hbm_to_vmem [thread:$0]  (!%p8722_p5), %s10779_s0, 6912, %s171_s22, [#allocation9], %s8647_s10, %s8647_s10, %s8648_s11  }
  0x3d   : > { %s8524_s29 = scalar_lea.hbm %s10781_s2, 16 }
  0x3e   : > { %p8525_p2 = scmp.ne.s32.totalorder %s10781_s2, %s8524_s29  ;;  %p8531_p9 = scmp.lt.u32.totalorder %s8524_s29, %s10781_s2 }
  0x40   : > { %p8527_p3 = pnand %p8525_p2, %p8739_p8 }
  0x42   : > { %p8528_p6 = pneg %p8527_p3 }
  0x44   : > { %p8533_p10 = pnand %p8531_p9, %p8528_p6 }
  0x46   : > { %8536 = shalt.err (!%p8533_p10)
}
  0x47   : > { %s8537_s23 = scalar_lea.vmem %s198_s28, 16  ;;  %s8544_s10 = scalar_lea.vmem %s198_s28, 32 }
  0x48   : > { %p8538_p11 = scmp.ne.s32.totalorder %s198_s28, %s8537_s23  ;;  %p8545_p0 = scmp.lt.s32.totalorder %s198_s28, %s198_s28 }
  0x49   : > { %p8546_p1 = scmp.lt.s32.totalorder %s8544_s10, %s8537_s23 }
  0x4a   : > { %p8540_p12 = pnand %p8538_p11, %p8739_p8 }
  0x4b   : > { %p8547_p4 = por %p8546_p1, %p8545_p0 }
  0x4c   : > { %p8541_p13 = pneg %p8540_p12 }
  0x4e   : > { %p8548_p7 = pnand %p8547_p4, %p8541_p13 }
  0x50   : > { %8551 = shalt.err (!%p8548_p7)
}
  0x51   : > { %8304 = dma.hbm_to_vmem [thread:$0]  (!%p8722_p5), %s10781_s2, 16, %s198_s28, [#allocation12]  }
  0x52   : > { %s8651_s26 = smov [#allocation14]   ;;  %s8552_s14 = scalar_lea.hbm %s10782_s3, 16 }
  0x53   : > { %s208_s9 = sshll.u32 %s8651_s26, 4  ;;  %p8553_p2 = scmp.ne.s32.totalorder %s10782_s3, %s8552_s14  ;;  %s209_s9 = int_to_ptr.vmem [resolvable:$true] %s208_s9 }
  0x54   : > { %p8559_p9 = scmp.lt.u32.totalorder %s8552_s14, %s10782_s3 }
  0x55   : > { %p8555_p3 = pnand %p8553_p2, %p8739_p8 }
  0x57   : > { %p8556_p6 = pneg %p8555_p3 }
  0x59   : > { %p8561_p10 = pnand %p8559_p9, %p8556_p6 }
  0x5b   : > { %8564 = shalt.err (!%p8561_p10)
}
  0x5c   : > { %s8565_s28 = scalar_lea.vmem %s209_s9, 16  ;;  %s8572_s7 = scalar_lea.vmem %s209_s9, 32 }
  0x5d   : > { %p8566_p11 = scmp.ne.s32.totalorder %s209_s9, %s8565_s28  ;;  %p8573_p0 = scmp.lt.s32.totalorder %s209_s9, %s209_s9 }
  0x5e   : > { %p8574_p1 = scmp.lt.s32.totalorder %s8572_s7, %s8565_s28 }
  0x5f   : > { %p8568_p12 = pnand %p8566_p11, %p8739_p8 }
  0x60   : > { %p8575_p4 = por %p8574_p1, %p8573_p0 }
  0x61   : > { %p8569_p13 = pneg %p8568_p12 }
  0x63   : > { %p8576_p7 = pnand %p8575_p4, %p8569_p13 }
  0x65   : > { %8579 = shalt.err (!%p8576_p7)
}
  0x66   : > { %8307 = dma.hbm_to_vmem [thread:$0]  (!%p8722_p5), %s10782_s3, 16, %s209_s9, [#allocation15]  }
  0x67   : > { %p10799_p2 = scmp.ne.s32.totalorder %s10794_s21, 0 }
  0x68   : > { %p10800_p3 = scmp.ne.s32.totalorder (!%p10799_p2), %s10793_s20, 0 }
  0x69   : > { %221 = sbr.rel (%p10799_p2) target bundleno = 1225 (0x4c9), region = 36 }
  0x70   : > { %8619 = dma.done.wait (%p10800_p3), [#allocation9], 6912  }
  0x71   : > { %8621 = vsyncadd (%p10800_p3), [#allocation9], 4294960384 }
  0x72   : > { %8623 = dma.done.wait (%p10800_p3), [#allocation12], 592  }
  0x73   : > { %8625 = vsyncadd (%p10800_p3), [#allocation12], 4294966704 }
  0x74   : > { %8627 = dma.done.wait (%p10800_p3), [#allocation15], 16  }
  0x75   : > { %8629 = vsyncadd (%p10800_p3), [#allocation15], 4294967280  ;;  %p258_p5 = scmp.eq.s32.totalorder %s8636_s15, 0 }
  0x76   : > { %v8652_v0 = vmov (%p258_p5), 0.0  }
  0x77   : > { %263 = sbr.rel (!%p258_p5) target bundleno = 126 (0x7e), region = 56  ;;  %264 = vst [vmem:[#allocation4] sm:$0x1] (%p258_p5), %v8652_v0  ;;  %265 = vst [vmem:[#allocation5] sm:$0x1] (%p258_p5), %v8652_v0 }
  0x7e PF: > { %p7690_p8 = scmp.ne.s32.totalorder %s8636_s15, 0 }
  0x80   : > { %268 = sbr.rel (%p7690_p8) target bundleno = 1110 (0x456), region = 60 }
  0x87   : > { %v559_v1 = vld [vmem:[#allocation8] sm:$0xf]  ;;  %v560_v2 = vld [vmem:[#allocation8 + $0x4] sm:$0xf]  ;;  %v561_v3 = vld [vmem:[#allocation8 + $0x8] sm:$0x1] }
  0x88   : > { %vm607_vm0 = vsmask.f32 3328  ;;  %vm608_vm1 = vsmask.f32 7440  ;;  %v611_v4 = vshrl.u32 %v559_v1, 16  ;;  %v614_v5 = vshll.u32 %v559_v1, 16 }
  0x89   : > { %v620_v6 = vshll.u32 %v560_v2, 16  ;;  %v624_v7 = vshrl.u32 %v560_v2, 16  ;;  %v630_v8 = vshll.u32 %v561_v3, 16  ;;  %v565_v9 = vld [vmem:[#allocation8 + $0x18] sm:$0xf]  ;;  %vm8833_vm2 = vmor %vm607_vm0, %vm608_vm1  ;;  %v10801_v23 = vmov 0 }
  0x8a   : > { %v613_v10 = vrot.slane %v611_v4, 4  ;;  %v616_v11 = vrot.slane %v614_v5, 5  ;;  %v566_v12 = vld [vmem:[#allocation8 + $0x1c] sm:$0xf]  ;;  %v567_v13 = vld [vmem:[#allocation8 + $0x20] sm:$0x1] }
  0x8b   : > { %v622_v14 = vrot.slane %v620_v6, 5  ;;  %v626_v15 = vrot.slane %v624_v7, 4  ;;  %v632_v16 = vrot.slane %v630_v8, 5  ;;  %v659_v17 = vshrl.u32 %v565_v9, 16  ;;  %v562_v18 = vld [vmem:[#allocation8 + $0xc] sm:$0xf] }
  0x8c   : > { %v617_v19 = vor.u32 %v616_v11, %v613_v10  ;;  %v662_v20 = vshll.u32 %v565_v9, 16  ;;  %v668_v21 = vshll.u32 %v566_v12, 16  ;;  %v672_v22 = vshrl.u32 %v566_v12, 16  ;;  %v563_v27 = vld [vmem:[#allocation8 + $0x10] sm:$0xf]  ;;  %s8653_s20 = smov 8  }
  0x8d   : > { %v10802_v23 = vsel %vm8833_vm2, 4294967295, %v10801_v23  ;;  %v627_v24 = vor.u32 %v626_v15, %v622_v14  ;;  %v661_v25 = vrot.slane %v659_v17, 4  ;;  %v678_v26 = vshll.u32 %v567_v13, 16  ;;  %v564_v33 = vld [vmem:[#allocation8 + $0x14] sm:$0x1]  ;;  %s8654_s21 = smov 16  }
  0x8e   : > { %10803 = vst [vmem:[#allocation21_spill] sm:$0xff] %v10802_v23  ;;  %v635_v28 = vshrl.u32 %v562_v18, 16  ;;  %v618_v29 = vrot.slane %v617_v19, 4  ;;  %v664_v30 = vrot.slane %v662_v20, 5  ;;  %v670_v31 = vrot.slane %v668_v21, 5  ;;  %s8655_s24 = smov 24  }
  0x8f   : > { %v674_v32 = vrot.slane %v672_v22, 4  ;;  %v628_v34 = vrot.slane %v627_v24, 4  ;;  %v680_v35 = vrot.slane %v678_v26, 5  ;;  %v638_v37 = vshll.u32 %v562_v18, 16  ;;  %v568_v42 = vld [vmem:[#allocation8 + $0x24] sm:$0xf] }
  0x90   : > { %v637_v36 = vrot.slane %v635_v28, 4  ;;  %v623_v38 = vsel %vm8833_vm2, %v618_v29, %v622_v14  ;;  %v665_v39 = vor.u32 %v664_v30, %v661_v25  ;;  %v644_v41 = vshll.u32 %v563_v27, 16  ;;  %v569_v47 = vld [vmem:[#allocation8 + $0x28] sm:$0xf]  ;;  %v570_v55 = vld [vmem:[#allocation8 + $0x2c] sm:$0x1] }
  0x91   : > { %v675_v40 = vor.u32 %v674_v32, %v670_v31  ;;  %v633_v43 = vsel %vm8833_vm2, %v628_v34, %v632_v16  ;;  %v640_v44 = vrot.slane %v638_v37, 5  ;;  %v648_v45 = vshrl.u32 %v563_v27, 16  ;;  %v571_v61 = vld [vmem:[#allocation8 + $0x30] sm:$0xf]  ;;  %v572_v2 = vld [vmem:[#allocation8 + $0x34] sm:$0xf] }
  0x92   : > { %v654_v46 = vshll.u32 %v564_v33, 16  ;;  %v7723_v48 = vcombine.low %v623_v38, %v633_v43  ;;  %v666_v49 = vrot.slane %v665_v39, 4  ;;  %v646_v51 = vrot.slane %v644_v41, 5  ;;  %v573_v9 = vld [vmem:[#allocation8 + $0x38] sm:$0x1]  ;;  %s8656_s6 = smov 32  }
  0x93   : > { %v676_v50 = vrot.slane %v675_v40, 4  ;;  %v641_v52 = vor.u32 %v640_v44, %v637_v36  ;;  %v650_v53 = vrot.slane %v648_v45, 4  ;;  %v683_v56 = vshrl.u32 %v568_v42, 16  ;;  %v574_v16 = vld [vmem:[#allocation8 + $0x3c] sm:$0xf]  ;;  %s8657_s10 = smov 40  }
  0x94   : > { %v656_v54 = vrot.slane %v654_v46, 5  ;;  %1042 = vrot.lane.b32.xlu0 %v7723_v48, %s8653_s20  ;;  %v671_v57 = vsel %vm8833_vm2, %v666_v49, %v670_v31  ;;  %v686_v59 = vshll.u32 %v568_v42, 16  ;;  %v692_v60 = vshll.u32 %v569_v47, 16  ;;  %v575_v21 = vld [vmem:[#allocation8 + $0x40] sm:$0xf]  ;;  %s8658_s11 = smov 48  }
  0x95   : > { %v681_v58 = vsel %vm8833_vm2, %v676_v50, %v680_v35  ;;  %v642_v63 = vrot.slane %v641_v52, 4  ;;  %v651_v0 = vor.u32 %v650_v53, %v646_v51  ;;  %v685_v1 = vrot.slane %v683_v56, 4  ;;  %v576_v33 = vld [vmem:[#allocation8 + $0x44] sm:$0x1]  ;;  %v577_v40 = vld [vmem:[#allocation8 + $0x48] sm:$0xf] }
  0x96   : > { %v7725_v62 = vcombine.low %v671_v57, %v681_v58  ;;  %v688_v3 = vrot.slane %v686_v59, 5  ;;  %v694_v4 = vrot.slane %v692_v60, 5  ;;  %v696_v5 = vshrl.u32 %v569_v47, 16  ;;  %v578_v45 = vld [vmem:[#allocation8 + $0x4c] sm:$0xf]  ;;  %s8659_s22 = smov 56  }
  0x97   : > { %v702_v6 = vshll.u32 %v570_v55, 16  ;;  %v647_v7 = vsel %vm8833_vm2, %v642_v63, %v646_v51  ;;  %v652_v8 = vrot.slane %v651_v0, 4  ;;  %v707_v10 = vshrl.u32 %v571_v61, 16  ;;  %v579_v52 = vld [vmem:[#allocation8 + $0x50] sm:$0x1]  ;;  %s8660_s26 = smov 64  }
  0x98   : > { %1046 = vrot.lane.b32.xlu1 %v7725_v62, %s8653_s20  ;;  %v710_v11 = vshll.u32 %v571_v61, 16  ;;  %v689_v12 = vor.u32 %v688_v3, %v685_v1  ;;  %v698_v13 = vrot.slane %v696_v5, 4  ;;  %v716_v15 = vshll.u32 %v572_v2, 16  ;;  %v580_v59 = vld [vmem:[#allocation8 + $0x54] sm:$0xf] }
  0x99   : > { %v704_v14 = vrot.slane %v702_v6, 5  ;;  %v657_v17 = vsel %vm8833_vm2, %v652_v8, %v656_v54  ;;  %v709_v18 = vrot.slane %v707_v10, 4  ;;  %v720_v20 = vshrl.u32 %v572_v2, 16  ;;  %v581_v0 = vld [vmem:[#allocation8 + $0x58] sm:$0xf] }
  0x9a   : > { %v712_v19 = vrot.slane %v710_v11, 5  ;;  %v7724_v22 = vcombine.low %v647_v7, %v657_v17  ;;  %v690_v24 = vrot.slane %v689_v12, 4  ;;  %v699_v25 = vor.u32 %v698_v13, %v694_v4  ;;  %v582_v12 = vld [vmem:[#allocation8 + $0x5c] sm:$0x1] }
  0x9b   : > { %v718_v26 = vrot.slane %v716_v15, 5  ;;  %v722_v28 = vrot.slane %v720_v20, 4  ;;  %v726_v29 = vshll.u32 %v573_v9, 16  ;;  %v731_v30 = vshrl.u32 %v574_v16, 16 }
  0x9c   : > { %v713_v27 = vor.u32 %v712_v19, %v709_v18  ;;  %1044 = vrot.lane.b32.xlu0 %v7724_v22, %s8653_s20  ;;  %v695_v31 = vsel %vm8833_vm2, %v690_v24, %v694_v4  ;;  %v700_v32 = vrot.slane %v699_v25, 4  ;;  %v734_v34 = vshll.u32 %v574_v16, 16  ;;  %v584_v19 = vld [vmem:[#allocation8 + $0x64] sm:$0xf] }
  0x9d   : > { %v740_v35 = vshll.u32 %v575_v21, 16  ;;  %v723_v37 = vor.u32 %v722_v28, %v718_v26  ;;  %v728_v38 = vrot.slane %v726_v29, 5  ;;  %v733_v39 = vrot.slane %v731_v30, 4 }
  0x9e   : > { %v714_v36 = vrot.slane %v713_v27, 4  ;;  %v705_v41 = vsel %vm8833_vm2, %v700_v32, %v704_v14  ;;  %v736_v42 = vrot.slane %v734_v34, 5  ;;  %v744_v44 = vshrl.u32 %v575_v21, 16  ;;  %v583_v14 = vld [vmem:[#allocation8 + $0x60] sm:$0xf] }
  0x9f   : > { %v742_v43 = vrot.slane %v740_v35, 5  ;;  %v7726_v46 = vcombine.low %v695_v31, %v705_v41  ;;  %v724_v48 = vrot.slane %v723_v37, 4  ;;  %v750_v49 = vshll.u32 %v576_v33, 16  ;;  %v585_v31 = vld [vmem:[#allocation8 + $0x68] sm:$0x1] }
  0xa0   : > { %v719_v47 = vsel %vm8833_vm2, %v714_v36, %v718_v26  ;;  %v737_v50 = vor.u32 %v736_v42, %v733_v39  ;;  %v746_v51 = vrot.slane %v744_v44, 4  ;;  %v755_v53 = vshrl.u32 %v577_v40, 16  ;;  %v586_v34 = vld [vmem:[#allocation8 + $0x6c] sm:$0xf]  ;;  %v587_v39 = vld [vmem:[#allocation8 + $0x70] sm:$0xf] }
  0xa1   : > { %v758_v54 = vshll.u32 %v577_v40, 16  ;;  %1048 = vrot.lane.b32.xlu1 %v7726_v46, %s8653_s20  ;;  %v729_v55 = vsel %vm8833_vm2, %v724_v48, %v728_v38  ;;  %v752_v56 = vrot.slane %v750_v49, 5  ;;  %v764_v57 = vshll.u32 %v578_v45, 16 }
  0xa2   : > { %v768_v58 = vshrl.u32 %v578_v45, 16  ;;  %v7727_v60 = vcombine.low %v719_v47, %v729_v55  ;;  %v738_v61 = vrot.slane %v737_v50, 4  ;;  %v747_v62 = vor.u32 %v746_v51, %v742_v43  ;;  %v588_v47 = vld [vmem:[#allocation8 + $0x74] sm:$0x1] }
  0xa3   : > { %v757_v63 = vrot.slane %v755_v53, 4  ;;  %v760_v1 = vrot.slane %v758_v54, 5  ;;  %v766_v2 = vrot.slane %v764_v57, 5  ;;  %v774_v4 = vshll.u32 %v579_v52, 16  ;;  %v589_v53 = vld [vmem:[#allocation8 + $0x78] sm:$0xf] }
  0xa4   : > { %v770_v3 = vrot.slane %v768_v58, 4  ;;  %1050 = vrot.lane.b32.xlu0 %v7727_v60, %s8653_s20  ;;  %v743_v5 = vsel %vm8833_vm2, %v738_v61, %v742_v43  ;;  %v748_v6 = vrot.slane %v747_v62, 4  ;;  %v779_v7 = vshrl.u32 %v580_v59, 16  ;;  %v590_v62 = vld [vmem:[#allocation8 + $0x7c] sm:$0xf] }
  0xa5   : > { %v782_v8 = vshll.u32 %v580_v59, 16  ;;  %v761_v9 = vor.u32 %v760_v1, %v757_v63  ;;  %v776_v11 = vrot.slane %v774_v4, 5  ;;  %v788_v13 = vshll.u32 %v581_v0, 16 }
  0xa6   : > { %v771_v10 = vor.u32 %v770_v3, %v766_v2  ;;  %v753_v15 = vsel %vm8833_vm2, %v748_v6, %v752_v56  ;;  %v781_v16 = vrot.slane %v779_v7, 4  ;;  %v792_v18 = vshrl.u32 %v581_v0, 16  ;;  %v591_v6 = vld [vmem:[#allocation8 + $0x80] sm:$0x1] }
  0xa7   : > { %v784_v17 = vrot.slane %v782_v8, 5  ;;  %v7728_v20 = vcombine.low %v743_v5, %v753_v15  ;;  %v762_v21 = vrot.slane %v761_v9, 4  ;;  %v790_v24 = vrot.slane %v788_v13, 5 }
  0xa8   : > { %v772_v22 = vrot.slane %v771_v10, 4  ;;  %v794_v26 = vrot.slane %v792_v18, 4  ;;  %v798_v27 = vshll.u32 %v582_v12, 16  ;;  %v803_v28 = vshrl.u32 %v583_v14, 16  ;;  %v592_v12 = vld [vmem:[#allocation8 + $0x84] sm:$0xf] }
  0xa9   : > { %v785_v25 = vor.u32 %v784_v17, %v781_v16  ;;  %1052 = vrot.lane.b32.xlu1 %v7728_v20, %s8653_s20  ;;  %v767_v29 = vsel %vm8833_vm2, %v762_v21, %v766_v2  ;;  %v806_v32 = vshll.u32 %v583_v14, 16  ;;  %v812_v33 = vshll.u32 %v584_v19, 16  ;;  %v593_v17 = vld [vmem:[#allocation8 + $0x88] sm:$0xf] }
  0xaa   : > { %v777_v30 = vsel %vm8833_vm2, %v772_v22, %v776_v11  ;;  %v795_v37 = vor.u32 %v794_v26, %v790_v24  ;;  %v800_v38 = vrot.slane %v798_v27, 5  ;;  %v805_v40 = vrot.slane %v803_v28, 4  ;;  %v594_v26 = vld [vmem:[#allocation8 + $0x8c] sm:$0x1] }
  0xab   : > { %v7729_v35 = vcombine.low %v767_v29, %v777_v30  ;;  %v786_v36 = vrot.slane %v785_v25, 4  ;;  %v808_v41 = vrot.slane %v806_v32, 5  ;;  %v814_v42 = vrot.slane %v812_v33, 5  ;;  %v595_v32 = vld [vmem:[#allocation8 + $0x90] sm:$0xf] }
  0xac   : > { %v816_v43 = vshrl.u32 %v584_v19, 16  ;;  %v796_v45 = vrot.slane %v795_v37, 4  ;;  %v822_v46 = vshll.u32 %v585_v31, 16  ;;  %v827_v48 = vshrl.u32 %v586_v34, 16  ;;  %v596_v37 = vld [vmem:[#allocation8 + $0x94] sm:$0xf] }
  0xad   : > { %1054 = vrot.lane.b32.xlu0 %v7729_v35, %s8653_s20  ;;  %v791_v44 = vsel %vm8833_vm2, %v786_v36, %v790_v24  ;;  %v809_v49 = vor.u32 %v808_v41, %v805_v40  ;;  %v830_v51 = vshll.u32 %v586_v34, 16  ;;  %v836_v52 = vshll.u32 %v587_v39, 16 }
  0xae   : > { %v818_v50 = vrot.slane %v816_v43, 4  ;;  %v801_v54 = vsel %vm8833_vm2, %v796_v45, %v800_v38  ;;  %v824_v55 = vrot.slane %v822_v46, 5  ;;  %v829_v56 = vrot.slane %v827_v48, 4 }
  0xaf   : > { %v840_v57 = vshrl.u32 %v587_v39, 16  ;;  %v7730_v58 = vcombine.low %v791_v44, %v801_v54  ;;  %v810_v59 = vrot.slane %v809_v49, 4  ;;  %v832_v61 = vrot.slane %v830_v51, 5  ;;  %v597_v44 = vld [vmem:[#allocation8 + $0x98] sm:$0x1] }
  0xb0   : > { %v819_v60 = vor.u32 %v818_v50, %v814_v42  ;;  %v838_v63 = vrot.slane %v836_v52, 5  ;;  %v846_v1 = vshll.u32 %v588_v47, 16  ;;  %v851_v2 = vshrl.u32 %v589_v53, 16  ;;  %v598_v51 = vld [vmem:[#allocation8 + $0x9c] sm:$0xf] }
  0xb1   : > { %v842_v0 = vrot.slane %v840_v57, 4  ;;  %1056 = vrot.lane.b32.xlu1 %v7730_v58, %s8653_s20  ;;  %v815_v3 = vsel %vm8833_vm2, %v810_v59, %v814_v42  ;;  %v833_v5 = vor.u32 %v832_v61, %v829_v56  ;;  %v854_v7 = vshll.u32 %v589_v53, 16  ;;  %v599_v56 = vld [vmem:[#allocation8 + $0xa0] sm:$0xf] }
  0xb2   : > { %v820_v4 = vrot.slane %v819_v60, 4  ;;  %v848_v9 = vrot.slane %v846_v1, 5  ;;  %v853_v10 = vrot.slane %v851_v2, 4  ;;  %v860_v11 = vshll.u32 %v590_v62, 16 }
  0xb3   : > { %v843_v8 = vor.u32 %v842_v0, %v838_v63  ;;  %v834_v14 = vrot.slane %v833_v5, 4  ;;  %v856_v15 = vrot.slane %v854_v7, 5  ;;  %v864_v16 = vshrl.u32 %v590_v62, 16 }
  0xb4   : > { %v825_v13 = vsel %vm8833_vm2, %v820_v4, %v824_v55  ;;  %v862_v20 = vrot.slane %v860_v11, 5  ;;  %v870_v21 = vshll.u32 %v591_v6, 16  ;;  %v875_v27 = vshrl.u32 %v592_v12, 16 }
  0xb5   : > { %v7731_v18 = vcombine.low %v815_v3, %v825_v13  ;;  %v844_v19 = vrot.slane %v843_v8, 4  ;;  %v839_v22 = vsel %vm8833_vm2, %v834_v14, %v838_v63  ;;  %v857_v24 = vor.u32 %v856_v15, %v853_v10  ;;  %v600_v3 = vld [vmem:[#allocation8 + $0xa4] sm:$0x1]  ;;  %v601_v10 = vld [vmem:[#allocation8 + $0xa8] sm:$0xf] }
  0xb6   : > { %v866_v25 = vrot.slane %v864_v16, 4  ;;  %v872_v29 = vrot.slane %v870_v21, 5  ;;  %v878_v30 = vshll.u32 %v592_v12, 16  ;;  %v884_v31 = vshll.u32 %v593_v17, 16  ;;  %v602_v15 = vld [vmem:[#allocation8 + $0xac] sm:$0xf] }
  0xb7   : > { %1058 = vrot.lane.b32.xlu0 %v7731_v18, %s8653_s20  ;;  %v849_v28 = vsel %vm8833_vm2, %v844_v19, %v848_v9  ;;  %v858_v34 = vrot.slane %v857_v24, 4  ;;  %v877_v36 = vrot.slane %v875_v27, 4  ;;  %v888_v40 = vshrl.u32 %v593_v17, 16 }
  0xb8   : > { %v7732_v33 = vcombine.low %v839_v22, %v849_v28  ;;  %v867_v35 = vor.u32 %v866_v25, %v862_v20  ;;  %v880_v38 = vrot.slane %v878_v30, 5  ;;  %v886_v39 = vrot.slane %v884_v31, 5  ;;  %v603_v22 = vld [vmem:[#allocation8 + $0xb0] sm:$0x1]  ;;  %v604_v30 = vld [vmem:[#allocation8 + $0xb4] sm:$0xf] }
  0xb9   : > { %v894_v41 = vshll.u32 %v594_v26, 16  ;;  %v863_v42 = vsel %vm8833_vm2, %v858_v34, %v862_v20  ;;  %v899_v45 = vshrl.u32 %v595_v32, 16  ;;  %v902_v46 = vshll.u32 %v595_v32, 16 }
  0xba   : > { %1060 = vrot.lane.b32.xlu1 %v7732_v33, %s8653_s20  ;;  %v868_v43 = vrot.slane %v867_v35, 4  ;;  %v881_v47 = vor.u32 %v880_v38, %v877_v36  ;;  %v890_v48 = vrot.slane %v888_v40, 4  ;;  %v908_v50 = vshll.u32 %v596_v37, 16  ;;  %v605_v35 = vld [vmem:[#allocation8 + $0xb8] sm:$0xf] }
  0xbb   : > { %v896_v49 = vrot.slane %v894_v41, 5  ;;  %v901_v53 = vrot.slane %v899_v45, 4  ;;  %v904_v54 = vrot.slane %v902_v46, 5  ;;  %v912_v55 = vshrl.u32 %v596_v37, 16 }
  0xbc   : > { %v873_v52 = vsel %vm8833_vm2, %v868_v43, %v872_v29  ;;  %v882_v58 = vrot.slane %v881_v47, 4  ;;  %v891_v59 = vor.u32 %v890_v48, %v886_v39  ;;  %v910_v60 = vrot.slane %v908_v50, 5  ;;  %v606_v47 = vld [vmem:[#allocation8 + $0xbc] sm:$0x1] }
  0xbd   : > { %v7733_v57 = vcombine.low %v863_v42, %v873_v52  ;;  %v905_v61 = vor.u32 %v904_v54, %v901_v53  ;;  %v914_v62 = vrot.slane %v912_v55, 4  ;;  %v918_v63 = vshll.u32 %v597_v44, 16  ;;  %v1108_v54 = vld [vmem:[#allocation8 + $0xdc] sm:$0xf] }
  0xbe   : > { %v923_v0 = vshrl.u32 %v598_v51, 16  ;;  %v887_v1 = vsel %vm8833_vm2, %v882_v58, %v886_v39  ;;  %v892_v2 = vrot.slane %v891_v59, 4  ;;  %v926_v4 = vshll.u32 %v598_v51, 16 }
  0xbf   : > { %1062 = vrot.lane.b32.xlu0 %v7733_v57, %s8653_s20  ;;  %v932_v5 = vshll.u32 %v599_v56, 16  ;;  %v906_v6 = vrot.slane %v905_v61, 4  ;;  %v915_v7 = vor.u32 %v914_v62, %v910_v60  ;;  %v920_v8 = vrot.slane %v918_v63, 5 }
  0xc0   : > { %v925_v9 = vrot.slane %v923_v0, 4  ;;  %v897_v11 = vsel %vm8833_vm2, %v892_v2, %v896_v49  ;;  %v928_v12 = vrot.slane %v926_v4, 5  ;;  %v936_v14 = vshrl.u32 %v599_v56, 16  ;;  %v1107_v49 = vld [vmem:[#allocation8 + $0xd8] sm:$0xf] }
  0xc1   : > { %v934_v13 = vrot.slane %v932_v5, 5  ;;  %v7734_v16 = vcombine.low %v887_v1, %v897_v11  ;;  %v911_v17 = vsel %vm8833_vm2, %v906_v6, %v910_v60  ;;  %v916_v18 = vrot.slane %v915_v7, 4  ;;  %v1109_v1 = vld [vmem:[#allocation8 + $0xe0] sm:$0x1]  ;;  %v1110_v4 = vld [vmem:[#allocation8 + $0xe4] sm:$0xf] }
  0xc2   : > { %v942_v19 = vshll.u32 %v600_v3, 16  ;;  %v929_v20 = vor.u32 %v928_v12, %v925_v9  ;;  %v938_v21 = vrot.slane %v936_v14, 4  ;;  %v947_v24 = vshrl.u32 %v601_v10, 16  ;;  %v1111_v9 = vld [vmem:[#allocation8 + $0xe8] sm:$0xf] }
  0xc3   : > { %v950_v25 = vshll.u32 %v601_v10, 16  ;;  %1064 = vrot.lane.b32.xlu1 %v7734_v16, %s8653_s20  ;;  %v921_v26 = vsel %vm8833_vm2, %v916_v18, %v920_v8  ;;  %v956_v28 = vshll.u32 %v602_v15, 16  ;;  %v960_v29 = vshrl.u32 %v602_v15, 16 }
  0xc4   : > { %v944_v27 = vrot.slane %v942_v19, 5  ;;  %v7735_v31 = vcombine.low %v911_v17, %v921_v26  ;;  %v930_v32 = vrot.slane %v929_v20, 4  ;;  %v939_v33 = vor.u32 %v938_v21, %v934_v13  ;;  %v1112_v17 = vld [vmem:[#allocation8 + $0xec] sm:$0x1] }
  0xc5   : > { %v949_v34 = vrot.slane %v947_v24, 4  ;;  %v952_v36 = vrot.slane %v950_v25, 5  ;;  %v958_v37 = vrot.slane %v956_v28, 5  ;;  %v962_v38 = vrot.slane %v960_v29, 4  ;;  %v1113_v24 = vld [vmem:[#allocation8 + $0xf0] sm:$0xf] }
  0xc6   : > { %v966_v39 = vshll.u32 %v603_v22, 16  ;;  %1066 = vrot.lane.b32.xlu0 %v7735_v31, %s8653_s20  ;;  %v935_v40 = vsel %vm8833_vm2, %v930_v32, %v934_v13  ;;  %v940_v41 = vrot.slane %v939_v33, 4  ;;  %v971_v42 = vshrl.u32 %v604_v30, 16  ;;  %v1114_v33 = vld [vmem:[#allocation8 + $0xf4] sm:$0xf] }
  0xc7   : > { %v974_v43 = vshll.u32 %v604_v30, 16  ;;  %v953_v44 = vor.u32 %v952_v36, %v949_v34  ;;  %v963_v45 = vor.u32 %v962_v38, %v958_v37  ;;  %v980_v48 = vshll.u32 %v605_v35, 16 }
  0xc8   : > { %v968_v46 = vrot.slane %v966_v39, 5  ;;  %v945_v50 = vsel %vm8833_vm2, %v940_v41, %v944_v27  ;;  %v973_v51 = vrot.slane %v971_v42, 4  ;;  %v984_v53 = vshrl.u32 %v605_v35, 16  ;;  %v1115_v41 = vld [vmem:[#allocation8 + $0xf8] sm:$0x1] }
  0xc9   : > { %v976_v52 = vrot.slane %v974_v43, 5  ;;  %v7736_v55 = vcombine.low %v935_v40, %v945_v50  ;;  %v954_v56 = vrot.slane %v953_v44, 4  ;;  %v964_v57 = vrot.slane %v963_v45, 4 }
  0xca   : > { %v982_v58 = vrot.slane %v980_v48, 5  ;;  %v986_v60 = vrot.slane %v984_v53, 4  ;;  %v990_v61 = vshll.u32 %v606_v47, 16  ;;  %v1156_v62 = vshrl.u32 %v1107_v49, 16  ;;  %v1116_v47 = vld [vmem:[#allocation8 + $0xfc] sm:$0xf] }
  0xcb   : > { %v977_v59 = vor.u32 %v976_v52, %v973_v51  ;;  %1068 = vrot.lane.b32.xlu1 %v7736_v55, %s8653_s20  ;;  %v959_v63 = vsel %vm8833_vm2, %v954_v56, %v958_v37  ;;  %v969_v0 = vsel %vm8833_vm2, %v964_v57, %v968_v46  ;;  %v1159_v2 = vshll.u32 %v1107_v49, 16  ;;  %v1117_v52 = vld [vmem:[#allocation8 + $0x100] sm:$0xf] }
  0xcc   : > { %v1165_v3 = vshll.u32 %v1108_v54, 16  ;;  %v7737_v5 = vcombine.low %v959_v63, %v969_v0  ;;  %v987_v7 = vor.u32 %v986_v60, %v982_v58  ;;  %v992_v8 = vrot.slane %v990_v61, 5  ;;  %v1118_v60 = vld [vmem:[#allocation8 + $0x104] sm:$0x1] }
  0xcd   : > { %v978_v6 = vrot.slane %v977_v59, 4  ;;  %v1158_v10 = vrot.slane %v1156_v62, 4  ;;  %v1161_v11 = vrot.slane %v1159_v2, 5  ;;  %v1169_v13 = vshrl.u32 %v1108_v54, 16  ;;  %v1119_v2 = vld [vmem:[#allocation8 + $0x108] sm:$0xf] }
  0xce   : > { %v1167_v12 = vrot.slane %v1165_v3, 5  ;;  %1070 = vrot.lane.b32.xlu0 %v7737_v5, %s8653_s20  ;;  %v988_v15 = vrot.slane %v987_v7, 4  ;;  %v1175_v16 = vshll.u32 %v1109_v1, 16  ;;  %v1180_v18 = vshrl.u32 %v1110_v4, 16  ;;  %v1120_v7 = vld [vmem:[#allocation8 + $0x10c] sm:$0xf] }
  0xcf   : > { %v983_v14 = vsel %vm8833_vm2, %v978_v6, %v982_v58  ;;  %v1162_v19 = vor.u32 %v1161_v11, %v1158_v10  ;;  %v1171_v20 = vrot.slane %v1169_v13, 4  ;;  %v1183_v21 = vshll.u32 %v1110_v4, 16 }
  0xd0   : > { %v1189_v22 = vshll.u32 %v1111_v9, 16  ;;  %v993_v25 = vsel %vm8833_vm2, %v988_v15, %v992_v8  ;;  %v1177_v26 = vrot.slane %v1175_v16, 5  ;;  %v1182_v27 = vrot.slane %v1180_v18, 4 }
  0xd1   : > { %v1193_v28 = vshrl.u32 %v1111_v9, 16  ;;  %v7738_v29 = vcombine.low %v983_v14, %v993_v25  ;;  %v1163_v30 = vrot.slane %v1162_v19, 4  ;;  %v1172_v31 = vor.u32 %v1171_v20, %v1167_v12  ;;  %v1121_v14 = vld [vmem:[#allocation8 + $0x110] sm:$0x1] }
  0xd2   : > { %v1185_v32 = vrot.slane %v1183_v21, 5  ;;  %v1191_v34 = vrot.slane %v1189_v22, 5  ;;  %v1199_v36 = vshll.u32 %v1112_v17, 16  ;;  %v1204_v37 = vshrl.u32 %v1113_v24, 16  ;;  %v1122_v21 = vld [vmem:[#allocation8 + $0x114] sm:$0xf] }
  0xd3   : > { %v1195_v35 = vrot.slane %v1193_v28, 4  ;;  %1072 = vrot.lane.b32.xlu1 %v7738_v29, %s8653_s20  ;;  %v1168_v38 = vsel %vm8833_vm2, %v1163_v30, %v1167_v12  ;;  %v1173_v39 = vrot.slane %v1172_v31, 4  ;;  %v1207_v42 = vshll.u32 %v1113_v24, 16 }
  0xd4   : > { %v1186_v40 = vor.u32 %v1185_v32, %v1182_v27  ;;  %v1201_v44 = vrot.slane %v1199_v36, 5  ;;  %v1206_v45 = vrot.slane %v1204_v37, 4  ;;  %v1213_v46 = vshll.u32 %v1114_v33, 16  ;;  %v1123_v27 = vld [vmem:[#allocation8 + $0x118] sm:$0xf] }
  0xd5   : > { %v1196_v43 = vor.u32 %v1195_v35, %v1191_v34  ;;  %v1178_v48 = vsel %vm8833_vm2, %v1173_v39, %v1177_v26  ;;  %v1209_v50 = vrot.slane %v1207_v42, 5  ;;  %v1217_v51 = vshrl.u32 %v1114_v33, 16 }
  0xd6   : > { %v1187_v49 = vrot.slane %v1186_v40, 4  ;;  %v7739_v53 = vcombine.low %v1168_v38, %v1178_v48  ;;  %v1215_v55 = vrot.slane %v1213_v46, 5  ;;  %v1223_v56 = vshll.u32 %v1115_v41, 16  ;;  %v1124_v38 = vld [vmem:[#allocation8 + $0x11c] sm:$0x1] }
  0xd7   : > { %v1197_v54 = vrot.slane %v1196_v43, 4  ;;  %v1210_v58 = vor.u32 %v1209_v50, %v1206_v45  ;;  %v1219_v59 = vrot.slane %v1217_v51, 4  ;;  %v1228_v61 = vshrl.u32 %v1116_v47, 16  ;;  %v1125_v45 = vld [vmem:[#allocation8 + $0x120] sm:$0xf] }
  0xd8   : > { %v1192_v57 = vsel %vm8833_vm2, %v1187_v49, %v1191_v34  ;;  %1587 = vrot.lane.b32.xlu0 %v7739_v53, %s8653_s20  ;;  %v1225_v63 = vrot.slane %v1223_v56, 5  ;;  %v1231_v0 = vshll.u32 %v1116_v47, 16  ;;  %v1237_v1 = vshll.u32 %v1117_v52, 16  ;;  %v1126_v50 = vld [vmem:[#allocation8 + $0x124] sm:$0xf] }
  0xd9   : > { %v1202_v62 = vsel %vm8833_vm2, %v1197_v54, %v1201_v44  ;;  %v1211_v4 = vrot.slane %v1210_v58, 4  ;;  %v1220_v5 = vor.u32 %v1219_v59, %v1215_v55  ;;  %v1230_v6 = vrot.slane %v1228_v61, 4 }
  0xda   : > { %v7740_v3 = vcombine.low %v1192_v57, %v1202_v62  ;;  %v1233_v8 = vrot.slane %v1231_v0, 5  ;;  %v1239_v9 = vrot.slane %v1237_v1, 5  ;;  %v1241_v10 = vshrl.u32 %v1117_v52, 16  ;;  %v1127_v57 = vld [vmem:[#allocation8 + $0x128] sm:$0x1] }
  0xdb   : > { %v1247_v11 = vshll.u32 %v1118_v60, 16  ;;  %v1216_v12 = vsel %vm8833_vm2, %v1211_v4, %v1215_v55  ;;  %v1221_v13 = vrot.slane %v1220_v5, 4  ;;  %v1252_v15 = vshrl.u32 %v1119_v2, 16  ;;  %v1128_v0 = vld [vmem:[#allocation8 + $0x12c] sm:$0xf] }
  0xdc   : > { %1589 = vrot.lane.b32.xlu1 %v7740_v3, %s8653_s20  ;;  %v1255_v16 = vshll.u32 %v1119_v2, 16  ;;  %v1234_v17 = vor.u32 %v1233_v8, %v1230_v6  ;;  %v1243_v18 = vrot.slane %v1241_v10, 4  ;;  %v1261_v20 = vshll.u32 %v1120_v7, 16  ;;  %v1129_v5 = vld [vmem:[#allocation8 + $0x130] sm:$0xf] }
  0xdd   : > { %v1249_v19 = vrot.slane %v1247_v11, 5  ;;  %v1226_v22 = vsel %vm8833_vm2, %v1221_v13, %v1225_v63  ;;  %v1254_v24 = vrot.slane %v1252_v15, 4  ;;  %v1265_v26 = vshrl.u32 %v1120_v7, 16  ;;  %v1130_v10 = vld [vmem:[#allocation8 + $0x134] sm:$0x1] }
  0xde   : > { %v1257_v25 = vrot.slane %v1255_v16, 5  ;;  %v7741_v28 = vcombine.low %v1216_v12, %v1226_v22  ;;  %v1235_v29 = vrot.slane %v1234_v17, 4  ;;  %v1244_v30 = vor.u32 %v1243_v18, %v1239_v9  ;;  %v1131_v11 = vld [vmem:[#allocation8 + $0x138] sm:$0xf]  ;;  %v1132_v16 = vld [vmem:[#allocation8 + $0x13c] sm:$0xf] }
  0xdf   : > { %v1263_v31 = vrot.slane %v1261_v20, 5  ;;  %v1267_v33 = vrot.slane %v1265_v26, 4  ;;  %v1271_v34 = vshll.u32 %v1121_v14, 16  ;;  %v1276_v35 = vshrl.u32 %v1122_v21, 16 }
  0xe0   : > { %v1258_v32 = vor.u32 %v1257_v25, %v1254_v24  ;;  %1591 = vrot.lane.b32.xlu0 %v7741_v28, %s8653_s20  ;;  %v1240_v36 = vsel %vm8833_vm2, %v1235_v29, %v1239_v9  ;;  %v1245_v37 = vrot.slane %v1244_v30, 4  ;;  %v1279_v39 = vshll.u32 %v1122_v21, 16 }
  0xe1   : > { %v1285_v40 = vshll.u32 %v1123_v27, 16  ;;  %v1268_v42 = vor.u32 %v1267_v33, %v1263_v31  ;;  %v1273_v43 = vrot.slane %v1271_v34, 5  ;;  %v1278_v44 = vrot.slane %v1276_v35, 4 }
  0xe2   : > { %v1259_v41 = vrot.slane %v1258_v32, 4  ;;  %v1250_v46 = vsel %vm8833_vm2, %v1245_v37, %v1249_v19  ;;  %v1281_v47 = vrot.slane %v1279_v39, 5  ;;  %v1289_v49 = vshrl.u32 %v1123_v27, 16  ;;  %v1134_v39 = vld [vmem:[#allocation8 + $0x144] sm:$0xf] }
  0xe3   : > { %v1287_v48 = vrot.slane %v1285_v40, 5  ;;  %v7742_v51 = vcombine.low %v1240_v36, %v1250_v46  ;;  %v1269_v53 = vrot.slane %v1268_v42, 4  ;;  %v1295_v54 = vshll.u32 %v1124_v38, 16  ;;  %v1133_v36 = vld [vmem:[#allocation8 + $0x140] sm:$0x1] }
  0xe4   : > { %v1264_v52 = vsel %vm8833_vm2, %v1259_v41, %v1263_v31  ;;  %v1282_v55 = vor.u32 %v1281_v47, %v1278_v44  ;;  %v1291_v56 = vrot.slane %v1289_v49, 4  ;;  %v1300_v58 = vshrl.u32 %v1125_v45, 16  ;;  %v1135_v44 = vld [vmem:[#allocation8 + $0x148] sm:$0xf] }
  0xe5   : > { %v1303_v59 = vshll.u32 %v1125_v45, 16  ;;  %1593 = vrot.lane.b32.xlu1 %v7742_v51, %s8653_s20  ;;  %v1274_v60 = vsel %vm8833_vm2, %v1269_v53, %v1273_v43  ;;  %v1297_v61 = vrot.slane %v1295_v54, 5  ;;  %v1309_v62 = vshll.u32 %v1126_v50, 16 }
  0xe6   : > { %v1313_v63 = vshrl.u32 %v1126_v50, 16  ;;  %v7743_v1 = vcombine.low %v1264_v52, %v1274_v60  ;;  %v1283_v2 = vrot.slane %v1282_v55, 4  ;;  %v1292_v3 = vor.u32 %v1291_v56, %v1287_v48  ;;  %v1136_v52 = vld [vmem:[#allocation8 + $0x14c] sm:$0x1] }
  0xe7   : > { %v1302_v4 = vrot.slane %v1300_v58, 4  ;;  %v1305_v6 = vrot.slane %v1303_v59, 5  ;;  %v1311_v7 = vrot.slane %v1309_v62, 5  ;;  %v1319_v9 = vshll.u32 %v1127_v57, 16  ;;  %v1137_v58 = vld [vmem:[#allocation8 + $0x150] sm:$0xf] }
  0xe8   : > { %v1315_v8 = vrot.slane %v1313_v63, 4  ;;  %1595 = vrot.lane.b32.xlu0 %v7743_v1, %s8653_s20  ;;  %v1288_v12 = vsel %vm8833_vm2, %v1283_v2, %v1287_v48  ;;  %v1293_v13 = vrot.slane %v1292_v3, 4  ;;  %v1324_v14 = vshrl.u32 %v1128_v0, 16  ;;  %v1138_v3 = vld [vmem:[#allocation8 + $0x154] sm:$0xf] }
  0xe9   : > { %v1327_v15 = vshll.u32 %v1128_v0, 16  ;;  %v1306_v17 = vor.u32 %v1305_v6, %v1302_v4  ;;  %v1321_v19 = vrot.slane %v1319_v9, 5  ;;  %v1333_v20 = vshll.u32 %v1129_v5, 16  ;;  %v1139_v4 = vld [vmem:[#allocation8 + $0x158] sm:$0x1] }
  0xea   : > { %v1316_v18 = vor.u32 %v1315_v8, %v1311_v7  ;;  %v1298_v21 = vsel %vm8833_vm2, %v1293_v13, %v1297_v61  ;;  %v1326_v22 = vrot.slane %v1324_v14, 4  ;;  %v1337_v25 = vshrl.u32 %v1129_v5, 16  ;;  %v1140_v9 = vld [vmem:[#allocation8 + $0x15c] sm:$0xf]  ;;  %v1141_v14 = vld [vmem:[#allocation8 + $0x160] sm:$0xf] }
  0xeb   : > { %v1329_v24 = vrot.slane %v1327_v15, 5  ;;  %v7744_v26 = vcombine.low %v1288_v12, %v1298_v21  ;;  %v1307_v27 = vrot.slane %v1306_v17, 4  ;;  %v1335_v29 = vrot.slane %v1333_v20, 5 }
  0xec   : > { %v1317_v28 = vrot.slane %v1316_v18, 4  ;;  %v1339_v31 = vrot.slane %v1337_v25, 4  ;;  %v1343_v32 = vshll.u32 %v1130_v10, 16  ;;  %v1348_v33 = vshrl.u32 %v1131_v11, 16 }
  0xed   : > { %v1330_v30 = vor.u32 %v1329_v24, %v1326_v22  ;;  %1597 = vrot.lane.b32.xlu1 %v7744_v26, %s8653_s20  ;;  %v1312_v34 = vsel %vm8833_vm2, %v1307_v27, %v1311_v7  ;;  %v1351_v37 = vshll.u32 %v1131_v11, 16  ;;  %v1357_v38 = vshll.u32 %v1132_v16, 16 }
  0xee   : > { %v1322_v35 = vsel %vm8833_vm2, %v1317_v28, %v1321_v19  ;;  %v1340_v42 = vor.u32 %v1339_v31, %v1335_v29  ;;  %v1345_v43 = vrot.slane %v1343_v32, 5  ;;  %v1350_v45 = vrot.slane %v1348_v33, 4  ;;  %v1142_v31 = vld [vmem:[#allocation8 + $0x164] sm:$0x1] }
  0xef   : > { %v7745_v40 = vcombine.low %v1312_v34, %v1322_v35  ;;  %v1331_v41 = vrot.slane %v1330_v30, 4  ;;  %v1353_v46 = vrot.slane %v1351_v37, 5  ;;  %v1359_v47 = vrot.slane %v1357_v38, 5  ;;  %v1143_v37 = vld [vmem:[#allocation8 + $0x168] sm:$0xf] }
  0xf0   : > { %v1361_v48 = vshrl.u32 %v1132_v16, 16  ;;  %v1341_v50 = vrot.slane %v1340_v42, 4  ;;  %v1367_v51 = vshll.u32 %v1133_v36, 16  ;;  %v1372_v53 = vshrl.u32 %v1134_v39, 16  ;;  %v1144_v42 = vld [vmem:[#allocation8 + $0x16c] sm:$0xf] }
  0xf1   : > { %1599 = vrot.lane.b32.xlu0 %v7745_v40, %s8653_s20  ;;  %v1336_v49 = vsel %vm8833_vm2, %v1331_v41, %v1335_v29  ;;  %v1354_v54 = vor.u32 %v1353_v46, %v1350_v45  ;;  %v1375_v56 = vshll.u32 %v1134_v39, 16  ;;  %v1381_v57 = vshll.u32 %v1135_v44, 16 }
  0xf2   : > { %v1363_v55 = vrot.slane %v1361_v48, 4  ;;  %v1346_v59 = vsel %vm8833_vm2, %v1341_v50, %v1345_v43  ;;  %v1369_v60 = vrot.slane %v1367_v51, 5  ;;  %v1374_v61 = vrot.slane %v1372_v53, 4 }
  0xf3   : > { %v1385_v62 = vshrl.u32 %v1135_v44, 16  ;;  %v7746_v63 = vcombine.low %v1336_v49, %v1346_v59  ;;  %v1355_v0 = vrot.slane %v1354_v54, 4  ;;  %v1377_v2 = vrot.slane %v1375_v56, 5  ;;  %v1145_v49 = vld [vmem:[#allocation8 + $0x170] sm:$0x1] }
  0xf4   : > { %v1364_v1 = vor.u32 %v1363_v55, %v1359_v47  ;;  %v1383_v5 = vrot.slane %v1381_v57, 5  ;;  %v1391_v7 = vshll.u32 %v1136_v52, 16  ;;  %v1396_v8 = vshrl.u32 %v1137_v58, 16  ;;  %v1146_v56 = vld [vmem:[#allocation8 + $0x174] sm:$0xf] }
  0xf5   : > { %v1387_v6 = vrot.slane %v1385_v62, 4  ;;  %1601 = vrot.lane.b32.xlu1 %v7746_v63, %s8653_s20  ;;  %v1360_v10 = vsel %vm8833_vm2, %v1355_v0, %v1359_v47  ;;  %v1378_v12 = vor.u32 %v1377_v2, %v1374_v61  ;;  %v1399_v13 = vshll.u32 %v1137_v58, 16  ;;  %v1147_v61 = vld [vmem:[#allocation8 + $0x178] sm:$0xf]  ;;  %v1148_v2 = vld [vmem:[#allocation8 + $0x17c] sm:$0x1] }
  0xf6   : > { %v1365_v11 = vrot.slane %v1364_v1, 4  ;;  %v1393_v16 = vrot.slane %v1391_v7, 5  ;;  %v1398_v17 = vrot.slane %v1396_v8, 4  ;;  %v1405_v18 = vshll.u32 %v1138_v3, 16  ;;  %v1149_v7 = vld [vmem:[#allocation8 + $0x180] sm:$0xf] }
  0xf7   : > { %v1388_v15 = vor.u32 %v1387_v6, %v1383_v5  ;;  %v1379_v20 = vrot.slane %v1378_v12, 4  ;;  %v1401_v21 = vrot.slane %v1399_v13, 5  ;;  %v1409_v22 = vshrl.u32 %v1138_v3, 16  ;;  %v1150_v12 = vld [vmem:[#allocation8 + $0x184] sm:$0xf] }
  0xf8   : > { %v1370_v19 = vsel %vm8833_vm2, %v1365_v11, %v1369_v60  ;;  %v1407_v26 = vrot.slane %v1405_v18, 5  ;;  %v1415_v27 = vshll.u32 %v1139_v4, 16  ;;  %v1420_v32 = vshrl.u32 %v1140_v9, 16 }
  0xf9   : > { %v7747_v24 = vcombine.low %v1360_v10, %v1370_v19  ;;  %v1389_v25 = vrot.slane %v1388_v15, 4  ;;  %v1384_v28 = vsel %vm8833_vm2, %v1379_v20, %v1383_v5  ;;  %v1402_v29 = vor.u32 %v1401_v21, %v1398_v17 }
  0xfa   : > { %v1411_v30 = vrot.slane %v1409_v22, 4  ;;  %v1417_v34 = vrot.slane %v1415_v27, 5  ;;  %v1423_v35 = vshll.u32 %v1140_v9, 16  ;;  %v1429_v36 = vshll.u32 %v1141_v14, 16 }
  0xfb   : > { %1603 = vrot.lane.b32.xlu0 %v7747_v24, %s8653_s20  ;;  %v1394_v33 = vsel %vm8833_vm2, %v1389_v25, %v1393_v16  ;;  %v1403_v39 = vrot.slane %v1402_v29, 4  ;;  %v1422_v41 = vrot.slane %v1420_v32, 4  ;;  %v1433_v45 = vshrl.u32 %v1141_v14, 16 }
  0xfc   : > { %v7748_v38 = vcombine.low %v1384_v28, %v1394_v33  ;;  %v1412_v40 = vor.u32 %v1411_v30, %v1407_v26  ;;  %v1425_v43 = vrot.slane %v1423_v35, 5  ;;  %v1431_v44 = vrot.slane %v1429_v36, 5  ;;  %v1151_v28 = vld [vmem:[#allocation8 + $0x188] sm:$0x1]  ;;  %v1152_v35 = vld [vmem:[#allocation8 + $0x18c] sm:$0xf] }
  0xfd   : > { %v1439_v46 = vshll.u32 %v1142_v31, 16  ;;  %v1408_v47 = vsel %vm8833_vm2, %v1403_v39, %v1407_v26  ;;  %v1444_v50 = vshrl.u32 %v1143_v37, 16  ;;  %v1447_v51 = vshll.u32 %v1143_v37, 16 }
  0xfe   : > { %1605 = vrot.lane.b32.xlu1 %v7748_v38, %s8653_s20  ;;  %v1413_v48 = vrot.slane %v1412_v40, 4  ;;  %v1426_v52 = vor.u32 %v1425_v43, %v1422_v41  ;;  %v1435_v53 = vrot.slane %v1433_v45, 4  ;;  %v1453_v55 = vshll.u32 %v1144_v42, 16  ;;  %v1153_v40 = vld [vmem:[#allocation8 + $0x190] sm:$0xf] }
  0xff   : > { %v1441_v54 = vrot.slane %v1439_v46, 5  ;;  %v1446_v58 = vrot.slane %v1444_v50, 4  ;;  %v1449_v59 = vrot.slane %v1447_v51, 5  ;;  %v1457_v60 = vshrl.u32 %v1144_v42, 16  ;;  %v1154_v45 = vld [vmem:[#allocation8 + $0x194] sm:$0x1] }
 0x100   : > { %v1418_v57 = vsel %vm8833_vm2, %v1413_v48, %v1417_v34  ;;  %v1427_v63 = vrot.slane %v1426_v52, 4  ;;  %v1436_v0 = vor.u32 %v1435_v53, %v1431_v44  ;;  %v1455_v1 = vrot.slane %v1453_v55, 5  ;;  %v1651_v50 = vld [vmem:[#allocation8] sm:$0xe] }
 0x101   : > { %v7749_v62 = vcombine.low %v1408_v47, %v1418_v57  ;;  %v1450_v3 = vor.u32 %v1449_v59, %v1446_v58  ;;  %v1459_v4 = vrot.slane %v1457_v60, 4  ;;  %v1463_v5 = vshll.u32 %v1145_v49, 16  ;;  %v1652_v59 = vld [vmem:[#allocation8 + $0x4] sm:$0xf]  ;;  %v1653_v60 = vld [vmem:[#allocation8 + $0x8] sm:$0x1] }
 0x102   : > { %v1468_v6 = vshrl.u32 %v1146_v56, 16  ;;  %v1432_v8 = vsel %vm8833_vm2, %v1427_v63, %v1431_v44  ;;  %v1437_v9 = vrot.slane %v1436_v0, 4  ;;  %v1471_v10 = vshll.u32 %v1146_v56, 16 }
 0x103   : > { %1607 = vrot.lane.b32.xlu0 %v7749_v62, %s8653_s20  ;;  %v1477_v11 = vshll.u32 %v1147_v61, 16  ;;  %v1451_v13 = vrot.slane %v1450_v3, 4  ;;  %v1460_v14 = vor.u32 %v1459_v4, %v1455_v1  ;;  %v1465_v15 = vrot.slane %v1463_v5, 5  ;;  %v1655_v62 = vld [vmem:[#allocation8 + $0x10] sm:$0xf] }
 0x104   : > { %v1470_v16 = vrot.slane %v1468_v6, 4  ;;  %v1442_v17 = vsel %vm8833_vm2, %v1437_v9, %v1441_v54  ;;  %v1473_v18 = vrot.slane %v1471_v10, 5  ;;  %v1481_v20 = vshrl.u32 %v1147_v61, 16  ;;  %v1654_v61 = vld [vmem:[#allocation8 + $0xc] sm:$0xe] }
 0x105   : > { %v1479_v19 = vrot.slane %v1477_v11, 5  ;;  %v7750_v21 = vcombine.low %v1432_v8, %v1442_v17  ;;  %v1456_v22 = vsel %vm8833_vm2, %v1451_v13, %v1455_v1  ;;  %v1461_v24 = vrot.slane %v1460_v14, 4  ;;  %v1656_v3 = vld [vmem:[#allocation8 + $0x14] sm:$0x1]  ;;  %v1658_v11 = vld [vmem:[#allocation8 + $0x1c] sm:$0xf] }
 0x106   : > { %v1487_v25 = vshll.u32 %v1148_v2, 16  ;;  %v1474_v26 = vor.u32 %v1473_v18, %v1470_v16  ;;  %v1483_v27 = vrot.slane %v1481_v20, 4  ;;  %v1492_v29 = vshrl.u32 %v1149_v7, 16  ;;  %v1660_v13 = vld [vmem:[#allocation8 + $0x24] sm:$0xe] }
 0x107   : > { %v1495_v30 = vshll.u32 %v1149_v7, 16  ;;  %1609 = vrot.lane.b32.xlu1 %v7750_v21, %s8653_s20  ;;  %v1466_v31 = vsel %vm8833_vm2, %v1461_v24, %v1465_v15  ;;  %v1501_v33 = vshll.u32 %v1150_v12, 16  ;;  %v1505_v34 = vshrl.u32 %v1150_v12, 16  ;;  %v1657_v7 = vld [vmem:[#allocation8 + $0x18] sm:$0xe] }
 0x108   : > { %v1489_v32 = vrot.slane %v1487_v25, 5  ;;  %v7751_v36 = vcombine.low %v1456_v22, %v1466_v31  ;;  %v1475_v37 = vrot.slane %v1474_v26, 4  ;;  %v1484_v38 = vor.u32 %v1483_v27, %v1479_v19  ;;  %v1659_v12 = vld [vmem:[#allocation8 + $0x20] sm:$0x1] }
 0x109   : > { %v1494_v39 = vrot.slane %v1492_v29, 4  ;;  %v1497_v41 = vrot.slane %v1495_v30, 5  ;;  %v1503_v42 = vrot.slane %v1501_v33, 5  ;;  %v1507_v43 = vrot.slane %v1505_v34, 4  ;;  %v1662_v29 = vld [vmem:[#allocation8 + $0x2c] sm:$0x1] }
 0x10a   : > { %v1511_v44 = vshll.u32 %v1151_v28, 16  ;;  %1611 = vrot.lane.b32.xlu0 %v7751_v36, %s8653_s20  ;;  %v1480_v46 = vsel %vm8833_vm2, %v1475_v37, %v1479_v19  ;;  %v1485_v47 = vrot.slane %v1484_v38, 4  ;;  %v1516_v48 = vshrl.u32 %v1152_v35, 16  ;;  %v1661_v19 = vld [vmem:[#allocation8 + $0x28] sm:$0xf] }
 0x10b   : > { %v1519_v49 = vshll.u32 %v1152_v35, 16  ;;  %v1498_v51 = vor.u32 %v1497_v41, %v1494_v39  ;;  %v1508_v52 = vor.u32 %v1507_v43, %v1503_v42  ;;  %v1525_v54 = vshll.u32 %v1153_v40, 16  ;;  %v1663_v30 = vld [vmem:[#allocation8 + $0x30] sm:$0xe]  ;;  %v1664_v35 = vld [vmem:[#allocation8 + $0x34] sm:$0xf] }
 0x10c   : > { %v1513_v53 = vrot.slane %v1511_v44, 5  ;;  %v1490_v55 = vsel %vm8833_vm2, %v1485_v47, %v1489_v32  ;;  %v1518_v56 = vrot.slane %v1516_v48, 4  ;;  %v1529_v58 = vshrl.u32 %v1153_v40, 16  ;;  %v1665_v36 = vld [vmem:[#allocation8 + $0x38] sm:$0x1] }
 0x10d   : > { %v1521_v57 = vrot.slane %v1519_v49, 5  ;;  %v7752_v63 = vcombine.low %v1480_v46, %v1490_v55  ;;  %v1499_v0 = vrot.slane %v1498_v51, 4  ;;  %v1509_v1 = vrot.slane %v1508_v52, 4  ;;  %v1666_v37 = vld [vmem:[#allocation8 + $0x3c] sm:$0xe]  ;;  %v9010_v55 = vpop.permute.xlu0 %1042 }
 0x10e   : > { %v1527_v2 = vrot.slane %v1525_v54, 5  ;;  %v1531_v5 = vrot.slane %v1529_v58, 4  ;;  %v1535_v6 = vshll.u32 %v1154_v45, 16  ;;  %vm1747_vm3 = vcmask 1042432   ;;  %v1668_v43 = vld [vmem:[#allocation8 + $0x44] sm:$0x1] }
 0x10f   : > { %v1522_v4 = vor.u32 %v1521_v57, %v1518_v56  ;;  %1613 = vrot.lane.b32.xlu1 %v7752_v63, %s8653_s20  ;;  %v1504_v8 = vsel %vm8833_vm2, %v1499_v0, %v1503_v42  ;;  %v1514_v9 = vsel %vm8833_vm2, %v1509_v1, %v1513_v53  ;;  %vm1748_vm4 = vcmask 1046532   ;;  %v1667_v42 = vld [vmem:[#allocation8 + $0x40] sm:$0xf]  ;;  %v1669_v48 = vld [vmem:[#allocation8 + $0x48] sm:$0xe] }
 0x110   : > { %v7755_v10 = vrot.slane %v1651_v50, 9  ;;  %v7753_v14 = vcombine.low %v1504_v8, %v1514_v9  ;;  %v1532_v16 = vor.u32 %v1531_v5, %v1527_v2  ;;  %v1537_v17 = vrot.slane %v1535_v6, 5  ;;  %vm8991_vm5 = vmor %vm1747_vm3, %vm1748_vm4  ;;  %v1670_v53 = vld [vmem:[#allocation8 + $0x4c] sm:$0xf]  ;;  %v1671_v54 = vld [vmem:[#allocation8 + $0x50] sm:$0x1] }
 0x111   : > { %v1523_v15 = vrot.slane %v1522_v4, 4  ;;  %v10804_v18 = vmov 0  ;;  %v1752_v20 = vrot.slane %v1652_v59, 5  ;;  %v1755_v21 = vrot.slane %v1653_v60, 5  ;;  %v1672_v60 = vld [vmem:[#allocation8 + $0x54] sm:$0xe] }
 0x112   : > { %v10805_v18 = vsel %vm8991_vm5, 4294967295, %v10804_v18  ;;  %v7756_v22 = vrot.slane %v1654_v61, 9  ;;  %v1759_v24 = vrot.slane %v1655_v62, 5  ;;  %1615 = vrot.lane.b32.xlu0 %v7753_v14, %s8653_s20  ;;  %v1533_v26 = vrot.slane %v1532_v16, 4  ;;  %v1673_v61 = vld [vmem:[#allocation8 + $0x58] sm:$0xf] }
 0x113   : > { %10806 = vst [vmem:[#allocation22_spill] sm:$0xff] %v10805_v18  ;;  %v1528_v25 = vsel %vm8833_vm2, %v1523_v15, %v1527_v2  ;;  %v1762_v27 = vrot.slane %v1656_v3, 5  ;;  %v7757_v28 = vrot.slane %v1657_v7, 9  ;;  %v1753_v31 = vsel %vm8991_vm5, %v7755_v10, %v1752_v20  ;;  %v1674_v6 = vld [vmem:[#allocation8 + $0x5c] sm:$0x1] }
 0x114   : > { %v1754_v32 = vrot.slane %v1752_v20, 4  ;;  %v1760_v33 = vsel %vm8991_vm5, %v7756_v22, %v1759_v24  ;;  %v1761_v34 = vrot.slane %v1759_v24, 4  ;;  %v1538_v38 = vsel %vm8833_vm2, %v1533_v26, %v1537_v17  ;;  %v1675_v7 = vld [vmem:[#allocation8 + $0x60] sm:$0xe]  ;;  %v1678_v14 = vld [vmem:[#allocation8 + $0x6c] sm:$0xe]  ;;  %v9025_v22 = vpop.permute.xlu1 %1046 }
 0x115   : > { %v1766_v39 = vrot.slane %v1658_v11, 5  ;;  %v1769_v40 = vrot.slane %v1659_v12, 5  ;;  %v7758_v41 = vrot.slane %v1660_v13, 9  ;;  %v7754_v44 = vcombine.low %v1528_v25, %v1538_v38  ;;  %v1676_v12 = vld [vmem:[#allocation8 + $0x64] sm:$0xf] }
 0x116   : > { %v1756_v45 = vsel %vm8991_vm5, %v1754_v32, %v1755_v21  ;;  %v1763_v46 = vsel %vm8991_vm5, %v1761_v34, %v1762_v27  ;;  %v1773_v47 = vrot.slane %v1661_v19, 5  ;;  %v1776_v58 = vrot.slane %v1662_v29, 5  ;;  %v1677_v13 = vld [vmem:[#allocation8 + $0x68] sm:$0x1]  ;;  %v1679_v20 = vld [vmem:[#allocation8 + $0x70] sm:$0xf]  ;;  %v9030_v29 = vpop.permute.xlu0 %1044 }
 0x117   : > { %v7771_v49 = vcombine.low %v1753_v31, %v1756_v45  ;;  %v7772_v50 = vcombine.low %v1760_v33, %v1763_v46  ;;  %v1767_v51 = vsel %vm8991_vm5, %v7757_v28, %v1766_v39  ;;  %v1768_v52 = vrot.slane %v1766_v39, 4  ;;  %1617 = vrot.lane.b32.xlu1 %v7754_v44, %s8653_s20  ;;  %v1680_v21 = vld [vmem:[#allocation8 + $0x74] sm:$0x1]  ;;  %v2650_v28 = vld [vmem:[#allocation8 + $0xc] sm:$0xf] }
 0x118   : > { %v1774_v56 = vsel %vm8991_vm5, %v7758_v41, %v1773_v47  ;;  %v1775_v57 = vrot.slane %v1773_v47, 4  ;;  %v7759_v59 = vrot.slane %v1663_v30, 9  ;;  %v1780_v63 = vrot.slane %v1664_v35, 5  ;;  %v2652_v47 = vld [vmem:[#allocation8 + $0x14] sm:$0x1] }
 0x119   : > { %1910 = vrot.lane.b32.xlu0 %v7771_v49, %s8654_s21  ;;  %v1770_v62 = vsel %vm8991_vm5, %v1768_v52, %v1769_v40  ;;  %v1783_v0 = vrot.slane %v1665_v36, 5  ;;  %v7760_v1 = vrot.slane %v1666_v37, 9  ;;  %v1787_v4 = vrot.slane %v1667_v42, 5  ;;  %v2651_v42 = vld [vmem:[#allocation8 + $0x10] sm:$0xf] }
 0x11a   : > { %v7773_v2 = vcombine.low %v1767_v51, %v1770_v62  ;;  %v1777_v3 = vsel %vm8991_vm5, %v1775_v57, %v1776_v58  ;;  %v1790_v5 = vrot.slane %v1668_v43, 5  ;;  %v1781_v9 = vsel %vm8991_vm5, %v7759_v59, %v1780_v63  ;;  %v2653_v52 = vld [vmem:[#allocation8 + $0x18] sm:$0xf]  ;;  %v9050_v62 = vpop.permute.xlu0 %1050  ;;  %v9234_v18 = vld [vmem:[#allocation8 + $0x28] sm:$0xf] }
 0x11b   : > { %v7774_v8 = vcombine.low %v1774_v56, %v1777_v3  ;;  %v1782_v10 = vrot.slane %v1780_v63, 4  ;;  %v7761_v11 = vrot.slane %v1669_v48, 9  ;;  %1912 = vrot.lane.b32.xlu1 %v7772_v50, %s8654_s21  ;;  %v1788_v15 = vsel %vm8991_vm5, %v7760_v1, %v1787_v4 }
 0x11c   : > { %v1789_v16 = vrot.slane %v1787_v4, 4  ;;  %v1794_v17 = vrot.slane %v1670_v53, 5  ;;  %v1797_v19 = vrot.slane %v1671_v54, 5  ;;  %v7762_v25 = vrot.slane %v1672_v60, 9  ;;  %v2654_v53 = vld [vmem:[#allocation8 + $0x1c] sm:$0xf]  ;;  %v9046_v54 = vpop.permute.xlu1 %1048 }
 0x11d   : > { %1914 = vrot.lane.b32.xlu0 %v7773_v2, %s8654_s21  ;;  %v1784_v24 = vsel %vm8991_vm5, %v1782_v10, %v1783_v0  ;;  %v1801_v26 = vrot.slane %v1673_v61, 5  ;;  %v1804_v27 = vrot.slane %v1674_v6, 5  ;;  %v7763_v37 = vrot.slane %v1675_v7, 9  ;;  %v2655_v60 = vld [vmem:[#allocation8 + $0x20] sm:$0x1] }
 0x11e   : > { %v7775_v30 = vcombine.low %v1781_v9, %v1784_v24  ;;  %v1791_v31 = vsel %vm8991_vm5, %v1789_v16, %v1790_v5  ;;  %v1795_v32 = vsel %vm8991_vm5, %v7761_v11, %v1794_v17  ;;  %v1796_v33 = vrot.slane %v1794_v17, 4  ;;  %v3739_v61 = vld [vmem:[#allocation8 + $0xc] sm:$0xe]  ;;  %v3740_v7 = vld [vmem:[#allocation8 + $0x10] sm:$0xf] }
 0x11f   : > { %v7776_v34 = vcombine.low %v1788_v15, %v1791_v31  ;;  %v1802_v35 = vsel %vm8991_vm5, %v7762_v25, %v1801_v26  ;;  %v1803_v36 = vrot.slane %v1801_v26, 4  ;;  %1916 = vrot.lane.b32.xlu1 %v7774_v8, %s8654_s21  ;;  %v1808_v39 = vrot.slane %v1676_v12, 5  ;;  %v3741_v8 = vld [vmem:[#allocation8 + $0x14] sm:$0x1] }
 0x120   : > { %v1798_v38 = vsel %vm8991_vm5, %v1796_v33, %v1797_v19  ;;  %v1811_v40 = vrot.slane %v1677_v13, 5  ;;  %v7764_v41 = vrot.slane %v1678_v14, 9  ;;  %v1815_v45 = vrot.slane %v1679_v20, 5  ;;  %v3742_v13 = vld [vmem:[#allocation8 + $0x18] sm:$0xe]  ;;  %v8365_v14 = vld [vmem:[#allocation8 + $0xc] sm:$0xff]  }
 0x121   : > { %1918 = vrot.lane.b32.xlu0 %v7775_v30, %s8654_s21  ;;  %v7777_v43 = vcombine.low %v1795_v32, %v1798_v38  ;;  %v1805_v44 = vsel %vm8991_vm5, %v1803_v36, %v1804_v27  ;;  %v1818_v46 = vrot.slane %v1680_v21, 5  ;;  %v1809_v49 = vsel %vm8991_vm5, %v7763_v37, %v1808_v39  ;;  %v3743_v20 = vld [vmem:[#allocation8 + $0x1c] sm:$0xf]  ;;  %v3744_v27 = vld [vmem:[#allocation8 + $0x20] sm:$0x1] }
 0x122   : > { %v7778_v48 = vcombine.low %v1802_v35, %v1805_v44  ;;  %v1810_v50 = vrot.slane %v1808_v39, 4  ;;  %v2699_v51 = vshrl.u32 %v2650_v28, 16  ;;  %v1816_v56 = vsel %vm8991_vm5, %v7764_v41, %v1815_v45  ;;  %v9062_v35 = vpop.permute.xlu0 %1054  ;;  %v8366_v36 = vld [vmem:[#allocation8 + $0x18] sm:$0xff]  }
 0x123   : > { %v1817_v57 = vrot.slane %v1815_v45, 4  ;;  %v2702_v58 = vshll.u32 %v2650_v28, 16  ;;  %v2708_v59 = vshll.u32 %v2651_v42, 16  ;;  %1920 = vrot.lane.b32.xlu1 %v7776_v34, %s8654_s21  ;;  %v2712_v1 = vshrl.u32 %v2651_v42, 16  ;;  %v9059_v28 = vpop.permute.xlu1 %1052  ;;  %v4735_v34 = vld [vmem:[#allocation8 + $0x18] sm:$0xf] }
 0x124   : > { %v1812_v63 = vsel %vm8991_vm5, %v1810_v50, %v1811_v40  ;;  %v2701_v0 = vrot.slane %v2699_v51, 4  ;;  %v2718_v2 = vshll.u32 %v2652_v47, 16  ;;  %v2723_v12 = vshrl.u32 %v2653_v52, 16  ;;  %10807 = vst [vmem:[#allocation23_spill] sm:$0xff] %v9062_v35  ;;  %v8417_v45 = vld [vmem:[#allocation11] sm:$0xff]  }
 0x125   : > { %1922 = vrot.lane.b32.xlu0 %v7777_v43, %s8654_s21  ;;  %v7779_v3 = vcombine.low %v1809_v49, %v1812_v63  ;;  %v1819_v4 = vsel %vm8991_vm5, %v1817_v57, %v1818_v46  ;;  %v2704_v5 = vrot.slane %v2702_v58, 5  ;;  %v2710_v6 = vrot.slane %v2708_v59, 5  ;;  %8189 = vmatprep.subr.bf16.mxu0 %v8417_v45  ;;  %v4738_v63 = vld [vmem:[#allocation8 + $0x24] sm:$0xf] }
 0x126   : > { %v7780_v9 = vcombine.low %v1816_v56, %v1819_v4  ;;  %v2714_v10 = vrot.slane %v2712_v1, 4  ;;  %v2720_v11 = vrot.slane %v2718_v2, 5  ;;  %v2726_v16 = vshll.u32 %v2653_v52, 16  ;;  %v4736_v56 = vld [vmem:[#allocation8 + $0x1c] sm:$0xf]  ;;  %8190 = vmatpush3.bf16.msra.mxu0 %v8417_v45  ;;  %8263 = vmatprep.subr.bf16.mxu1 %v8417_v45 }
 0x127   : > { %v2705_v15 = vor.u32 %v2704_v5, %v2701_v0  ;;  %v2732_v17 = vshll.u32 %v2654_v53, 16  ;;  %v2736_v19 = vshrl.u32 %v2654_v53, 16  ;;  %1924 = vrot.lane.b32.xlu1 %v7778_v48, %s8654_s21  ;;  %v2725_v24 = vrot.slane %v2723_v12, 4  ;;  %v9080_v0 = vpop.permute.xlu1 %1056  ;;  %v4739_v5 = vld [vmem:[#allocation8 + $0x28] sm:$0xf]  ;;  %8268 = vmatpush3.bf16.msra.mxu1 %v8417_v45 }
 0x128   : > { %v2715_v21 = vor.u32 %v2714_v10, %v2710_v6  ;;  %v2742_v25 = vshll.u32 %v2655_v60, 16  ;;  %v7883_v26 = vrot.slane %v3739_v61, 9  ;;  %v2728_v31 = vrot.slane %v2726_v16, 5  ;;  %v4737_v60 = vld [vmem:[#allocation8 + $0x20] sm:$0x1]  ;;  %10808 = vst [vmem:[#allocation24_spill] sm:$0xff] %v9080_v0 }
 0x129   : > { %1926 = vrot.lane.b32.xlu0 %v7779_v3, %s8654_s21  ;;  %v2706_v30 = vrot.slane %v2705_v15, 4  ;;  %v2734_v32 = vrot.slane %v2732_v17, 5  ;;  %v2738_v33 = vrot.slane %v2736_v19, 4  ;;  %v3837_v39 = vrot.slane %v3740_v7, 5  ;;  %v9087_v7 = vpop.permute.xlu0 %1058  ;;  %v5824_v12 = vld [vmem:[#allocation8 + $0x18] sm:$0xe] }
 0x12a   : > { %v2716_v37 = vrot.slane %v2715_v21, 4  ;;  %v2744_v38 = vrot.slane %v2742_v25, 5  ;;  %v3840_v40 = vrot.slane %v3741_v8, 5  ;;  %v2729_v42 = vor.u32 %v2728_v31, %v2725_v24  ;;  %10809 = vst [vmem:[#allocation25_spill] sm:$0xff] %v9087_v7  ;;  %v5825_v17 = vld [vmem:[#allocation8 + $0x1c] sm:$0xf] }
 0x12b   : > { %v2711_v41 = vsel %vm8833_vm2, %v2706_v30, %v2710_v6  ;;  %v2739_v43 = vor.u32 %v2738_v33, %v2734_v32  ;;  %v7884_v44 = vrot.slane %v3742_v13, 9  ;;  %1928 = vrot.lane.b32.xlu1 %v7780_v9, %s8654_s21  ;;  %v9071_v47 = vsel %vm8991_vm5, %v7883_v26, %v3837_v39  ;;  %v4740_v6 = vld [vmem:[#allocation8 + $0x2c] sm:$0x1]  ;;  %v9094_v19 = vld [vmem:[#allocation8 + $0x20] sm:$0x1]  ;;  %v8367_v30 = vld [vmem:[#allocation8 + $0x18] sm:$0xff]  }
 0x12c   : > { %v2721_v46 = vsel %vm8833_vm2, %v2716_v37, %v2720_v11  ;;  %v3839_v48 = vrot.slane %v3837_v39, 4  ;;  %v3844_v49 = vrot.slane %v3743_v20, 5  ;;  %v2730_v51 = vrot.slane %v2729_v42, 4  ;;  %v8420_v20 = vld [vmem:[#allocation11 + $0x8] sm:$0xff]   ;;  %v9097_v42 = vpop.permute.xlu1 %1060 }
 0x12d   : > { %2408 = vrot.lane.b32.xlu0 %v8365_v14, %s8655_s24  ;;  %v7851_v50 = vcombine.low %v2711_v41, %v2721_v46  ;;  %v2740_v52 = vrot.slane %v2739_v43, 4  ;;  %v3847_v53 = vrot.slane %v3744_v27, 5  ;;  %v4784_v61 = vshrl.u32 %v4735_v34, 16  ;;  %v5827_v27 = vld [vmem:[#allocation8 + $0x24] sm:$0xe]  ;;  %8191 = vmatprep.subr.bf16.mxu0 %v8420_v20  ;;  %10810 = vst [vmem:[#allocation26_spill] sm:$0xff] %v9097_v42 }
 0x12e   : > { %v3841_v57 = vsel %vm8991_vm5, %v3839_v48, %v3840_v40  ;;  %v9078_v58 = vsel %vm8991_vm5, %v7884_v44, %v3844_v49  ;;  %v3846_v59 = vrot.slane %v3844_v49, 4  ;;  %v2735_v1 = vsel %vm8833_vm2, %v2730_v51, %v2734_v32  ;;  %8264 = vmatprep.subr.bf16.mxu1 %v8420_v20  ;;  %v5828_v41 = vld [vmem:[#allocation8 + $0x28] sm:$0xf]  ;;  %8192 = vmatpush3.bf16.msra.mxu0 %v8420_v20 }
 0x12f   : > { %v2745_v2 = vsel %vm8833_vm2, %v2740_v52, %v2744_v38  ;;  %v7899_v3 = vcombine.low %v9071_v47, %v3841_v57  ;;  %v4787_v4 = vshll.u32 %v4735_v34, 16  ;;  %2410 = vrot.lane.b32.xlu1 %v8366_v36, %s8655_s24  ;;  %v4786_v10 = vrot.slane %v4784_v61, 4  ;;  %v8421_v36 = vld [vmem:[#allocation11 + $0x10] sm:$0xff]   ;;  %v9100_v47 = vld [vmem:[#allocation8 + $0x2c] sm:$0x1]  ;;  %8269 = vmatpush3.bf16.msra.mxu1 %v8420_v20 }
 0x130   : > { %v7852_v8 = vcombine.low %v2735_v1, %v2745_v2  ;;  %v3848_v9 = vsel %vm8991_vm5, %v3846_v59, %v3847_v53  ;;  %v4793_v11 = vshll.u32 %v4736_v56, 16  ;;  %v4797_v15 = vshrl.u32 %v4736_v56, 16  ;;  %8193 = vmatprep.subr.bf16.mxu0 %v8421_v36  ;;  %v9104_v49 = vld [vmem:[#allocation11 + $0x18] sm:$0xff]   ;;  %v9107_v56 = vld [vmem:[#allocation8 + $0x24] sm:$0xf]  ;;  %8265 = vmatprep.subr.bf16.mxu1 %v8421_v36 }
 0x131   : > { %3130 = vrot.lane.b32.xlu0 %v7851_v50, %s8656_s6  ;;  %v7900_v13 = vcombine.low %v9078_v58, %v3848_v9  ;;  %v4789_v14 = vrot.slane %v4787_v4, 5  ;;  %v4803_v16 = vshll.u32 %v4737_v60, 16  ;;  %v4808_v24 = vshrl.u32 %v4738_v63, 16  ;;  %v9102_v48 = vpop.permute.xlu0 %1062  ;;  %v8368_v57 = vld [vmem:[#allocation8 + $0x24] sm:$0xff]  }
 0x132   : > { %v4795_v21 = vrot.slane %v4793_v11, 5  ;;  %v4811_v25 = vshll.u32 %v4738_v63, 16  ;;  %v4817_v26 = vshll.u32 %v4739_v5, 16  ;;  %v4799_v32 = vrot.slane %v4797_v15, 4  ;;  %10811 = vst [vmem:[#allocation27_spill] sm:$0xff] %v9102_v48  ;;  %8194 = vmatpush3.bf16.msra.mxu0 %v8421_v36 }
 0x133   : > { %v4790_v31 = vor.u32 %v4789_v14, %v4786_v10  ;;  %v4805_v33 = vrot.slane %v4803_v16, 5  ;;  %v4821_v34 = vshrl.u32 %v4739_v5, 16  ;;  %3132 = vrot.lane.b32.xlu1 %v7852_v8, %s8656_s6  ;;  %v4810_v37 = vrot.slane %v4808_v24, 4  ;;  %v9111_v63 = vld [vmem:[#allocation8 + $0x28] sm:$0xf]  ;;  %8195 = vmatprep.subr.bf16.mxu0 %v9104_v49 }
 0x134   : > { %v4813_v38 = vrot.slane %v4811_v25, 5  ;;  %v4819_v39 = vrot.slane %v4817_v26, 5  ;;  %v4827_v40 = vshll.u32 %v4740_v6, 16  ;;  %v4800_v44 = vor.u32 %v4799_v32, %v4795_v21  ;;  %v9118_v5 = vld [vmem:[#allocation8 + $0x2c] sm:$0x1]  ;;  %8270 = vmatpush3.bf16.msra.mxu1 %v8421_v36 }
 0x135   : > { %3995 = vrot.lane.b32.xlu0 %v7899_v3, %s8657_s10  ;;  %v4791_v43 = vrot.slane %v4790_v31, 4  ;;  %v4823_v45 = vrot.slane %v4821_v34, 4  ;;  %v8011_v46 = vrot.slane %v5824_v12, 9  ;;  %v5922_v52 = vrot.slane %v5825_v17, 5  ;;  %v9120_v6 = vld [vmem:[#allocation8 + $0x30] sm:$0xf]  ;;  %v9140_v17 = vpop.permute.xlu1 %1064  ;;  %8266 = vmatprep.subr.bf16.mxu1 %v9104_v49 }
 0x136   : > { %v4814_v50 = vor.u32 %v4813_v38, %v4810_v37  ;;  %v4829_v51 = vrot.slane %v4827_v40, 5  ;;  %v5925_v53 = vrot.slane %v9094_v19, 5  ;;  %v4801_v59 = vrot.slane %v4800_v44, 4  ;;  %v9138_v16 = vld [vmem:[#allocation8 + $0x34] sm:$0xf]  ;;  %10813 = vst [vmem:[#allocation29_spill] sm:$0xff] %v9140_v17  ;;  %8196 = vmatpush3.bf16.msra.mxu0 %v9104_v49 }
 0x137   : > { %v4796_v58 = vsel %vm8833_vm2, %v4791_v43, %v4795_v21  ;;  %v4824_v60 = vor.u32 %v4823_v45, %v4819_v39  ;;  %v8012_v61 = vrot.slane %v5827_v27, 9  ;;  %3997 = vrot.lane.b32.xlu1 %v7900_v13, %s8657_s10  ;;  %v9116_v2 = vsel %vm8991_vm5, %v8011_v46, %v5922_v52  ;;  %v9148_v25 = vld [vmem:[#allocation8 + $0x38] sm:$0x1]  ;;  %v9161_v36 = vld [vmem:[#allocation8 + $0xc] sm:$0xff]   ;;  %v9163_v37 = vld [vmem:[#allocation8 + $0x24] sm:$0xff]  }
 0x138   : > { %v4815_v1 = vrot.slane %v4814_v50, 4  ;;  %v5924_v3 = vrot.slane %v5922_v52, 4  ;;  %v5929_v4 = vrot.slane %v5828_v41, 5  ;;  %v4806_v8 = vsel %vm8833_vm2, %v4801_v59, %v4805_v33  ;;  %v9150_v26 = vpop.permute.xlu0 %1066  ;;  %v9157_v33 = vld [vmem:[#allocation8] sm:$0xff]   ;;  %v9159_v34 = vld [vmem:[#allocation8 + $0x18] sm:$0xff]   ;;  %v9165_v38 = vld [vmem:[#allocation8 + $0x30] sm:$0xff]   ;;  %8271 = vmatpush3.bf16.msra.mxu1 %v9104_v49 }
 0x139   : > { %4493 = vrot.lane.b32.xlu0 %v8367_v30, %s8658_s11  ;;  %v4825_v9 = vrot.slane %v4824_v60, 4  ;;  %v5932_v10 = vrot.slane %v9100_v47, 5  ;;  %v2747_v11 = vshrl.u32 %v9107_v56, 16  ;;  %v7979_v12 = vcombine.low %v4796_v58, %v4806_v8  ;;  %10814 = vst [vmem:[#allocation30_spill] sm:$0xff] %v9150_v26  ;;  %v9169_v40 = vld [vmem:[#allocation8 + $0x48] sm:$0xff]   ;;  %v9171_v41 = vld [vmem:[#allocation8 + $0x54] sm:$0xff]  }
 0x13a   : > { %v4820_v13 = vsel %vm8833_vm2, %v4815_v1, %v4819_v39  ;;  %v9132_v14 = vsel %vm8991_vm5, %v5924_v3, %v5925_v53  ;;  %v9136_v15 = vsel %vm8991_vm5, %v8012_v61, %v5929_v4  ;;  %v5931_v21 = vrot.slane %v5929_v4, 4  ;;  %v9167_v39 = vld [vmem:[#allocation8 + $0x3c] sm:$0xff]   ;;  %v9175_v44 = vld [vmem:[#allocation8 + $0x6c] sm:$0xff]   ;;  %v9179_v46 = vld [vmem:[#allocation8 + $0x84] sm:$0xff]  }
 0x13b   : > { %10812 = vst [vmem:[#allocation28_spill] sm:$0xff] %v9136_v15  ;;  %v4830_v19 = vsel %vm8833_vm2, %v4825_v9, %v4829_v51  ;;  %v9146_v24 = vrot.slane %v2747_v11, 4  ;;  %4495 = vrot.lane.b32.xlu1 %v8368_v57, %s8658_s11  ;;  %v2750_v30 = vshll.u32 %v9107_v56, 16  ;;  %v2756_v31 = vshll.u32 %v9111_v63, 16  ;;  %v9173_v43 = vld [vmem:[#allocation8 + $0x60] sm:$0xff]   ;;  %v9177_v45 = vld [vmem:[#allocation8 + $0x78] sm:$0xff]  }
 0x13c   : > { %v7980_v27 = vcombine.low %v4820_v13, %v4830_v19  ;;  %v2760_v32 = vshrl.u32 %v9111_v63, 16  ;;  %v9181_v47 = vld [vmem:[#allocation8 + $0x90] sm:$0xff]   ;;  %v9183_v50 = vld [vmem:[#allocation8 + $0x9c] sm:$0xff]   ;;  %v9185_v51 = vld [vmem:[#allocation8 + $0xa8] sm:$0xff]   ;;  %v9221_v13 = vsel %vm8991_vm5, %v5931_v21, %v5932_v10  ;;  %v2766_v19 = vshll.u32 %v9118_v5, 16 }
 0x13d   : > { %v9187_v52 = vld [vmem:[#allocation8 + $0xb4] sm:$0xff]   ;;  %v9191_v56 = vld [vmem:[#allocation8 + $0xe4] sm:$0xff]   ;;  %v9195_v58 = vld [vmem:[#allocation8 + $0xfc] sm:$0xff]   ;;  %5215 = vrot.lane.b32.xlu0 %v7979_v12, %s8659_s22  ;;  %10815 = vst [vmem:[#allocation31_spill] sm:$0xff] %v9221_v13  ;;  %v2771_v20 = vshrl.u32 %v9120_v6, 16  ;;  %v2774_v23 = vshll.u32 %v9120_v6, 16  ;;  %v9249_v15 = vpop.permute.xlu1 %1068 }
 0x13e   : > { %v9189_v53 = vld [vmem:[#allocation8 + $0xd8] sm:$0xff]   ;;  %v9193_v57 = vld [vmem:[#allocation8 + $0xf0] sm:$0xff]   ;;  %v9197_v59 = vld [vmem:[#allocation8 + $0x108] sm:$0xff]   ;;  %v2752_v48 = vrot.slane %v2750_v30, 5  ;;  %v9230_v42 = vrot.slane %v2756_v31, 5  ;;  %v2762_v7 = vrot.slane %v2760_v32, 4 }
 0x13f   : > { %v9199_v60 = vld [vmem:[#allocation8 + $0x114] sm:$0xff]   ;;  %v9201_v61 = vld [vmem:[#allocation8 + $0x120] sm:$0xff]   ;;  %v9203_v63 = vld [vmem:[#allocation8 + $0x12c] sm:$0xff]   ;;  %v9239_v21 = vrot.slane %v2766_v19, 5  ;;  %v2773_v6 = vrot.slane %v2771_v20, 4  ;;  %v2776_v0 = vrot.slane %v2774_v23, 5  ;;  %5217 = vrot.lane.b32.xlu1 %v7980_v27, %s8659_s22  ;;  %v10816_v23 = vcombine.low %v9116_v2, %v9132_v14 }
 0x140   : > { %v9205_v1 = vld [vmem:[#allocation8 + $0x138] sm:$0xff]   ;;  %v9207_v3 = vld [vmem:[#allocation8 + $0x144] sm:$0xff]   ;;  %v9209_v4 = vld [vmem:[#allocation8 + $0x150] sm:$0xff]   ;;  %v2780_v35 = vshll.u32 %v9138_v16, 16  ;;  %v2753_v30 = vor.u32 %v2752_v48, %v9146_v24  ;;  %v2763_v31 = vor.u32 %v2762_v7, %v9230_v42  ;;  %v2784_v32 = vshrl.u32 %v9138_v16, 16  ;;  %v1071_v48 = vpop.permute.xlu0 %1070 }
 0x141   : > { %v9211_v8 = vld [vmem:[#allocation8 + $0x15c] sm:$0xff]   ;;  %v9213_v9 = vld [vmem:[#allocation8 + $0x168] sm:$0xff]   ;;  %v9215_v11 = vld [vmem:[#allocation8 + $0x174] sm:$0xff]   ;;  %v2790_v13 = vshll.u32 %v9148_v25, 16  ;;  %6080 = vrot.lane.b32.xlu0 %v10816_v23, %s8660_s26  ;;  %v2777_v20 = vor.u32 %v2776_v0, %v2773_v6  ;;  %vm1090_vm6 = vcmask 130112   ;;  %vm397_vm7 = vcmask 64512  }
 0x142   : > { %v9226_v26 = vld [vmem:[#allocation8 + $0x180] sm:$0xff]   ;;  %v9236_v10 = vld [vmem:[#allocation8 + $0x2c] sm:$0x1]  ;;  %v9242_v17 = vld [vmem:[#allocation8 + $0x30] sm:$0xe]  ;;  %v9257_v27 = vrot.slane %v2780_v35, 5 }
 0x143   : > { %v9232_v12 = vld [vmem:[#allocation8 + $0x24] sm:$0xe]  ;;  %v8412_v5 = vld [vmem:[#allocation8 + $0x18c] sm:$0xff]   ;;  %v9259_v7 = vld [vmem:[#allocation8 + $0x34] sm:$0xf]  ;;  %v9261_v16 = vrot.slane %v2753_v30, 4 }
 0x144   : > { %v9255_v49 = vld [vmem:[#allocation8 + $0x24] sm:$0xff]   ;;  %v9263_v24 = vrot.slane %v2763_v31, 4  ;;  %v9265_v25 = vrot.slane %v2784_v32, 4  ;;  %v9267_v19 = vrot.slane %v2790_v13, 5  ;;  %398 = vst.msk [vmem:[#allocation2] sm:$0xff] %vm397_vm7, %v9157_v33  ;;  %400 = vst.msk [vmem:[#allocation2 + $0x10] sm:$0xff] %vm397_vm7, %v9159_v34 }
 0x145   : > { %v9273_v35 = vld [vmem:[#allocation8 + $0x38] sm:$0x1]  ;;  %399 = vst.msk [vmem:[#allocation2 + $0x8] sm:$0xff] %vm397_vm7, %v9161_v36  ;;  %401 = vst.msk [vmem:[#allocation2 + $0x18] sm:$0xff] %vm397_vm7, %v9163_v37  ;;  %v2778_v0 = vrot.slane %v2777_v20, 4  ;;  %v7885_v2 = vrot.slane %v9232_v12, 9  ;;  %2412 = vrot.lane.b32.xlu0 %v9255_v49, %s8655_s24 }
 0x146   : > { %402 = vst.msk [vmem:[#allocation2 + $0x20] sm:$0xff] %vm397_vm7, %v9165_v38  ;;  %403 = vst.msk [vmem:[#allocation2 + $0x28] sm:$0xff] %vm397_vm7, %v9167_v39  ;;  %v3851_v14 = vrot.slane %v9234_v18, 5  ;;  %v3854_v33 = vrot.slane %v9236_v10, 5  ;;  %v10819_v18 = vld [vmem:[#allocation25_spill] sm:$0xff]  ;;  %v10824_v34 = vld [vmem:[#allocation28_spill] sm:$0xff] }
 0x147   : > { %404 = vst.msk [vmem:[#allocation2 + $0x30] sm:$0xff] %vm397_vm7, %v9169_v40  ;;  %405 = vst.msk [vmem:[#allocation2 + $0x38] sm:$0xff] %vm397_vm7, %v9171_v41  ;;  %v10825_v36 = vld [vmem:[#allocation31_spill] sm:$0xff]  ;;  %v8370_v38 = vld [vmem:[#allocation8 + $0x30] sm:$0xff]   ;;  %v2759_v40 = vsel %vm8833_vm2, %v9261_v16, %v9230_v42  ;;  %v2769_v41 = vsel %vm8833_vm2, %v9263_v24, %v9239_v21  ;;  %vm1958_vm8 = vcmask 195712   ;;  %vm2456_vm9 = vcmask 261312  }
 0x148   : > { %406 = vst.msk [vmem:[#allocation2 + $0x40] sm:$0xff] %vm397_vm7, %v9173_v43  ;;  %407 = vst.msk [vmem:[#allocation2 + $0x48] sm:$0xff] %vm397_vm7, %v9175_v44  ;;  %v10826_v37 = vcombine.low %v10824_v34, %v10825_v36  ;;  %v7886_v43 = vrot.slane %v9242_v17, 9  ;;  %v4742_v44 = vld [vmem:[#allocation8 + $0x34] sm:$0xf]  ;;  %v3861_v17 = vrot.slane %v9273_v35, 5 }
 0x149   : > { %408 = vst.msk [vmem:[#allocation2 + $0x50] sm:$0xff] %vm397_vm7, %v9177_v45  ;;  %409 = vst.msk [vmem:[#allocation2 + $0x58] sm:$0xff] %vm397_vm7, %v9179_v46  ;;  %v7853_v45 = vcombine.low %v2759_v40, %v2769_v41  ;;  %v2783_v46 = vsel %vm8833_vm2, %v2778_v0, %v9257_v27  ;;  %v5830_v32 = vld [vmem:[#allocation8 + $0x30] sm:$0xe]  ;;  %vm3178_vm10 = vcmask 326912   ;;  %vm4043_vm11 = vcmask 392512  }
 0x14a   : > { %410 = vst.msk [vmem:[#allocation2 + $0x60] sm:$0xff] %vm397_vm7, %v9181_v47  ;;  %411 = vst.msk [vmem:[#allocation2 + $0x68] sm:$0xff] %vm397_vm7, %v9183_v50  ;;  %6082 = vrot.lane.b32.xlu1 %v10826_v37, %s8660_s26  ;;  %v3852_v47 = vsel %vm8991_vm5, %v7885_v2, %v3851_v14  ;;  %v3853_v50 = vrot.slane %v3851_v14, 4  ;;  %v1588_v16 = vpop.permute.xlu0 %1587  ;;  %v8375_v24 = vld [vmem:[#allocation8 + $0x30] sm:$0xff]   ;;  %v5833_v2 = vld [vmem:[#allocation8 + $0x3c] sm:$0xe] }
 0x14b   : > { %412 = vst.msk [vmem:[#allocation2 + $0x70] sm:$0xff] %vm397_vm7, %v9185_v51  ;;  %413 = vst.msk [vmem:[#allocation2 + $0x78] sm:$0xff] %vm397_vm7, %v9187_v52  ;;  %v4743_v51 = vld [vmem:[#allocation8 + $0x38] sm:$0x1]  ;;  %v4744_v52 = vld [vmem:[#allocation8 + $0x3c] sm:$0xf]  ;;  %3134 = vrot.lane.b32.xlu0 %v7853_v45, %s8656_s6 }
 0x14c   : > { %543 = vst.msk [vmem:[#allocation2 + $0x80] sm:$0xff] %vm397_vm7, %v9189_v53  ;;  %544 = vst.msk [vmem:[#allocation2 + $0x88] sm:$0xff] %vm397_vm7, %v9191_v56  ;;  %v3858_v56 = vrot.slane %v9259_v7, 5  ;;  %v4851_v30 = vshll.u32 %v4743_v51, 16  ;;  %v4856_v31 = vshrl.u32 %v4744_v52, 16  ;;  %v4859_v20 = vshll.u32 %v4744_v52, 16 }
 0x14d   : > { %545 = vst.msk [vmem:[#allocation2 + $0x90] sm:$0xff] %vm397_vm7, %v9193_v57  ;;  %546 = vst.msk [vmem:[#allocation2 + $0x98] sm:$0xff] %vm397_vm7, %v9195_v58  ;;  %v1073_v58 = vpop.permute.xlu1 %1072  ;;  %v5831_v7 = vld [vmem:[#allocation8 + $0x34] sm:$0xf]  ;;  %v5834_v14 = vld [vmem:[#allocation8 + $0x40] sm:$0xf] }
 0x14e   : > { %547 = vst.msk [vmem:[#allocation2 + $0xa0] sm:$0xff] %vm397_vm7, %v9197_v59  ;;  %548 = vst.msk [vmem:[#allocation2 + $0xa8] sm:$0xff] %vm397_vm7, %v9199_v60  ;;  %v3855_v59 = vsel %vm8991_vm5, %v3853_v50, %v3854_v33  ;;  %2414 = vrot.lane.b32.xlu1 %v8370_v38, %s8655_s24  ;;  %v4858_v35 = vrot.slane %v4856_v31, 4  ;;  %v5936_v34 = vrot.slane %v5831_v7, 5  ;;  %v2664_v50 = vld [vmem:[#allocation8 + $0x44] sm:$0x1] }
 0x14f   : > { %549 = vst.msk [vmem:[#allocation2 + $0xb0] sm:$0xff] %vm397_vm7, %v9201_v61  ;;  %550 = vst.msk [vmem:[#allocation2 + $0xb8] sm:$0xff] %vm397_vm7, %v9203_v63  ;;  %v4841_v61 = vshll.u32 %v4742_v44, 16  ;;  %v4845_v63 = vshrl.u32 %v4742_v44, 16  ;;  %v2814_v31 = vshll.u32 %v2664_v50, 16  ;;  %vm4541_vm12 = vcmask 458112  }
 0x150   : > { %551 = vst.msk [vmem:[#allocation2 + $0xc0] sm:$0xff] %vm397_vm7, %v9205_v1  ;;  %552 = vst.msk [vmem:[#allocation2 + $0xc8] sm:$0xff] %vm397_vm7, %v9207_v3  ;;  %v7901_v3 = vcombine.low %v3852_v47, %v3855_v59  ;;  %v5938_v47 = vrot.slane %v5936_v34, 4  ;;  %v3753_v7 = vld [vmem:[#allocation8 + $0x44] sm:$0x1]  ;;  %vm5263_vm13 = vcmask 523712  }
 0x151   : > { %553 = vst.msk [vmem:[#allocation2 + $0xd0] sm:$0xff] %vm397_vm7, %v9209_v4  ;;  %554 = vst.msk [vmem:[#allocation2 + $0xd8] sm:$0xff] %vm397_vm7, %v9211_v8  ;;  %v3859_v4 = vsel %vm8991_vm5, %v7886_v43, %v3858_v56  ;;  %v3860_v8 = vrot.slane %v3858_v56, 4  ;;  %v4843_v10 = vrot.slane %v4841_v61, 5  ;;  %v4847_v6 = vrot.slane %v4845_v63, 4  ;;  %v1590_v36 = vpop.permute.xlu1 %1589  ;;  %v8376_v43 = vld [vmem:[#allocation8 + $0x3c] sm:$0xff]  }
 0x152   : > { %555 = vst.msk [vmem:[#allocation2 + $0xe0] sm:$0xff] %vm397_vm7, %v9213_v9  ;;  %556 = vst.msk [vmem:[#allocation2 + $0xe8] sm:$0xff] %vm397_vm7, %v9215_v11  ;;  %v4745_v9 = vld [vmem:[#allocation8 + $0x40] sm:$0xf]  ;;  %3999 = vrot.lane.b32.xlu0 %v7901_v3, %s8657_s10  ;;  %v5943_v56 = vrot.slane %v5834_v14, 5  ;;  %vm6128_vm14 = vcmask 589312  }
 0x153   : > { %557 = vst.msk [vmem:[#allocation2 + $0xf0] sm:$0xff] %vm397_vm7, %v9226_v26  ;;  %558 = vst.msk [vmem:[#allocation2 + $0xf8] sm:$0xff] %vm397_vm7, %v8412_v5  ;;  %v10818_v26 = vld [vmem:[#allocation24_spill] sm:$0xff]  ;;  %v4746_v5 = vld [vmem:[#allocation8 + $0x44] sm:$0x1]  ;;  %v3862_v21 = vsel %vm8991_vm5, %v3860_v8, %v3861_v17  ;;  %v4869_v0 = vshrl.u32 %v4745_v9, 16 }
 0x154   : > { %1091 = vst.msk [vmem:[#allocation2] sm:$0xff] %vm1090_vm6, %v9010_v55  ;;  %1093 = vst.msk [vmem:[#allocation2 + $0x10] sm:$0xff] %vm1090_vm6, %v9025_v22  ;;  %v4741_v55 = vld [vmem:[#allocation8 + $0x30] sm:$0xf]  ;;  %v10817_v22 = vld [vmem:[#allocation23_spill] sm:$0xff]  ;;  %v7902_v23 = vcombine.low %v3859_v4, %v3862_v21  ;;  %v5945_v4 = vrot.slane %v5943_v56, 4 }
 0x155   : > { %1092 = vst.msk [vmem:[#allocation2 + $0x8] sm:$0xff] %vm1090_vm6, %v9030_v29  ;;  %1094 = vst.msk [vmem:[#allocation2 + $0x18] sm:$0xff] %vm1090_vm6, %v9046_v54  ;;  %v10820_v29 = vld [vmem:[#allocation26_spill] sm:$0xff]  ;;  %v10821_v54 = vld [vmem:[#allocation27_spill] sm:$0xff]  ;;  %v4832_v57 = vshrl.u32 %v4741_v55, 16  ;;  %v4835_v60 = vshll.u32 %v4741_v55, 16 }
 0x156   : > { %1095 = vst.msk [vmem:[#allocation2 + $0x20] sm:$0xff] %vm1090_vm6, %v9050_v62  ;;  %1096 = vst.msk [vmem:[#allocation2 + $0x28] sm:$0xff] %vm1090_vm6, %v9059_v28  ;;  %v10822_v62 = vld [vmem:[#allocation29_spill] sm:$0xff]  ;;  %v10823_v28 = vld [vmem:[#allocation30_spill] sm:$0xff]  ;;  %v4861_v55 = vrot.slane %v4859_v20, 5  ;;  %4497 = vrot.lane.b32.xlu0 %v8375_v24, %s8658_s11  ;;  %vm6630_vm15 = vcmask 1043456  }
 0x157   : > { %1097 = vst.msk [vmem:[#allocation2 + $0x30] sm:$0xff] %vm1090_vm6, %v10817_v22  ;;  %1098 = vst.msk [vmem:[#allocation2 + $0x38] sm:$0xff] %vm1090_vm6, %v10818_v26  ;;  %v4834_v13 = vrot.slane %v4832_v57, 4  ;;  %v4837_v12 = vrot.slane %v4835_v60, 5  ;;  %v4875_v26 = vshll.u32 %v4746_v5, 16  ;;  %vm6533_vm0 = vcmask 588800  }
 0x158   : > { %1099 = vst.msk [vmem:[#allocation2 + $0x40] sm:$0xff] %vm1090_vm6, %v10819_v18  ;;  %1100 = vst.msk [vmem:[#allocation2 + $0x48] sm:$0xff] %vm1090_vm6, %v10820_v29  ;;  %v5835_v18 = vld [vmem:[#allocation8 + $0x44] sm:$0x1]  ;;  %v2662_v29 = vld [vmem:[#allocation8 + $0x3c] sm:$0xf]  ;;  %v4862_v38 = vor.u32 %v4861_v55, %v4858_v35  ;;  %v1594_v55 = vpop.permute.xlu1 %1593 }
 0x159   : > { %1101 = vst.msk [vmem:[#allocation2 + $0x50] sm:$0xff] %vm1090_vm6, %v10821_v54  ;;  %1102 = vst.msk [vmem:[#allocation2 + $0x58] sm:$0xff] %vm1090_vm6, %v10822_v62  ;;  %v4838_v49 = vor.u32 %v4837_v12, %v4834_v13  ;;  %v4871_v62 = vrot.slane %v4869_v0, 4  ;;  %v4877_v40 = vrot.slane %v4875_v26, 5  ;;  %v2665_v17 = vld [vmem:[#allocation8 + $0x48] sm:$0xf] }
 0x15a   : > { %1103 = vst.msk [vmem:[#allocation2 + $0x60] sm:$0xff] %vm1090_vm6, %v10823_v28  ;;  %1104 = vst.msk [vmem:[#allocation2 + $0x68] sm:$0xff] %vm1090_vm6, %v9249_v15  ;;  %v2787_v15 = vor.u32 %v9265_v25, %v9257_v27  ;;  %v4865_v27 = vshll.u32 %v4745_v9, 16  ;;  %v4848_v25 = vor.u32 %v4847_v6, %v4843_v10  ;;  %v8013_v28 = vrot.slane %v5830_v32, 9  ;;  %v2666_v61 = vld [vmem:[#allocation8 + $0x4c] sm:$0xf]  ;;  %v1592_v9 = vpop.permute.xlu0 %1591 }
 0x15b   : > { %1105 = vst.msk [vmem:[#allocation2 + $0x70] sm:$0xff] %vm1090_vm6, %v1071_v48  ;;  %1106 = vst.msk [vmem:[#allocation2 + $0x78] sm:$0xff] %vm1090_vm6, %v1073_v58  ;;  %v5832_v48 = vld [vmem:[#allocation8 + $0x38] sm:$0x1]  ;;  %v4839_v33 = vrot.slane %v4838_v49, 4  ;;  %v4863_v52 = vrot.slane %v4862_v38, 4 }
 0x15c   : > { %v2788_v53 = vrot.slane %v2787_v15, 4  ;;  %1635 = vst.msk [vmem:[#allocation2 + $0x80] sm:$0xff] %vm1090_vm6, %v1588_v16  ;;  %v4867_v22 = vrot.slane %v4865_v27, 5  ;;  %v4849_v54 = vrot.slane %v4848_v25, 4  ;;  %v5939_v41 = vrot.slane %v5832_v48, 5  ;;  %1636 = vst.msk [vmem:[#allocation2 + $0x88] sm:$0xff] %vm1090_vm6, %v1590_v36 }
 0x15d   : > { %v4844_v37 = vsel %vm8833_vm2, %v4839_v33, %v4843_v10  ;;  %v2663_v15 = vld [vmem:[#allocation8 + $0x40] sm:$0xf]  ;;  %v5946_v59 = vrot.slane %v5835_v18, 5  ;;  %v2795_v60 = vshrl.u32 %v2662_v29, 16  ;;  %v2667_v8 = vld [vmem:[#allocation8 + $0x50] sm:$0x1] }
 0x15e   : > { %v2793_v1 = vsel %vm8833_vm2, %v2788_v53, %v9267_v19  ;;  %v4853_v19 = vrot.slane %v4851_v30, 5  ;;  %v4872_v45 = vor.u32 %v4871_v62, %v4867_v22  ;;  %v8014_v53 = vrot.slane %v5833_v2, 9  ;;  %v3751_v5 = vld [vmem:[#allocation8 + $0x3c] sm:$0xe]  ;;  %1637 = vst.msk [vmem:[#allocation2 + $0x90] sm:$0xff] %vm1090_vm6, %v1592_v9  ;;  %1638 = vst.msk [vmem:[#allocation2 + $0x98] sm:$0xff] %vm1090_vm6, %v1594_v55 }
 0x15f   : > { %v7854_v11 = vcombine.low %v2783_v46, %v2793_v1  ;;  %v5937_v46 = vsel %vm8991_vm5, %v8013_v28, %v5936_v34  ;;  %v5940_v58 = vsel %vm8991_vm5, %v5938_v47, %v5939_v41  ;;  %v4868_v63 = vsel %vm8833_vm2, %v4863_v52, %v4867_v22  ;;  %v3752_v32 = vld [vmem:[#allocation8 + $0x40] sm:$0xf]  ;;  %v3755_v33 = vld [vmem:[#allocation8 + $0x4c] sm:$0xf]  ;;  %v3756_v62 = vld [vmem:[#allocation8 + $0x50] sm:$0x1] }
 0x160   : > { %v4854_v44 = vsel %vm8833_vm2, %v4849_v54, %v4853_v19  ;;  %v4873_v57 = vrot.slane %v4872_v45, 4  ;;  %v8029_v1 = vcombine.low %v5937_v46, %v5940_v58  ;;  %v5944_v3 = vsel %vm8991_vm5, %v8014_v53, %v5943_v56  ;;  %v3754_v19 = vld [vmem:[#allocation8 + $0x48] sm:$0xe]  ;;  %v8383_v22 = vld [vmem:[#allocation8 + $0x3c] sm:$0xff]   ;;  %v1596_v45 = vpop.permute.xlu0 %1595 }
 0x161   : > { %3136 = vrot.lane.b32.xlu1 %v7854_v11, %s8656_s6  ;;  %v7981_v51 = vcombine.low %v4844_v37, %v4854_v44  ;;  %v2797_v13 = vrot.slane %v2795_v60, 4  ;;  %v2798_v12 = vshll.u32 %v2662_v29, 16  ;;  %v2804_v10 = vshll.u32 %v2663_v15, 16  ;;  %v4747_v38 = vld [vmem:[#allocation8 + $0x48] sm:$0xf]  ;;  %1639 = vst.msk [vmem:[#allocation2 + $0xa0] sm:$0xff] %vm1090_vm6, %v1596_v45 }
 0x162   : > { %v4878_v11 = vsel %vm8833_vm2, %v4873_v57, %v4877_v40  ;;  %v5947_v6 = vsel %vm8991_vm5, %v5945_v4, %v5946_v59  ;;  %v2808_v30 = vshrl.u32 %v2663_v15, 16  ;;  %v2819_v27 = vshrl.u32 %v2665_v17, 16  ;;  %v4748_v44 = vld [vmem:[#allocation8 + $0x4c] sm:$0xf] }
 0x163   : > { %5219 = vrot.lane.b32.xlu0 %v7981_v51, %s8659_s22  ;;  %v7982_v21 = vcombine.low %v4868_v63, %v4878_v11  ;;  %v2800_v49 = vrot.slane %v2798_v12, 5  ;;  %v2806_v20 = vrot.slane %v2804_v10, 5  ;;  %v2816_v16 = vrot.slane %v2814_v31, 5  ;;  %v8384_v46 = vld [vmem:[#allocation8 + $0x48] sm:$0xff]   ;;  %v4751_v11 = vld [vmem:[#allocation8 + $0x58] sm:$0xf] }
 0x164   : > { %v2810_v48 = vrot.slane %v2808_v30, 4  ;;  %v2822_v24 = vshll.u32 %v2665_v17, 16  ;;  %v2828_v25 = vshll.u32 %v2666_v61, 16  ;;  %v2821_v0 = vrot.slane %v2819_v27, 4  ;;  %v1598_v30 = vpop.permute.xlu1 %1597 }
 0x165   : > { %4001 = vrot.lane.b32.xlu1 %v7902_v23, %s8657_s10  ;;  %v8030_v23 = vcombine.low %v5944_v3, %v5947_v6  ;;  %v2801_v35 = vor.u32 %v2800_v49, %v2797_v13  ;;  %v2832_v2 = vshrl.u32 %v2666_v61, 16  ;;  %v2838_v14 = vshll.u32 %v2667_v8, 16  ;;  %v4749_v61 = vld [vmem:[#allocation8 + $0x50] sm:$0x1]  ;;  %v4752_v13 = vld [vmem:[#allocation8 + $0x5c] sm:$0x1] }
 0x166   : > { %v2811_v26 = vor.u32 %v2810_v48, %v2806_v20  ;;  %v2824_v18 = vrot.slane %v2822_v24, 5  ;;  %v2830_v29 = vrot.slane %v2828_v25, 5  ;;  %v7887_v54 = vrot.slane %v3751_v5, 9  ;;  %v5836_v6 = vld [vmem:[#allocation8 + $0x48] sm:$0xe]  ;;  %1640 = vst.msk [vmem:[#allocation2 + $0xa8] sm:$0xff] %vm1090_vm6, %v1598_v30 }
 0x167   : > { %6084 = vrot.lane.b32.xlu0 %v8029_v1, %s8660_s26  ;;  %v2802_v28 = vrot.slane %v2801_v35, 4  ;;  %v2834_v34 = vrot.slane %v2832_v2, 4  ;;  %v2840_v36 = vrot.slane %v2838_v14, 5  ;;  %v3865_v37 = vrot.slane %v3752_v32, 5  ;;  %v4750_v1 = vld [vmem:[#allocation8 + $0x54] sm:$0xf]  ;;  %v1600_v14 = vpop.permute.xlu0 %1599 }
 0x168   : > { %v2812_v40 = vrot.slane %v2811_v26, 4  ;;  %v2825_v41 = vor.u32 %v2824_v18, %v2821_v0  ;;  %v3868_v15 = vrot.slane %v3753_v7, 5  ;;  %v3872_v17 = vrot.slane %v3755_v33, 5  ;;  %v5838_v24 = vld [vmem:[#allocation8 + $0x50] sm:$0x1]  ;;  %1641 = vst.msk [vmem:[#allocation2 + $0xb0] sm:$0xff] %vm1090_vm6, %v1600_v14 }
 0x169   : > { %4499 = vrot.lane.b32.xlu1 %v8376_v43, %s8658_s11  ;;  %v7888_v43 = vrot.slane %v3754_v19, 9  ;;  %v2807_v47 = vsel %vm8833_vm2, %v2802_v28, %v2806_v20  ;;  %v2835_v50 = vor.u32 %v2834_v34, %v2830_v29  ;;  %v3866_v51 = vsel %vm8991_vm5, %v7887_v54, %v3865_v37  ;;  %v5837_v20 = vld [vmem:[#allocation8 + $0x4c] sm:$0xf]  ;;  %v5839_v25 = vld [vmem:[#allocation8 + $0x54] sm:$0xe] }
 0x16a   : > { %v3867_v52 = vrot.slane %v3865_v37, 4  ;;  %v2817_v53 = vsel %vm8833_vm2, %v2812_v40, %v2816_v16  ;;  %v2826_v56 = vrot.slane %v2825_v41, 4  ;;  %v3875_v57 = vrot.slane %v3756_v62, 5  ;;  %v5840_v18 = vld [vmem:[#allocation8 + $0x58] sm:$0xf]  ;;  %v8391_v54 = vld [vmem:[#allocation8 + $0x48] sm:$0xff]  }
 0x16b   : > { %2416 = vrot.lane.b32.xlu0 %v8383_v22, %s8655_s24  ;;  %v7855_v58 = vcombine.low %v2807_v47, %v2817_v53  ;;  %v2836_v59 = vrot.slane %v2835_v50, 4  ;;  %v4880_v63 = vshrl.u32 %v4747_v38, 16  ;;  %v3873_v8 = vsel %vm8991_vm5, %v7888_v43, %v3872_v17  ;;  %v2668_v37 = vld [vmem:[#allocation8 + $0x54] sm:$0xf]  ;;  %v2669_v47 = vld [vmem:[#allocation8 + $0x58] sm:$0xf] }
 0x16c   : > { %v3869_v60 = vsel %vm8991_vm5, %v3867_v52, %v3868_v15  ;;  %v2831_v3 = vsel %vm8833_vm2, %v2826_v56, %v2830_v29  ;;  %v3874_v9 = vrot.slane %v3872_v17, 4  ;;  %v4883_v5 = vshll.u32 %v4747_v38, 16  ;;  %v5841_v29 = vld [vmem:[#allocation8 + $0x5c] sm:$0x1]  ;;  %v8392_v50 = vld [vmem:[#allocation8 + $0x54] sm:$0xff]   ;;  %v1602_v17 = vpop.permute.xlu1 %1601 }
 0x16d   : > { %5221 = vrot.lane.b32.xlu1 %v7982_v21, %s8659_s22  ;;  %v7903_v4 = vcombine.low %v3866_v51, %v3869_v60  ;;  %v2841_v12 = vsel %vm8833_vm2, %v2836_v59, %v2840_v36  ;;  %v4882_v10 = vrot.slane %v4880_v63, 4  ;;  %v4889_v21 = vshll.u32 %v4748_v44, 16  ;;  %1642 = vst.msk [vmem:[#allocation2 + $0xb8] sm:$0xff] %vm1090_vm6, %v1602_v17 }
 0x16e   : > { %v7856_v31 = vcombine.low %v2831_v3, %v2841_v12  ;;  %v3876_v32 = vsel %vm8991_vm5, %v3874_v9, %v3875_v57  ;;  %v4899_v49 = vshll.u32 %v4749_v61, 16  ;;  %v4885_v7 = vrot.slane %v4883_v5, 5  ;;  %v2670_v57 = vld [vmem:[#allocation8 + $0x5c] sm:$0x1]  ;;  %v2671_v12 = vld [vmem:[#allocation8 + $0x60] sm:$0xf] }
 0x16f   : > { %3138 = vrot.lane.b32.xlu0 %v7855_v58, %s8656_s6  ;;  %v7904_v27 = vcombine.low %v3873_v8, %v3876_v32  ;;  %v4891_v48 = vrot.slane %v4889_v21, 5  ;;  %v4904_v16 = vshrl.u32 %v4750_v1, 16  ;;  %v4907_v0 = vshll.u32 %v4750_v1, 16 }
 0x170   : > { %v4901_v35 = vrot.slane %v4899_v49, 5  ;;  %v4913_v2 = vshll.u32 %v4751_v11, 16  ;;  %v4886_v33 = vor.u32 %v4885_v7, %v4882_v10  ;;  %v4917_v22 = vshrl.u32 %v4751_v11, 16  ;;  %v2672_v10 = vld [vmem:[#allocation8 + $0x64] sm:$0xf] }
 0x171   : > { %6086 = vrot.lane.b32.xlu1 %v8030_v23, %s8660_s26  ;;  %v4893_v23 = vshrl.u32 %v4748_v44, 16  ;;  %v4906_v55 = vrot.slane %v4904_v16, 4  ;;  %v4923_v26 = vshll.u32 %v4752_v13, 16  ;;  %v4909_v28 = vrot.slane %v4907_v0, 5  ;;  %v3757_v7 = vld [vmem:[#allocation8 + $0x54] sm:$0xe] }
 0x172   : > { %v4915_v34 = vrot.slane %v4913_v2, 5  ;;  %v8015_v36 = vrot.slane %v5836_v6, 9  ;;  %v4887_v38 = vrot.slane %v4886_v33, 4  ;;  %v4919_v40 = vrot.slane %v4917_v22, 4  ;;  %v3760_v0 = vld [vmem:[#allocation8 + $0x60] sm:$0xe] }
 0x173   : > { %v4895_v19 = vrot.slane %v4893_v23, 4  ;;  %4003 = vrot.lane.b32.xlu0 %v7903_v4, %s8657_s10  ;;  %v4925_v41 = vrot.slane %v4923_v26, 5  ;;  %v5950_v15 = vrot.slane %v5837_v20, 5  ;;  %v4910_v44 = vor.u32 %v4909_v28, %v4906_v55  ;;  %v3762_v28 = vld [vmem:[#allocation8 + $0x68] sm:$0x1] }
 0x174   : > { %v5953_v45 = vrot.slane %v5838_v24, 5  ;;  %v4892_v51 = vsel %vm8833_vm2, %v4887_v38, %v4891_v48  ;;  %v4920_v52 = vor.u32 %v4919_v40, %v4915_v34  ;;  %v5957_v60 = vrot.slane %v5840_v18, 5 }
 0x175   : > { %2418 = vrot.lane.b32.xlu1 %v8384_v46, %s8655_s24  ;;  %v4896_v62 = vor.u32 %v4895_v19, %v4891_v48  ;;  %v8016_v46 = vrot.slane %v5839_v25, 9  ;;  %v5951_v53 = vsel %vm8991_vm5, %v8015_v36, %v5950_v15  ;;  %v5952_v56 = vrot.slane %v5950_v15, 4  ;;  %v3758_v48 = vld [vmem:[#allocation8 + $0x58] sm:$0xf] }
 0x176   : > { %v4911_v59 = vrot.slane %v4910_v44, 4  ;;  %v5960_v61 = vrot.slane %v5841_v29, 5  ;;  %v4921_v1 = vrot.slane %v4920_v52, 4  ;;  %v2843_v4 = vshrl.u32 %v2668_v37, 16  ;;  %v8400_v52 = vld [vmem:[#allocation8 + $0x60] sm:$0xff]  }
 0x177   : > { %v4897_v43 = vrot.slane %v4896_v62, 4  ;;  %4501 = vrot.lane.b32.xlu0 %v8391_v54, %s8658_s11  ;;  %v5954_v3 = vsel %vm8991_vm5, %v5952_v56, %v5953_v45  ;;  %v5958_v11 = vsel %vm8991_vm5, %v8016_v46, %v5957_v60  ;;  %v5959_v13 = vrot.slane %v5957_v60, 4  ;;  %v1606_v54 = vpop.permute.xlu1 %1605  ;;  %v3761_v62 = vld [vmem:[#allocation8 + $0x64] sm:$0xf] }
 0x178   : > { %v4916_v8 = vsel %vm8833_vm2, %v4911_v59, %v4915_v34  ;;  %v8031_v9 = vcombine.low %v5951_v53, %v5954_v3  ;;  %v4926_v5 = vsel %vm8833_vm2, %v4921_v1, %v4925_v41  ;;  %v2845_v21 = vrot.slane %v2843_v4, 4  ;;  %v8399_v34 = vld [vmem:[#allocation8 + $0x54] sm:$0xff]   ;;  %1644 = vst.msk [vmem:[#allocation2 + $0xc8] sm:$0xff] %vm1090_vm6, %v1606_v54  ;;  %v4755_v3 = vld [vmem:[#allocation8 + $0x68] sm:$0x1] }
 0x179   : > { %3140 = vrot.lane.b32.xlu1 %v7856_v31, %s8656_s6  ;;  %v4902_v58 = vsel %vm8833_vm2, %v4897_v43, %v4901_v35  ;;  %v2846_v6 = vshll.u32 %v2668_v37, 16  ;;  %v2852_v30 = vshll.u32 %v2669_v47, 16  ;;  %v2673_v31 = vld [vmem:[#allocation8 + $0x68] sm:$0x1]  ;;  %v7984_v32 = vcombine.low %v4916_v8, %v4926_v5  ;;  %v3759_v35 = vld [vmem:[#allocation8 + $0x5c] sm:$0x1] }
 0x17a   : > { %v7983_v63 = vcombine.low %v4892_v51, %v4902_v58  ;;  %v5961_v23 = vsel %vm8991_vm5, %v5959_v13, %v5960_v61  ;;  %v2856_v49 = vshrl.u32 %v2669_v47, 16  ;;  %v2862_v20 = vshll.u32 %v2670_v57, 16  ;;  %v4753_v51 = vld [vmem:[#allocation8 + $0x60] sm:$0xf]  ;;  %v4754_v58 = vld [vmem:[#allocation8 + $0x64] sm:$0xf] }
 0x17b   : > { %v8032_v16 = vcombine.low %v5958_v11, %v5961_v23  ;;  %v2848_v24 = vrot.slane %v2846_v6, 5  ;;  %v2854_v25 = vrot.slane %v2852_v30, 5  ;;  %v2867_v19 = vshrl.u32 %v2671_v12, 16  ;;  %v4756_v13 = vld [vmem:[#allocation8 + $0x6c] sm:$0xf] }
 0x17c   : > { %5223 = vrot.lane.b32.xlu0 %v7983_v63, %s8659_s22  ;;  %v2858_v2 = vrot.slane %v2856_v49, 4  ;;  %v2864_v14 = vrot.slane %v2862_v20, 5  ;;  %v2870_v33 = vshll.u32 %v2671_v12, 16  ;;  %v2876_v55 = vshll.u32 %v2672_v10, 16  ;;  %v4757_v12 = vld [vmem:[#allocation8 + $0x70] sm:$0xf] }
 0x17d   : > { %4005 = vrot.lane.b32.xlu1 %v7904_v27, %s8657_s10  ;;  %v1604_v27 = vpop.permute.xlu0 %1603  ;;  %v2849_v22 = vor.u32 %v2848_v24, %v2845_v21  ;;  %v2869_v26 = vrot.slane %v2867_v19, 4  ;;  %v2880_v18 = vshrl.u32 %v2672_v10, 16  ;;  %v2886_v29 = vshll.u32 %v2673_v31, 16  ;;  %v4758_v30 = vld [vmem:[#allocation8 + $0x74] sm:$0x1] }
 0x17e   : > { %1643 = vst.msk [vmem:[#allocation2 + $0xc0] sm:$0xff] %vm1090_vm6, %v1604_v27  ;;  %v2859_v36 = vor.u32 %v2858_v2, %v2854_v25  ;;  %v2872_v37 = vrot.slane %v2870_v33, 5  ;;  %v2878_v38 = vrot.slane %v2876_v55, 5  ;;  %v7889_v40 = vrot.slane %v3757_v7, 9  ;;  %v5843_v2 = vld [vmem:[#allocation8 + $0x64] sm:$0xf] }
 0x17f   : > { %v2850_v41 = vrot.slane %v2849_v22, 4  ;;  %v2882_v15 = vrot.slane %v2880_v18, 4  ;;  %v2888_v43 = vrot.slane %v2886_v29, 5  ;;  %v3879_v44 = vrot.slane %v3758_v48, 5 }
 0x180   : > { %6088 = vrot.lane.b32.xlu0 %v8031_v9, %s8660_s26  ;;  %v2860_v45 = vrot.slane %v2859_v36, 4  ;;  %v2873_v46 = vor.u32 %v2872_v37, %v2869_v26  ;;  %v3882_v47 = vrot.slane %v3759_v35, 5  ;;  %v3886_v61 = vrot.slane %v3761_v62, 5  ;;  %v5844_v26 = vld [vmem:[#allocation8 + $0x68] sm:$0x1] }
 0x181   : > { %4503 = vrot.lane.b32.xlu1 %v8392_v50, %s8658_s11  ;;  %v7890_v50 = vrot.slane %v3760_v0, 9  ;;  %v2855_v53 = vsel %vm8833_vm2, %v2850_v41, %v2854_v25  ;;  %v2883_v56 = vor.u32 %v2882_v15, %v2878_v38  ;;  %v3880_v17 = vsel %vm8991_vm5, %v7889_v40, %v3879_v44  ;;  %v1608_v1 = vpop.permute.xlu0 %1607  ;;  %v1610_v25 = vpop.permute.xlu1 %1609  ;;  %v5846_v15 = vld [vmem:[#allocation8 + $0x70] sm:$0xf] }
 0x182   : > { %v3881_v57 = vrot.slane %v3879_v44, 4  ;;  %v2865_v59 = vsel %vm8833_vm2, %v2860_v45, %v2864_v14  ;;  %v2874_v60 = vrot.slane %v2873_v46, 4  ;;  %v3889_v63 = vrot.slane %v3762_v28, 5  ;;  %1645 = vst.msk [vmem:[#allocation2 + $0xd0] sm:$0xff] %vm1090_vm6, %v1608_v1  ;;  %1646 = vst.msk [vmem:[#allocation2 + $0xd8] sm:$0xff] %vm1090_vm6, %v1610_v25 }
 0x183   : > { %v7857_v4 = vcombine.low %v2855_v53, %v2865_v59  ;;  %v2884_v8 = vrot.slane %v2883_v56, 4  ;;  %v4928_v11 = vshrl.u32 %v4753_v51, 16  ;;  %v3887_v21 = vsel %vm8991_vm5, %v7890_v50, %v3886_v61  ;;  %v5845_v28 = vld [vmem:[#allocation8 + $0x6c] sm:$0xe] }
 0x184   : > { %2420 = vrot.lane.b32.xlu0 %v8399_v34, %s8655_s24  ;;  %v3883_v9 = vsel %vm8991_vm5, %v3881_v57, %v3882_v47  ;;  %v2879_v10 = vsel %vm8833_vm2, %v2874_v60, %v2878_v38  ;;  %v3888_v6 = vrot.slane %v3886_v61, 4  ;;  %v4931_v23 = vshll.u32 %v4753_v51, 16  ;;  %v8407_v34 = vld [vmem:[#allocation8 + $0x60] sm:$0xff]   ;;  %v5847_v47 = vld [vmem:[#allocation8 + $0x74] sm:$0x1]  ;;  %v8408_v56 = vld [vmem:[#allocation8 + $0x6c] sm:$0xff]  }
 0x185   : > { %5225 = vrot.lane.b32.xlu1 %v7984_v32, %s8659_s22  ;;  %v7905_v5 = vcombine.low %v3880_v17, %v3883_v9  ;;  %v2889_v31 = vsel %vm8833_vm2, %v2884_v8, %v2888_v43  ;;  %v4930_v32 = vrot.slane %v4928_v11, 4  ;;  %v4937_v49 = vshll.u32 %v4754_v58, 16  ;;  %v1612_v36 = vpop.permute.xlu0 %1611  ;;  %v2674_v60 = vld [vmem:[#allocation8 + $0x6c] sm:$0xf]  ;;  %v1614_v8 = vpop.permute.xlu1 %1613 }
 0x186   : > { %v7858_v20 = vcombine.low %v2879_v10, %v2889_v31  ;;  %v3890_v27 = vsel %vm8991_vm5, %v3888_v6, %v3889_v63  ;;  %v4941_v7 = vshrl.u32 %v4754_v58, 16  ;;  %v4947_v48 = vshll.u32 %v4755_v3, 16  ;;  %1647 = vst.msk [vmem:[#allocation2 + $0xe0] sm:$0xff] %vm1090_vm6, %v1612_v36  ;;  %v2677_v10 = vld [vmem:[#allocation8 + $0x78] sm:$0xf]  ;;  %1648 = vst.msk [vmem:[#allocation2 + $0xe8] sm:$0xff] %vm1090_vm6, %v1614_v8 }
 0x187   : > { %v7906_v24 = vcombine.low %v3887_v21, %v3890_v27  ;;  %v4933_v19 = vrot.slane %v4931_v23, 5  ;;  %v4939_v35 = vrot.slane %v4937_v49, 5  ;;  %v4952_v0 = vshrl.u32 %v4756_v13, 16  ;;  %v2678_v31 = vld [vmem:[#allocation8 + $0x7c] sm:$0xf] }
 0x188   : > { %3142 = vrot.lane.b32.xlu0 %v7857_v4, %s8656_s6  ;;  %v4943_v14 = vrot.slane %v4941_v7, 4  ;;  %v4949_v33 = vrot.slane %v4947_v48, 5  ;;  %v4955_v55 = vshll.u32 %v4756_v13, 16  ;;  %v4961_v22 = vshll.u32 %v4757_v12, 16  ;;  %v2675_v4 = vld [vmem:[#allocation8 + $0x70] sm:$0xf] }
 0x189   : > { %6090 = vrot.lane.b32.xlu1 %v8032_v16, %s8660_s26  ;;  %v5842_v16 = vld [vmem:[#allocation8 + $0x60] sm:$0xe]  ;;  %v4934_v18 = vor.u32 %v4933_v19, %v4930_v32  ;;  %v4954_v29 = vrot.slane %v4952_v0, 4  ;;  %v4965_v54 = vshrl.u32 %v4757_v12, 16  ;;  %v4971_v62 = vshll.u32 %v4758_v30, 16  ;;  %v1616_v48 = vpop.permute.xlu0 %1615 }
 0x18a   : > { %v4944_v37 = vor.u32 %v4943_v14, %v4939_v35  ;;  %v4957_v38 = vrot.slane %v4955_v55, 5  ;;  %v4963_v40 = vrot.slane %v4961_v22, 5  ;;  %v8017_v41 = vrot.slane %v5842_v16, 9  ;;  %v2676_v12 = vld [vmem:[#allocation8 + $0x74] sm:$0x1]  ;;  %1649 = vst.msk [vmem:[#allocation2 + $0xf0] sm:$0xff] %vm1090_vm6, %v1616_v48 }
 0x18b   : > { %v4935_v43 = vrot.slane %v4934_v18, 4  ;;  %v4967_v44 = vrot.slane %v4965_v54, 4  ;;  %v4973_v45 = vrot.slane %v4971_v62, 5  ;;  %v5964_v46 = vrot.slane %v5843_v2, 5  ;;  %v2679_v32 = vld [vmem:[#allocation8 + $0x80] sm:$0x1] }
 0x18c   : > { %4007 = vrot.lane.b32.xlu0 %v7905_v5, %s8657_s10  ;;  %v4945_v50 = vrot.slane %v4944_v37, 4  ;;  %v4958_v51 = vor.u32 %v4957_v38, %v4954_v29  ;;  %v8018_v53 = vrot.slane %v5845_v28, 9  ;;  %v5971_v1 = vrot.slane %v5846_v15, 5  ;;  %v3763_v19 = vld [vmem:[#allocation8 + $0x6c] sm:$0xe] }
 0x18d   : > { %2422 = vrot.lane.b32.xlu1 %v8400_v52, %s8655_s24  ;;  %v5967_v52 = vrot.slane %v5844_v26, 5  ;;  %v4940_v17 = vsel %vm8833_vm2, %v4935_v43, %v4939_v35  ;;  %v4968_v57 = vor.u32 %v4967_v44, %v4963_v40  ;;  %v5965_v58 = vsel %vm8991_vm5, %v8017_v41, %v5964_v46  ;;  %v3765_v29 = vld [vmem:[#allocation8 + $0x74] sm:$0x1]  ;;  %v3766_v36 = vld [vmem:[#allocation8 + $0x78] sm:$0xe]  ;;  %v8413_v37 = vld [vmem:[#allocation8 + $0x6c] sm:$0xff]   ;;  %v1618_v44 = vpop.permute.xlu1 %1617 }
 0x18e   : > { %v5966_v59 = vrot.slane %v5964_v46, 4  ;;  %v4950_v61 = vsel %vm8833_vm2, %v4945_v50, %v4949_v33  ;;  %v4959_v63 = vrot.slane %v4958_v51, 4  ;;  %v5974_v3 = vrot.slane %v5847_v47, 5  ;;  %v3764_v33 = vld [vmem:[#allocation8 + $0x70] sm:$0xf]  ;;  %1650 = vst.msk [vmem:[#allocation2 + $0xf8] sm:$0xff] %vm1090_vm6, %v1618_v44  ;;  %v1911_v51 = vpop.permute.xlu0 %1910 }
 0x18f   : > { %v7985_v9 = vcombine.low %v4940_v17, %v4950_v61  ;;  %v4969_v11 = vrot.slane %v4968_v57, 4  ;;  %v5972_v6 = vsel %vm8991_vm5, %v8018_v53, %v5971_v1  ;;  %v5973_v30 = vrot.slane %v5971_v1, 4  ;;  %v3767_v43 = vld [vmem:[#allocation8 + $0x7c] sm:$0xf]  ;;  %1959 = vst.msk [vmem:[#allocation2] sm:$0xff] %vm1958_vm8, %v1911_v51 }
 0x190   : > { %4505 = vrot.lane.b32.xlu0 %v8407_v34, %s8658_s11  ;;  %v5968_v13 = vsel %vm8991_vm5, %v5966_v59, %v5967_v52  ;;  %v4964_v5 = vsel %vm8833_vm2, %v4959_v63, %v4963_v40  ;;  %v2891_v49 = vshrl.u32 %v2674_v60, 16  ;;  %v2900_v27 = vshll.u32 %v2675_v4, 16  ;;  %v8414_v52 = vld [vmem:[#allocation8 + $0x78] sm:$0xff]   ;;  %v5852_v51 = vld [vmem:[#allocation8 + $0x88] sm:$0xf] }
 0x191   : > { %3144 = vrot.lane.b32.xlu1 %v7858_v20, %s8656_s6  ;;  %v8033_v21 = vcombine.low %v5965_v58, %v5968_v13  ;;  %v4974_v23 = vsel %vm8833_vm2, %v4969_v11, %v4973_v45  ;;  %v2894_v20 = vshll.u32 %v2674_v60, 16  ;;  %v5975_v16 = vsel %vm8991_vm5, %v5973_v30, %v5974_v3  ;;  %v3768_v60 = vld [vmem:[#allocation8 + $0x80] sm:$0x1]  ;;  %v4759_v1 = vld [vmem:[#allocation8 + $0x78] sm:$0xf]  ;;  %v1913_v13 = vpop.permute.xlu1 %1912 }
 0x192   : > { %v7986_v7 = vcombine.low %v4964_v5, %v4974_v23  ;;  %v2910_v25 = vshll.u32 %v2676_v12, 16  ;;  %v8034_v35 = vcombine.low %v5972_v6, %v5975_v16  ;;  %v2893_v0 = vrot.slane %v2891_v49, 4  ;;  %v4760_v11 = vld [vmem:[#allocation8 + $0x7c] sm:$0xf]  ;;  %1960 = vst.msk [vmem:[#allocation2 + $0x8] sm:$0xff] %vm1958_vm8, %v1913_v13  ;;  %v1915_v6 = vpop.permute.xlu0 %1914 }
 0x193   : > { %v2896_v2 = vrot.slane %v2894_v20, 5  ;;  %v2902_v14 = vrot.slane %v2900_v27, 5  ;;  %v2915_v26 = vshrl.u32 %v2677_v10, 16  ;;  %v2918_v18 = vshll.u32 %v2677_v10, 16  ;;  %v4761_v23 = vld [vmem:[#allocation8 + $0x80] sm:$0x1] }
 0x194   : > { %5227 = vrot.lane.b32.xlu0 %v7985_v9, %s8659_s22  ;;  %v2912_v22 = vrot.slane %v2910_v25, 5  ;;  %v2924_v62 = vshll.u32 %v2678_v31, 16  ;;  %v2928_v28 = vshrl.u32 %v2678_v31, 16  ;;  %v2934_v34 = vshll.u32 %v2679_v32, 16  ;;  %1961 = vst.msk [vmem:[#allocation2 + $0x10] sm:$0xff] %vm1958_vm8, %v1915_v6  ;;  %v8415_v44 = vld [vmem:[#allocation8 + $0x78] sm:$0xff]  }
 0x195   : > { %4009 = vrot.lane.b32.xlu1 %v7906_v24, %s8657_s10  ;;  %v2904_v24 = vshrl.u32 %v2675_v4, 16  ;;  %v2897_v54 = vor.u32 %v2896_v2, %v2893_v0  ;;  %v2917_v40 = vrot.slane %v2915_v26, 4  ;;  %v2920_v41 = vrot.slane %v2918_v18, 5  ;;  %v4762_v16 = vld [vmem:[#allocation8 + $0x84] sm:$0xf] }
 0x196   : > { %v7891_v15 = vrot.slane %v3763_v19, 9  ;;  %v2926_v46 = vrot.slane %v2924_v62, 5  ;;  %v2930_v47 = vrot.slane %v2928_v28, 4  ;;  %v2936_v50 = vrot.slane %v2934_v34, 5  ;;  %v4764_v2 = vld [vmem:[#allocation8 + $0x8c] sm:$0x1] }
 0x197   : > { %v2906_v55 = vrot.slane %v2904_v24, 4  ;;  %v2898_v45 = vrot.slane %v2897_v54, 4  ;;  %v3893_v17 = vrot.slane %v3764_v33, 5  ;;  %v3896_v57 = vrot.slane %v3765_v29, 5  ;;  %v4763_v24 = vld [vmem:[#allocation8 + $0x88] sm:$0xf]  ;;  %v1919_v54 = vpop.permute.xlu0 %1918 }
 0x198   : > { %6092 = vrot.lane.b32.xlu0 %v8033_v21, %s8660_s26  ;;  %v2931_v59 = vor.u32 %v2930_v47, %v2926_v46  ;;  %v7892_v61 = vrot.slane %v3766_v36, 9  ;;  %v3900_v63 = vrot.slane %v3767_v43, 5  ;;  %v3903_v32 = vrot.slane %v3768_v60, 5  ;;  %v5848_v18 = vld [vmem:[#allocation8 + $0x78] sm:$0xe]  ;;  %1963 = vst.msk [vmem:[#allocation2 + $0x20] sm:$0xff] %vm1958_vm8, %v1919_v54 }
 0x199   : > { %4507 = vrot.lane.b32.xlu1 %v8408_v56, %s8658_s11  ;;  %v2907_v38 = vor.u32 %v2906_v55, %v2902_v14  ;;  %v2921_v56 = vor.u32 %v2920_v41, %v2917_v40  ;;  %v2903_v58 = vsel %vm8833_vm2, %v2898_v45, %v2902_v14  ;;  %v3894_v8 = vsel %vm8991_vm5, %v7891_v15, %v3893_v17  ;;  %v1917_v14 = vpop.permute.xlu1 %1916  ;;  %v5849_v29 = vld [vmem:[#allocation8 + $0x7c] sm:$0xf]  ;;  %v8416_v60 = vld [vmem:[#allocation8 + $0x84] sm:$0xff]   ;;  %v1683_v6 = vld [vmem:[#allocation8 + $0x80] sm:$0x1] }
 0x19a   : > { %v3895_v9 = vrot.slane %v3893_v17, 4  ;;  %v2932_v10 = vrot.slane %v2931_v59, 4  ;;  %v9541_v5 = vsel %vm8991_vm5, %v7892_v61, %v3900_v63  ;;  %v3902_v21 = vrot.slane %v3900_v63, 4  ;;  %1962 = vst.msk [vmem:[#allocation2 + $0x18] sm:$0xff] %vm1958_vm8, %v1917_v14  ;;  %v1682_v13 = vld [vmem:[#allocation8 + $0x7c] sm:$0xf] }
 0x19b   : > { %v2908_v53 = vrot.slane %v2907_v38, 4  ;;  %v2922_v4 = vrot.slane %v2921_v56, 4  ;;  %v4976_v49 = vshrl.u32 %v4759_v1, 16  ;;  %v4985_v48 = vshll.u32 %v4760_v11, 16  ;;  %v5851_v38 = vld [vmem:[#allocation8 + $0x84] sm:$0xe]  ;;  %v1923_v59 = vpop.permute.xlu0 %1922 }
 0x19c   : > { %2424 = vrot.lane.b32.xlu0 %v8413_v37, %s8655_s24  ;;  %v3897_v31 = vsel %vm8991_vm5, %v3895_v9, %v3896_v57  ;;  %v2937_v20 = vsel %vm8833_vm2, %v2932_v10, %v2936_v50  ;;  %v3904_v19 = vsel %vm8991_vm5, %v3902_v21, %v3903_v32  ;;  %v4989_v0 = vshrl.u32 %v4760_v11, 16  ;;  %v5850_v37 = vld [vmem:[#allocation8 + $0x80] sm:$0x1]  ;;  %1965 = vst.msk [vmem:[#allocation2 + $0x30] sm:$0xff] %vm1958_vm8, %v1923_v59 }
 0x19d   : > { %5229 = vrot.lane.b32.xlu1 %v7986_v7, %s8659_s22  ;;  %v2913_v3 = vsel %vm8833_vm2, %v2908_v53, %v2912_v22  ;;  %v2927_v30 = vsel %vm8833_vm2, %v2922_v4, %v2926_v46  ;;  %v7907_v27 = vcombine.low %v3894_v8, %v3897_v31  ;;  %v4979_v7 = vshll.u32 %v4759_v1, 16  ;;  %v1921_v53 = vpop.permute.xlu1 %1920 }
 0x19e   : > { %v7859_v12 = vcombine.low %v2903_v58, %v2913_v3  ;;  %v7860_v25 = vcombine.low %v2927_v30, %v2937_v20  ;;  %v7908_v33 = vcombine.low %v9541_v5, %v3904_v19  ;;  %v4987_v22 = vrot.slane %v4985_v48, 5  ;;  %v1681_v58 = vld [vmem:[#allocation8 + $0x78] sm:$0xe]  ;;  %1964 = vst.msk [vmem:[#allocation2 + $0x28] sm:$0xff] %vm1958_vm8, %v1921_v53  ;;  %v1684_v30 = vld [vmem:[#allocation8 + $0x84] sm:$0xe] }
 0x19f   : > { %v4981_v55 = vrot.slane %v4979_v7, 5  ;;  %v4995_v26 = vshll.u32 %v4761_v23, 16  ;;  %v4991_v62 = vrot.slane %v4989_v0, 4  ;;  %v5000_v28 = vshrl.u32 %v4762_v16, 16  ;;  %v1927_v7 = vpop.permute.xlu0 %1926  ;;  %v2680_v19 = vld [vmem:[#allocation8 + $0x84] sm:$0xf] }
 0x1a0   : > { %3146 = vrot.lane.b32.xlu0 %v7859_v12, %s8656_s6  ;;  %v5003_v34 = vshll.u32 %v4762_v16, 16  ;;  %v5009_v36 = vshll.u32 %v4763_v24, 16  ;;  %v5013_v15 = vshrl.u32 %v4763_v24, 16  ;;  %v5019_v43 = vshll.u32 %v4764_v2, 16  ;;  %1967 = vst.msk [vmem:[#allocation2 + $0x40] sm:$0xff] %vm1958_vm8, %v1927_v7 }
 0x1a1   : > { %6094 = vrot.lane.b32.xlu1 %v8034_v35, %s8660_s26  ;;  %v4978_v35 = vrot.slane %v4976_v49, 4  ;;  %v4997_v41 = vrot.slane %v4995_v26, 5  ;;  %v4992_v45 = vor.u32 %v4991_v62, %v4987_v22  ;;  %v5002_v46 = vrot.slane %v5000_v28, 4  ;;  %v1925_v31 = vpop.permute.xlu1 %1924  ;;  %v2685_v53 = vld [vmem:[#allocation8 + $0x98] sm:$0x1] }
 0x1a2   : > { %v5005_v47 = vrot.slane %v5003_v34, 5  ;;  %v5011_v50 = vrot.slane %v5009_v36, 5  ;;  %v5015_v17 = vrot.slane %v5013_v15, 4  ;;  %v5021_v57 = vrot.slane %v5019_v43, 5  ;;  %1966 = vst.msk [vmem:[#allocation2 + $0x38] sm:$0xff] %vm1958_vm8, %v1925_v31 }
 0x1a3   : > { %v4982_v40 = vor.u32 %v4981_v55, %v4978_v35  ;;  %v4993_v61 = vrot.slane %v4992_v45, 4  ;;  %v8019_v1 = vrot.slane %v5848_v18, 9  ;;  %v5978_v3 = vrot.slane %v5849_v29, 5  ;;  %v2681_v18 = vld [vmem:[#allocation8 + $0x88] sm:$0xf]  ;;  %v2409_v36 = vpop.permute.xlu0 %2408 }
 0x1a4   : > { %4011 = vrot.lane.b32.xlu0 %v7907_v27, %s8657_s10  ;;  %v5006_v63 = vor.u32 %v5005_v47, %v5002_v46  ;;  %v5016_v8 = vor.u32 %v5015_v17, %v5011_v50  ;;  %v5981_v9 = vrot.slane %v5850_v37, 5  ;;  %v8020_v11 = vrot.slane %v5851_v38, 9  ;;  %v1685_v27 = vld [vmem:[#allocation8 + $0x88] sm:$0xf]  ;;  %v2682_v34 = vld [vmem:[#allocation8 + $0x8c] sm:$0x1] }
 0x1a5   : > { %2426 = vrot.lane.b32.xlu1 %v8414_v52, %s8655_s24  ;;  %v5853_v52 = vld [vmem:[#allocation8 + $0x8c] sm:$0x1]  ;;  %v4983_v56 = vrot.slane %v4982_v40, 4  ;;  %v4998_v12 = vsel %vm8833_vm2, %v4993_v61, %v4997_v41  ;;  %v5979_v5 = vsel %vm8991_vm5, %v8019_v1, %v5978_v3  ;;  %v5980_v21 = vrot.slane %v5978_v3, 4  ;;  %v1929_v29 = vpop.permute.xlu1 %1928  ;;  %v2683_v41 = vld [vmem:[#allocation8 + $0x90] sm:$0xf] }
 0x1a6   : > { %v5007_v10 = vrot.slane %v5006_v63, 4  ;;  %v5017_v23 = vrot.slane %v5016_v8, 4  ;;  %v5985_v49 = vrot.slane %v5852_v51, 5  ;;  %v5988_v20 = vrot.slane %v5853_v52, 5  ;;  %1968 = vst.msk [vmem:[#allocation2 + $0x48] sm:$0xff] %vm1958_vm8, %v1929_v29 }
 0x1a7   : > { %v4988_v4 = vsel %vm8833_vm2, %v4983_v56, %v4987_v22  ;;  %v5982_v16 = vsel %vm8991_vm5, %v5980_v21, %v5981_v9  ;;  %v7765_v24 = vrot.slane %v1681_v58, 9  ;;  %v1822_v55 = vrot.slane %v1682_v13, 5  ;;  %2457 = vst.msk [vmem:[#allocation2] sm:$0xff] %vm2456_vm9, %v2409_v36  ;;  %v2684_v46 = vld [vmem:[#allocation8 + $0x94] sm:$0xf]  ;;  %v3131_v61 = vpop.permute.xlu0 %3130 }
 0x1a8   : > { %4509 = vrot.lane.b32.xlu0 %v8415_v44, %s8658_s11  ;;  %v7987_v32 = vcombine.low %v4988_v4, %v4998_v12  ;;  %v5012_v48 = vsel %vm8833_vm2, %v5007_v10, %v5011_v50  ;;  %v5022_v35 = vsel %vm8833_vm2, %v5017_v23, %v5021_v57  ;;  %v8035_v0 = vcombine.low %v5979_v5, %v5982_v16  ;;  %v3770_v8 = vld [vmem:[#allocation8 + $0x88] sm:$0xf]  ;;  %v3771_v9 = vld [vmem:[#allocation8 + $0x8c] sm:$0x1]  ;;  %v3772_v5 = vld [vmem:[#allocation8 + $0x90] sm:$0xe] }
 0x1a9   : > { %3148 = vrot.lane.b32.xlu1 %v7860_v25, %s8656_s6  ;;  %v1686_v25 = vld [vmem:[#allocation8 + $0x8c] sm:$0x1]  ;;  %v5986_v2 = vsel %vm8991_vm5, %v8020_v11, %v5985_v49  ;;  %v5987_v14 = vrot.slane %v5985_v49, 4  ;;  %v1825_v22 = vrot.slane %v1683_v6, 5  ;;  %v7766_v26 = vrot.slane %v1684_v30, 9  ;;  %v2411_v56 = vpop.permute.xlu1 %2410  ;;  %3179 = vst.msk [vmem:[#allocation2] sm:$0xff] %vm3178_vm10, %v3131_v61 }
 0x1aa   : > { %v1829_v62 = vrot.slane %v1685_v27, 5  ;;  %v1832_v28 = vrot.slane %v1686_v25, 5  ;;  %v1823_v38 = vsel %vm8991_vm5, %v7765_v24, %v1822_v55  ;;  %v1824_v40 = vrot.slane %v1822_v55, 4  ;;  %2458 = vst.msk [vmem:[#allocation2 + $0x8] sm:$0xff] %vm2456_vm9, %v2411_v56  ;;  %v3773_v21 = vld [vmem:[#allocation8 + $0x94] sm:$0xf] }
 0x1ab   : > { %v5989_v54 = vsel %vm8991_vm5, %v5987_v14, %v5988_v20  ;;  %v2939_v44 = vshrl.u32 %v2680_v19, 16  ;;  %v2942_v45 = vshll.u32 %v2680_v19, 16  ;;  %v2948_v50 = vshll.u32 %v2681_v18, 16  ;;  %v8418_v6 = vld [vmem:[#allocation8 + $0x84] sm:$0xff]   ;;  %v3774_v55 = vld [vmem:[#allocation8 + $0x98] sm:$0x1] }
 0x1ac   : > { %5231 = vrot.lane.b32.xlu0 %v7987_v32, %s8659_s22  ;;  %v8036_v37 = vcombine.low %v5986_v2, %v5989_v54  ;;  %v1830_v15 = vsel %vm8991_vm5, %v7766_v26, %v1829_v62  ;;  %v1831_v43 = vrot.slane %v1829_v62, 4  ;;  %v1826_v47 = vsel %vm8991_vm5, %v1824_v40, %v1825_v22  ;;  %v8425_v54 = vld [vmem:[#allocation11 + $0x20] ss:$0 sps:$4 sm:$0xff]  }
 0x1ad   : > { %4013 = vrot.lane.b32.xlu1 %v7908_v33, %s8657_s10  ;;  %v7988_v33 = vcombine.low %v5012_v48, %v5022_v35  ;;  %v2952_v51 = vshrl.u32 %v2681_v18, 16  ;;  %v2958_v52 = vshll.u32 %v2682_v34, 16  ;;  %v7781_v17 = vcombine.low %v1823_v38, %v1826_v47  ;;  %v3133_v23 = vpop.permute.xlu1 %3132  ;;  %v3996_v48 = vpop.permute.xlu0 %3995  ;;  %v8419_v35 = vld [vmem:[#allocation8 + $0x90] sm:$0xff]   ;;  %8273 = vmatprep.subr.msk.bf16.mxu0 %vm6630_vm15, %v8425_v54 }
 0x1ae   : > { %v1833_v57 = vsel %vm8991_vm5, %v1831_v43, %v1832_v28  ;;  %v2941_v58 = vrot.slane %v2939_v44, 4  ;;  %v2944_v59 = vrot.slane %v2942_v45, 5  ;;  %v2950_v1 = vrot.slane %v2948_v50, 5  ;;  %3180 = vst.msk [vmem:[#allocation2 + $0x8] sm:$0xff] %vm3178_vm10, %v3133_v23  ;;  %v4765_v38 = vld [vmem:[#allocation8 + $0x90] sm:$0xf]  ;;  %8274 = vmatprep.subr.msk.bf16.mxu1 %vm6630_vm15, %v8425_v54 }
 0x1af   : > { %v7782_v63 = vcombine.low %v1830_v15, %v1833_v57  ;;  %v2954_v3 = vrot.slane %v2952_v51, 4  ;;  %v2960_v4 = vrot.slane %v2958_v52, 5  ;;  %v2963_v13 = vshrl.u32 %v2683_v41, 16  ;;  %4044 = vst.msk [vmem:[#allocation2] sm:$0xff] %vm4043_vm11, %v3996_v48  ;;  %v4766_v45 = vld [vmem:[#allocation8 + $0x94] sm:$0xf] }
 0x1b0   : > { %6096 = vrot.lane.b32.xlu0 %v8035_v0, %s8660_s26  ;;  %v2945_v11 = vor.u32 %v2944_v59, %v2941_v58  ;;  %v2966_v12 = vshll.u32 %v2683_v41, 16  ;;  %v2972_v10 = vshll.u32 %v2684_v46, 16  ;;  %v2976_v31 = vshrl.u32 %v2684_v46, 16  ;;  %v4767_v50 = vld [vmem:[#allocation8 + $0x98] sm:$0x1] }
 0x1b1   : > { %4511 = vrot.lane.b32.xlu1 %v8416_v60, %s8658_s11  ;;  %v3769_v60 = vld [vmem:[#allocation8 + $0x84] sm:$0xe]  ;;  %v2955_v30 = vor.u32 %v2954_v3, %v2950_v1  ;;  %v2982_v32 = vshll.u32 %v2685_v53, 16  ;;  %v2965_v20 = vrot.slane %v2963_v13, 4  ;;  %v3907_v14 = vrot.slane %v3770_v8, 5  ;;  %v3998_v62 = vpop.permute.xlu1 %3997  ;;  %v4494_v40 = vpop.permute.xlu0 %4493 }
 0x1b2   : > { %v2946_v49 = vrot.slane %v2945_v11, 4  ;;  %v2968_v27 = vrot.slane %v2966_v12, 5  ;;  %v2974_v7 = vrot.slane %v2972_v10, 5  ;;  %v2978_v24 = vrot.slane %v2976_v31, 4  ;;  %4045 = vst.msk [vmem:[#allocation2 + $0x8] sm:$0xff] %vm4043_vm11, %v3998_v62 }
 0x1b3   : > { %v2956_v16 = vrot.slane %v2955_v30, 4  ;;  %v2984_v25 = vrot.slane %v2982_v32, 5  ;;  %v7893_v19 = vrot.slane %v3769_v60, 9  ;;  %v7894_v18 = vrot.slane %v3772_v5, 9  ;;  %4542 = vst.msk [vmem:[#allocation2] sm:$0xff] %vm4541_vm12, %v4494_v40 }
 0x1b4   : > { %1930 = vrot.lane.b32.xlu0 %v7781_v17, %s8654_s21  ;;  %v2951_v0 = vsel %vm8833_vm2, %v2946_v49, %v2950_v1  ;;  %v2969_v2 = vor.u32 %v2968_v27, %v2965_v20  ;;  %v2979_v26 = vor.u32 %v2978_v24, %v2974_v7  ;;  %v3914_v29 = vrot.slane %v3773_v21, 5  ;;  %v4768_v17 = vld [vmem:[#allocation8 + $0x9c] sm:$0xf]  ;;  %v4770_v1 = vld [vmem:[#allocation8 + $0xa4] sm:$0x1] }
 0x1b5   : > { %5233 = vrot.lane.b32.xlu1 %v7988_v33, %s8659_s22  ;;  %v3910_v33 = vrot.slane %v3771_v9, 5  ;;  %v2961_v22 = vsel %vm8833_vm2, %v2956_v16, %v2960_v4  ;;  %v3908_v36 = vsel %vm8991_vm5, %v7893_v19, %v3907_v14  ;;  %v3917_v44 = vrot.slane %v3774_v55, 5  ;;  %v4496_v57 = vpop.permute.xlu1 %4495  ;;  %v5216_v3 = vpop.permute.xlu0 %5215  ;;  %v8423_v4 = vld [vmem:[#allocation8 + $0x90] sm:$0xff]   ;;  %v5856_v20 = vld [vmem:[#allocation8 + $0x98] sm:$0x1] }
 0x1b6   : > { %v7861_v28 = vcombine.low %v2951_v0, %v2961_v22  ;;  %v2970_v34 = vrot.slane %v2969_v2, 4  ;;  %v2980_v41 = vrot.slane %v2979_v26, 4  ;;  %v3915_v15 = vsel %vm8991_vm5, %v7894_v18, %v3914_v29  ;;  %4543 = vst.msk [vmem:[#allocation2 + $0x8] sm:$0xff] %vm4541_vm12, %v4496_v57  ;;  %v5854_v12 = vld [vmem:[#allocation8 + $0x90] sm:$0xe] }
 0x1b7   : > { %v3916_v43 = vrot.slane %v3914_v29, 4  ;;  %v5024_v56 = vshrl.u32 %v4765_v38, 16  ;;  %v5027_v60 = vshll.u32 %v4765_v38, 16  ;;  %v5033_v61 = vshll.u32 %v4766_v45, 16  ;;  %5264 = vst.msk [vmem:[#allocation2] sm:$0xff] %vm5263_vm13, %v5216_v3 }
 0x1b8   : > { %2428 = vrot.lane.b32.xlu0 %v8418_v6, %s8655_s24  ;;  %v2975_v46 = vsel %vm8833_vm2, %v2970_v34, %v2974_v7  ;;  %v2985_v51 = vsel %vm8833_vm2, %v2980_v41, %v2984_v25  ;;  %v5037_v9 = vshrl.u32 %v4766_v45, 16  ;;  %v5043_v11 = vshll.u32 %v4767_v50, 16  ;;  %v5855_v30 = vld [vmem:[#allocation8 + $0x94] sm:$0xf]  ;;  %v5857_v25 = vld [vmem:[#allocation8 + $0x9c] sm:$0xe] }
 0x1b9   : > { %6098 = vrot.lane.b32.xlu1 %v8036_v37, %s8660_s26  ;;  %v3909_v37 = vrot.slane %v3907_v14, 4  ;;  %v3918_v53 = vsel %vm8991_vm5, %v3916_v43, %v3917_v44  ;;  %v7862_v58 = vcombine.low %v2975_v46, %v2985_v51  ;;  %v5026_v8 = vrot.slane %v5024_v56, 4  ;;  %v5218_v27 = vpop.permute.xlu1 %5217  ;;  %v6081_v19 = vpop.permute.xlu0 %6080  ;;  %v5858_v14 = vld [vmem:[#allocation8 + $0xa0] sm:$0xf]  ;;  %v5859_v29 = vld [vmem:[#allocation8 + $0xa4] sm:$0x1] }
 0x1ba   : > { %v7910_v59 = vcombine.low %v3915_v15, %v3918_v53  ;;  %v6632_v13 = vsel %vm6630_vm15, %v8425_v54, 0  ;;  %v5029_v10 = vrot.slane %v5027_v60, 5  ;;  %v5035_v5 = vrot.slane %v5033_v61, 5  ;;  %5265 = vst.msk [vmem:[#allocation2 + $0x8] sm:$0xff] %vm5263_vm13, %v5218_v27  ;;  %v1687_v54 = vld [vmem:[#allocation8 + $0x90] sm:$0xe] }
 0x1bb   : > { %v3911_v47 = vsel %vm8991_vm5, %v3909_v37, %v3910_v33  ;;  %8198 = vmatpush3.bf16.msra.mxu0 %v6632_v13  ;;  %v5048_v21 = vshrl.u32 %v4768_v17, 16  ;;  %v5051_v6 = vshll.u32 %v4768_v17, 16  ;;  %v5039_v31 = vrot.slane %v5037_v9, 4  ;;  %8272 = vmatpush3.bf16.msra.mxu1 %v6632_v13  ;;  %6129 = vst.msk [vmem:[#allocation2] sm:$0xff] %vm6128_vm14, %v6081_v19  ;;  %v8424_v33 = vld [vmem:[#allocation8 + $0x9c] sm:$0xff]  }
 0x1bc   : > { %3150 = vrot.lane.b32.xlu0 %v7861_v28, %s8656_s6  ;;  %v7909_v52 = vcombine.low %v3908_v36, %v3911_v47  ;;  %v5045_v32 = vrot.slane %v5043_v11, 5  ;;  %v5030_v7 = vor.u32 %v5029_v10, %v5026_v8  ;;  %v5067_v24 = vshll.u32 %v4770_v1, 16  ;;  %v1688_v37 = vld [vmem:[#allocation8 + $0x94] sm:$0xf]  ;;  %v1689_v38 = vld [vmem:[#allocation8 + $0x98] sm:$0x1] }
 0x1bd   : > { %1932 = vrot.lane.b32.xlu1 %v7782_v63, %s8654_s21  ;;  %v4769_v63 = vld [vmem:[#allocation8 + $0xa0] sm:$0xf]  ;;  %v5050_v48 = vrot.slane %v5048_v21, 4  ;;  %v5053_v16 = vrot.slane %v5051_v6, 5  ;;  %v8021_v18 = vrot.slane %v5854_v12, 9  ;;  %v5992_v34 = vrot.slane %v5855_v30, 5  ;;  %v6083_v40 = vpop.permute.xlu1 %6082  ;;  %v2413_v46 = vpop.permute.xlu0 %2412 }
 0x1be   : > { %v5057_v23 = vshll.u32 %v4769_v63, 16  ;;  %v5061_v49 = vshrl.u32 %v4769_v63, 16  ;;  %v5031_v55 = vrot.slane %v5030_v7, 4  ;;  %v5069_v26 = vrot.slane %v5067_v24, 5  ;;  %v1690_v45 = vld [vmem:[#allocation8 + $0x9c] sm:$0xe] }
 0x1bf   : > { %v5054_v22 = vor.u32 %v5053_v16, %v5050_v48  ;;  %v5995_v36 = vrot.slane %v5856_v20, 5  ;;  %v8022_v43 = vrot.slane %v5857_v25, 9  ;;  %v5999_v44 = vrot.slane %v5858_v14, 5  ;;  %6130 = vst.msk [vmem:[#allocation2 + $0x8] sm:$0xff] %vm6128_vm14, %v6083_v40  ;;  %v2686_v3 = vld [vmem:[#allocation8 + $0x9c] sm:$0xf] }
 0x1c0   : > { %4015 = vrot.lane.b32.xlu0 %v7909_v52, %s8657_s10  ;;  %v5059_v0 = vrot.slane %v5057_v23, 5  ;;  %v5063_v2 = vrot.slane %v5061_v49, 4  ;;  %v5036_v41 = vsel %vm8833_vm2, %v5031_v55, %v5035_v5  ;;  %v5993_v51 = vsel %vm8991_vm5, %v8021_v18, %v5992_v34  ;;  %2459 = vst.msk [vmem:[#allocation2 + $0x10] sm:$0xff] %vm2456_vm9, %v2413_v46  ;;  %v2687_v12 = vld [vmem:[#allocation8 + $0xa0] sm:$0xf] }
 0x1c1   : > { %2430 = vrot.lane.b32.xlu1 %v8419_v35, %s8655_s24  ;;  %v5040_v35 = vor.u32 %v5039_v31, %v5035_v5  ;;  %v5055_v15 = vrot.slane %v5054_v22, 4  ;;  %v5994_v52 = vrot.slane %v5992_v34, 4  ;;  %v6000_v17 = vsel %vm8991_vm5, %v8022_v43, %v5999_v44  ;;  %v3135_v10 = vpop.permute.xlu0 %3134  ;;  %v2689_v7 = vld [vmem:[#allocation8 + $0xa8] sm:$0xf]  ;;  %v2690_v48 = vld [vmem:[#allocation8 + $0xac] sm:$0xf] }
 0x1c2   : > { %v5064_v28 = vor.u32 %v5063_v2, %v5059_v0  ;;  %v6001_v57 = vrot.slane %v5999_v44, 4  ;;  %v6002_v63 = vrot.slane %v5859_v29, 5  ;;  %v7767_v1 = vrot.slane %v1687_v54, 9  ;;  %v6465_v5 = vld [vmem:[#allocation2] sm:$0xff]  ;;  %3181 = vst.msk [vmem:[#allocation2 + $0x10] sm:$0xff] %vm3178_vm10, %v3135_v10 }
 0x1c3   : > { %v5041_v62 = vrot.slane %v5040_v35, 4  ;;  %v5060_v56 = vsel %vm8833_vm2, %v5055_v15, %v5059_v0  ;;  %v5996_v61 = vsel %vm8991_vm5, %v5994_v52, %v5995_v36  ;;  %v1836_v11 = vrot.slane %v1688_v37, 5  ;;  %8199 = vmatprep.mubr.msk.bf16.mxu0 %vm6533_vm0, %v6465_v5  ;;  %v2691_v35 = vld [vmem:[#allocation8 + $0xb0] sm:$0x1]  ;;  %v3776_v34 = vld [vmem:[#allocation8 + $0xa0] sm:$0xf] }
 0x1c4   : > { %4513 = vrot.lane.b32.xlu0 %v8423_v4, %s8658_s11  ;;  %v5065_v50 = vrot.slane %v5064_v28, 4  ;;  %v2415_v4 = vpop.permute.xlu1 %2414  ;;  %v8037_v9 = vcombine.low %v5993_v51, %v5996_v61  ;;  %v1839_v13 = vrot.slane %v1689_v38, 5  ;;  %v6003_v21 = vsel %vm8991_vm5, %v6001_v57, %v6002_v63  ;;  %v3777_v36 = vld [vmem:[#allocation8 + $0xa4] sm:$0x1]  ;;  %v3778_v15 = vld [vmem:[#allocation8 + $0xa8] sm:$0xe] }
 0x1c5   : > { %3152 = vrot.lane.b32.xlu1 %v7862_v58, %s8656_s6  ;;  %v5046_v47 = vsel %vm8833_vm2, %v5041_v62, %v5045_v32  ;;  %v1691_v58 = vld [vmem:[#allocation8 + $0xa0] sm:$0xf]  ;;  %2460 = vst.msk [vmem:[#allocation2 + $0x18] sm:$0xff] %vm2456_vm9, %v2415_v4  ;;  %v7768_v6 = vrot.slane %v1690_v45, 9  ;;  %v2688_v32 = vld [vmem:[#allocation8 + $0xa4] sm:$0x1]  ;;  %v8038_v23 = vcombine.low %v6000_v17, %v6003_v21  ;;  %v1837_v49 = vsel %vm8991_vm5, %v7767_v1, %v1836_v11  ;;  %v4000_v18 = vpop.permute.xlu0 %3999 }
 0x1c6   : > { %v7989_v53 = vcombine.low %v5036_v41, %v5046_v47  ;;  %v5070_v60 = vsel %vm8833_vm2, %v5065_v50, %v5069_v26  ;;  %v1843_v30 = vrot.slane %v1691_v58, 5  ;;  %v1838_v20 = vrot.slane %v1836_v11, 4  ;;  %v6466_v2 = vld [vmem:[#allocation2 + $0x8] sm:$0xff]  ;;  %v3775_v26 = vld [vmem:[#allocation8 + $0x9c] sm:$0xe]  ;;  %4046 = vst.msk [vmem:[#allocation2 + $0x10] sm:$0xff] %vm4043_vm11, %v4000_v18 }
 0x1c7   : > { %v7990_v8 = vcombine.low %v5060_v56, %v5070_v60  ;;  %v2987_v27 = vshrl.u32 %v2686_v3, 16  ;;  %v2990_v25 = vshll.u32 %v2686_v3, 16  ;;  %v2996_v19 = vshll.u32 %v2687_v12, 16  ;;  %8200 = vmatmul.mubr.msk.bf16.vlgmr.msra.gmra.mrb[0].mxu0 %vm6533_vm0, %v6466_v2  ;;  %v8426_v43 = vld [vmem:[#allocation8 + $0x9c] sm:$0xff]   ;;  %v8427_v51 = vld [vmem:[#allocation8 + $0xa8] sm:$0xff]  }
 0x1c8   : > { %5235 = vrot.lane.b32.xlu0 %v7989_v53, %s8659_s22  ;;  %v1844_v16 = vsel %vm8991_vm5, %v7768_v6, %v1843_v30  ;;  %v1845_v24 = vrot.slane %v1843_v30, 4  ;;  %v1840_v14 = vsel %vm8991_vm5, %v1838_v20, %v1839_v13  ;;  %v3000_v55 = vshrl.u32 %v2687_v12, 16  ;;  %v3779_v63 = vld [vmem:[#allocation8 + $0xac] sm:$0xf]  ;;  %v4771_v5 = vld [vmem:[#allocation8 + $0xa8] sm:$0xf] }
 0x1c9   : > { %4017 = vrot.lane.b32.xlu1 %v7910_v59, %s8657_s10  ;;  %v1692_v59 = vld [vmem:[#allocation8 + $0xa4] sm:$0x1]  ;;  %v3006_v22 = vshll.u32 %v2688_v32, 16  ;;  %v7783_v29 = vcombine.low %v1837_v49, %v1840_v14  ;;  %v2992_v62 = vrot.slane %v2990_v25, 5  ;;  %v2998_v28 = vrot.slane %v2996_v19, 5  ;;  %v4498_v57 = vpop.permute.xlu0 %4497 }
 0x1ca   : > { %v1846_v31 = vrot.slane %v1692_v59, 5  ;;  %v3002_v38 = vrot.slane %v3000_v55, 4  ;;  %v3011_v41 = vshrl.u32 %v2689_v7, 16  ;;  %v3014_v45 = vshll.u32 %v2689_v7, 16  ;;  %4544 = vst.msk [vmem:[#allocation2 + $0x10] sm:$0xff] %vm4541_vm12, %v4498_v57 }
 0x1cb   : > { %v3008_v40 = vrot.slane %v3006_v22, 5  ;;  %v3020_v46 = vshll.u32 %v2690_v48, 16  ;;  %v3024_v47 = vshrl.u32 %v2690_v48, 16  ;;  %v3030_v56 = vshll.u32 %v2691_v35, 16  ;;  %v4772_v48 = vld [vmem:[#allocation8 + $0xac] sm:$0xf] }
 0x1cc   : > { %6100 = vrot.lane.b32.xlu0 %v8037_v9, %s8660_s26  ;;  %v1847_v54 = vsel %vm8991_vm5, %v1845_v24, %v1846_v31  ;;  %v3003_v52 = vor.u32 %v3002_v38, %v2998_v28  ;;  %v3013_v53 = vrot.slane %v3011_v41, 4  ;;  %v7895_v17 = vrot.slane %v3775_v26, 9  ;;  %v3780_v9 = vld [vmem:[#allocation8 + $0xb0] sm:$0x1]  ;;  %v4774_v55 = vld [vmem:[#allocation8 + $0xb4] sm:$0xf] }
 0x1cd   : > { %4515 = vrot.lane.b32.xlu1 %v8424_v33, %s8658_s11  ;;  %v2989_v33 = vrot.slane %v2987_v27, 4  ;;  %v7784_v37 = vcombine.low %v1844_v16, %v1847_v54  ;;  %v3016_v59 = vrot.slane %v3014_v45, 5  ;;  %v3022_v60 = vrot.slane %v3020_v46, 5  ;;  %v4773_v19 = vld [vmem:[#allocation8 + $0xb0] sm:$0x1] }
 0x1ce   : > { %v3026_v61 = vrot.slane %v3024_v47, 4  ;;  %v3004_v1 = vrot.slane %v3003_v52, 4  ;;  %v3032_v3 = vrot.slane %v3030_v56, 5  ;;  %v3921_v4 = vrot.slane %v3776_v34, 5  ;;  %v4775_v22 = vld [vmem:[#allocation8 + $0xb8] sm:$0xf] }
 0x1cf   : > { %v2993_v44 = vor.u32 %v2992_v62, %v2989_v33  ;;  %v3017_v13 = vor.u32 %v3016_v59, %v3013_v53  ;;  %v7896_v10 = vrot.slane %v3778_v15, 9  ;;  %v3928_v32 = vrot.slane %v3779_v63, 5  ;;  %v5860_v34 = vld [vmem:[#allocation8 + $0xa8] sm:$0xe]  ;;  %v5861_v15 = vld [vmem:[#allocation8 + $0xac] sm:$0xf] }
 0x1d0   : > { %1934 = vrot.lane.b32.xlu0 %v7783_v29, %s8654_s21  ;;  %v3027_v12 = vor.u32 %v3026_v61, %v3022_v60  ;;  %v3009_v6 = vsel %vm8833_vm2, %v3004_v1, %v3008_v40  ;;  %v3922_v30 = vsel %vm8991_vm5, %v7895_v17, %v3921_v4  ;;  %v3923_v31 = vrot.slane %v3921_v4, 4  ;;  %v5864_v57 = vld [vmem:[#allocation8 + $0xb8] sm:$0xf]  ;;  %v5865_v1 = vld [vmem:[#allocation8 + $0xbc] sm:$0x1] }
 0x1d1   : > { %5237 = vrot.lane.b32.xlu1 %v7990_v8, %s8659_s22  ;;  %v2994_v58 = vrot.slane %v2993_v44, 4  ;;  %v3924_v8 = vrot.slane %v3777_v36, 5  ;;  %v3018_v20 = vrot.slane %v3017_v13, 4  ;;  %v3931_v7 = vrot.slane %v3780_v9, 5  ;;  %v1693_v13 = vld [vmem:[#allocation8 + $0xa8] sm:$0xe] }
 0x1d2   : > { %v3028_v27 = vrot.slane %v3027_v12, 4  ;;  %v3929_v24 = vsel %vm8991_vm5, %v7896_v10, %v3928_v32  ;;  %v3930_v25 = vrot.slane %v3928_v32, 4  ;;  %v5072_v35 = vshrl.u32 %v4771_v5, 16  ;;  %v8429_v12 = vld [vmem:[#allocation8 + $0xb4] sm:$0xff]  }
 0x1d3   : > { %v3137_v0 = vpop.permute.xlu1 %3136  ;;  %v2999_v11 = vsel %vm8833_vm2, %v2994_v58, %v2998_v28  ;;  %v3925_v16 = vsel %vm8991_vm5, %v3923_v31, %v3924_v8  ;;  %v5075_v33 = vshll.u32 %v4771_v5, 16  ;;  %v5081_v62 = vshll.u32 %v4772_v48, 16  ;;  %v4776_v28 = vld [vmem:[#allocation8 + $0xbc] sm:$0x1] }
 0x1d4   : > { %3182 = vst.msk [vmem:[#allocation2 + $0x18] sm:$0xff] %vm3178_vm10, %v3137_v0  ;;  %2432 = vrot.lane.b32.xlu0 %v8426_v43, %s8655_s24  ;;  %v7863_v49 = vcombine.low %v2999_v11, %v3009_v6  ;;  %v3023_v0 = vsel %vm8833_vm2, %v3018_v20, %v3022_v60  ;;  %v3033_v2 = vsel %vm8833_vm2, %v3028_v27, %v3032_v3  ;;  %v5074_v54 = vrot.slane %v5072_v35, 4  ;;  %v5862_v43 = vld [vmem:[#allocation8 + $0xb0] sm:$0x1] }
 0x1d5   : > { %6102 = vrot.lane.b32.xlu1 %v8038_v23, %s8660_s26  ;;  %v5220_v23 = vpop.permute.xlu0 %5219  ;;  %v7911_v14 = vcombine.low %v3922_v30, %v3925_v16  ;;  %v7864_v18 = vcombine.low %v3023_v0, %v3033_v2  ;;  %v3932_v29 = vsel %vm8991_vm5, %v3930_v25, %v3931_v7  ;;  %v5077_v38 = vrot.slane %v5075_v33, 5  ;;  %v1694_v30 = vld [vmem:[#allocation8 + $0xac] sm:$0xf]  ;;  %v1695_v20 = vld [vmem:[#allocation8 + $0xb0] sm:$0x1] }
 0x1d6   : > { %5266 = vst.msk [vmem:[#allocation2 + $0x10] sm:$0xff] %vm5263_vm13, %v5220_v23  ;;  %v5085_v40 = vshrl.u32 %v4772_v48, 16  ;;  %v5091_v41 = vshll.u32 %v4773_v19, 16  ;;  %v5083_v44 = vrot.slane %v5081_v62, 5  ;;  %v5096_v45 = vshrl.u32 %v4774_v55, 16 }
 0x1d7   : > { %v4002_v50 = vpop.permute.xlu1 %4001  ;;  %v5099_v46 = vshll.u32 %v4774_v55, 16  ;;  %v5105_v47 = vshll.u32 %v4775_v22, 16  ;;  %v5078_v52 = vor.u32 %v5077_v38, %v5074_v54  ;;  %v5109_v17 = vshrl.u32 %v4775_v22, 16  ;;  %v1696_v33 = vld [vmem:[#allocation8 + $0xb4] sm:$0xe] }
 0x1d8   : > { %4047 = vst.msk [vmem:[#allocation2 + $0x18] sm:$0xff] %vm4043_vm11, %v4002_v50  ;;  %3154 = vrot.lane.b32.xlu0 %v7863_v49, %s8656_s6  ;;  %v5863_v50 = vld [vmem:[#allocation8 + $0xb4] sm:$0xe]  ;;  %v5087_v53 = vrot.slane %v5085_v40, 4  ;;  %v5093_v56 = vrot.slane %v5091_v41, 5  ;;  %v5098_v59 = vrot.slane %v5096_v45, 4 }
 0x1d9   : > { %1936 = vrot.lane.b32.xlu1 %v7784_v37, %s8654_s21  ;;  %v6085_v36 = vpop.permute.xlu0 %6084  ;;  %v7912_v37 = vcombine.low %v3929_v24, %v3932_v29  ;;  %v5101_v60 = vrot.slane %v5099_v46, 5  ;;  %v5107_v61 = vrot.slane %v5105_v47, 5  ;;  %v5115_v63 = vshll.u32 %v4776_v28, 16  ;;  %v1697_v29 = vld [vmem:[#allocation8 + $0xb8] sm:$0xf] }
 0x1da   : > { %6131 = vst.msk [vmem:[#allocation2 + $0x10] sm:$0xff] %vm6128_vm14, %v6085_v36  ;;  %v5079_v4 = vrot.slane %v5078_v52, 4  ;;  %v5088_v8 = vor.u32 %v5087_v53, %v5083_v44  ;;  %v5111_v9 = vrot.slane %v5109_v17, 4  ;;  %v8023_v11 = vrot.slane %v5860_v34, 9  ;;  %v1698_v54 = vld [vmem:[#allocation8 + $0xbc] sm:$0x1] }
 0x1db   : > { %v4500_v21 = vpop.permute.xlu1 %4499  ;;  %v5102_v10 = vor.u32 %v5101_v60, %v5098_v59  ;;  %v5117_v5 = vrot.slane %v5115_v63, 5  ;;  %v6009_v6 = vrot.slane %v5862_v43, 5  ;;  %v8024_v49 = vrot.slane %v5863_v50, 9  ;;  %v2693_v38 = vld [vmem:[#allocation8 + $0xb8] sm:$0xf] }
 0x1dc   : > { %4545 = vst.msk [vmem:[#allocation2 + $0x18] sm:$0xff] %vm4541_vm12, %v4500_v21  ;;  %4019 = vrot.lane.b32.xlu0 %v7911_v14, %s8657_s10  ;;  %v6006_v21 = vrot.slane %v5861_v15, 5  ;;  %v5084_v31 = vsel %vm8833_vm2, %v5079_v4, %v5083_v44  ;;  %v5089_v32 = vrot.slane %v5088_v8, 4  ;;  %v5112_v23 = vor.u32 %v5111_v9, %v5107_v61  ;;  %v2694_v53 = vld [vmem:[#allocation8 + $0xbc] sm:$0x1] }
 0x1dd   : > { %2434 = vrot.lane.b32.xlu1 %v8427_v51, %s8655_s24  ;;  %v8428_v51 = vld [vmem:[#allocation8 + $0xa8] sm:$0xff]   ;;  %v2417_v3 = vpop.permute.xlu0 %2416  ;;  %v5103_v7 = vrot.slane %v5102_v10, 4  ;;  %v6013_v24 = vrot.slane %v5864_v57, 5  ;;  %v6016_v2 = vrot.slane %v5865_v1, 5  ;;  %v7769_v14 = vrot.slane %v1693_v13, 9 }
 0x1de   : > { %2461 = vst.msk [vmem:[#allocation2 + $0x20] sm:$0xff] %vm2456_vm9, %v2417_v3  ;;  %v6007_v48 = vsel %vm8991_vm5, %v8023_v11, %v6006_v21  ;;  %v6008_v16 = vrot.slane %v6006_v21, 4  ;;  %v5094_v35 = vsel %vm8833_vm2, %v5089_v32, %v5093_v56  ;;  %v5113_v0 = vrot.slane %v5112_v23, 4  ;;  %v2695_v59 = vld [vmem:[#allocation8 + $0xc0] sm:$0xf] }
 0x1df   : > { %v5222_v26 = vpop.permute.xlu1 %5221  ;;  %v7991_v55 = vcombine.low %v5084_v31, %v5094_v35  ;;  %v5108_v22 = vsel %vm8833_vm2, %v5103_v7, %v5107_v61  ;;  %v6014_v34 = vsel %vm8991_vm5, %v8024_v49, %v6013_v24  ;;  %v1850_v36 = vrot.slane %v1694_v30, 5  ;;  %v2696_v3 = vld [vmem:[#allocation8 + $0xc4] sm:$0xf]  ;;  %v2697_v4 = vld [vmem:[#allocation8 + $0xc8] sm:$0x1] }
 0x1e0   : > { %5267 = vst.msk [vmem:[#allocation2 + $0x18] sm:$0xff] %vm5263_vm13, %v5222_v26  ;;  %4517 = vrot.lane.b32.xlu0 %v8428_v51, %s8658_s11  ;;  %v6010_v26 = vsel %vm8991_vm5, %v6008_v16, %v6009_v6  ;;  %v5118_v62 = vsel %vm8833_vm2, %v5113_v0, %v5117_v5  ;;  %v1853_v44 = vrot.slane %v1695_v20, 5  ;;  %v7770_v45 = vrot.slane %v1696_v33, 9  ;;  %v3781_v10 = vld [vmem:[#allocation8 + $0xb4] sm:$0xe]  ;;  %v8431_v0 = vld [vmem:[#allocation8 + $0xc0] sm:$0xff]  }
 0x1e1   : > { %3156 = vrot.lane.b32.xlu1 %v7864_v18, %s8656_s6  ;;  %v3139_v25 = vpop.permute.xlu0 %3138  ;;  %v6467_v19 = vld [vmem:[#allocation2 + $0x10] sm:$0xff]  ;;  %v6015_v18 = vrot.slane %v6013_v24, 4  ;;  %v8039_v28 = vcombine.low %v6007_v48, %v6010_v26  ;;  %v7992_v15 = vcombine.low %v5108_v22, %v5118_v62  ;;  %v1851_v50 = vsel %vm8991_vm5, %v7769_v14, %v1850_v36  ;;  %v3782_v5 = vld [vmem:[#allocation8 + $0xb8] sm:$0xf]  ;;  %v3783_v23 = vld [vmem:[#allocation8 + $0xbc] sm:$0x1] }
 0x1e2   : > { %3183 = vst.msk [vmem:[#allocation2 + $0x20] sm:$0xff] %vm3178_vm10, %v3139_v25  ;;  %8203 = vmatprep.mubr.msk.bf16.mxu0 %vm6533_vm0, %v6467_v19  ;;  %v1852_v51 = vrot.slane %v1850_v36, 4  ;;  %v1857_v52 = vrot.slane %v1697_v29, 5  ;;  %v1860_v56 = vrot.slane %v1698_v54, 5  ;;  %v3048_v1 = vshrl.u32 %v2693_v38, 16  ;;  %v8430_v48 = vld [vmem:[#allocation8 + $0xb4] sm:$0xff]  }
 0x1e3   : > { %v6087_v58 = vpop.permute.xlu1 %6086  ;;  %v6017_v43 = vsel %vm8991_vm5, %v6015_v18, %v6016_v2  ;;  %v3054_v31 = vshll.u32 %v2694_v53, 16  ;;  %v3059_v32 = vshrl.u32 %v2695_v59, 16  ;;  %v3068_v7 = vshll.u32 %v2696_v3, 16  ;;  %v3784_v22 = vld [vmem:[#allocation8 + $0xc0] sm:$0xe] }
 0x1e4   : > { %6132 = vst.msk [vmem:[#allocation2 + $0x18] sm:$0xff] %vm6128_vm14, %v6087_v58  ;;  %5239 = vrot.lane.b32.xlu0 %v7991_v55, %s8659_s22  ;;  %v8040_v47 = vcombine.low %v6014_v34, %v6017_v43  ;;  %v3044_v58 = vshll.u32 %v2693_v38, 16  ;;  %v1854_v60 = vsel %vm8991_vm5, %v1852_v51, %v1853_v44  ;;  %v1858_v61 = vsel %vm8991_vm5, %v7770_v45, %v1857_v52  ;;  %v4778_v53 = vld [vmem:[#allocation8 + $0xc4] sm:$0xf] }
 0x1e5   : > { %4021 = vrot.lane.b32.xlu1 %v7912_v37, %s8657_s10  ;;  %v2692_v37 = vld [vmem:[#allocation8 + $0xb4] sm:$0xf]  ;;  %v4004_v46 = vpop.permute.xlu0 %4003  ;;  %v1859_v63 = vrot.slane %v1857_v52, 4  ;;  %v7785_v9 = vcombine.low %v1851_v50, %v1854_v60  ;;  %v3050_v30 = vrot.slane %v3048_v1, 4  ;;  %v3056_v24 = vrot.slane %v3054_v31, 5 }
 0x1e6   : > { %4048 = vst.msk [vmem:[#allocation2 + $0x20] sm:$0xff] %vm4043_vm11, %v4004_v46  ;;  %v3035_v17 = vshrl.u32 %v2692_v37, 16  ;;  %v3038_v57 = vshll.u32 %v2692_v37, 16  ;;  %v3061_v25 = vrot.slane %v3059_v32, 4  ;;  %v3072_v19 = vshrl.u32 %v2696_v3, 16 }
 0x1e7   : > { %v2419_v27 = vpop.permute.xlu1 %2418  ;;  %v1861_v6 = vsel %vm8991_vm5, %v1859_v63, %v1860_v56  ;;  %v3070_v33 = vrot.slane %v3068_v7, 5  ;;  %v3078_v55 = vshll.u32 %v2697_v4, 16  ;;  %v7897_v54 = vrot.slane %v3781_v10, 9  ;;  %v4780_v4 = vld [vmem:[#allocation8 + $0xcc] sm:$0xf] }
 0x1e8   : > { %2462 = vst.msk [vmem:[#allocation2 + $0x28] sm:$0xff] %vm2456_vm9, %v2419_v27  ;;  %6104 = vrot.lane.b32.xlu0 %v8039_v28, %s8660_s26  ;;  %v3037_v11 = vrot.slane %v3035_v17, 4  ;;  %v3040_v13 = vrot.slane %v3038_v57, 5  ;;  %v7786_v49 = vcombine.low %v1858_v61, %v1861_v6  ;;  %v3062_v27 = vshll.u32 %v2695_v59, 16  ;;  %v3785_v28 = vld [vmem:[#allocation8 + $0xc4] sm:$0xf] }
 0x1e9   : > { %4519 = vrot.lane.b32.xlu1 %v8429_v12, %s8658_s11  ;;  %v3046_v12 = vrot.slane %v3044_v58, 5  ;;  %v4502_v21 = vpop.permute.xlu0 %4501  ;;  %v3074_v29 = vrot.slane %v3072_v19, 4  ;;  %v3935_v62 = vrot.slane %v3782_v5, 5  ;;  %v3080_v37 = vrot.slane %v3078_v55, 5  ;;  %v4779_v59 = vld [vmem:[#allocation8 + $0xc8] sm:$0x1] }
 0x1ea   : > { %4546 = vst.msk [vmem:[#allocation2 + $0x20] sm:$0xff] %vm4541_vm12, %v4502_v21  ;;  %v3041_v20 = vor.u32 %v3040_v13, %v3037_v11  ;;  %v3064_v14 = vrot.slane %v3062_v27, 5  ;;  %v3938_v38 = vrot.slane %v3783_v23, 5  ;;  %v7898_v51 = vrot.slane %v3784_v22, 9  ;;  %v4782_v10 = vld [vmem:[#allocation8 + $0xd4] sm:$0x1] }
 0x1eb   : > { %v3141_v40 = vpop.permute.xlu1 %3140  ;;  %v6468_v41 = vld [vmem:[#allocation2 + $0x18] sm:$0xff]  ;;  %v3051_v16 = vor.u32 %v3050_v30, %v3046_v12  ;;  %v3075_v43 = vor.u32 %v3074_v29, %v3070_v33  ;;  %v3936_v44 = vsel %vm8991_vm5, %v7897_v54, %v3935_v62  ;;  %v3937_v45 = vrot.slane %v3935_v62, 4  ;;  %v5866_v32 = vld [vmem:[#allocation8 + $0xc0] sm:$0xe]  ;;  %v5867_v23 = vld [vmem:[#allocation8 + $0xc4] sm:$0xf] }
 0x1ec   : > { %3184 = vst.msk [vmem:[#allocation2 + $0x28] sm:$0xff] %vm3178_vm10, %v3141_v40  ;;  %8204 = vmatmul.mubr.msk.bf16.gmra.mrb[4].mxu0 %vm6533_vm0, %v6468_v41  ;;  %1938 = vrot.lane.b32.xlu0 %v7785_v9, %s8654_s21  ;;  %v3042_v2 = vrot.slane %v3041_v20, 4  ;;  %v3065_v36 = vor.u32 %v3064_v14, %v3061_v25  ;;  %v3786_v40 = vld [vmem:[#allocation8 + $0xc8] sm:$0x1]  ;;  %v4777_v41 = vld [vmem:[#allocation8 + $0xc0] sm:$0xf] }
 0x1ed   : > { %5241 = vrot.lane.b32.xlu1 %v7992_v15, %s8659_s22  ;;  %v3052_v18 = vrot.slane %v3051_v16, 4  ;;  %v3942_v52 = vrot.slane %v3785_v28, 5  ;;  %v3076_v17 = vrot.slane %v3075_v43, 4  ;;  %v3939_v57 = vsel %vm8991_vm5, %v3937_v45, %v3938_v38  ;;  %v5868_v16 = vld [vmem:[#allocation8 + $0xc8] sm:$0x1]  ;;  %v8432_v29 = vld [vmem:[#allocation8 + $0xc0] sm:$0xff]  }
 0x1ee   : > { %v5224_v26 = vpop.permute.xlu0 %5223  ;;  %v3047_v34 = vsel %vm8833_vm2, %v3042_v2, %v3046_v12  ;;  %v3066_v50 = vrot.slane %v3065_v36, 4  ;;  %v3945_v58 = vrot.slane %v3786_v40, 5  ;;  %v5120_v60 = vshrl.u32 %v4777_v41, 16  ;;  %v5870_v22 = vld [vmem:[#allocation8 + $0xd0] sm:$0xf] }
 0x1ef   : > { %v4006_v8 = vpop.permute.xlu1 %4005  ;;  %5268 = vst.msk [vmem:[#allocation2 + $0x20] sm:$0xff] %vm5263_vm13, %v5224_v26  ;;  %v3057_v15 = vsel %vm8833_vm2, %v3052_v18, %v3056_v24  ;;  %v7913_v63 = vcombine.low %v3936_v44, %v3939_v57  ;;  %v3943_v1 = vsel %vm8991_vm5, %v7898_v51, %v3942_v52  ;;  %v3944_v3 = vrot.slane %v3942_v52, 4  ;;  %v9770_v26 = vld [vmem:[#allocation8 + $0xd4] sm:$0x1]  ;;  %v9773_v36 = vld [vmem:[#allocation8 + $0xd8] sm:$0xe] }
 0x1f0   : > { %4049 = vst.msk [vmem:[#allocation2 + $0x28] sm:$0xff] %vm4043_vm11, %v4006_v8  ;;  %2436 = vrot.lane.b32.xlu0 %v8430_v48, %s8655_s24  ;;  %v3071_v61 = vsel %vm8833_vm2, %v3066_v50, %v3070_v33  ;;  %v4781_v8 = vld [vmem:[#allocation8 + $0xd0] sm:$0xf]  ;;  %v3081_v9 = vsel %vm8833_vm2, %v3076_v17, %v3080_v37  ;;  %v5122_v11 = vrot.slane %v5120_v60, 4  ;;  %v5123_v13 = vshll.u32 %v4777_v41, 16 }
 0x1f1   : > { %6106 = vrot.lane.b32.xlu1 %v8040_v47, %s8660_s26  ;;  %v7865_v47 = vcombine.low %v3047_v34, %v3057_v15  ;;  %v5129_v12 = vshll.u32 %v4778_v53, 16  ;;  %v7866_v21 = vcombine.low %v3071_v61, %v3081_v9  ;;  %v3946_v6 = vsel %vm8991_vm5, %v3944_v3, %v3945_v58  ;;  %v8433_v44 = vld [vmem:[#allocation8 + $0xcc] sm:$0xff]   ;;  %v1976_v51 = vld [vmem:[#allocation8 + $0xdc] sm:$0xf]  ;;  %v1977_v52 = vld [vmem:[#allocation8 + $0xe0] sm:$0x1] }
 0x1f2   : > { %v6089_v56 = vpop.permute.xlu0 %6088  ;;  %v5133_v30 = vshrl.u32 %v4778_v53, 16  ;;  %v5139_v31 = vshll.u32 %v4779_v59, 16  ;;  %v7914_v20 = vcombine.low %v3943_v1, %v3946_v6  ;;  %v5125_v27 = vrot.slane %v5123_v13, 5  ;;  %v1978_v53 = vld [vmem:[#allocation8 + $0xe4] sm:$0xe] }
 0x1f3   : > { %v4504_v35 = vpop.permute.xlu1 %4503  ;;  %6133 = vst.msk [vmem:[#allocation2 + $0x20] sm:$0xff] %vm6128_vm14, %v6089_v56  ;;  %v5131_v7 = vrot.slane %v5129_v12, 5  ;;  %v5144_v48 = vshrl.u32 %v4780_v4, 16  ;;  %v5147_v19 = vshll.u32 %v4780_v4, 16  ;;  %v5157_v33 = vshrl.u32 %v4781_v8, 16 }
 0x1f4   : > { %4547 = vst.msk [vmem:[#allocation2 + $0x28] sm:$0xff] %vm4541_vm12, %v4504_v35  ;;  %3158 = vrot.lane.b32.xlu0 %v7865_v47, %s8656_s6  ;;  %v5135_v24 = vrot.slane %v5133_v30, 4  ;;  %v5141_v25 = vrot.slane %v5139_v31, 5  ;;  %v5153_v35 = vshll.u32 %v4781_v8, 16  ;;  %v5126_v2 = vor.u32 %v5125_v27, %v5122_v11  ;;  %v1979_v59 = vld [vmem:[#allocation8 + $0xe8] sm:$0xf] }
 0x1f5   : > { %1940 = vrot.lane.b32.xlu1 %v7786_v49, %s8654_s21  ;;  %v5146_v14 = vrot.slane %v5144_v48, 4  ;;  %v5163_v55 = vshll.u32 %v4782_v10, 16  ;;  %v5149_v62 = vrot.slane %v5147_v19, 5  ;;  %v8025_v34 = vrot.slane %v5866_v32, 9  ;;  %v1980_v10 = vld [vmem:[#allocation8 + $0xec] sm:$0x1] }
 0x1f6   : > { %v2421_v49 = vpop.permute.xlu0 %2420  ;;  %v5136_v54 = vor.u32 %v5135_v24, %v5131_v7  ;;  %v5155_v28 = vrot.slane %v5153_v35, 5  ;;  %v5127_v40 = vrot.slane %v5126_v2, 4  ;;  %v5159_v41 = vrot.slane %v5157_v33, 4  ;;  %v3195_v31 = vld [vmem:[#allocation8 + $0xe4] sm:$0xf] }
 0x1f7   : > { %v5226_v46 = vpop.permute.xlu1 %5225  ;;  %2463 = vst.msk [vmem:[#allocation2 + $0x30] sm:$0xff] %vm2456_vm9, %v2421_v49  ;;  %v5165_v15 = vrot.slane %v5163_v55, 5  ;;  %v6020_v43 = vrot.slane %v5867_v23, 5  ;;  %v6023_v47 = vrot.slane %v5868_v16, 5  ;;  %v6027_v3 = vrot.slane %v5870_v22, 5 }
 0x1f8   : > { %5269 = vst.msk [vmem:[#allocation2 + $0x28] sm:$0xff] %vm5263_vm13, %v5226_v46  ;;  %4023 = vrot.lane.b32.xlu0 %v7913_v63, %s8657_s10  ;;  %v5137_v45 = vrot.slane %v5136_v54, 4  ;;  %v5150_v46 = vor.u32 %v5149_v62, %v5146_v14  ;;  %v5132_v56 = vsel %vm8833_vm2, %v5127_v40, %v5131_v7  ;;  %v5160_v17 = vor.u32 %v5159_v41, %v5155_v28  ;;  %v3196_v27 = vld [vmem:[#allocation8 + $0xe8] sm:$0xf]  ;;  %v3197_v19 = vld [vmem:[#allocation8 + $0xec] sm:$0x1] }
 0x1f9   : > { %2438 = vrot.lane.b32.xlu1 %v8431_v0, %s8655_s24  ;;  %v5869_v0 = vld [vmem:[#allocation8 + $0xcc] sm:$0xe]  ;;  %v6021_v57 = vsel %vm8991_vm5, %v8025_v34, %v6020_v43  ;;  %v6022_v58 = vrot.slane %v6020_v43, 4  ;;  %v6030_v4 = vrot.slane %v9770_v26, 5  ;;  %v7787_v12 = vrot.slane %v9773_v36, 9 }
 0x1fa   : > { %v3143_v37 = vpop.permute.xlu0 %3142  ;;  %v6469_v38 = vld [vmem:[#allocation2 + $0x20] sm:$0xff]  ;;  %v8026_v50 = vrot.slane %v5869_v0, 9  ;;  %v5142_v63 = vsel %vm8833_vm2, %v5137_v45, %v5141_v25  ;;  %v5151_v1 = vrot.slane %v5150_v46, 4  ;;  %v5161_v11 = vrot.slane %v5160_v17, 4  ;;  %v3198_v55 = vld [vmem:[#allocation8 + $0xf0] sm:$0xf] }
 0x1fb   : > { %v6091_v5 = vpop.permute.xlu1 %6090  ;;  %3185 = vst.msk [vmem:[#allocation2 + $0x30] sm:$0xff] %vm3178_vm10, %v3143_v37  ;;  %8207 = vmatprep.mubr.msk.bf16.mxu0 %vm6533_vm0, %v6469_v38  ;;  %v7993_v9 = vcombine.low %v5132_v56, %v5142_v63  ;;  %v6024_v13 = vsel %vm8991_vm5, %v6022_v58, %v6023_v47  ;;  %v6029_v30 = vrot.slane %v6027_v3, 4  ;;  %v2073_v23 = vrot.slane %v1976_v51, 5  ;;  %v3199_v22 = vld [vmem:[#allocation8 + $0xf4] sm:$0xf] }
 0x1fc   : > { %6134 = vst.msk [vmem:[#allocation2 + $0x28] sm:$0xff] %vm6128_vm14, %v6091_v5  ;;  %4521 = vrot.lane.b32.xlu0 %v8432_v29, %s8658_s11  ;;  %v5156_v5 = vsel %vm8833_vm2, %v5151_v1, %v5155_v28  ;;  %v6028_v6 = vsel %vm8991_vm5, %v8026_v50, %v6027_v3  ;;  %v5166_v32 = vsel %vm8833_vm2, %v5161_v11, %v5165_v15  ;;  %v2076_v49 = vrot.slane %v1977_v52, 5  ;;  %v3200_v62 = vld [vmem:[#allocation8 + $0xf8] sm:$0x1]  ;;  %v4060_v38 = vld [vmem:[#allocation8 + $0xe4] sm:$0xe] }
 0x1fd   : > { %3160 = vrot.lane.b32.xlu1 %v7866_v21, %s8656_s6  ;;  %v8041_v21 = vcombine.low %v6021_v57, %v6024_v13  ;;  %v7994_v48 = vcombine.low %v5156_v5, %v5166_v32  ;;  %v6031_v16 = vsel %vm8991_vm5, %v6029_v30, %v6030_v4  ;;  %v2080_v24 = vrot.slane %v1979_v59, 5  ;;  %v4061_v45 = vld [vmem:[#allocation8 + $0xe8] sm:$0xf]  ;;  %v4062_v46 = vld [vmem:[#allocation8 + $0xec] sm:$0x1]  ;;  %v8435_v32 = vld [vmem:[#allocation8 + $0xf0] sm:$0xff]  }
 0x1fe   : > { %v4008_v8 = vpop.permute.xlu0 %4007  ;;  %v2083_v25 = vrot.slane %v1980_v10, 5  ;;  %v8042_v0 = vcombine.low %v6028_v6, %v6031_v16  ;;  %v2074_v2 = vsel %vm8991_vm5, %v7787_v12, %v2073_v23  ;;  %v2075_v14 = vrot.slane %v2073_v23, 4  ;;  %v4063_v56 = vld [vmem:[#allocation8 + $0xf0] sm:$0xe] }
 0x1ff   : > { %v2423_v18 = vpop.permute.xlu1 %2422  ;;  %4050 = vst.msk [vmem:[#allocation2 + $0x30] sm:$0xff] %vm4043_vm11, %v4008_v8  ;;  %v3244_v33 = vshrl.u32 %v3195_v31, 16  ;;  %v3247_v29 = vshll.u32 %v3195_v31, 16  ;;  %v3253_v54 = vshll.u32 %v3196_v27, 16  ;;  %v3257_v36 = vshrl.u32 %v3196_v27, 16 }
 0x200   : > { %2464 = vst.msk [vmem:[#allocation2 + $0x38] sm:$0xff] %vm2456_vm9, %v2423_v18  ;;  %5243 = vrot.lane.b32.xlu0 %v7993_v9, %s8659_s22  ;;  %v2082_v18 = vrot.slane %v2080_v24, 4  ;;  %v2077_v28 = vsel %vm8991_vm5, %v2075_v14, %v2076_v49  ;;  %v3263_v37 = vshll.u32 %v3197_v19, 16  ;;  %v3271_v57 = vshll.u32 %v3198_v55, 16  ;;  %v4065_v31 = vld [vmem:[#allocation8 + $0xf8] sm:$0x1] }
 0x201   : > { %4025 = vrot.lane.b32.xlu1 %v7914_v20, %s8657_s10  ;;  %v7788_v20 = vrot.slane %v1978_v53, 9  ;;  %v3246_v34 = vrot.slane %v3244_v33, 4  ;;  %v7803_v41 = vcombine.low %v2074_v2, %v2077_v28  ;;  %v3249_v43 = vrot.slane %v3247_v29, 5  ;;  %v5281_v33 = vld [vmem:[#allocation8 + $0xf4] sm:$0xf] }
 0x202   : > { %v4506_v35 = vpop.permute.xlu0 %4505  ;;  %v2084_v15 = vsel %vm8991_vm5, %v2082_v18, %v2083_v25  ;;  %v3259_v51 = vrot.slane %v3257_v36, 4  ;;  %v3265_v52 = vrot.slane %v3263_v37, 5  ;;  %v3268_v53 = vshrl.u32 %v3198_v55, 16  ;;  %v5282_v29 = vld [vmem:[#allocation8 + $0xf8] sm:$0x1] }
 0x203   : > { %v3145_v60 = vpop.permute.xlu1 %3144  ;;  %v6470_v61 = vld [vmem:[#allocation2 + $0x28] sm:$0xff]  ;;  %4548 = vst.msk [vmem:[#allocation2 + $0x30] sm:$0xff] %vm4541_vm12, %v4506_v35  ;;  %v2081_v26 = vsel %vm8991_vm5, %v7788_v20, %v2080_v24  ;;  %v3250_v17 = vor.u32 %v3249_v43, %v3246_v34  ;;  %v3277_v58 = vshll.u32 %v3199_v22, 16  ;;  %v3281_v59 = vshrl.u32 %v3199_v22, 16  ;;  %v5283_v37 = vld [vmem:[#allocation8 + $0xfc] sm:$0xf] }
 0x204   : > { %3186 = vst.msk [vmem:[#allocation2 + $0x38] sm:$0xff] %vm3178_vm10, %v3145_v60  ;;  %8208 = vmatmul.mubr.msk.bf16.gmra.mrb[8].mxu0 %vm6533_vm0, %v6470_v61  ;;  %6108 = vrot.lane.b32.xlu0 %v8041_v21, %s8660_s26  ;;  %v7804_v50 = vcombine.low %v2081_v26, %v2084_v15  ;;  %v4064_v60 = vld [vmem:[#allocation8 + $0xf4] sm:$0xf]  ;;  %v8434_v61 = vld [vmem:[#allocation8 + $0xe4] sm:$0xff]   ;;  %v3270_v1 = vrot.slane %v3268_v53, 4  ;;  %v3287_v3 = vshll.u32 %v3200_v62, 16 }
 0x205   : > { %4523 = vrot.lane.b32.xlu1 %v8433_v44, %s8658_s11  ;;  %v3255_v44 = vrot.slane %v3253_v54, 5  ;;  %v7915_v4 = vrot.slane %v4060_v38, 9  ;;  %v3251_v9 = vrot.slane %v3250_v17, 4  ;;  %v3273_v11 = vrot.slane %v3271_v57, 5  ;;  %v5284_v38 = vld [vmem:[#allocation8 + $0x100] sm:$0xf] }
 0x206   : > { %v5228_v47 = vpop.permute.xlu0 %5227  ;;  %v3279_v13 = vrot.slane %v3277_v58, 5  ;;  %v3283_v12 = vrot.slane %v3281_v59, 4  ;;  %v3289_v21 = vrot.slane %v3287_v3, 5  ;;  %v4158_v6 = vrot.slane %v4061_v45, 5  ;;  %v6145_v45 = vld [vmem:[#allocation8 + $0xf0] sm:$0xe] }
 0x207   : > { %v4010_v7 = vpop.permute.xlu1 %4009  ;;  %5270 = vst.msk [vmem:[#allocation2 + $0x30] sm:$0xff] %vm5263_vm13, %v5228_v47  ;;  %v3260_v63 = vor.u32 %v3259_v51, %v3255_v44  ;;  %v4161_v30 = vrot.slane %v4062_v46, 5  ;;  %v3256_v23 = vsel %vm8833_vm2, %v3251_v9, %v3255_v44  ;;  %v3274_v49 = vor.u32 %v3273_v11, %v3270_v1  ;;  %v5285_v44 = vld [vmem:[#allocation8 + $0x104] sm:$0x1]  ;;  %v6146_v53 = vld [vmem:[#allocation8 + $0xf4] sm:$0xf] }
 0x208   : > { %4051 = vst.msk [vmem:[#allocation2 + $0x38] sm:$0xff] %vm4043_vm11, %v4010_v7  ;;  %2231 = vrot.lane.b32.xlu0 %v7803_v41, %s8654_s21  ;;  %v3284_v20 = vor.u32 %v3283_v12, %v3279_v13  ;;  %v7916_v27 = vrot.slane %v4063_v56, 9  ;;  %v5280_v7 = vld [vmem:[#allocation8 + $0xf0] sm:$0xf]  ;;  %v4159_v16 = vsel %vm8991_vm5, %v7915_v4, %v4158_v6  ;;  %v4160_v24 = vrot.slane %v4158_v6, 4 }
 0x209   : > { %5245 = vrot.lane.b32.xlu1 %v7994_v48, %s8659_s22  ;;  %v3261_v5 = vrot.slane %v3260_v63, 4  ;;  %v4165_v25 = vrot.slane %v4064_v60, 5  ;;  %v4168_v14 = vrot.slane %v4065_v31, 5  ;;  %v5329_v54 = vshrl.u32 %v5280_v7, 16  ;;  %v9846_v56 = vld [vmem:[#allocation8 + $0xf8] sm:$0x1] }
 0x20a   : > { %v6093_v10 = vpop.permute.xlu0 %6092  ;;  %v3285_v2 = vrot.slane %v3284_v20, 4  ;;  %v4162_v22 = vsel %vm8991_vm5, %v4160_v24, %v4161_v30  ;;  %v5332_v36 = vshll.u32 %v5280_v7, 16  ;;  %v5338_v43 = vshll.u32 %v5281_v33, 16  ;;  %v6148_v63 = vld [vmem:[#allocation8 + $0xfc] sm:$0xe]  ;;  %v8436_v1 = vld [vmem:[#allocation8 + $0xf0] sm:$0xff]  }
 0x20b   : > { %v4508_v40 = vpop.permute.xlu1 %4507  ;;  %6135 = vst.msk [vmem:[#allocation2 + $0x30] sm:$0xff] %vm6128_vm14, %v6093_v10  ;;  %v3266_v48 = vsel %vm8833_vm2, %v3261_v5, %v3265_v52  ;;  %v9834_v26 = vsel %vm8991_vm5, %v7916_v27, %v4165_v25  ;;  %v4167_v18 = vrot.slane %v4165_v25, 4  ;;  %v7931_v34 = vcombine.low %v4159_v16, %v4162_v22  ;;  %v6149_v11 = vld [vmem:[#allocation8 + $0x100] sm:$0xf]  ;;  %v1981_v20 = vld [vmem:[#allocation8 + $0xf0] sm:$0xe] }
 0x20c   : > { %4549 = vst.msk [vmem:[#allocation2 + $0x38] sm:$0xff] %vm4541_vm12, %v4508_v40  ;;  %2586 = vrot.lane.b32.xlu0 %v8434_v61, %s8655_s24  ;;  %v7867_v35 = vcombine.low %v3256_v23, %v3266_v48  ;;  %v3290_v28 = vsel %vm8833_vm2, %v3285_v2, %v3289_v21  ;;  %v5331_v15 = vrot.slane %v5329_v54, 4  ;;  %v5342_v51 = vshrl.u32 %v5281_v33, 16  ;;  %v6150_v21 = vld [vmem:[#allocation8 + $0x104] sm:$0x1]  ;;  %v8437_v7 = vld [vmem:[#allocation8 + $0xfc] sm:$0xff]  }
 0x20d   : > { %6110 = vrot.lane.b32.xlu1 %v8042_v0, %s8660_s26  ;;  %v3275_v0 = vrot.slane %v3274_v49, 4  ;;  %v4169_v41 = vsel %vm8991_vm5, %v4167_v18, %v4168_v14  ;;  %v5348_v52 = vshll.u32 %v5282_v29, 16  ;;  %v5340_v58 = vrot.slane %v5338_v43, 5  ;;  %v1983_v33 = vld [vmem:[#allocation8 + $0xf8] sm:$0x1] }
 0x20e   : > { %v2425_v55 = vpop.permute.xlu0 %2424  ;;  %v7932_v47 = vcombine.low %v9834_v26, %v4169_v41  ;;  %v5353_v59 = vshrl.u32 %v5283_v37, 16  ;;  %v5356_v60 = vshll.u32 %v5283_v37, 16  ;;  %v5362_v61 = vshll.u32 %v5284_v38, 16  ;;  %v1985_v22 = vld [vmem:[#allocation8 + $0x100] sm:$0xf] }
 0x20f   : > { %v5230_v8 = vpop.permute.xlu1 %5229  ;;  %2465 = vst.msk [vmem:[#allocation2 + $0x40] sm:$0xff] %vm2456_vm9, %v2425_v55  ;;  %v3280_v62 = vsel %vm8833_vm2, %v3275_v0, %v3279_v13  ;;  %v5344_v4 = vrot.slane %v5342_v51, 4  ;;  %v5366_v9 = vshrl.u32 %v5284_v38, 16  ;;  %v5372_v5 = vshll.u32 %v5285_v44, 16  ;;  %v1984_v55 = vld [vmem:[#allocation8 + $0xfc] sm:$0xe] }
 0x210   : > { %5271 = vst.msk [vmem:[#allocation2 + $0x38] sm:$0xff] %vm5263_vm13, %v5230_v8  ;;  %v7868_v40 = vcombine.low %v3280_v62, %v3290_v28  ;;  %3675 = vrot.lane.b32.xlu0 %v7867_v35, %s8656_s6  ;;  %v5350_v8 = vrot.slane %v5348_v52, 5  ;;  %v5355_v13 = vrot.slane %v5353_v59, 4  ;;  %v5358_v12 = vrot.slane %v5356_v60, 5  ;;  %v1986_v44 = vld [vmem:[#allocation8 + $0x104] sm:$0x1] }
 0x211   : > { %2233 = vrot.lane.b32.xlu1 %v7804_v50, %s8654_s21  ;;  %v5334_v50 = vrot.slane %v5332_v36, 5  ;;  %v5364_v10 = vrot.slane %v5362_v61, 5  ;;  %v5368_v23 = vrot.slane %v5366_v9, 4  ;;  %v8043_v49 = vrot.slane %v6145_v45, 9  ;;  %v3201_v51 = vld [vmem:[#allocation8 + $0xfc] sm:$0xf] }
 0x212   : > { %v3147_v17 = vpop.permute.xlu0 %3146  ;;  %v6471_v57 = vld [vmem:[#allocation2 + $0x30] sm:$0xff]  ;;  %v5359_v48 = vor.u32 %v5358_v12, %v5355_v13  ;;  %v5374_v16 = vrot.slane %v5372_v5, 5  ;;  %v6243_v24 = vrot.slane %v6146_v53, 5  ;;  %v6246_v25 = vrot.slane %v9846_v56, 5  ;;  %v3204_v13 = vld [vmem:[#allocation8 + $0x108] sm:$0xf] }
 0x213   : > { %v6095_v19 = vpop.permute.xlu1 %6094  ;;  %3187 = vst.msk [vmem:[#allocation2 + $0x40] sm:$0xff] %vm3178_vm10, %v3147_v17  ;;  %8211 = vmatprep.mubr.msk.bf16.mxu0 %vm6533_vm0, %v6471_v57  ;;  %v5335_v3 = vor.u32 %v5334_v50, %v5331_v15  ;;  %v5369_v2 = vor.u32 %v5368_v23, %v5364_v10  ;;  %v8044_v14 = vrot.slane %v6148_v63, 9  ;;  %v6250_v54 = vrot.slane %v6149_v11, 5  ;;  %v3202_v57 = vld [vmem:[#allocation8 + $0x100] sm:$0xf] }
 0x214   : > { %6136 = vst.msk [vmem:[#allocation2 + $0x38] sm:$0xff] %vm6128_vm14, %v6095_v19  ;;  %4316 = vrot.lane.b32.xlu0 %v7931_v34, %s8657_s10  ;;  %v1982_v19 = vld [vmem:[#allocation8 + $0xf4] sm:$0xf]  ;;  %v5360_v26 = vrot.slane %v5359_v48, 4  ;;  %v6244_v18 = vsel %vm8991_vm5, %v8043_v49, %v6243_v24  ;;  %v6245_v29 = vrot.slane %v6243_v24, 4  ;;  %v6253_v36 = vrot.slane %v6150_v21, 5 }
 0x215   : > { %2588 = vrot.lane.b32.xlu1 %v8435_v32, %s8655_s24  ;;  %v5336_v31 = vrot.slane %v5335_v3, 4  ;;  %v5345_v32 = vor.u32 %v5344_v4, %v5340_v58  ;;  %v5370_v34 = vrot.slane %v5369_v2, 4  ;;  %v7789_v37 = vrot.slane %v1981_v20, 9  ;;  %v3206_v49 = vld [vmem:[#allocation8 + $0x110] sm:$0x1] }
 0x216   : > { %v4012_v27 = vpop.permute.xlu0 %4011  ;;  %v5365_v41 = vsel %vm8833_vm2, %v5360_v26, %v5364_v10  ;;  %v6247_v15 = vsel %vm8991_vm5, %v6245_v29, %v6246_v25  ;;  %v6251_v43 = vsel %vm8991_vm5, %v8044_v14, %v6250_v54  ;;  %v2087_v50 = vrot.slane %v1982_v19, 5  ;;  %v4066_v20 = vld [vmem:[#allocation8 + $0xfc] sm:$0xe]  ;;  %v4067_v25 = vld [vmem:[#allocation8 + $0x100] sm:$0xf] }
 0x217   : > { %v2427_v46 = vpop.permute.xlu1 %2426  ;;  %4052 = vst.msk [vmem:[#allocation2 + $0x40] sm:$0xff] %vm4043_vm11, %v4012_v27  ;;  %v5341_v35 = vsel %vm8833_vm2, %v5336_v31, %v5340_v58  ;;  %v5346_v0 = vrot.slane %v5345_v32, 4  ;;  %v5375_v45 = vsel %vm8833_vm2, %v5370_v34, %v5374_v16  ;;  %v2090_v53 = vrot.slane %v1983_v33, 5  ;;  %v4068_v19 = vld [vmem:[#allocation8 + $0x104] sm:$0x1] }
 0x218   : > { %2466 = vst.msk [vmem:[#allocation2 + $0x48] sm:$0xff] %vm2456_vm9, %v2427_v46  ;;  %4671 = vrot.lane.b32.xlu0 %v8436_v1, %s8658_s11  ;;  %v8059_v46 = vcombine.low %v6244_v18, %v6247_v15  ;;  %v7996_v52 = vcombine.low %v5365_v41, %v5375_v45  ;;  %v7790_v56 = vrot.slane %v1984_v55, 9  ;;  %v2094_v17 = vrot.slane %v1985_v22, 5  ;;  %v3203_v1 = vld [vmem:[#allocation8 + $0x104] sm:$0x1] }
 0x219   : > { %3677 = vrot.lane.b32.xlu1 %v7868_v40, %s8656_s6  ;;  %v5351_v28 = vsel %vm8833_vm2, %v5346_v0, %v5350_v8  ;;  %v2088_v60 = vsel %vm8991_vm5, %v7789_v37, %v2087_v50  ;;  %v2089_v61 = vrot.slane %v2087_v50, 4  ;;  %v2097_v63 = vrot.slane %v1986_v44, 5  ;;  %v4071_v50 = vld [vmem:[#allocation8 + $0x110] sm:$0x1] }
 0x21a   : > { %v4510_v38 = vpop.permute.xlu0 %4509  ;;  %v7995_v40 = vcombine.low %v5341_v35, %v5351_v28  ;;  %v2095_v8 = vsel %vm8991_vm5, %v7790_v56, %v2094_v17  ;;  %v2096_v9 = vrot.slane %v2094_v17, 4  ;;  %v3292_v11 = vshrl.u32 %v3201_v51, 16  ;;  %v4069_v35 = vld [vmem:[#allocation8 + $0x108] sm:$0xe] }
 0x21b   : > { %v3149_v6 = vpop.permute.xlu1 %3148  ;;  %v6472_v30 = vld [vmem:[#allocation2 + $0x38] sm:$0xff]  ;;  %4550 = vst.msk [vmem:[#allocation2 + $0x40] sm:$0xff] %vm4541_vm12, %v4510_v38  ;;  %v2091_v12 = vsel %vm8991_vm5, %v2089_v61, %v2090_v53  ;;  %v3295_v10 = vshll.u32 %v3201_v51, 16  ;;  %v3301_v5 = vshll.u32 %v3202_v57, 16  ;;  %v3305_v21 = vshrl.u32 %v3202_v57, 16  ;;  %v8438_v38 = vld [vmem:[#allocation8 + $0xfc] sm:$0xff]  }
 0x21c   : > { %3188 = vst.msk [vmem:[#allocation2 + $0x48] sm:$0xff] %vm3178_vm10, %v3149_v6  ;;  %8212 = vmatmul.mubr.msk.bf16.gmra.mrb[12].mxu0 %vm6533_vm0, %v6472_v30  ;;  %5760 = vrot.lane.b32.xlu0 %v7995_v40, %s8659_s22  ;;  %v3205_v6 = vld [vmem:[#allocation8 + $0x10c] sm:$0xf]  ;;  %v7805_v30 = vcombine.low %v2088_v60, %v2091_v12  ;;  %v2098_v31 = vsel %vm8991_vm5, %v2096_v9, %v2097_v63  ;;  %v3294_v32 = vrot.slane %v3292_v11, 4  ;;  %v3311_v23 = vshll.u32 %v3203_v1, 16 }
 0x21d   : > { %4318 = vrot.lane.b32.xlu1 %v7932_v47, %s8657_s10  ;;  %v6252_v47 = vrot.slane %v6250_v54, 4  ;;  %v3297_v48 = vrot.slane %v3295_v10, 5  ;;  %v3303_v16 = vrot.slane %v3301_v5, 5  ;;  %v3307_v24 = vrot.slane %v3305_v21, 4  ;;  %v5287_v1 = vld [vmem:[#allocation8 + $0x10c] sm:$0xf] }
 0x21e   : > { %v5232_v3 = vpop.permute.xlu0 %5231  ;;  %v3313_v2 = vrot.slane %v3311_v23, 5  ;;  %v3316_v14 = vshrl.u32 %v3204_v13, 16  ;;  %v3319_v33 = vshll.u32 %v3204_v13, 16  ;;  %v3325_v55 = vshll.u32 %v3205_v6, 16  ;;  %v5288_v13 = vld [vmem:[#allocation8 + $0x110] sm:$0x1] }
 0x21f   : > { %v4014_v62 = vpop.permute.xlu1 %4013  ;;  %v6254_v59 = vsel %vm8991_vm5, %v6252_v47, %v6253_v36  ;;  %5272 = vst.msk [vmem:[#allocation2 + $0x40] sm:$0xff] %vm5263_vm13, %v5232_v3  ;;  %v3298_v22 = vor.u32 %v3297_v48, %v3294_v32  ;;  %v3308_v26 = vor.u32 %v3307_v24, %v3303_v16  ;;  %v3329_v18 = vshrl.u32 %v3205_v6, 16  ;;  %v4070_v36 = vld [vmem:[#allocation8 + $0x10c] sm:$0xf] }
 0x220   : > { %4053 = vst.msk [vmem:[#allocation2 + $0x48] sm:$0xff] %vm4043_vm11, %v4014_v62  ;;  %v8060_v4 = vcombine.low %v6251_v43, %v6254_v59  ;;  %6401 = vrot.lane.b32.xlu0 %v8059_v46, %s8660_s26  ;;  %v3335_v29 = vshll.u32 %v3206_v49, 16  ;;  %v3318_v54 = vrot.slane %v3316_v14, 4  ;;  %v3321_v62 = vrot.slane %v3319_v33, 5 }
 0x221   : > { %4673 = vrot.lane.b32.xlu1 %v8437_v7, %s8658_s11  ;;  %v7806_v7 = vcombine.low %v2095_v8, %v2098_v31  ;;  %v3327_v28 = vrot.slane %v3325_v55, 5  ;;  %v7917_v34 = vrot.slane %v4066_v20, 9  ;;  %v3299_v40 = vrot.slane %v3298_v22, 4  ;;  %v5289_v31 = vld [vmem:[#allocation8 + $0x114] sm:$0xf] }
 0x222   : > { %v6097_v0 = vpop.permute.xlu0 %6096  ;;  %v3309_v41 = vrot.slane %v3308_v26, 4  ;;  %v3331_v15 = vrot.slane %v3329_v18, 4  ;;  %v3337_v43 = vrot.slane %v3335_v29, 5  ;;  %v3322_v45 = vor.u32 %v3321_v62, %v3318_v54  ;;  %v6153_v26 = vld [vmem:[#allocation8 + $0x110] sm:$0x1] }
 0x223   : > { %v4512_v58 = vpop.permute.xlu1 %4511  ;;  %6137 = vst.msk [vmem:[#allocation2 + $0x40] sm:$0xff] %vm6128_vm14, %v6097_v0  ;;  %v4172_v46 = vrot.slane %v4067_v25, 5  ;;  %v4175_v47 = vrot.slane %v4068_v19, 5  ;;  %v7918_v51 = vrot.slane %v4069_v35, 9  ;;  %v3304_v53 = vsel %vm8833_vm2, %v3299_v40, %v3303_v16  ;;  %v6151_v19 = vld [vmem:[#allocation8 + $0x108] sm:$0xe] }
 0x224   : > { %4551 = vst.msk [vmem:[#allocation2 + $0x48] sm:$0xff] %vm4541_vm12, %v4512_v58  ;;  %2235 = vrot.lane.b32.xlu0 %v7805_v30, %s8654_s21  ;;  %v3314_v56 = vsel %vm8833_vm2, %v3309_v41, %v3313_v2  ;;  %v3332_v17 = vor.u32 %v3331_v15, %v3327_v28  ;;  %v4179_v57 = vrot.slane %v4070_v36, 5  ;;  %v5286_v58 = vld [vmem:[#allocation8 + $0x108] sm:$0xf]  ;;  %v3323_v60 = vrot.slane %v3322_v45, 4 }
 0x225   : > { %5762 = vrot.lane.b32.xlu1 %v7996_v52, %s8659_s22  ;;  %v8439_v52 = vld [vmem:[#allocation8 + $0x108] sm:$0xff]   ;;  %v7869_v59 = vcombine.low %v3304_v53, %v3314_v56  ;;  %v4173_v61 = vsel %vm8991_vm5, %v7917_v34, %v4172_v46  ;;  %v4174_v63 = vrot.slane %v4172_v46, 4  ;;  %v4182_v11 = vrot.slane %v4071_v50, 5  ;;  %v6154_v34 = vld [vmem:[#allocation8 + $0x114] sm:$0xe] }
 0x226   : > { %v1931_v44 = vpop.permute.xlu0 %1930  ;;  %v9907_v8 = vsel %vm8991_vm5, %v7918_v51, %v4179_v57  ;;  %v4181_v9 = vrot.slane %v4179_v57, 4  ;;  %v3328_v5 = vsel %vm8833_vm2, %v3323_v60, %v3327_v28  ;;  %v5377_v6 = vshrl.u32 %v5286_v58, 16  ;;  %v6152_v35 = vld [vmem:[#allocation8 + $0x10c] sm:$0xf]  ;;  %v6155_v41 = vld [vmem:[#allocation8 + $0x118] sm:$0xf] }
 0x227   : > { %v5234_v27 = vpop.permute.xlu1 %5233  ;;  %1969 = vst.msk [vmem:[#allocation2 + $0x50] sm:$0xff] %vm1958_vm8, %v1931_v44  ;;  %v4176_v21 = vsel %vm8991_vm5, %v4174_v63, %v4175_v47  ;;  %v5380_v30 = vshll.u32 %v5286_v58, 16  ;;  %v5386_v20 = vshll.u32 %v5287_v1, 16  ;;  %v5390_v33 = vshrl.u32 %v5287_v1, 16  ;;  %v6156_v46 = vld [vmem:[#allocation8 + $0x11c] sm:$0x1] }
 0x228   : > { %5273 = vst.msk [vmem:[#allocation2 + $0x48] sm:$0xff] %vm5263_vm13, %v5234_v27  ;;  %2590 = vrot.lane.b32.xlu0 %v8438_v38, %s8655_s24  ;;  %v7933_v23 = vcombine.low %v4173_v61, %v4176_v21  ;;  %v4183_v49 = vsel %vm8991_vm5, %v4181_v9, %v4182_v11  ;;  %v5290_v27 = vld [vmem:[#allocation8 + $0x118] sm:$0xf]  ;;  %v5379_v24 = vrot.slane %v5377_v6, 4  ;;  %v5396_v55 = vshll.u32 %v5288_v13, 16  ;;  %v8440_v50 = vld [vmem:[#allocation8 + $0x108] sm:$0xff]  }
 0x229   : > { %6403 = vrot.lane.b32.xlu1 %v8060_v4, %s8660_s26  ;;  %v3333_v4 = vrot.slane %v3332_v17, 4  ;;  %v7934_v16 = vcombine.low %v9907_v8, %v4183_v49  ;;  %v5382_v25 = vrot.slane %v5380_v30, 5  ;;  %v9923_v14 = vrot.slane %v5386_v20, 5  ;;  %v1987_v17 = vld [vmem:[#allocation8 + $0x108] sm:$0xe]  ;;  %v8441_v1 = vld [vmem:[#allocation8 + $0x114] sm:$0xff]  }
 0x22a   : > { %v2429_v12 = vpop.permute.xlu0 %2428  ;;  %v6473_v10 = vld [vmem:[#allocation2 + $0x40] sm:$0xff]  ;;  %v5401_v22 = vshrl.u32 %v5289_v31, 16  ;;  %v5404_v54 = vshll.u32 %v5289_v31, 16  ;;  %v5410_v62 = vshll.u32 %v5290_v27, 16  ;;  %v5414_v28 = vshrl.u32 %v5290_v27, 16 }
 0x22b   : > { %v6099_v37 = vpop.permute.xlu1 %6098  ;;  %2467 = vst.msk [vmem:[#allocation2 + $0x50] sm:$0xff] %vm2456_vm9, %v2429_v12  ;;  %8215 = vmatprep.mubr.msk.bf16.mxu0 %vm6533_vm0, %v6473_v10  ;;  %v3338_v32 = vsel %vm8833_vm2, %v3333_v4, %v3337_v43  ;;  %v5383_v29 = vor.u32 %v5382_v25, %v5379_v24  ;;  %v5392_v36 = vrot.slane %v5390_v33, 4  ;;  %v8045_v53 = vrot.slane %v6151_v19, 9  ;;  %v1988_v63 = vld [vmem:[#allocation8 + $0x10c] sm:$0xf] }
 0x22c   : > { %6138 = vst.msk [vmem:[#allocation2 + $0x48] sm:$0xff] %vm6128_vm14, %v6099_v37  ;;  %v7870_v48 = vcombine.low %v3328_v5, %v3338_v32  ;;  %3679 = vrot.lane.b32.xlu0 %v7869_v59, %s8656_s6  ;;  %v5398_v37 = vrot.slane %v5396_v55, 5  ;;  %v5403_v38 = vrot.slane %v5401_v22, 4  ;;  %v5406_v43 = vrot.slane %v5404_v54, 5  ;;  %v1989_v11 = vld [vmem:[#allocation8 + $0x110] sm:$0x1] }
 0x22d   : > { %2237 = vrot.lane.b32.xlu1 %v7806_v7, %s8654_s21  ;;  %v5291_v7 = vld [vmem:[#allocation8 + $0x11c] sm:$0x1]  ;;  %v5384_v15 = vrot.slane %v5383_v29, 4  ;;  %v5412_v44 = vrot.slane %v5410_v62, 5  ;;  %v5416_v45 = vrot.slane %v5414_v28, 4  ;;  %v5393_v51 = vor.u32 %v5392_v36, %v9923_v14 }
 0x22e   : > { %v3151_v18 = vpop.permute.xlu0 %3150  ;;  %v5420_v40 = vshll.u32 %v5291_v7, 16  ;;  %v6257_v56 = vrot.slane %v6152_v35, 5  ;;  %v5407_v59 = vor.u32 %v5406_v43, %v5403_v38  ;;  %v6260_v61 = vrot.slane %v6153_v26, 5  ;;  %v1990_v13 = vld [vmem:[#allocation8 + $0x114] sm:$0xe] }
 0x22f   : > { %v1933_v3 = vpop.permute.xlu1 %1932  ;;  %3189 = vst.msk [vmem:[#allocation2 + $0x50] sm:$0xff] %vm3178_vm10, %v3151_v18  ;;  %v5389_v58 = vsel %vm8833_vm2, %v5384_v15, %v9923_v14  ;;  %v5417_v60 = vor.u32 %v5416_v45, %v5412_v44  ;;  %v8046_v9 = vrot.slane %v6154_v34, 9  ;;  %v6264_v5 = vrot.slane %v6155_v41, 5  ;;  %v1991_v49 = vld [vmem:[#allocation8 + $0x118] sm:$0xf] }
 0x230   : > { %1970 = vst.msk [vmem:[#allocation2 + $0x58] sm:$0xff] %vm1958_vm8, %v1933_v3  ;;  %4320 = vrot.lane.b32.xlu0 %v7933_v23, %s8657_s10  ;;  %v5394_v3 = vrot.slane %v5393_v51, 4  ;;  %v9939_v4 = vsel %vm8991_vm5, %v8045_v53, %v6257_v56  ;;  %v6259_v8 = vrot.slane %v6257_v56, 4  ;;  %v5408_v12 = vrot.slane %v5407_v59, 4  ;;  %v1992_v24 = vld [vmem:[#allocation8 + $0x11c] sm:$0x1] }
 0x231   : > { %2592 = vrot.lane.b32.xlu1 %v8439_v52, %s8655_s24  ;;  %v5422_v52 = vrot.slane %v5420_v40, 5  ;;  %v5418_v10 = vrot.slane %v5417_v60, 4  ;;  %v6267_v21 = vrot.slane %v6156_v46, 5  ;;  %v7791_v32 = vrot.slane %v1987_v17, 9  ;;  %v3207_v25 = vld [vmem:[#allocation8 + $0x114] sm:$0xf] }
 0x232   : > { %v4016_v57 = vpop.permute.xlu0 %4015  ;;  %v5399_v30 = vsel %vm8833_vm2, %v5394_v3, %v5398_v37  ;;  %v6261_v31 = vsel %vm8991_vm5, %v6259_v8, %v6260_v61  ;;  %v2101_v23 = vrot.slane %v1988_v63, 5  ;;  %v5413_v7 = vsel %vm8833_vm2, %v5408_v12, %v5412_v44  ;;  %v3208_v14 = vld [vmem:[#allocation8 + $0x118] sm:$0xf]  ;;  %v3209_v18 = vld [vmem:[#allocation8 + $0x11c] sm:$0x1] }
 0x233   : > { %v2431_v0 = vpop.permute.xlu1 %2430  ;;  %v6474_v2 = vld [vmem:[#allocation2 + $0x48] sm:$0xff]  ;;  %4054 = vst.msk [vmem:[#allocation2 + $0x50] sm:$0xff] %vm4043_vm11, %v4016_v57  ;;  %v7997_v27 = vcombine.low %v5389_v58, %v5399_v30  ;;  %v6265_v35 = vsel %vm8991_vm5, %v8046_v9, %v6264_v5  ;;  %v2104_v55 = vrot.slane %v1989_v11, 5  ;;  %v7792_v22 = vrot.slane %v1990_v13, 9  ;;  %v3210_v36 = vld [vmem:[#allocation8 + $0x120] sm:$0xf] }
 0x234   : > { %2468 = vst.msk [vmem:[#allocation2 + $0x58] sm:$0xff] %vm2456_vm9, %v2431_v0  ;;  %8216 = vmatmul.mubr.msk.bf16.gmra.mrb[16].mxu0 %vm6533_vm0, %v6474_v2  ;;  %4675 = vrot.lane.b32.xlu0 %v8440_v50, %s8658_s11  ;;  %v6266_v0 = vrot.slane %v6264_v5, 4  ;;  %v2102_v2 = vsel %vm8991_vm5, %v7791_v32, %v2101_v23  ;;  %v2103_v33 = vrot.slane %v2101_v23, 4  ;;  %v2108_v26 = vrot.slane %v1991_v49, 5  ;;  %v3211_v15 = vld [vmem:[#allocation8 + $0x124] sm:$0xf] }
 0x235   : > { %3681 = vrot.lane.b32.xlu1 %v7870_v48, %s8656_s6  ;;  %v5423_v48 = vsel %vm8833_vm2, %v5418_v10, %v5422_v52  ;;  %v2111_v62 = vrot.slane %v1992_v24, 5  ;;  %v3340_v28 = vshrl.u32 %v3207_v25, 16  ;;  %v3343_v34 = vshll.u32 %v3207_v25, 16  ;;  %v3212_v43 = vld [vmem:[#allocation8 + $0x128] sm:$0x1] }
 0x236   : > { %v4514_v20 = vpop.permute.xlu0 %4513  ;;  %v7998_v19 = vcombine.low %v5413_v7, %v5423_v48  ;;  %v6268_v54 = vsel %vm8991_vm5, %v6266_v0, %v6267_v21  ;;  %v2105_v38 = vsel %vm8991_vm5, %v2103_v33, %v2104_v55  ;;  %v2109_v40 = vsel %vm8991_vm5, %v7792_v22, %v2108_v26  ;;  %v4072_v51 = vld [vmem:[#allocation8 + $0x114] sm:$0xe]  ;;  %v4073_v57 = vld [vmem:[#allocation8 + $0x118] sm:$0xf]  ;;  %v4075_v11 = vld [vmem:[#allocation8 + $0x120] sm:$0xe] }
 0x237   : > { %v3153_v47 = vpop.permute.xlu1 %3152  ;;  %4552 = vst.msk [vmem:[#allocation2 + $0x50] sm:$0xff] %vm4541_vm12, %v4514_v20  ;;  %v8062_v37 = vcombine.low %v6265_v35, %v6268_v54  ;;  %v2110_v41 = vrot.slane %v2108_v26, 4  ;;  %v7807_v45 = vcombine.low %v2102_v2, %v2105_v38  ;;  %v3342_v46 = vrot.slane %v3340_v28, 4  ;;  %v4076_v49 = vld [vmem:[#allocation8 + $0x124] sm:$0xf] }
 0x238   : > { %3190 = vst.msk [vmem:[#allocation2 + $0x58] sm:$0xff] %vm3178_vm10, %v3153_v47  ;;  %5764 = vrot.lane.b32.xlu0 %v7997_v27, %s8659_s22  ;;  %v3345_v47 = vrot.slane %v3343_v34, 5  ;;  %v3349_v50 = vshll.u32 %v3208_v14, 16  ;;  %v3353_v53 = vshrl.u32 %v3208_v14, 16  ;;  %v3359_v56 = vshll.u32 %v3209_v18, 16  ;;  %v8443_v33 = vld [vmem:[#allocation8 + $0x120] sm:$0xff]  }
 0x239   : > { %4322 = vrot.lane.b32.xlu1 %v7934_v16, %s8657_s10  ;;  %v8061_v16 = vcombine.low %v9939_v4, %v6261_v31  ;;  %v2112_v52 = vsel %vm8991_vm5, %v2110_v41, %v2111_v62  ;;  %v3364_v17 = vshrl.u32 %v3210_v36, 16  ;;  %v3367_v63 = vshll.u32 %v3210_v36, 16  ;;  %v4077_v24 = vld [vmem:[#allocation8 + $0x128] sm:$0x1]  ;;  %v5292_v25 = vld [vmem:[#allocation8 + $0x120] sm:$0xf] }
 0x23a   : > { %v5236_v44 = vpop.permute.xlu0 %5235  ;;  %v7808_v59 = vcombine.low %v2109_v40, %v2112_v52  ;;  %v3346_v60 = vor.u32 %v3345_v47, %v3342_v46  ;;  %v3351_v61 = vrot.slane %v3349_v50, 5  ;;  %v3355_v3 = vrot.slane %v3353_v53, 4  ;;  %v5293_v28 = vld [vmem:[#allocation8 + $0x124] sm:$0xf]  ;;  %v5294_v34 = vld [vmem:[#allocation8 + $0x128] sm:$0x1] }
 0x23b   : > { %v4018_v6 = vpop.permute.xlu1 %4017  ;;  %5274 = vst.msk [vmem:[#allocation2 + $0x50] sm:$0xff] %vm5263_vm13, %v5236_v44  ;;  %v3361_v4 = vrot.slane %v3359_v56, 5  ;;  %v3366_v8 = vrot.slane %v3364_v17, 4  ;;  %v3373_v9 = vshll.u32 %v3211_v15, 16  ;;  %v3369_v10 = vrot.slane %v3367_v63, 5 }
 0x23c   : > { %4055 = vst.msk [vmem:[#allocation2 + $0x58] sm:$0xff] %vm4043_vm11, %v4018_v6  ;;  %6405 = vrot.lane.b32.xlu0 %v8061_v16, %s8660_s26  ;;  %v3347_v12 = vrot.slane %v3346_v60, 4  ;;  %v3377_v5 = vshrl.u32 %v3211_v15, 16  ;;  %v3383_v21 = vshll.u32 %v3212_v43, 16  ;;  %v8442_v6 = vld [vmem:[#allocation8 + $0x114] sm:$0xff]   ;;  %v3356_v30 = vor.u32 %v3355_v3, %v3351_v61 }
 0x23d   : > { %4677 = vrot.lane.b32.xlu1 %v8441_v1, %s8658_s11  ;;  %v4074_v1 = vld [vmem:[#allocation8 + $0x11c] sm:$0x1]  ;;  %v3375_v31 = vrot.slane %v3373_v9, 5  ;;  %v7919_v32 = vrot.slane %v4072_v51, 9  ;;  %v4186_v23 = vrot.slane %v4073_v57, 5  ;;  %v3370_v7 = vor.u32 %v3369_v10, %v3366_v8 }
 0x23e   : > { %v6101_v13 = vpop.permute.xlu0 %6100  ;;  %v3352_v27 = vsel %vm8833_vm2, %v3347_v12, %v3351_v61  ;;  %v3379_v48 = vrot.slane %v3377_v5, 4  ;;  %v3385_v16 = vrot.slane %v3383_v21, 5  ;;  %v4189_v2 = vrot.slane %v4074_v1, 5  ;;  %v5295_v43 = vld [vmem:[#allocation8 + $0x12c] sm:$0xf] }
 0x23f   : > { %v4516_v29 = vpop.permute.xlu1 %4515  ;;  %6139 = vst.msk [vmem:[#allocation2 + $0x50] sm:$0xff] %vm6128_vm14, %v6101_v13  ;;  %v9980_v35 = vsel %vm8991_vm5, %v7919_v32, %v4186_v23  ;;  %v4188_v0 = vrot.slane %v4186_v23, 4  ;;  %v3371_v55 = vrot.slane %v3370_v7, 4  ;;  %v7920_v26 = vrot.slane %v4075_v11, 9  ;;  %v5296_v50 = vld [vmem:[#allocation8 + $0x130] sm:$0xf] }
 0x240   : > { %4553 = vst.msk [vmem:[#allocation2 + $0x58] sm:$0xff] %vm4541_vm12, %v4516_v29  ;;  %2239 = vrot.lane.b32.xlu0 %v7807_v45, %s8654_s21  ;;  %v3380_v22 = vor.u32 %v3379_v48, %v3375_v31  ;;  %v4193_v18 = vrot.slane %v4076_v49, 5  ;;  %v4196_v62 = vrot.slane %v4077_v24, 5  ;;  %v5425_v36 = vshrl.u32 %v5292_v25, 16  ;;  %v6157_v1 = vld [vmem:[#allocation8 + $0x120] sm:$0xe] }
 0x241   : > { %5766 = vrot.lane.b32.xlu1 %v7998_v19, %s8659_s22  ;;  %v3357_v19 = vrot.slane %v3356_v30, 4  ;;  %v9988_v54 = vsel %vm8991_vm5, %v4188_v0, %v4189_v2  ;;  %v3376_v40 = vsel %vm8833_vm2, %v3371_v55, %v3375_v31  ;;  %v5428_v47 = vshll.u32 %v5292_v25, 16  ;;  %v6158_v3 = vld [vmem:[#allocation8 + $0x124] sm:$0xf]  ;;  %v6159_v10 = vld [vmem:[#allocation8 + $0x128] sm:$0x1] }
 0x242   : > { %v1935_v14 = vpop.permute.xlu0 %1934  ;;  %v3381_v41 = vrot.slane %v3380_v22, 4  ;;  %v7935_v15 = vcombine.low %v9980_v35, %v9988_v54  ;;  %v9998_v44 = vsel %vm8991_vm5, %v7920_v26, %v4193_v18  ;;  %v4195_v45 = vrot.slane %v4193_v18, 4  ;;  %v6160_v31 = vld [vmem:[#allocation8 + $0x12c] sm:$0xe]  ;;  %v8444_v23 = vld [vmem:[#allocation8 + $0x120] sm:$0xff]  }
 0x243   : > { %v5238_v58 = vpop.permute.xlu1 %5237  ;;  %1971 = vst.msk [vmem:[#allocation2 + $0x60] sm:$0xff] %vm1958_vm8, %v1935_v14  ;;  %v3362_v29 = vsel %vm8833_vm2, %v3357_v19, %v3361_v4  ;;  %v5427_v46 = vrot.slane %v5425_v36, 4  ;;  %v5434_v56 = vshll.u32 %v5293_v28, 16  ;;  %v5438_v17 = vshrl.u32 %v5293_v28, 16  ;;  %v6161_v48 = vld [vmem:[#allocation8 + $0x130] sm:$0xf] }
 0x244   : > { %5275 = vst.msk [vmem:[#allocation2 + $0x58] sm:$0xff] %vm5263_vm13, %v5238_v58  ;;  %2594 = vrot.lane.b32.xlu0 %v8442_v6, %s8655_s24  ;;  %v7871_v38 = vcombine.low %v3352_v27, %v3362_v29  ;;  %v3386_v53 = vsel %vm8833_vm2, %v3381_v41, %v3385_v16  ;;  %v5444_v57 = vshll.u32 %v5294_v34, 16  ;;  %v5297_v58 = vld [vmem:[#allocation8 + $0x134] sm:$0x1]  ;;  %v4197_v60 = vsel %vm8991_vm5, %v4195_v45, %v4196_v62  ;;  %v1993_v22 = vld [vmem:[#allocation8 + $0x120] sm:$0xe] }
 0x245   : > { %6407 = vrot.lane.b32.xlu1 %v8062_v37, %s8660_s26  ;;  %v5430_v61 = vrot.slane %v5428_v47, 5  ;;  %v5449_v63 = vshrl.u32 %v5295_v43, 16  ;;  %v7936_v9 = vcombine.low %v9998_v44, %v4197_v60  ;;  %v5436_v11 = vrot.slane %v5434_v56, 5  ;;  %v6162_v35 = vld [vmem:[#allocation8 + $0x134] sm:$0x1]  ;;  %v8445_v29 = vld [vmem:[#allocation8 + $0x12c] sm:$0xff]  }
 0x246   : > { %v2433_v51 = vpop.permute.xlu0 %2432  ;;  %v6475_v52 = vld [vmem:[#allocation2 + $0x50] sm:$0xff]  ;;  %v5440_v13 = vrot.slane %v5438_v17, 4  ;;  %v5446_v12 = vrot.slane %v5444_v57, 5  ;;  %v5452_v6 = vshll.u32 %v5295_v43, 16  ;;  %v5458_v30 = vshll.u32 %v5296_v50, 16 }
 0x247   : > { %v6103_v20 = vpop.permute.xlu1 %6102  ;;  %2469 = vst.msk [vmem:[#allocation2 + $0x60] sm:$0xff] %vm2456_vm9, %v2433_v51  ;;  %8219 = vmatprep.mubr.msk.bf16.mxu0 %vm6533_vm0, %v6475_v52  ;;  %v5431_v5 = vor.u32 %v5430_v61, %v5427_v46  ;;  %v5451_v21 = vrot.slane %v5449_v63, 4  ;;  %v5468_v27 = vshll.u32 %v5297_v58, 16  ;;  %v8047_v7 = vrot.slane %v6157_v1, 9  ;;  %v1994_v26 = vld [vmem:[#allocation8 + $0x124] sm:$0xf] }
 0x248   : > { %6140 = vst.msk [vmem:[#allocation2 + $0x58] sm:$0xff] %vm6128_vm14, %v6103_v20  ;;  %3683 = vrot.lane.b32.xlu0 %v7871_v38, %s8656_s6  ;;  %v5441_v49 = vor.u32 %v5440_v13, %v5436_v11  ;;  %v5462_v20 = vshrl.u32 %v5296_v50, 16  ;;  %v5454_v24 = vrot.slane %v5452_v6, 5  ;;  %v5460_v25 = vrot.slane %v5458_v30, 5  ;;  %v1995_v18 = vld [vmem:[#allocation8 + $0x128] sm:$0x1] }
 0x249   : > { %2241 = vrot.lane.b32.xlu1 %v7808_v59, %s8654_s21  ;;  %v7872_v59 = vcombine.low %v3376_v40, %v3386_v53  ;;  %v5432_v16 = vrot.slane %v5431_v5, 4  ;;  %v6271_v19 = vrot.slane %v6158_v3, 5  ;;  %v6274_v55 = vrot.slane %v6159_v10, 5  ;;  %v1996_v46 = vld [vmem:[#allocation8 + $0x12c] sm:$0xe] }
 0x24a   : > { %v3155_v32 = vpop.permute.xlu0 %3154  ;;  %v5442_v2 = vrot.slane %v5441_v49, 4  ;;  %v5464_v14 = vrot.slane %v5462_v20, 4  ;;  %v5455_v62 = vor.u32 %v5454_v24, %v5451_v21  ;;  %v8048_v40 = vrot.slane %v6160_v31, 9  ;;  %v1997_v47 = vld [vmem:[#allocation8 + $0x130] sm:$0xf] }
 0x24b   : > { %v1937_v37 = vpop.permute.xlu1 %1936  ;;  %3191 = vst.msk [vmem:[#allocation2 + $0x60] sm:$0xff] %vm3178_vm10, %v3155_v32  ;;  %v5437_v54 = vsel %vm8833_vm2, %v5432_v16, %v5436_v11  ;;  %v10019_v28 = vsel %vm8991_vm5, %v8047_v7, %v6271_v19  ;;  %v6273_v34 = vrot.slane %v6271_v19, 4  ;;  %v6278_v41 = vrot.slane %v6161_v48, 5  ;;  %v1998_v17 = vld [vmem:[#allocation8 + $0x134] sm:$0x1] }
 0x24c   : > { %1972 = vst.msk [vmem:[#allocation2 + $0x68] sm:$0xff] %vm1958_vm8, %v1937_v37  ;;  %4324 = vrot.lane.b32.xlu0 %v7935_v15, %s8657_s10  ;;  %v5447_v37 = vsel %vm8833_vm2, %v5442_v2, %v5446_v12  ;;  %v5465_v38 = vor.u32 %v5464_v14, %v5460_v25  ;;  %v5456_v43 = vrot.slane %v5455_v62, 4  ;;  %v6281_v45 = vrot.slane %v6162_v35, 5  ;;  %v3213_v61 = vld [vmem:[#allocation8 + $0x12c] sm:$0xf] }
 0x24d   : > { %2596 = vrot.lane.b32.xlu1 %v8443_v33, %s8655_s24  ;;  %v5470_v33 = vrot.slane %v5468_v27, 5  ;;  %v7999_v15 = vcombine.low %v5437_v54, %v5447_v37  ;;  %v6275_v44 = vsel %vm8991_vm5, %v6273_v34, %v6274_v55  ;;  %v6279_v53 = vsel %vm8991_vm5, %v8048_v40, %v6278_v41  ;;  %v3215_v5 = vld [vmem:[#allocation8 + $0x134] sm:$0x1]  ;;  %v3216_v21 = vld [vmem:[#allocation8 + $0x138] sm:$0xf] }
 0x24e   : > { %v4020_v36 = vpop.permute.xlu0 %4019  ;;  %v5466_v51 = vrot.slane %v5465_v38, 4  ;;  %v8063_v52 = vcombine.low %v10019_v28, %v6275_v44  ;;  %v6280_v56 = vrot.slane %v6278_v41, 4  ;;  %v5461_v57 = vsel %vm8833_vm2, %v5456_v43, %v5460_v25  ;;  %v3217_v49 = vld [vmem:[#allocation8 + $0x13c] sm:$0xf]  ;;  %v3218_v16 = vld [vmem:[#allocation8 + $0x140] sm:$0x1] }
 0x24f   : > { %v2435_v4 = vpop.permute.xlu1 %2434  ;;  %v6476_v8 = vld [vmem:[#allocation2 + $0x58] sm:$0xff]  ;;  %4056 = vst.msk [vmem:[#allocation2 + $0x60] sm:$0xff] %vm4043_vm11, %v4020_v36  ;;  %v7793_v58 = vrot.slane %v1993_v22, 9  ;;  %v2118_v60 = vrot.slane %v1995_v18, 5  ;;  %v2125_v32 = vrot.slane %v1998_v17, 5  ;;  %v3391_v27 = vshll.u32 %v3213_v61, 16 }
 0x250   : > { %2470 = vst.msk [vmem:[#allocation2 + $0x68] sm:$0xff] %vm2456_vm9, %v2435_v4  ;;  %8220 = vmatmul.mubr.msk.bf16.gmra.mrb[20].mxu0 %vm6533_vm0, %v6476_v8  ;;  %4679 = vrot.lane.b32.xlu0 %v8444_v23, %s8658_s11  ;;  %v5471_v1 = vsel %vm8833_vm2, %v5466_v51, %v5470_v33  ;;  %v6282_v3 = vsel %vm8991_vm5, %v6280_v56, %v6281_v45  ;;  %v7794_v4 = vrot.slane %v1996_v46, 9  ;;  %v2122_v8 = vrot.slane %v1997_v47, 5  ;;  %v4078_v2 = vld [vmem:[#allocation8 + $0x12c] sm:$0xe] }
 0x251   : > { %3685 = vrot.lane.b32.xlu1 %v7872_v59, %s8656_s6  ;;  %v2115_v59 = vrot.slane %v1994_v26, 5  ;;  %v8000_v11 = vcombine.low %v5461_v57, %v5471_v1  ;;  %v8064_v13 = vcombine.low %v6279_v53, %v6282_v3  ;;  %v3388_v23 = vshrl.u32 %v3213_v61, 16  ;;  %v4079_v26 = vld [vmem:[#allocation8 + $0x130] sm:$0xf]  ;;  %v4080_v18 = vld [vmem:[#allocation8 + $0x134] sm:$0x1] }
 0x252   : > { %v4518_v63 = vpop.permute.xlu0 %4517  ;;  %v10045_v30 = vsel %vm8991_vm5, %v7794_v4, %v2122_v8  ;;  %v2124_v31 = vrot.slane %v2122_v8, 4  ;;  %v3393_v33 = vrot.slane %v3391_v27, 5  ;;  %v3412_v62 = vshrl.u32 %v3216_v21, 16  ;;  %v4081_v41 = vld [vmem:[#allocation8 + $0x138] sm:$0xe]  ;;  %v8446_v17 = vld [vmem:[#allocation8 + $0x12c] sm:$0xff]  }
 0x253   : > { %v3157_v0 = vpop.permute.xlu1 %3156  ;;  %4554 = vst.msk [vmem:[#allocation2 + $0x60] sm:$0xff] %vm4541_vm12, %v4518_v63  ;;  %v2116_v12 = vsel %vm8991_vm5, %v7793_v58, %v2115_v59  ;;  %v2117_v10 = vrot.slane %v2115_v59, 4  ;;  %v3390_v35 = vrot.slane %v3388_v23, 4  ;;  %v3415_v28 = vshll.u32 %v3216_v21, 16  ;;  %v4082_v47 = vld [vmem:[#allocation8 + $0x13c] sm:$0xf] }
 0x254   : > { %3192 = vst.msk [vmem:[#allocation2 + $0x68] sm:$0xff] %vm3178_vm10, %v3157_v0  ;;  %5768 = vrot.lane.b32.xlu0 %v7999_v15, %s8659_s22  ;;  %v2126_v19 = vsel %vm8991_vm5, %v2124_v31, %v2125_v32  ;;  %v3407_v0 = vshll.u32 %v3215_v5, 16  ;;  %v3421_v34 = vshll.u32 %v3217_v49, 16  ;;  %v3425_v38 = vshrl.u32 %v3217_v49, 16  ;;  %v5298_v8 = vld [vmem:[#allocation8 + $0x138] sm:$0xf] }
 0x255   : > { %4326 = vrot.lane.b32.xlu1 %v7936_v9, %s8657_s10  ;;  %v3214_v9 = vld [vmem:[#allocation8 + $0x130] sm:$0xf]  ;;  %v2119_v20 = vsel %vm8991_vm5, %v2117_v10, %v2118_v60  ;;  %v7810_v14 = vcombine.low %v10045_v30, %v2126_v19  ;;  %v3394_v36 = vor.u32 %v3393_v33, %v3390_v35  ;;  %v3431_v40 = vshll.u32 %v3218_v16, 16  ;;  %v4083_v60 = vld [vmem:[#allocation8 + $0x140] sm:$0x1] }
 0x256   : > { %v3397_v7 = vshll.u32 %v3214_v9, 16  ;;  %v3401_v48 = vshrl.u32 %v3214_v9, 16  ;;  %v5240_v24 = vpop.permute.xlu0 %5239  ;;  %v7809_v25 = vcombine.low %v2116_v12, %v2119_v20  ;;  %v3409_v54 = vrot.slane %v3407_v0, 5  ;;  %v5299_v21 = vld [vmem:[#allocation8 + $0x13c] sm:$0xf] }
 0x257   : > { %v4022_v50 = vpop.permute.xlu1 %4021  ;;  %5276 = vst.msk [vmem:[#allocation2 + $0x60] sm:$0xff] %vm5263_vm13, %v5240_v24  ;;  %v3414_v43 = vrot.slane %v3412_v62, 4  ;;  %v3417_v44 = vrot.slane %v3415_v28, 5  ;;  %v3423_v45 = vrot.slane %v3421_v34, 5  ;;  %v7921_v46 = vrot.slane %v4078_v2, 9 }
 0x258   : > { %4057 = vst.msk [vmem:[#allocation2 + $0x68] sm:$0xff] %vm4043_vm11, %v4022_v50  ;;  %v3399_v55 = vrot.slane %v3397_v7, 5  ;;  %v3403_v22 = vrot.slane %v3401_v48, 4  ;;  %6409 = vrot.lane.b32.xlu0 %v8063_v52, %s8660_s26  ;;  %v3395_v50 = vrot.slane %v3394_v36, 4  ;;  %v3427_v52 = vrot.slane %v3425_v38, 4 }
 0x259   : > { %4681 = vrot.lane.b32.xlu1 %v8445_v29, %s8658_s11  ;;  %v3433_v53 = vrot.slane %v3431_v40, 5  ;;  %v3418_v57 = vor.u32 %v3417_v44, %v3414_v43  ;;  %v4200_v58 = vrot.slane %v4079_v26, 5  ;;  %v4203_v59 = vrot.slane %v4080_v18, 5  ;;  %v5300_v27 = vld [vmem:[#allocation8 + $0x140] sm:$0x1] }
 0x25a   : > { %v3404_v37 = vor.u32 %v3403_v22, %v3399_v55  ;;  %v6105_v15 = vpop.permute.xlu0 %6104  ;;  %v7922_v61 = vrot.slane %v4081_v41, 9  ;;  %v3400_v63 = vsel %vm8833_vm2, %v3395_v50, %v3399_v55  ;;  %v3428_v3 = vor.u32 %v3427_v52, %v3423_v45  ;;  %v5301_v16 = vld [vmem:[#allocation8 + $0x144] sm:$0xf]  ;;  %v5302_v0 = vld [vmem:[#allocation8 + $0x148] sm:$0xf] }
 0x25b   : > { %v4520_v6 = vpop.permute.xlu1 %4519  ;;  %6141 = vst.msk [vmem:[#allocation2 + $0x60] sm:$0xff] %vm6128_vm14, %v6105_v15  ;;  %v4207_v4 = vrot.slane %v4082_v47, 5  ;;  %v3419_v12 = vrot.slane %v3418_v57, 4  ;;  %v10068_v10 = vsel %vm8991_vm5, %v7921_v46, %v4200_v58  ;;  %v4202_v5 = vrot.slane %v4200_v58, 4  ;;  %v5303_v2 = vld [vmem:[#allocation8 + $0x14c] sm:$0x1] }
 0x25c   : > { %4555 = vst.msk [vmem:[#allocation2 + $0x68] sm:$0xff] %vm4541_vm12, %v4520_v6  ;;  %v3405_v51 = vrot.slane %v3404_v37, 4  ;;  %2243 = vrot.lane.b32.xlu0 %v7809_v25, %s8654_s21  ;;  %v3429_v6 = vrot.slane %v3428_v3, 4  ;;  %v4210_v32 = vrot.slane %v4083_v60, 5  ;;  %v5473_v7 = vshrl.u32 %v5298_v8, 16 }
 0x25d   : > { %5770 = vrot.lane.b32.xlu1 %v8000_v11, %s8659_s22  ;;  %v8447_v11 = vld [vmem:[#allocation8 + $0x138] sm:$0xff]   ;;  %v10073_v30 = vsel %vm8991_vm5, %v7922_v61, %v4207_v4  ;;  %v4209_v31 = vrot.slane %v4207_v4, 4  ;;  %v3424_v49 = vsel %vm8833_vm2, %v3419_v12, %v3423_v45  ;;  %v4204_v20 = vsel %vm8991_vm5, %v4202_v5, %v4203_v59  ;;  %v6165_v37 = vld [vmem:[#allocation8 + $0x140] sm:$0x1]  ;;  %v6166_v45 = vld [vmem:[#allocation8 + $0x144] sm:$0xe] }
 0x25e   : > { %v3410_v1 = vsel %vm8833_vm2, %v3405_v51, %v3409_v54  ;;  %v1939_v9 = vpop.permute.xlu0 %1938  ;;  %v5476_v48 = vshll.u32 %v5298_v8, 16  ;;  %v3434_v24 = vsel %vm8833_vm2, %v3429_v6, %v3433_v53  ;;  %v7937_v25 = vcombine.low %v10068_v10, %v4204_v20  ;;  %v6164_v54 = vld [vmem:[#allocation8 + $0x13c] sm:$0xf]  ;;  %v6167_v52 = vld [vmem:[#allocation8 + $0x148] sm:$0xf] }
 0x25f   : > { %v5242_v29 = vpop.permute.xlu1 %5241  ;;  %1973 = vst.msk [vmem:[#allocation2 + $0x70] sm:$0xff] %vm1958_vm8, %v1939_v9  ;;  %v4211_v19 = vsel %vm8991_vm5, %v4209_v31, %v4210_v32  ;;  %v5482_v35 = vshll.u32 %v5299_v21, 16  ;;  %v7874_v55 = vcombine.low %v3424_v49, %v3434_v24  ;;  %v5475_v26 = vrot.slane %v5473_v7, 4  ;;  %v10095_v53 = vld [vmem:[#allocation8 + $0x14c] sm:$0x1]  ;;  %v8448_v9 = vld [vmem:[#allocation8 + $0x138] sm:$0xff]  }
 0x260   : > { %5277 = vst.msk [vmem:[#allocation2 + $0x68] sm:$0xff] %vm5263_vm13, %v5242_v29  ;;  %2598 = vrot.lane.b32.xlu0 %v8446_v17, %s8655_s24  ;;  %v7938_v22 = vcombine.low %v10073_v30, %v4211_v19  ;;  %v5478_v18 = vrot.slane %v5476_v48, 5  ;;  %v6163_v29 = vld [vmem:[#allocation8 + $0x138] sm:$0xe]  ;;  %v5486_v28 = vshrl.u32 %v5299_v21, 16  ;;  %v5492_v34 = vshll.u32 %v5300_v27, 16 }
 0x261   : > { %6411 = vrot.lane.b32.xlu1 %v8064_v13, %s8660_s26  ;;  %v7873_v13 = vcombine.low %v3400_v63, %v3410_v1  ;;  %v10090_v62 = vrot.slane %v5482_v35, 5  ;;  %v5497_v36 = vshrl.u32 %v5301_v16, 16  ;;  %v5500_v15 = vshll.u32 %v5301_v16, 16  ;;  %v1999_v60 = vld [vmem:[#allocation8 + $0x138] sm:$0xe]  ;;  %v8449_v5 = vld [vmem:[#allocation8 + $0x144] sm:$0xff]  }
 0x262   : > { %v6477_v33 = vld [vmem:[#allocation2 + $0x60] sm:$0xff]  ;;  %v5479_v41 = vor.u32 %v5478_v18, %v5475_v26  ;;  %v5506_v43 = vshll.u32 %v5302_v0, 16  ;;  %v5510_v44 = vshrl.u32 %v5302_v0, 16  ;;  %v5488_v46 = vrot.slane %v5486_v28, 4  ;;  %v2002_v19 = vld [vmem:[#allocation8 + $0x144] sm:$0xe] }
 0x263   : > { %v6107_v56 = vpop.permute.xlu1 %6106  ;;  %8223 = vmatprep.mubr.msk.bf16.mxu0 %vm6533_vm0, %v6477_v33  ;;  %v5494_v47 = vrot.slane %v5492_v34, 5  ;;  %v5499_v50 = vrot.slane %v5497_v36, 4  ;;  %v5516_v51 = vshll.u32 %v5303_v2, 16  ;;  %v5502_v57 = vrot.slane %v5500_v15, 5  ;;  %v2000_v61 = vld [vmem:[#allocation8 + $0x13c] sm:$0xf] }
 0x264   : > { %6142 = vst.msk [vmem:[#allocation2 + $0x68] sm:$0xff] %vm6128_vm14, %v6107_v56  ;;  %3687 = vrot.lane.b32.xlu0 %v7873_v13, %s8656_s6  ;;  %v5480_v17 = vrot.slane %v5479_v41, 4  ;;  %v5508_v58 = vrot.slane %v5506_v43, 5  ;;  %v5512_v59 = vrot.slane %v5510_v44, 4  ;;  %v5489_v63 = vor.u32 %v5488_v46, %v10090_v62  ;;  %v2001_v7 = vld [vmem:[#allocation8 + $0x140] sm:$0x1] }
 0x265   : > { %2245 = vrot.lane.b32.xlu1 %v7810_v14, %s8654_s21  ;;  %v2437_v14 = vpop.permute.xlu0 %2436  ;;  %v5518_v1 = vrot.slane %v5516_v51, 5  ;;  %v8049_v3 = vrot.slane %v6163_v29, 9  ;;  %v6285_v4 = vrot.slane %v6164_v54, 5  ;;  %v5503_v13 = vor.u32 %v5502_v57, %v5499_v50  ;;  %v2003_v35 = vld [vmem:[#allocation8 + $0x148] sm:$0xf] }
 0x266   : > { %2471 = vst.msk [vmem:[#allocation2 + $0x70] sm:$0xff] %vm2456_vm9, %v2437_v14  ;;  %v5513_v12 = vor.u32 %v5512_v59, %v5508_v58  ;;  %v6288_v10 = vrot.slane %v6165_v37, 5  ;;  %v5490_v21 = vrot.slane %v5489_v63, 4  ;;  %v8050_v31 = vrot.slane %v6166_v45, 9  ;;  %v3219_v26 = vld [vmem:[#allocation8 + $0x144] sm:$0xf] }
 0x267   : > { %v1941_v23 = vpop.permute.xlu1 %1940  ;;  %v10107_v6 = vsel %vm8991_vm5, %v8049_v3, %v6285_v4  ;;  %v6287_v30 = vrot.slane %v6285_v4, 4  ;;  %v6292_v20 = vrot.slane %v6167_v52, 5  ;;  %v6295_v27 = vrot.slane %v10095_v53, 5  ;;  %v3220_v28 = vld [vmem:[#allocation8 + $0x148] sm:$0xf] }
 0x268   : > { %1974 = vst.msk [vmem:[#allocation2 + $0x78] sm:$0xff] %vm1958_vm8, %v1941_v23  ;;  %4328 = vrot.lane.b32.xlu0 %v7937_v25, %s8657_s10  ;;  %v5504_v23 = vrot.slane %v5503_v13, 4  ;;  %v5514_v49 = vrot.slane %v5513_v12, 4  ;;  %v5495_v48 = vsel %vm8833_vm2, %v5490_v21, %v5494_v47  ;;  %v7795_v24 = vrot.slane %v1999_v60, 9  ;;  %v3221_v41 = vld [vmem:[#allocation8 + $0x14c] sm:$0x1] }
 0x269   : > { %2600 = vrot.lane.b32.xlu1 %v8447_v11, %s8655_s24  ;;  %v3159_v56 = vpop.permute.xlu0 %3158  ;;  %v5485_v11 = vsel %vm8833_vm2, %v5480_v17, %v10090_v62  ;;  %v6289_v16 = vsel %vm8991_vm5, %v6287_v30, %v6288_v10  ;;  %v2129_v25 = vrot.slane %v2000_v61, 5  ;;  %v6293_v29 = vsel %vm8991_vm5, %v8050_v31, %v6292_v20  ;;  %v3222_v46 = vld [vmem:[#allocation8 + $0x150] sm:$0xf]  ;;  %v3224_v17 = vld [vmem:[#allocation8 + $0x158] sm:$0x1] }
 0x26a   : > { %3193 = vst.msk [vmem:[#allocation2 + $0x70] sm:$0xff] %vm3178_vm10, %v3159_v56  ;;  %v8001_v2 = vcombine.low %v5485_v11, %v5495_v48  ;;  %v5509_v14 = vsel %vm8833_vm2, %v5504_v23, %v5508_v58  ;;  %v5519_v33 = vsel %vm8833_vm2, %v5514_v49, %v5518_v1  ;;  %v6294_v54 = vrot.slane %v6292_v20, 4  ;;  %v3223_v56 = vld [vmem:[#allocation8 + $0x154] sm:$0xf]  ;;  %v4084_v61 = vld [vmem:[#allocation8 + $0x144] sm:$0xe] }
 0x26b   : > { %v2439_v38 = vpop.permute.xlu1 %2438  ;;  %v6478_v40 = vld [vmem:[#allocation2 + $0x68] sm:$0xff]  ;;  %v8002_v18 = vcombine.low %v5509_v14, %v5519_v33  ;;  %v10127_v62 = vsel %vm8991_vm5, %v7795_v24, %v2129_v25  ;;  %v2131_v36 = vrot.slane %v2129_v25, 4  ;;  %v2132_v37 = vrot.slane %v2001_v7, 5  ;;  %v4087_v7 = vld [vmem:[#allocation8 + $0x150] sm:$0xe] }
 0x26c   : > { %2472 = vst.msk [vmem:[#allocation2 + $0x78] sm:$0xff] %vm2456_vm9, %v2439_v38  ;;  %8224 = vmatmul.mubr.msk.bf16.gmra.mrb[24].mxu0 %vm6533_vm0, %v6478_v40  ;;  %4683 = vrot.lane.b32.xlu0 %v8448_v9, %s8658_s11  ;;  %v7796_v38 = vrot.slane %v2002_v19, 9  ;;  %v2136_v40 = vrot.slane %v2003_v35, 5  ;;  %v6296_v15 = vsel %vm8991_vm5, %v6294_v54, %v6295_v27  ;;  %v3436_v44 = vshrl.u32 %v3219_v26, 16  ;;  %v4085_v63 = vld [vmem:[#allocation8 + $0x148] sm:$0xf] }
 0x26d   : > { %3689 = vrot.lane.b32.xlu1 %v7874_v55, %s8656_s6  ;;  %v4024_v32 = vpop.permute.xlu0 %4023  ;;  %v8065_v55 = vcombine.low %v10107_v6, %v6289_v16  ;;  %v3439_v45 = vshll.u32 %v3219_v26, 16  ;;  %v8066_v50 = vcombine.low %v6293_v29, %v6296_v15  ;;  %v2133_v51 = vsel %vm8991_vm5, %v2131_v36, %v2132_v37  ;;  %v4088_v35 = vld [vmem:[#allocation8 + $0x154] sm:$0xf] }
 0x26e   : > { %4058 = vst.msk [vmem:[#allocation2 + $0x70] sm:$0xff] %vm4043_vm11, %v4024_v32  ;;  %v2137_v52 = vsel %vm8991_vm5, %v7796_v38, %v2136_v40  ;;  %v2138_v53 = vrot.slane %v2136_v40, 4  ;;  %v7811_v57 = vcombine.low %v10127_v62, %v2133_v51  ;;  %v3438_v58 = vrot.slane %v3436_v44, 4  ;;  %v4086_v32 = vld [vmem:[#allocation8 + $0x14c] sm:$0x1] }
 0x26f   : > { %v3161_v8 = vpop.permute.xlu1 %3160  ;;  %v3441_v59 = vrot.slane %v3439_v45, 5  ;;  %v3445_v60 = vshll.u32 %v3220_v28, 16  ;;  %v3449_v4 = vshrl.u32 %v3220_v28, 16  ;;  %v3460_v9 = vshrl.u32 %v3222_v46, 16  ;;  %v5305_v45 = vld [vmem:[#allocation8 + $0x154] sm:$0xf] }
 0x270   : > { %3194 = vst.msk [vmem:[#allocation2 + $0x78] sm:$0xff] %vm3178_vm10, %v3161_v8  ;;  %5772 = vrot.lane.b32.xlu0 %v8001_v2, %s8659_s22  ;;  %v3455_v8 = vshll.u32 %v3221_v41, 16  ;;  %v3463_v10 = vshll.u32 %v3222_v46, 16  ;;  %v3469_v31 = vshll.u32 %v3223_v56, 16  ;;  %v3473_v20 = vshrl.u32 %v3223_v56, 16 }
 0x271   : > { %4330 = vrot.lane.b32.xlu1 %v7938_v22, %s8657_s10  ;;  %v2004_v22 = vld [vmem:[#allocation8 + $0x14c] sm:$0x1]  ;;  %v4522_v34 = vpop.permute.xlu0 %4521  ;;  %v3442_v13 = vor.u32 %v3441_v59, %v3438_v58  ;;  %v3447_v12 = vrot.slane %v3445_v60, 5  ;;  %v3451_v21 = vrot.slane %v3449_v4, 4  ;;  %v3462_v30 = vrot.slane %v3460_v9, 4 }
 0x272   : > { %4556 = vst.msk [vmem:[#allocation2 + $0x70] sm:$0xff] %vm4541_vm12, %v4522_v34  ;;  %v2139_v43 = vrot.slane %v2004_v22, 5  ;;  %v3457_v6 = vrot.slane %v3455_v8, 5  ;;  %v3465_v49 = vrot.slane %v3463_v10, 5  ;;  %v3479_v27 = vshll.u32 %v3224_v17, 16  ;;  %v8451_v34 = vld [vmem:[#allocation8 + $0x150] sm:$0xff]  }
 0x273   : > { %v4026_v0 = vpop.permute.xlu1 %4025  ;;  %v3443_v23 = vrot.slane %v3442_v13, 4  ;;  %v3452_v16 = vor.u32 %v3451_v21, %v3447_v12  ;;  %v3471_v24 = vrot.slane %v3469_v31, 5  ;;  %v7923_v25 = vrot.slane %v4084_v61, 9  ;;  %v5304_v22 = vld [vmem:[#allocation8 + $0x150] sm:$0xf] }
 0x274   : > { %4059 = vst.msk [vmem:[#allocation2 + $0x78] sm:$0xff] %vm4043_vm11, %v4026_v0  ;;  %v2140_v3 = vsel %vm8991_vm5, %v2138_v53, %v2139_v43  ;;  %6413 = vrot.lane.b32.xlu0 %v8065_v55, %s8660_s26  ;;  %v4214_v19 = vrot.slane %v4085_v63, 5  ;;  %v3466_v2 = vor.u32 %v3465_v49, %v3462_v30  ;;  %v3475_v14 = vrot.slane %v3473_v20, 4  ;;  %v4089_v55 = vld [vmem:[#allocation8 + $0x158] sm:$0x1] }
 0x275   : > { %4685 = vrot.lane.b32.xlu1 %v8449_v5, %s8658_s11  ;;  %v5244_v1 = vpop.permute.xlu0 %5243  ;;  %v7812_v11 = vcombine.low %v2137_v52, %v2140_v3  ;;  %v3448_v0 = vsel %vm8833_vm2, %v3443_v23, %v3447_v12  ;;  %v3481_v33 = vrot.slane %v3479_v27, 5  ;;  %v3453_v29 = vrot.slane %v3452_v16, 4  ;;  %v5306_v46 = vld [vmem:[#allocation8 + $0x158] sm:$0x1]  ;;  %v5307_v56 = vld [vmem:[#allocation8 + $0x15c] sm:$0xf] }
 0x276   : > { %5278 = vst.msk [vmem:[#allocation2 + $0x70] sm:$0xff] %vm5263_vm13, %v5244_v1  ;;  %v10153_v54 = vsel %vm8991_vm5, %v7923_v25, %v4214_v19  ;;  %v4216_v62 = vrot.slane %v4214_v19, 4  ;;  %v4217_v28 = vrot.slane %v4086_v32, 5  ;;  %v3467_v36 = vrot.slane %v3466_v2, 4  ;;  %v5308_v17 = vld [vmem:[#allocation8 + $0x160] sm:$0xf] }
 0x277   : > { %v4524_v47 = vpop.permute.xlu1 %4523  ;;  %v3476_v37 = vor.u32 %v3475_v14, %v3471_v24  ;;  %v7924_v38 = vrot.slane %v4087_v7, 9  ;;  %v4221_v40 = vrot.slane %v4088_v35, 5  ;;  %v3458_v15 = vsel %vm8833_vm2, %v3453_v29, %v3457_v6  ;;  %v5309_v63 = vld [vmem:[#allocation8 + $0x164] sm:$0x1]  ;;  %v6169_v9 = vld [vmem:[#allocation8 + $0x150] sm:$0xe] }
 0x278   : > { %4557 = vst.msk [vmem:[#allocation2 + $0x78] sm:$0xff] %vm4541_vm12, %v4524_v47  ;;  %2247 = vrot.lane.b32.xlu0 %v7811_v57, %s8654_s21  ;;  %v10161_v43 = vsel %vm8991_vm5, %v4216_v62, %v4217_v28  ;;  %v4224_v44 = vrot.slane %v4089_v55, 5  ;;  %v5521_v47 = vshrl.u32 %v5304_v22, 16  ;;  %v3472_v51 = vsel %vm8833_vm2, %v3467_v36, %v3471_v24  ;;  %v6170_v6 = vld [vmem:[#allocation8 + $0x154] sm:$0xf] }
 0x279   : > { %5774 = vrot.lane.b32.xlu1 %v8002_v18, %s8659_s22  ;;  %v6109_v48 = vpop.permute.xlu0 %6108  ;;  %v8450_v18 = vld [vmem:[#allocation8 + $0x144] sm:$0xff]   ;;  %v3477_v52 = vrot.slane %v3476_v37, 4  ;;  %v7939_v53 = vcombine.low %v10153_v54, %v10161_v43  ;;  %v10171_v58 = vsel %vm8991_vm5, %v7924_v38, %v4221_v40  ;;  %v4223_v59 = vrot.slane %v4221_v40, 4  ;;  %v6171_v49 = vld [vmem:[#allocation8 + $0x158] sm:$0x1]  ;;  %v8452_v55 = vld [vmem:[#allocation8 + $0x150] sm:$0xff]  }
 0x27a   : > { %6143 = vst.msk [vmem:[#allocation2 + $0x70] sm:$0xff] %vm6128_vm14, %v6109_v48  ;;  %v5523_v60 = vrot.slane %v5521_v47, 4  ;;  %v5524_v61 = vshll.u32 %v5304_v22, 16  ;;  %v5530_v3 = vshll.u32 %v5305_v45, 16  ;;  %v5534_v4 = vshrl.u32 %v5305_v45, 16 }
 0x27b   : > { %v5246_v5 = vpop.permute.xlu1 %5245  ;;  %v3482_v1 = vsel %vm8833_vm2, %v3477_v52, %v3481_v33  ;;  %v5540_v8 = vshll.u32 %v5306_v46, 16  ;;  %v4225_v10 = vsel %vm8991_vm5, %v4223_v59, %v4224_v44  ;;  %v5545_v21 = vshrl.u32 %v5307_v56, 16  ;;  %v6172_v25 = vld [vmem:[#allocation8 + $0x15c] sm:$0xe]  ;;  %v6173_v14 = vld [vmem:[#allocation8 + $0x160] sm:$0xf] }
 0x27c   : > { %5279 = vst.msk [vmem:[#allocation2 + $0x78] sm:$0xff] %vm5263_vm13, %v5246_v5  ;;  %2602 = vrot.lane.b32.xlu0 %v8450_v18, %s8655_s24  ;;  %v7876_v12 = vcombine.low %v3472_v51, %v3482_v1  ;;  %v5526_v5 = vrot.slane %v5524_v61, 5  ;;  %v7940_v30 = vcombine.low %v10171_v58, %v4225_v10  ;;  %v5532_v31 = vrot.slane %v5530_v3, 5  ;;  %v6174_v54 = vld [vmem:[#allocation8 + $0x164] sm:$0x1] }
 0x27d   : > { %6415 = vrot.lane.b32.xlu1 %v8066_v50, %s8660_s26  ;;  %v2232_v41 = vpop.permute.xlu0 %2231  ;;  %v7875_v50 = vcombine.low %v3448_v0, %v3458_v15  ;;  %v5536_v32 = vrot.slane %v5534_v4, 4  ;;  %v5542_v23 = vrot.slane %v5540_v8, 5  ;;  %v5547_v48 = vrot.slane %v5545_v21, 4  ;;  %v2005_v37 = vld [vmem:[#allocation8 + $0x150] sm:$0xe] }
 0x27e   : > { %2279 = vst.msk [vmem:[#allocation2 + $0x80] sm:$0xff] %vm1958_vm8, %v2232_v41  ;;  %v5527_v7 = vor.u32 %v5526_v5, %v5523_v60  ;;  %v5548_v16 = vshll.u32 %v5307_v56, 16  ;;  %v5554_v24 = vshll.u32 %v5308_v17, 16  ;;  %v5558_v35 = vshrl.u32 %v5308_v17, 16  ;;  %v2006_v38 = vld [vmem:[#allocation8 + $0x154] sm:$0xf] }
 0x27f   : > { %v6111_v26 = vpop.permute.xlu1 %6110  ;;  %v5537_v19 = vor.u32 %v5536_v32, %v5532_v31  ;;  %v5564_v0 = vshll.u32 %v5309_v63, 16  ;;  %v8051_v2 = vrot.slane %v6169_v9, 9  ;;  %v6299_v29 = vrot.slane %v6170_v6, 5  ;;  %v8453_v41 = vld [vmem:[#allocation8 + $0x15c] sm:$0xff]   ;;  %v2007_v52 = vld [vmem:[#allocation8 + $0x158] sm:$0x1] }
 0x280   : > { %6144 = vst.msk [vmem:[#allocation2 + $0x78] sm:$0xff] %vm6128_vm14, %v6111_v26  ;;  %3691 = vrot.lane.b32.xlu0 %v7875_v50, %s8656_s6  ;;  %v5528_v22 = vrot.slane %v5527_v7, 4  ;;  %v5550_v26 = vrot.slane %v5548_v16, 5  ;;  %v5556_v18 = vrot.slane %v5554_v24, 5  ;;  %v5560_v28 = vrot.slane %v5558_v35, 4 }
 0x281   : > { %2249 = vrot.lane.b32.xlu1 %v7812_v11, %s8654_s21  ;;  %v2587_v11 = vpop.permute.xlu0 %2586  ;;  %v6479_v13 = vld [vmem:[#allocation2 + $0x70] sm:$0xff]  ;;  %v5538_v62 = vrot.slane %v5537_v19, 4  ;;  %v6302_v36 = vrot.slane %v6171_v49, 5  ;;  %v10192_v44 = vsel %vm8991_vm5, %v8051_v2, %v6299_v29  ;;  %v6301_v45 = vrot.slane %v6299_v29, 4  ;;  %v2008_v59 = vld [vmem:[#allocation8 + $0x15c] sm:$0xe] }
 0x282   : > { %2634 = vst.msk [vmem:[#allocation2 + $0x80] sm:$0xff] %vm2456_vm9, %v2587_v11  ;;  %8227 = vmatprep.mubr.msk.bf16.mxu0 %vm6533_vm0, %v6479_v13  ;;  %v5533_v15 = vsel %vm8833_vm2, %v5528_v22, %v5532_v31  ;;  %v5551_v43 = vor.u32 %v5550_v26, %v5547_v48  ;;  %v5561_v47 = vor.u32 %v5560_v28, %v5556_v18  ;;  %v8052_v50 = vrot.slane %v6172_v25, 9  ;;  %v2009_v60 = vld [vmem:[#allocation8 + $0x160] sm:$0xf]  ;;  %v2010_v4 = vld [vmem:[#allocation8 + $0x164] sm:$0x1] }
 0x283   : > { %v2234_v57 = vpop.permute.xlu1 %2233  ;;  %v5543_v46 = vsel %vm8833_vm2, %v5538_v62, %v5542_v23  ;;  %v6306_v51 = vrot.slane %v6173_v14, 5  ;;  %v6309_v58 = vrot.slane %v6174_v54, 5  ;;  %v7797_v11 = vrot.slane %v2005_v37, 9  ;;  %v3225_v10 = vld [vmem:[#allocation8 + $0x15c] sm:$0xf] }
 0x284   : > { %2280 = vst.msk [vmem:[#allocation2 + $0x88] sm:$0xff] %vm1958_vm8, %v2234_v57  ;;  %4332 = vrot.lane.b32.xlu0 %v7939_v53, %s8657_s10  ;;  %v8003_v56 = vcombine.low %v5533_v15, %v5543_v46  ;;  %v5552_v17 = vrot.slane %v5551_v43, 4  ;;  %v10200_v57 = vsel %vm8991_vm5, %v6301_v45, %v6302_v36  ;;  %v5562_v61 = vrot.slane %v5561_v47, 4  ;;  %v3226_v31 = vld [vmem:[#allocation8 + $0x160] sm:$0xf] }
 0x285   : > { %2604 = vrot.lane.b32.xlu1 %v8451_v34, %s8655_s24  ;;  %v3676_v33 = vpop.permute.xlu0 %3675  ;;  %v5566_v34 = vrot.slane %v5564_v0, 5  ;;  %v8067_v63 = vcombine.low %v10192_v44, %v10200_v57  ;;  %v10207_v1 = vsel %vm8991_vm5, %v8052_v50, %v6306_v51  ;;  %v6308_v3 = vrot.slane %v6306_v51, 4  ;;  %v3227_v32 = vld [vmem:[#allocation8 + $0x164] sm:$0x1]  ;;  %v3228_v48 = vld [vmem:[#allocation8 + $0x168] sm:$0xf] }
 0x286   : > { %3723 = vst.msk [vmem:[#allocation2 + $0x80] sm:$0xff] %vm3178_vm10, %v3676_v33  ;;  %v5557_v9 = vsel %vm8833_vm2, %v5552_v17, %v5556_v18  ;;  %v2143_v13 = vrot.slane %v2006_v38, 5  ;;  %v7798_v6 = vrot.slane %v2008_v59, 9  ;;  %v3229_v16 = vld [vmem:[#allocation8 + $0x16c] sm:$0xf]  ;;  %v2153_v19 = vrot.slane %v2010_v4, 5 }
 0x287   : > { %v2589_v20 = vpop.permute.xlu1 %2588  ;;  %v6480_v27 = vld [vmem:[#allocation2 + $0x78] sm:$0xff]  ;;  %v5567_v5 = vsel %vm8833_vm2, %v5562_v61, %v5566_v34  ;;  %v6310_v21 = vsel %vm8991_vm5, %v6308_v3, %v6309_v58  ;;  %v3484_v35 = vshrl.u32 %v3225_v10, 16  ;;  %v3230_v0 = vld [vmem:[#allocation8 + $0x170] sm:$0x1]  ;;  %v3487_v33 = vshll.u32 %v3225_v10, 16  ;;  %v8454_v10 = vld [vmem:[#allocation8 + $0x15c] sm:$0xff]  }
 0x288   : > { %2635 = vst.msk [vmem:[#allocation2 + $0x88] sm:$0xff] %vm2456_vm9, %v2589_v20  ;;  %8228 = vmatmul.mubr.msk.bf16.gmra.mrb[28].mxu0 %vm6533_vm0, %v6480_v27  ;;  %4687 = vrot.lane.b32.xlu0 %v8452_v55, %s8658_s11  ;;  %v8004_v49 = vcombine.low %v5557_v9, %v5567_v5  ;;  %v8068_v20 = vcombine.low %v10207_v1, %v6310_v21  ;;  %v2145_v7 = vrot.slane %v2143_v13, 4  ;;  %v3493_v55 = vshll.u32 %v3226_v31, 16  ;;  %v4090_v26 = vld [vmem:[#allocation8 + $0x15c] sm:$0xe] }
 0x289   : > { %3693 = vrot.lane.b32.xlu1 %v7876_v12, %s8656_s6  ;;  %v4317_v53 = vpop.permute.xlu0 %4316  ;;  %v2146_v12 = vrot.slane %v2007_v52, 5  ;;  %v2144_v27 = vsel %vm8991_vm5, %v7797_v11, %v2143_v13  ;;  %v3497_v22 = vshrl.u32 %v3226_v31, 16  ;;  %v3486_v54 = vrot.slane %v3484_v35, 4  ;;  %v4092_v52 = vld [vmem:[#allocation8 + $0x164] sm:$0x1] }
 0x28a   : > { %4364 = vst.msk [vmem:[#allocation2 + $0x80] sm:$0xff] %vm4043_vm11, %v4317_v53  ;;  %v3503_v62 = vshll.u32 %v3227_v32, 16  ;;  %v3489_v36 = vrot.slane %v3487_v33, 5  ;;  %v3495_v37 = vrot.slane %v3493_v55, 5  ;;  %v3508_v15 = vshrl.u32 %v3228_v48, 16 }
 0x28b   : > { %v3678_v40 = vpop.permute.xlu1 %3677  ;;  %v2147_v14 = vsel %vm8991_vm5, %v2145_v7, %v2146_v12  ;;  %v3499_v38 = vrot.slane %v3497_v22, 4  ;;  %v3511_v43 = vshll.u32 %v3228_v48, 16  ;;  %v3517_v44 = vshll.u32 %v3229_v16, 16  ;;  %v4093_v53 = vld [vmem:[#allocation8 + $0x168] sm:$0xe] }
 0x28c   : > { %3724 = vst.msk [vmem:[#allocation2 + $0x88] sm:$0xff] %vm3178_vm10, %v3678_v40  ;;  %5776 = vrot.lane.b32.xlu0 %v8003_v56, %s8659_s22  ;;  %v7813_v18 = vcombine.low %v2144_v27, %v2147_v14  ;;  %v4091_v40 = vld [vmem:[#allocation8 + $0x160] sm:$0xf]  ;;  %v3490_v46 = vor.u32 %v3489_v36, %v3486_v54  ;;  %v3521_v50 = vshrl.u32 %v3229_v16, 16  ;;  %v3527_v51 = vshll.u32 %v3230_v0, 16  ;;  %v8455_v48 = vld [vmem:[#allocation8 + $0x168] sm:$0xff]  }
 0x28d   : > { %4334 = vrot.lane.b32.xlu1 %v7940_v30, %s8657_s10  ;;  %v2150_v30 = vrot.slane %v2009_v60, 5  ;;  %v4672_v23 = vpop.permute.xlu0 %4671  ;;  %v3500_v47 = vor.u32 %v3499_v38, %v3495_v37  ;;  %v3510_v56 = vrot.slane %v3508_v15, 4  ;;  %v3513_v17 = vrot.slane %v3511_v43, 5  ;;  %v4094_v59 = vld [vmem:[#allocation8 + $0x16c] sm:$0xf] }
 0x28e   : > { %4719 = vst.msk [vmem:[#allocation2 + $0x80] sm:$0xff] %vm4541_vm12, %v4672_v23  ;;  %v3519_v57 = vrot.slane %v3517_v44, 5  ;;  %v7925_v58 = vrot.slane %v4090_v26, 9  ;;  %v3491_v61 = vrot.slane %v3490_v46, 4  ;;  %v3523_v3 = vrot.slane %v3521_v50, 4 }
 0x28f   : > { %v4319_v8 = vpop.permute.xlu1 %4318  ;;  %v10224_v24 = vsel %vm8991_vm5, %v7798_v6, %v2150_v30  ;;  %v2152_v25 = vrot.slane %v2150_v30, 4  ;;  %v3501_v1 = vrot.slane %v3500_v47, 4  ;;  %v3514_v4 = vor.u32 %v3513_v17, %v3510_v56  ;;  %v4095_v11 = vld [vmem:[#allocation8 + $0x170] sm:$0x1]  ;;  %v5310_v31 = vld [vmem:[#allocation8 + $0x168] sm:$0xf] }
 0x290   : > { %4365 = vst.msk [vmem:[#allocation2 + $0x88] sm:$0xff] %vm4043_vm11, %v4319_v8  ;;  %6417 = vrot.lane.b32.xlu0 %v8067_v63, %s8660_s26  ;;  %v3529_v63 = vrot.slane %v3527_v51, 5  ;;  %v4228_v8 = vrot.slane %v4091_v40, 5  ;;  %v4231_v9 = vrot.slane %v4092_v52, 5  ;;  %v7926_v13 = vrot.slane %v4093_v53, 9 }
 0x291   : > { %4689 = vrot.lane.b32.xlu1 %v8453_v41, %s8658_s11  ;;  %v2154_v29 = vsel %vm8991_vm5, %v2152_v25, %v2153_v19  ;;  %v5761_v28 = vpop.permute.xlu0 %5760  ;;  %v3505_v41 = vrot.slane %v3503_v62, 5  ;;  %v3496_v5 = vsel %vm8833_vm2, %v3491_v61, %v3495_v37  ;;  %v3524_v6 = vor.u32 %v3523_v3, %v3519_v57  ;;  %v5311_v27 = vld [vmem:[#allocation8 + $0x16c] sm:$0xf]  ;;  %v5313_v55 = vld [vmem:[#allocation8 + $0x174] sm:$0xf] }
 0x292   : > { %v7814_v34 = vcombine.low %v10224_v24, %v2154_v29  ;;  %5808 = vst.msk [vmem:[#allocation2 + $0x80] sm:$0xff] %vm5263_vm13, %v5761_v28  ;;  %v4235_v30 = vrot.slane %v4094_v59, 5  ;;  %v3515_v23 = vrot.slane %v3514_v4, 4  ;;  %v4238_v19 = vrot.slane %v4095_v11, 5  ;;  %v5314_v62 = vld [vmem:[#allocation8 + $0x178] sm:$0xf] }
 0x293   : > { %v4674_v2 = vpop.permute.xlu1 %4673  ;;  %v3506_v21 = vsel %vm8833_vm2, %v3501_v1, %v3505_v41  ;;  %v3525_v16 = vrot.slane %v3524_v6, 4  ;;  %v5569_v14 = vshrl.u32 %v5310_v31, 16  ;;  %v5572_v33 = vshll.u32 %v5310_v31, 16  ;;  %v5315_v28 = vld [vmem:[#allocation8 + $0x17c] sm:$0x1]  ;;  %v8456_v6 = vld [vmem:[#allocation8 + $0x168] sm:$0xff]  }
 0x294   : > { %4720 = vst.msk [vmem:[#allocation2 + $0x88] sm:$0xff] %vm4541_vm12, %v4674_v2  ;;  %2251 = vrot.lane.b32.xlu0 %v7813_v18, %s8654_s21  ;;  %v7877_v32 = vcombine.low %v3496_v5, %v3506_v21  ;;  %v10252_v24 = vsel %vm8991_vm5, %v7926_v13, %v4235_v30  ;;  %v4237_v25 = vrot.slane %v4235_v30, 4  ;;  %v3520_v35 = vsel %vm8833_vm2, %v3515_v23, %v3519_v57  ;;  %v5312_v2 = vld [vmem:[#allocation8 + $0x170] sm:$0x1]  ;;  %v6175_v40 = vld [vmem:[#allocation8 + $0x168] sm:$0xe] }
 0x295   : > { %5778 = vrot.lane.b32.xlu1 %v8004_v49, %s8659_s22  ;;  %v6402_v60 = vpop.permute.xlu0 %6401  ;;  %v10247_v49 = vsel %vm8991_vm5, %v7925_v58, %v4228_v8  ;;  %v3530_v26 = vsel %vm8833_vm2, %v3525_v16, %v3529_v63  ;;  %v5578_v54 = vshll.u32 %v5311_v27, 16  ;;  %v5571_v37 = vrot.slane %v5569_v14, 4  ;;  %v6176_v41 = vld [vmem:[#allocation8 + $0x16c] sm:$0xf]  ;;  %v6177_v50 = vld [vmem:[#allocation8 + $0x170] sm:$0x1] }
 0x296   : > { %6449 = vst.msk [vmem:[#allocation2 + $0x80] sm:$0xff] %vm6128_vm14, %v6402_v60  ;;  %v10268_v29 = vsel %vm8991_vm5, %v4237_v25, %v4238_v19  ;;  %v5574_v38 = vrot.slane %v5572_v33, 5  ;;  %v5588_v46 = vshll.u32 %v5312_v2, 16  ;;  %v5593_v47 = vshrl.u32 %v5313_v55, 16  ;;  %v10278_v17 = vld [vmem:[#allocation8 + $0x174] sm:$0xe] }
 0x297   : > { %v5763_v45 = vpop.permute.xlu1 %5762  ;;  %v7942_v36 = vcombine.low %v10252_v24, %v10268_v29  ;;  %v10274_v44 = vrot.slane %v5578_v54, 5  ;;  %v5596_v52 = vshll.u32 %v5313_v55, 16  ;;  %v5602_v53 = vshll.u32 %v5314_v62, 16  ;;  %v10281_v3 = vld [vmem:[#allocation8 + $0x178] sm:$0xf] }
 0x298   : > { %5809 = vst.msk [vmem:[#allocation2 + $0x88] sm:$0xff] %vm5263_vm13, %v5763_v45  ;;  %2606 = vrot.lane.b32.xlu0 %v8454_v10, %s8655_s24  ;;  %v5582_v45 = vshrl.u32 %v5311_v27, 16  ;;  %v5575_v51 = vor.u32 %v5574_v38, %v5571_v37  ;;  %v5606_v56 = vshrl.u32 %v5314_v62, 16  ;;  %v5590_v60 = vrot.slane %v5588_v46, 5  ;;  %v10285_v11 = vld [vmem:[#allocation8 + $0x17c] sm:$0x1] }
 0x299   : > { %6419 = vrot.lane.b32.xlu1 %v8068_v20, %s8660_s26  ;;  %v4230_v20 = vrot.slane %v4228_v8, 4  ;;  %v2236_v7 = vpop.permute.xlu0 %2235  ;;  %v5595_v61 = vrot.slane %v5593_v47, 4  ;;  %v5612_v1 = vshll.u32 %v5315_v28, 16  ;;  %v5598_v4 = vrot.slane %v5596_v52, 5  ;;  %v2011_v62 = vld [vmem:[#allocation8 + $0x168] sm:$0xe] }
 0x29a   : > { %2281 = vst.msk [vmem:[#allocation2 + $0x90] sm:$0xff] %vm1958_vm8, %v2236_v7  ;;  %v5584_v59 = vrot.slane %v5582_v45, 4  ;;  %v5576_v63 = vrot.slane %v5575_v51, 4  ;;  %v5604_v8 = vrot.slane %v5602_v53, 5  ;;  %v8053_v5 = vrot.slane %v6175_v40, 9 }
 0x29b   : > { %v6404_v12 = vpop.permute.xlu1 %6403  ;;  %v10259_v0 = vsel %vm8991_vm5, %v4230_v20, %v4231_v9  ;;  %v5608_v9 = vrot.slane %v5606_v56, 4  ;;  %v5614_v10 = vrot.slane %v5612_v1, 5  ;;  %v6313_v21 = vrot.slane %v6176_v41, 5  ;;  %v8201_v20 = vpop.f32.mrb[0].mxu0  ;;  %v2012_v28 = vld [vmem:[#allocation8 + $0x16c] sm:$0xf] }
 0x29c   : > { %6450 = vst.msk [vmem:[#allocation2 + $0x88] sm:$0xff] %vm6128_vm14, %v6404_v12  ;;  %v7941_v18 = vcombine.low %v10247_v49, %v10259_v0  ;;  %3695 = vrot.lane.b32.xlu0 %v7877_v32, %s8656_s6  ;;  %v5585_v12 = vor.u32 %v5584_v59, %v10274_v44  ;;  %v5581_v30 = vsel %vm8833_vm2, %v5576_v63, %v10274_v44  ;;  %v6316_v23 = vrot.slane %v6177_v50, 5  ;;  %v6668_v19 = vpop.f32.mrb[1].mxu0  ;;  %v2013_v38 = vld [vmem:[#allocation8 + $0x170] sm:$0x1] }
 0x29d   : > { %2253 = vrot.lane.b32.xlu1 %v7814_v34, %s8654_s21  ;;  %v7878_v34 = vcombine.low %v3520_v35, %v3530_v26  ;;  %v2591_v15 = vpop.permute.xlu0 %2590  ;;  %v6481_v43 = vld [vmem:[#allocation2 + $0x80] sm:$0xff]  ;;  %v5599_v31 = vor.u32 %v5598_v4, %v5595_v61  ;;  %v5609_v32 = vor.u32 %v5608_v9, %v5604_v8  ;;  %v10296_v7 = vsel %vm8991_vm5, %v8053_v5, %v6313_v21  ;;  %v8457_v35 = vld [vmem:[#allocation8 + $0x174] sm:$0xff]   ;;  %v10305_v55 = vpop.f32.mrb[2].mxu0 }
 0x29e   : > { %2636 = vst.msk [vmem:[#allocation2 + $0x90] sm:$0xff] %vm2456_vm9, %v2591_v15  ;;  %8231 = vmatprep.mubr.msk.bf16.mxu1 %vm6533_vm0, %v6481_v43  ;;  %v5586_v27 = vrot.slane %v5585_v12, 4  ;;  %v8054_v16 = vrot.slane %v10278_v17, 9  ;;  %v6998_v25 = vmul.f32 %v8201_v20, %v8201_v20  ;;  %7135 = vst [vmem:[#allocation3 + $0x10] sm:$0xff] %v8201_v20  ;;  %v6320_v14 = vrot.slane %v10281_v3, 5  ;;  %v6671_v24 = vpop.f32.mrb[3].mxu0 }
 0x29f   : > { %v2238_v22 = vpop.permute.xlu1 %2237  ;;  %v5600_v0 = vrot.slane %v5599_v31, 4  ;;  %v5610_v2 = vrot.slane %v5609_v32, 4  ;;  %v6996_v33 = vmul.f32 %v6668_v19, %v6668_v19  ;;  %7133 = vst [vmem:[#allocation3] sm:$0xff] %v6668_v19  ;;  %v6323_v54 = vrot.slane %v10285_v11, 5  ;;  %7136 = vst [vmem:[#allocation3 + $0x18] sm:$0xff] %v10305_v55 }
 0x2a0   : > { %2282 = vst.msk [vmem:[#allocation2 + $0x98] sm:$0xff] %vm1958_vm8, %v2238_v22  ;;  %4336 = vrot.lane.b32.xlu0 %v7941_v18, %s8657_s10  ;;  %v5591_v26 = vsel %vm8833_vm2, %v5586_v27, %v5590_v60  ;;  %v2014_v40 = vld [vmem:[#allocation8 + $0x174] sm:$0xe]  ;;  %v6924_v41 = vadd.f32 %v6671_v24, %v6668_v19  ;;  %v6997_v15 = vmul.f32 %v6671_v24, %v6671_v24  ;;  %7134 = vst [vmem:[#allocation3 + $0x8] sm:$0xff] %v6671_v24  ;;  %v2015_v46 = vld [vmem:[#allocation8 + $0x178] sm:$0xf] }
 0x2a1   : > { %2608 = vrot.lane.b32.xlu1 %v8455_v48, %s8655_s24  ;;  %v3680_v13 = vpop.permute.xlu0 %3679  ;;  %v6315_v48 = vrot.slane %v6313_v21, 4  ;;  %v8005_v29 = vcombine.low %v5581_v30, %v5591_v26  ;;  %v5615_v37 = vsel %vm8833_vm2, %v5610_v2, %v5614_v10  ;;  %v2016_v47 = vld [vmem:[#allocation8 + $0x17c] sm:$0x1]  ;;  %v6321_v50 = vsel %vm8991_vm5, %v8054_v16, %v6320_v14  ;;  %v3231_v56 = vld [vmem:[#allocation8 + $0x174] sm:$0xf] }
 0x2a2   : > { %3725 = vst.msk [vmem:[#allocation2 + $0x90] sm:$0xff] %vm3178_vm10, %v3680_v13  ;;  %v6322_v51 = vrot.slane %v6320_v14, 4  ;;  %v7799_v52 = vrot.slane %v2011_v62, 9  ;;  %v2157_v53 = vrot.slane %v2012_v28, 5  ;;  %v6925_v17 = vadd.f32 %v8201_v20, %v6924_v41  ;;  %v3232_v61 = vld [vmem:[#allocation8 + $0x178] sm:$0xf] }
 0x2a3   : > { %v2593_v57 = vpop.permute.xlu1 %2592  ;;  %v6482_v58 = vld [vmem:[#allocation2 + $0x88] sm:$0xff]  ;;  %v10311_v18 = vsel %vm8991_vm5, %v6315_v48, %v6316_v23  ;;  %v2160_v59 = vrot.slane %v2013_v38, 5  ;;  %v7800_v60 = vrot.slane %v2014_v40, 9  ;;  %v2164_v4 = vrot.slane %v2015_v46, 5  ;;  %v3234_v27 = vld [vmem:[#allocation8 + $0x180] sm:$0xf] }
 0x2a4   : > { %2637 = vst.msk [vmem:[#allocation2 + $0x98] sm:$0xff] %vm2456_vm9, %v2593_v57  ;;  %8232 = vmatmul.mubr.msk.bf16.vlgmr.msra.gmra.mrb[0].mxu1 %vm6533_vm0, %v6482_v58  ;;  %4691 = vrot.lane.b32.xlu0 %v8456_v6, %s8658_s11  ;;  %v8069_v45 = vcombine.low %v10296_v7, %v10311_v18  ;;  %v7060_v57 = vadd.f32 %v6997_v15, %v6996_v33  ;;  %v2159_v63 = vrot.slane %v2157_v53, 4  ;;  %v2167_v12 = vrot.slane %v2016_v47, 5  ;;  %v3235_v19 = vld [vmem:[#allocation8 + $0x184] sm:$0xf]  ;;  %v8458_v47 = vld [vmem:[#allocation8 + $0x174] sm:$0xff]  }
 0x2a5   : > { %3697 = vrot.lane.b32.xlu1 %v7878_v34, %s8656_s6  ;;  %v4321_v22 = vpop.permute.xlu0 %4320  ;;  %v10316_v34 = vmul.f32 %v10305_v55, %v10305_v55  ;;  %v6324_v1 = vsel %vm8991_vm5, %v6322_v51, %v6323_v54  ;;  %v2158_v3 = vsel %vm8991_vm5, %v7799_v52, %v2157_v53  ;;  %v3532_v10 = vshrl.u32 %v3231_v56, 16  ;;  %v4096_v26 = vld [vmem:[#allocation8 + $0x174] sm:$0xe]  ;;  %v4097_v18 = vld [vmem:[#allocation8 + $0x178] sm:$0xf] }
 0x2a6   : > { %4366 = vst.msk [vmem:[#allocation2 + $0x90] sm:$0xff] %vm4043_vm11, %v4321_v22  ;;  %v7061_v9 = vadd.f32 %v7060_v57, %v6998_v25  ;;  %v8070_v13 = vcombine.low %v6321_v50, %v6324_v1  ;;  %v2161_v5 = vsel %vm8991_vm5, %v2159_v63, %v2160_v59  ;;  %v2165_v21 = vsel %vm8991_vm5, %v7800_v60, %v2164_v4  ;;  %v4098_v24 = vld [vmem:[#allocation8 + $0x17c] sm:$0x1]  ;;  %v4099_v41 = vld [vmem:[#allocation8 + $0x180] sm:$0xe] }
 0x2a7   : > { %v3682_v49 = vpop.permute.xlu1 %3681  ;;  %v2166_v6 = vrot.slane %v2164_v4, 4  ;;  %v3535_v30 = vshll.u32 %v3231_v56, 16  ;;  %v7815_v32 = vcombine.low %v2158_v3, %v2161_v5  ;;  %v3534_v23 = vrot.slane %v3532_v10, 4  ;;  %v4101_v59 = vld [vmem:[#allocation8 + $0x188] sm:$0x1] }
 0x2a8   : > { %3726 = vst.msk [vmem:[#allocation2 + $0x98] sm:$0xff] %vm3178_vm10, %v3682_v49  ;;  %5780 = vrot.lane.b32.xlu0 %v8005_v29, %s8659_s22  ;;  %v3541_v49 = vshll.u32 %v3232_v61, 16  ;;  %v3545_v20 = vshrl.u32 %v3232_v61, 16  ;;  %v10347_v25 = vadd.f32 %v10305_v55, %v6925_v17  ;;  %v10351_v22 = vadd.f32 %v7061_v9, %v10316_v34  ;;  %v8459_v61 = vld [vmem:[#allocation8 + $0x180] sm:$0xff]   ;;  %v5318_v5 = vld [vmem:[#allocation8 + $0x188] sm:$0x1] }
 0x2a9   : > { %4338 = vrot.lane.b32.xlu1 %v7942_v36, %s8657_s10  ;;  %v5605_v36 = vsel %vm8833_vm2, %v5600_v0, %v5604_v8  ;;  %v4676_v58 = vpop.permute.xlu0 %4675  ;;  %v3233_v8 = vld [vmem:[#allocation8 + $0x17c] sm:$0x1]  ;;  %v2168_v7 = vsel %vm8991_vm5, %v2166_v6, %v2167_v12  ;;  %v3537_v48 = vrot.slane %v3535_v30, 5  ;;  %v3556_v28 = vshrl.u32 %v3234_v27, 16  ;;  %v5317_v10 = vld [vmem:[#allocation8 + $0x184] sm:$0xf] }
 0x2aa   : > { %v8006_v44 = vcombine.low %v5605_v36, %v5615_v37  ;;  %4721 = vst.msk [vmem:[#allocation2 + $0x90] sm:$0xff] %vm4541_vm12, %v4676_v58  ;;  %v3551_v16 = vshll.u32 %v3233_v8, 16  ;;  %v7816_v2 = vcombine.low %v2165_v21, %v2168_v7  ;;  %v3543_v14 = vrot.slane %v3541_v49, 5  ;;  %v5316_v8 = vld [vmem:[#allocation8 + $0x180] sm:$0xf] }
 0x2ab   : > { %v4323_v43 = vpop.permute.xlu1 %4322  ;;  %v3547_v33 = vrot.slane %v3545_v20, 4  ;;  %v3538_v54 = vor.u32 %v3537_v48, %v3534_v23  ;;  %v3559_v55 = vshll.u32 %v3234_v27, 16  ;;  %v3565_v37 = vshll.u32 %v3235_v19, 16  ;;  %v5319_v23 = vld [vmem:[#allocation8 + $0x18c] sm:$0xf] }
 0x2ac   : > { %4367 = vst.msk [vmem:[#allocation2 + $0x98] sm:$0xff] %vm4043_vm11, %v4323_v43  ;;  %6421 = vrot.lane.b32.xlu0 %v8069_v45, %s8660_s26  ;;  %v3553_v62 = vrot.slane %v3551_v16, 5  ;;  %v3569_v38 = vshrl.u32 %v3235_v19, 16  ;;  %v3558_v15 = vrot.slane %v3556_v28, 4  ;;  %v4100_v45 = vld [vmem:[#allocation8 + $0x184] sm:$0xf] }
 0x2ad   : > { %4693 = vrot.lane.b32.xlu1 %v8457_v35, %s8658_s11  ;;  %v5765_v31 = vpop.permute.xlu0 %5764  ;;  %v3236_v35 = vld [vmem:[#allocation8 + $0x188] sm:$0x1]  ;;  %v3548_v36 = vor.u32 %v3547_v33, %v3543_v14  ;;  %v3539_v34 = vrot.slane %v3538_v54, 4  ;;  %v3561_v43 = vrot.slane %v3559_v55, 5  ;;  %v3567_v51 = vrot.slane %v3565_v37, 5 }
 0x2ae   : > { %5810 = vst.msk [vmem:[#allocation2 + $0x90] sm:$0xff] %vm5263_vm13, %v5765_v31  ;;  %v3575_v40 = vshll.u32 %v3236_v35, 16  ;;  %v3571_v52 = vrot.slane %v3569_v38, 4  ;;  %v4242_v57 = vrot.slane %v4097_v18, 5  ;;  %v4245_v58 = vrot.slane %v4098_v24, 5 }
 0x2af   : > { %v4678_v11 = vpop.permute.xlu1 %4677  ;;  %v3549_v50 = vrot.slane %v3548_v36, 4  ;;  %v3544_v56 = vsel %vm8833_vm2, %v3539_v34, %v3543_v14  ;;  %v3562_v17 = vor.u32 %v3561_v43, %v3558_v15  ;;  %v7928_v63 = vrot.slane %v4099_v41, 9  ;;  %v10378_v48 = vld [vmem:[#allocation8 + $0x190] sm:$0xf] }
 0x2b0   : > { %4722 = vst.msk [vmem:[#allocation2 + $0x98] sm:$0xff] %vm4541_vm12, %v4678_v11  ;;  %2255 = vrot.lane.b32.xlu0 %v7815_v32, %s8654_s21  ;;  %v3577_v53 = vrot.slane %v3575_v40, 5  ;;  %v3572_v3 = vor.u32 %v3571_v52, %v3567_v51  ;;  %v4249_v4 = vrot.slane %v4100_v45, 5  ;;  %v4244_v12 = vrot.slane %v4242_v57, 4 }
 0x2b1   : > { %5782 = vrot.lane.b32.xlu1 %v8006_v44, %s8659_s22  ;;  %v6406_v29 = vpop.permute.xlu0 %6405  ;;  %v7927_v44 = vrot.slane %v4096_v26, 9  ;;  %v3554_v1 = vsel %vm8833_vm2, %v3549_v50, %v3553_v62  ;;  %v3563_v11 = vrot.slane %v3562_v17, 4  ;;  %v4252_v32 = vrot.slane %v4101_v59, 5 }
 0x2b2   : > { %6451 = vst.msk [vmem:[#allocation2 + $0x90] sm:$0xff] %vm6128_vm14, %v6406_v29  ;;  %v7879_v9 = vcombine.low %v3544_v56, %v3554_v1  ;;  %v3573_v6 = vrot.slane %v3572_v3, 4  ;;  %v10371_v30 = vsel %vm8991_vm5, %v7928_v63, %v4249_v4  ;;  %v4251_v31 = vrot.slane %v4249_v4, 4  ;;  %v5321_v56 = vld [vmem:[#allocation8 + $0x194] sm:$0x1]  ;;  %v8461_v1 = vld [vmem:[#allocation8 + $0x18c] sm:$0xff]  }
 0x2b3   : > { %v5767_v0 = vpop.permute.xlu1 %5766  ;;  %v3568_v49 = vsel %vm8833_vm2, %v3563_v11, %v3567_v51  ;;  %v4246_v20 = vsel %vm8991_vm5, %v4244_v12, %v4245_v58  ;;  %v5617_v27 = vshrl.u32 %v5316_v8, 16  ;;  %v5620_v7 = vshll.u32 %v5316_v8, 16  ;;  %v6181_v63 = vld [vmem:[#allocation8 + $0x180] sm:$0xe]  ;;  %v6182_v4 = vld [vmem:[#allocation8 + $0x184] sm:$0xf] }
 0x2b4   : > { %5811 = vst.msk [vmem:[#allocation2 + $0x98] sm:$0xff] %vm5263_vm13, %v5767_v0  ;;  %2610 = vrot.lane.b32.xlu0 %v8458_v47, %s8655_s24  ;;  %v3578_v35 = vsel %vm8833_vm2, %v3573_v6, %v3577_v53  ;;  %v5626_v14 = vshll.u32 %v5317_v10, 16  ;;  %v5630_v29 = vshrl.u32 %v5317_v10, 16  ;;  %v5636_v36 = vshll.u32 %v5318_v5, 16  ;;  %v8460_v47 = vld [vmem:[#allocation8 + $0x180] sm:$0xff]  }
 0x2b5   : > { %6423 = vrot.lane.b32.xlu1 %v8070_v13, %s8660_s26  ;;  %v2240_v60 = vpop.permute.xlu0 %2239  ;;  %v10366_v13 = vsel %vm8991_vm5, %v7927_v44, %v4242_v57  ;;  %v7880_v33 = vcombine.low %v3568_v49, %v3578_v35  ;;  %v5619_v18 = vrot.slane %v5617_v27, 4  ;;  %v5622_v54 = vrot.slane %v5620_v7, 5  ;;  %v6183_v8 = vld [vmem:[#allocation8 + $0x188] sm:$0x1]  ;;  %v6184_v12 = vld [vmem:[#allocation8 + $0x18c] sm:$0xe] }
 0x2b6   : > { %2283 = vst.msk [vmem:[#allocation2 + $0xa0] sm:$0xff] %vm1958_vm8, %v2240_v60  ;;  %v7943_v0 = vcombine.low %v10366_v13, %v4246_v20  ;;  %v10390_v24 = vrot.slane %v5626_v14, 5  ;;  %v5641_v37 = vshrl.u32 %v5319_v23, 16  ;;  %v5644_v34 = vshll.u32 %v5319_v23, 16  ;;  %v6185_v10 = vld [vmem:[#allocation8 + $0x190] sm:$0xf] }
 0x2b7   : > { %v6408_v46 = vpop.permute.xlu1 %6407  ;;  %v5623_v41 = vor.u32 %v5622_v54, %v5619_v18  ;;  %v5650_v15 = vshll.u32 %v10378_v48, 16  ;;  %v5632_v50 = vrot.slane %v5630_v29, 4  ;;  %v5638_v51 = vrot.slane %v5636_v36, 5  ;;  %v6186_v5 = vld [vmem:[#allocation8 + $0x194] sm:$0x1] }
 0x2b8   : > { %6452 = vst.msk [vmem:[#allocation2 + $0x98] sm:$0xff] %vm6128_vm14, %v6408_v46  ;;  %3699 = vrot.lane.b32.xlu0 %v7879_v9, %s8656_s6  ;;  %v5643_v17 = vrot.slane %v5641_v37, 4  ;;  %v5646_v57 = vrot.slane %v5644_v34, 5  ;;  %v5654_v13 = vshrl.u32 %v10378_v48, 16  ;;  %v2017_v23 = vld [vmem:[#allocation8 + $0x180] sm:$0xe] }
 0x2b9   : > { %2257 = vrot.lane.b32.xlu1 %v7816_v2, %s8654_s21  ;;  %v2595_v16 = vpop.permute.xlu0 %2594  ;;  %v6483_v19 = vld [vmem:[#allocation2 + $0x90] sm:$0xff]  ;;  %v4253_v2 = vsel %vm8991_vm5, %v4251_v31, %v4252_v32  ;;  %v5633_v3 = vor.u32 %v5632_v50, %v10390_v24  ;;  %v5660_v32 = vshll.u32 %v5321_v56, 16  ;;  %v2018_v49 = vld [vmem:[#allocation8 + $0x184] sm:$0xf]  ;;  %v8055_v7 = vrot.slane %v6181_v63, 9 }
 0x2ba   : > { %2638 = vst.msk [vmem:[#allocation2 + $0xa0] sm:$0xff] %vm2456_vm9, %v2595_v16  ;;  %8235 = vmatprep.mubr.msk.bf16.mxu1 %vm6533_vm0, %v6483_v19  ;;  %v7944_v26 = vcombine.low %v10371_v30, %v4253_v2  ;;  %v5647_v11 = vor.u32 %v5646_v57, %v5643_v17  ;;  %v5656_v27 = vrot.slane %v5654_v13, 4  ;;  %v6327_v16 = vrot.slane %v6182_v4, 5  ;;  %v2019_v19 = vld [vmem:[#allocation8 + $0x188] sm:$0x1] }
 0x2bb   : > { %v2242_v21 = vpop.permute.xlu1 %2241  ;;  %v5634_v31 = vrot.slane %v5633_v3, 4  ;;  %v5662_v2 = vrot.slane %v5660_v32, 5  ;;  %v6330_v14 = vrot.slane %v6183_v8, 5  ;;  %v6334_v29 = vrot.slane %v6185_v10, 5  ;;  %v2021_v37 = vld [vmem:[#allocation8 + $0x190] sm:$0xf] }
 0x2bc   : > { %2284 = vst.msk [vmem:[#allocation2 + $0xa8] sm:$0xff] %vm1958_vm8, %v2242_v21  ;;  %4340 = vrot.lane.b32.xlu0 %v7943_v0, %s8657_s10  ;;  %v5648_v20 = vrot.slane %v5647_v11, 4  ;;  %v6328_v54 = vsel %vm8991_vm5, %v8055_v7, %v6327_v16  ;;  %v6337_v36 = vrot.slane %v6186_v5, 5  ;;  %v2174_v34 = vrot.slane %v2019_v19, 5  ;;  %v3237_v17 = vld [vmem:[#allocation8 + $0x18c] sm:$0xf] }
 0x2bd   : > { %2612 = vrot.lane.b32.xlu1 %v8459_v61, %s8655_s24  ;;  %v3684_v46 = vpop.permute.xlu0 %3683  ;;  %v5639_v0 = vsel %vm8833_vm2, %v5634_v31, %v5638_v51  ;;  %v3239_v3 = vld [vmem:[#allocation8 + $0x194] sm:$0x1]  ;;  %v3240_v11 = vld [vmem:[#allocation8 + $0x198] sm:$0xf]  ;;  %v3580_v5 = vshrl.u32 %v3237_v17, 16 }
 0x2be   : > { %3727 = vst.msk [vmem:[#allocation2 + $0xa0] sm:$0xff] %vm3178_vm10, %v3684_v46  ;;  %v3242_v31 = vld [vmem:[#allocation8 + $0x1a0] sm:$0x1]  ;;  %v4102_v7 = vld [vmem:[#allocation8 + $0x18c] sm:$0xe] }
 0x2bf   : > { %v2597_v62 = vpop.permute.xlu1 %2596  ;;  %v8205_v28 = vpop.f32.mrb[4].mxu0  ;;  %v6484_v55 = vld [vmem:[#allocation2 + $0x98] sm:$0xff] }
 0x2c0   : > { %2639 = vst.msk [vmem:[#allocation2 + $0xa8] sm:$0xff] %vm2456_vm9, %v2597_v62  ;;  %v7002_v38 = vmul.f32 %v8205_v28, %v8205_v28  ;;  %7139 = vst [vmem:[#allocation3 + $0x30] sm:$0xff] %v8205_v28  ;;  %v6684_v40 = vpop.f32.mrb[5].mxu0  ;;  %8236 = vmatmul.mubr.msk.bf16.gmra.mrb[4].mxu1 %vm6533_vm0, %v6484_v55  ;;  %4695 = vrot.lane.b32.xlu0 %v8460_v47, %s8658_s11  ;;  %v2020_v62 = vld [vmem:[#allocation8 + $0x18c] sm:$0xe]  ;;  %v6329_v55 = vrot.slane %v6327_v16, 4 }
 0x2c1   : > { %v6927_v43 = vadd.f32 %v10347_v25, %v6684_v40  ;;  %v7000_v44 = vmul.f32 %v6684_v40, %v6684_v40  ;;  %7137 = vst [vmem:[#allocation3 + $0x20] sm:$0xff] %v6684_v40  ;;  %3701 = vrot.lane.b32.xlu1 %v7880_v33, %s8656_s6  ;;  %v10397_v45 = vpop.f32.mrb[6].mxu0  ;;  %v5624_v25 = vrot.slane %v5623_v41, 4  ;;  %v4325_v30 = vpop.permute.xlu0 %4324  ;;  %v7801_v40 = vrot.slane %v2017_v23, 9 }
 0x2c2   : > { %v10401_v52 = vmul.f32 %v10397_v45, %v10397_v45  ;;  %7140 = vst [vmem:[#allocation3 + $0x38] sm:$0xff] %v10397_v45  ;;  %v6687_v53 = vpop.f32.mrb[7].mxu0  ;;  %4368 = vst.msk [vmem:[#allocation2 + $0xa0] sm:$0xff] %vm4043_vm11, %v4325_v30  ;;  %v2171_v41 = vrot.slane %v2018_v49, 5  ;;  %v6336_v47 = vrot.slane %v6334_v29, 4  ;;  %v7802_v50 = vrot.slane %v2020_v62, 9 }
 0x2c3   : > { %v7063_v58 = vadd.f32 %v10351_v22, %v7000_v44  ;;  %v6928_v59 = vadd.f32 %v6927_v43, %v6687_v53  ;;  %v7001_v60 = vmul.f32 %v6687_v53, %v6687_v53  ;;  %7138 = vst [vmem:[#allocation3 + $0x28] sm:$0xff] %v6687_v53  ;;  %v3686_v61 = vpop.permute.xlu1 %3685  ;;  %v5629_v9 = vsel %vm8833_vm2, %v5624_v25, %v10390_v24 }
 0x2c4   : > { %3728 = vst.msk [vmem:[#allocation2 + $0xa8] sm:$0xff] %vm3178_vm10, %v3686_v61  ;;  %v5652_v22 = vrot.slane %v5650_v15, 5  ;;  %v8007_v33 = vcombine.low %v5629_v9, %v5639_v0  ;;  %v8056_v24 = vrot.slane %v6184_v12, 9  ;;  %v2022_v15 = vld [vmem:[#allocation8 + $0x194] sm:$0x1]  ;;  %v6331_v44 = vsel %vm8991_vm5, %v6329_v55, %v6330_v14  ;;  %v8462_v14 = vld [vmem:[#allocation8 + $0x18c] sm:$0xff]  }
 0x2c5   : > { %v6929_v21 = vadd.f32 %v8205_v28, %v6928_v59  ;;  %v7064_v6 = vadd.f32 %v7063_v58, %v7001_v60  ;;  %4342 = vrot.lane.b32.xlu1 %v7944_v26, %s8657_s10  ;;  %v4680_v28 = vpop.permute.xlu0 %4679  ;;  %v8071_v53 = vcombine.low %v6328_v54, %v6331_v44  ;;  %v2172_v25 = vsel %vm8991_vm5, %v7801_v40, %v2171_v41  ;;  %v4103_v0 = vld [vmem:[#allocation8 + $0x190] sm:$0xf] }
 0x2c6   : > { %v5653_v26 = vsel %vm8833_vm2, %v5648_v20, %v5652_v22  ;;  %v5657_v18 = vor.u32 %v5656_v27, %v5652_v22  ;;  %4723 = vst.msk [vmem:[#allocation2 + $0xa0] sm:$0xff] %vm4541_vm12, %v4680_v28  ;;  %5784 = vrot.lane.b32.xlu0 %v8007_v33, %s8659_s22  ;;  %v6335_v46 = vsel %vm8991_vm5, %v8056_v24, %v6334_v29  ;;  %v2173_v56 = vrot.slane %v2171_v41, 4  ;;  %v4104_v29 = vld [vmem:[#allocation8 + $0x194] sm:$0x1] }
 0x2c7   : > { %v7065_v48 = vadd.f32 %v7064_v6, %v7002_v38  ;;  %v4327_v35 = vpop.permute.xlu1 %4326  ;;  %v6338_v59 = vsel %vm8991_vm5, %v6336_v47, %v6337_v36  ;;  %v2178_v60 = vrot.slane %v2021_v37, 5  ;;  %v2181_v61 = vrot.slane %v2022_v15, 5  ;;  %v3241_v6 = vld [vmem:[#allocation8 + $0x19c] sm:$0xf] }
 0x2c8   : > { %4369 = vst.msk [vmem:[#allocation2 + $0xa8] sm:$0xff] %vm4043_vm11, %v4327_v35  ;;  %v5658_v38 = vrot.slane %v5657_v18, 4  ;;  %v8072_v63 = vcombine.low %v6335_v46, %v6338_v59  ;;  %v2175_v4 = vsel %vm8991_vm5, %v2173_v56, %v2174_v34  ;;  %v10441_v8 = vadd.f32 %v10397_v45, %v6929_v21  ;;  %v8463_v34 = vld [vmem:[#allocation8 + $0x198] sm:$0xff]  }
 0x2c9   : > { %4697 = vrot.lane.b32.xlu1 %v8461_v1, %s8658_s11  ;;  %v5769_v58 = vpop.permute.xlu0 %5768  ;;  %v3238_v1 = vld [vmem:[#allocation8 + $0x190] sm:$0xf]  ;;  %v10444_v9 = vadd.f32 %v7065_v48, %v10401_v52  ;;  %v7817_v13 = vcombine.low %v2172_v25, %v2175_v4  ;;  %v2179_v12 = vsel %vm8991_vm5, %v7802_v50, %v2178_v60  ;;  %v2180_v10 = vrot.slane %v2178_v60, 4 }
 0x2ca   : > { %v5663_v51 = vsel %vm8833_vm2, %v5658_v38, %v5662_v2  ;;  %5812 = vst.msk [vmem:[#allocation2 + $0xa0] sm:$0xff] %vm5263_vm13, %v5769_v58  ;;  %6425 = vrot.lane.b32.xlu0 %v8071_v53, %s8660_s26  ;;  %v3583_v45 = vshll.u32 %v3237_v17, 16  ;;  %v3589_v21 = vshll.u32 %v3238_v1, 16  ;;  %v3593_v30 = vshrl.u32 %v3238_v1, 16  ;;  %v4105_v17 = vld [vmem:[#allocation8 + $0x198] sm:$0xe] }
 0x2cb   : > { %v4682_v43 = vpop.permute.xlu1 %4681  ;;  %v8008_v57 = vcombine.low %v5653_v26, %v5663_v51  ;;  %v3599_v52 = vshll.u32 %v3239_v3, 16  ;;  %v2182_v23 = vsel %vm8991_vm5, %v2180_v10, %v2181_v61  ;;  %v3582_v49 = vrot.slane %v3580_v5, 4  ;;  %v4106_v1 = vld [vmem:[#allocation8 + $0x19c] sm:$0xf]  ;;  %v4107_v10 = vld [vmem:[#allocation8 + $0x1a0] sm:$0x1] }
 0x2cc   : > { %4724 = vst.msk [vmem:[#allocation2 + $0xa8] sm:$0xff] %vm4541_vm12, %v4682_v43  ;;  %v3604_v20 = vshrl.u32 %v3240_v11, 16  ;;  %v3607_v27 = vshll.u32 %v3240_v11, 16  ;;  %v7818_v16 = vcombine.low %v2179_v12, %v2182_v23  ;;  %v3585_v19 = vrot.slane %v3583_v45, 5  ;;  %v5322_v5 = vld [vmem:[#allocation8 + $0x198] sm:$0xf] }
 0x2cd   : > { %5786 = vrot.lane.b32.xlu1 %v8008_v57, %s8659_s22  ;;  %v6410_v32 = vpop.permute.xlu0 %6409  ;;  %v3591_v48 = vrot.slane %v3589_v21, 5  ;;  %v3595_v35 = vrot.slane %v3593_v30, 4  ;;  %v3601_v33 = vrot.slane %v3599_v52, 5  ;;  %v3613_v54 = vshll.u32 %v3241_v6, 16 }
 0x2ce   : > { %6453 = vst.msk [vmem:[#allocation2 + $0xa0] sm:$0xff] %vm6128_vm14, %v6410_v32  ;;  %2259 = vrot.lane.b32.xlu0 %v7817_v13, %s8654_s21  ;;  %v3606_v26 = vrot.slane %v3604_v20, 4  ;;  %v3609_v18 = vrot.slane %v3607_v27, 5  ;;  %v3586_v62 = vor.u32 %v3585_v19, %v3582_v49  ;;  %v3617_v55 = vshrl.u32 %v3241_v6, 16  ;;  %v5323_v27 = vld [vmem:[#allocation8 + $0x19c] sm:$0xf] }
 0x2cf   : > { %v5771_v22 = vpop.permute.xlu1 %5770  ;;  %v3596_v28 = vor.u32 %v3595_v35, %v3591_v48  ;;  %v3623_v24 = vshll.u32 %v3242_v31, 16  ;;  %v10457_v38 = vrot.slane %v3613_v54, 5  ;;  %v7929_v40 = vrot.slane %v4102_v7, 9  ;;  %v5324_v19 = vld [vmem:[#allocation8 + $0x1a0] sm:$0x1] }
 0x2d0   : > { %5813 = vst.msk [vmem:[#allocation2 + $0xa8] sm:$0xff] %vm5263_vm13, %v5771_v22  ;;  %v3610_v37 = vor.u32 %v3609_v18, %v3606_v26  ;;  %v4256_v41 = vrot.slane %v4103_v0, 5  ;;  %v3587_v15 = vrot.slane %v3586_v62, 4  ;;  %v3619_v44 = vrot.slane %v3617_v55, 4  ;;  %v5325_v35 = vld [vmem:[#allocation8 + $0x1a4] sm:$0xf] }
 0x2d1   : > { %6427 = vrot.lane.b32.xlu1 %v8072_v63, %s8660_s26  ;;  %v2244_v36 = vpop.permute.xlu0 %2243  ;;  %v3597_v43 = vrot.slane %v3596_v28, 4  ;;  %v3625_v46 = vrot.slane %v3623_v24, 5  ;;  %v4259_v56 = vrot.slane %v4104_v29, 5  ;;  %v7930_v30 = vrot.slane %v4105_v17, 9  ;;  %v5326_v18 = vld [vmem:[#allocation8 + $0x1a8] sm:$0xf] }
 0x2d2   : > { %2285 = vst.msk [vmem:[#allocation2 + $0xb0] sm:$0xff] %vm1958_vm8, %v2244_v36  ;;  %2614 = vrot.lane.b32.xlu0 %v8462_v14, %s8655_s24  ;;  %v3611_v51 = vrot.slane %v3610_v37, 4  ;;  %v10464_v53 = vsel %vm8991_vm5, %v7929_v40, %v4256_v41  ;;  %v4258_v25 = vrot.slane %v4256_v41, 4  ;;  %v3592_v59 = vsel %vm8833_vm2, %v3587_v15, %v3591_v48  ;;  %v5327_v24 = vld [vmem:[#allocation8 + $0x1ac] sm:$0x1]  ;;  %v8464_v37 = vld [vmem:[#allocation8 + $0x198] sm:$0xff]  }
 0x2d3   : > { %v6412_v2 = vpop.permute.xlu1 %6411  ;;  %v3602_v60 = vsel %vm8833_vm2, %v3597_v43, %v3601_v33  ;;  %v3620_v61 = vor.u32 %v3619_v44, %v10457_v38  ;;  %v4263_v20 = vrot.slane %v4106_v1, 5  ;;  %v5665_v48 = vshrl.u32 %v5322_v5, 16  ;;  %v6189_v17 = vld [vmem:[#allocation8 + $0x1a0] sm:$0x1] }
 0x2d4   : > { %6454 = vst.msk [vmem:[#allocation2 + $0xa8] sm:$0xff] %vm6128_vm14, %v6412_v2  ;;  %v7881_v13 = vcombine.low %v3592_v59, %v3602_v60  ;;  %v3616_v12 = vsel %vm8833_vm2, %v3611_v51, %v10457_v38  ;;  %v4260_v21 = vsel %vm8991_vm5, %v4258_v25, %v4259_v56  ;;  %v5668_v28 = vshll.u32 %v5322_v5, 16 }
 0x2d5   : > { %2261 = vrot.lane.b32.xlu1 %v7818_v16, %s8654_s21  ;;  %v2599_v11 = vpop.permute.xlu0 %2598  ;;  %v6485_v22 = vld [vmem:[#allocation2 + $0xa0] sm:$0xff]  ;;  %v3621_v45 = vrot.slane %v3620_v61, 4  ;;  %v4266_v16 = vrot.slane %v4107_v10, 5  ;;  %v4264_v26 = vsel %vm8991_vm5, %v7930_v30, %v4263_v20  ;;  %v4265_v54 = vrot.slane %v4263_v20, 4  ;;  %v6190_v61 = vld [vmem:[#allocation8 + $0x1a4] sm:$0xe] }
 0x2d6   : > { %2640 = vst.msk [vmem:[#allocation2 + $0xb0] sm:$0xff] %vm2456_vm9, %v2599_v11  ;;  %8239 = vmatprep.mubr.msk.bf16.mxu1 %vm6533_vm0, %v6485_v22  ;;  %3703 = vrot.lane.b32.xlu0 %v7881_v13, %s8656_s6  ;;  %v5667_v62 = vrot.slane %v5665_v48, 4  ;;  %v5674_v55 = vshll.u32 %v5323_v27, 16  ;;  %v5678_v38 = vshrl.u32 %v5323_v27, 16  ;;  %v5684_v40 = vshll.u32 %v5324_v19, 16 }
 0x2d7   : > { %v2246_v47 = vpop.permute.xlu1 %2245  ;;  %v8209_v50 = vpop.f32.mrb[8].mxu0  ;;  %v3626_v7 = vsel %vm8833_vm2, %v3621_v45, %v3625_v46  ;;  %v5689_v41 = vshrl.u32 %v5325_v35, 16  ;;  %v4267_v15 = vsel %vm8991_vm5, %v4265_v54, %v4266_v16  ;;  %v5670_v43 = vrot.slane %v5668_v28, 5 }
 0x2d8   : > { %2286 = vst.msk [vmem:[#allocation2 + $0xb8] sm:$0xff] %vm1958_vm8, %v2246_v47  ;;  %v7006_v57 = vmul.f32 %v8209_v50, %v8209_v50  ;;  %7143 = vst [vmem:[#allocation3 + $0x50] sm:$0xff] %v8209_v50  ;;  %v6700_v58 = vpop.f32.mrb[9].mxu0  ;;  %v7882_v14 = vcombine.low %v3616_v12, %v3626_v7  ;;  %v5676_v44 = vrot.slane %v5674_v55, 5  ;;  %v5692_v46 = vshll.u32 %v5325_v35, 16 }
 0x2d9   : > { %v6931_v3 = vadd.f32 %v10441_v8, %v6700_v58  ;;  %v7004_v63 = vmul.f32 %v6700_v58, %v6700_v58  ;;  %7141 = vst [vmem:[#allocation3 + $0x40] sm:$0xff] %v6700_v58  ;;  %v10473_v4 = vpop.f32.mrb[10].mxu0  ;;  %2616 = vrot.lane.b32.xlu1 %v8463_v34, %s8655_s24  ;;  %v3688_v33 = vpop.permute.xlu0 %3687  ;;  %v6187_v34 = vld [vmem:[#allocation8 + $0x198] sm:$0xe]  ;;  %v6188_v47 = vld [vmem:[#allocation8 + $0x19c] sm:$0xf] }
 0x2da   : > { %v10480_v6 = vmul.f32 %v10473_v4, %v10473_v4  ;;  %7144 = vst [vmem:[#allocation3 + $0x58] sm:$0xff] %v10473_v4  ;;  %v6703_v8 = vpop.f32.mrb[11].mxu0  ;;  %3729 = vst.msk [vmem:[#allocation2 + $0xb0] sm:$0xff] %vm3178_vm10, %v3688_v33  ;;  %v5686_v25 = vrot.slane %v5684_v40, 5  ;;  %v5691_v56 = vrot.slane %v5689_v41, 4  ;;  %v5694_v58 = vrot.slane %v5692_v46, 5 }
 0x2db   : > { %v7067_v52 = vadd.f32 %v10444_v9, %v7004_v63  ;;  %v6932_v31 = vadd.f32 %v6931_v3, %v6703_v8  ;;  %v7005_v32 = vmul.f32 %v6703_v8, %v6703_v8  ;;  %7142 = vst [vmem:[#allocation3 + $0x48] sm:$0xff] %v6703_v8  ;;  %v2601_v23 = vpop.permute.xlu1 %2600  ;;  %v6486_v49 = vld [vmem:[#allocation2 + $0xa8] sm:$0xff]  ;;  %v7945_v9 = vcombine.low %v10464_v53, %v4260_v21  ;;  %v6192_v21 = vld [vmem:[#allocation8 + $0x1ac] sm:$0x1] }
 0x2dc   : > { %2641 = vst.msk [vmem:[#allocation2 + $0xb8] sm:$0xff] %vm2456_vm9, %v2601_v23  ;;  %8240 = vmatmul.mubr.msk.bf16.gmra.mrb[8].mxu1 %vm6533_vm0, %v6486_v49  ;;  %v5680_v53 = vrot.slane %v5678_v38, 4  ;;  %v5698_v59 = vshll.u32 %v5326_v18, 16  ;;  %v5702_v60 = vshrl.u32 %v5326_v18, 16  ;;  %v8465_v3 = vld [vmem:[#allocation8 + $0x1a4] sm:$0xff]   ;;  %v5708_v11 = vshll.u32 %v5327_v24, 16 }
 0x2dd   : > { %v10495_v0 = vadd.f32 %v8209_v50, %v6932_v31  ;;  %v7068_v2 = vadd.f32 %v7067_v52, %v7005_v32  ;;  %3705 = vrot.lane.b32.xlu1 %v7882_v14, %s8656_s6  ;;  %4344 = vrot.lane.b32.xlu0 %v7945_v9, %s8657_s10  ;;  %v7946_v50 = vcombine.low %v4264_v26, %v4267_v15  ;;  %v4329_v51 = vpop.permute.xlu0 %4328  ;;  %v8057_v22 = vrot.slane %v6187_v34, 9  ;;  %v6191_v12 = vld [vmem:[#allocation8 + $0x1a8] sm:$0xf] }
 0x2de   : > { %4370 = vst.msk [vmem:[#allocation2 + $0xb0] sm:$0xff] %vm4043_vm11, %v4329_v51  ;;  %v5681_v63 = vor.u32 %v5680_v53, %v5676_v44  ;;  %v6341_v13 = vrot.slane %v6188_v47, 5  ;;  %v5695_v5 = vor.u32 %v5694_v58, %v5691_v56  ;;  %v5700_v8 = vrot.slane %v5698_v59, 5 }
 0x2df   : > { %v10500_v29 = vadd.f32 %v7068_v2, %v7006_v57  ;;  %v3690_v36 = vpop.permute.xlu1 %3689  ;;  %v5671_v57 = vor.u32 %v5670_v43, %v5667_v62  ;;  %v5704_v45 = vrot.slane %v5702_v60, 4  ;;  %v5710_v31 = vrot.slane %v5708_v11, 5 }
 0x2e0   : > { %3730 = vst.msk [vmem:[#allocation2 + $0xb8] sm:$0xff] %vm3178_vm10, %v3690_v36  ;;  %v5682_v52 = vrot.slane %v5681_v63, 4  ;;  %v6342_v32 = vsel %vm8991_vm5, %v8057_v22, %v6341_v13  ;;  %v6343_v23 = vrot.slane %v6341_v13, 4  ;;  %v5696_v20 = vrot.slane %v5695_v5, 4 }
 0x2e1   : > { %4346 = vrot.lane.b32.xlu1 %v7946_v50, %s8657_s10  ;;  %4699 = vrot.lane.b32.xlu0 %v8464_v37, %s8658_s11  ;;  %v5672_v10 = vrot.slane %v5671_v57, 4  ;;  %v4684_v30 = vpop.permute.xlu0 %4683  ;;  %v5705_v27 = vor.u32 %v5704_v45, %v5700_v8  ;;  %v6344_v7 = vrot.slane %v6189_v17, 5  ;;  %v8058_v19 = vrot.slane %v6190_v61, 9 }
 0x2e2   : > { %4725 = vst.msk [vmem:[#allocation2 + $0xb0] sm:$0xff] %vm4541_vm12, %v4684_v30  ;;  %v5687_v16 = vsel %vm8833_vm2, %v5682_v52, %v5686_v25  ;;  %v6348_v48 = vrot.slane %v6191_v12, 5  ;;  %v6351_v35 = vrot.slane %v6192_v21, 5  ;;  %v5701_v14 = vsel %vm8833_vm2, %v5696_v20, %v5700_v8 }
 0x2e3   : > { %v4331_v1 = vpop.permute.xlu1 %4330  ;;  %v5677_v49 = vsel %vm8833_vm2, %v5672_v10, %v5676_v44  ;;  %v5706_v33 = vrot.slane %v5705_v27, 4  ;;  %v6345_v26 = vsel %vm8991_vm5, %v6343_v23, %v6344_v7  ;;  %v6934_v62 = vadd.f32 %v10473_v4, %v10495_v0 }
 0x2e4   : > { %4371 = vst.msk [vmem:[#allocation2 + $0xb8] sm:$0xff] %vm4043_vm11, %v4331_v1  ;;  %v8009_v2 = vcombine.low %v5677_v49, %v5687_v16  ;;  %v6350_v54 = vrot.slane %v6348_v48, 4  ;;  %v8073_v55 = vcombine.low %v6342_v32, %v6345_v26  ;;  %v6349_v24 = vsel %vm8991_vm5, %v8058_v19, %v6348_v48 }
 0x2e5   : > { %4701 = vrot.lane.b32.xlu1 %v8465_v3, %s8658_s11  ;;  %v5773_v18 = vpop.permute.xlu0 %5772  ;;  %v5711_v28 = vsel %vm8833_vm2, %v5706_v33, %v5710_v31  ;;  %v7070_v36 = vadd.f32 %v10500_v29, %v10480_v6 }
 0x2e6   : > { %5788 = vrot.lane.b32.xlu0 %v8009_v2, %s8659_s22  ;;  %5814 = vst.msk [vmem:[#allocation2 + $0xb0] sm:$0xff] %vm5263_vm13, %v5773_v18  ;;  %v8010_v37 = vcombine.low %v5701_v14, %v5711_v28  ;;  %v6352_v40 = vsel %vm8991_vm5, %v6350_v54, %v6351_v35 }
 0x2e7   : > { %v4686_v9 = vpop.permute.xlu1 %4685  ;;  %v8074_v39 = vcombine.low %v6349_v24, %v6352_v40 }
 0x2e8   : > { %4726 = vst.msk [vmem:[#allocation2 + $0xb8] sm:$0xff] %vm4541_vm12, %v4686_v9 }
 0x2e9   : > { %5790 = vrot.lane.b32.xlu1 %v8010_v37, %s8659_s22  ;;  %v6414_v4 = vpop.permute.xlu0 %6413 }
 0x2ea   : > { %6429 = vrot.lane.b32.xlu0 %v8073_v55, %s8660_s26  ;;  %6455 = vst.msk [vmem:[#allocation2 + $0xb0] sm:$0xff] %vm6128_vm14, %v6414_v4 }
 0x2eb   : > { %v5775_v38 = vpop.permute.xlu1 %5774 }
 0x2ec   : > { %5815 = vst.msk [vmem:[#allocation2 + $0xb8] sm:$0xff] %vm5263_vm13, %v5775_v38 }
 0x2ed   : > { %6431 = vrot.lane.b32.xlu1 %v8074_v39, %s8660_s26  ;;  %v2248_v15 = vpop.permute.xlu0 %2247 }
 0x2ee   : > { %2287 = vst.msk [vmem:[#allocation2 + $0xc0] sm:$0xff] %vm1958_vm8, %v2248_v15 }
 0x2ef   : > { %v6416_v0 = vpop.permute.xlu1 %6415  ;;  %v8213_v41 = vpop.f32.mrb[12].mxu0 }
 0x2f0   : > { %6456 = vst.msk [vmem:[#allocation2 + $0xb8] sm:$0xff] %vm6128_vm14, %v6416_v0  ;;  %7147 = vst [vmem:[#allocation3 + $0x70] sm:$0xff] %v8213_v41  ;;  %v6716_v6 = vpop.f32.mrb[13].mxu0  ;;  %v7010_v51 = vmul.f32 %v8213_v41, %v8213_v41 }
 0x2f1   : > { %v6935_v42 = vadd.f32 %v6934_v62, %v6716_v6  ;;  %v7008_v29 = vmul.f32 %v6716_v6, %v6716_v6  ;;  %7145 = vst [vmem:[#allocation3 + $0x60] sm:$0xff] %v6716_v6  ;;  %v8214_v34 = vpop.f32.mrb[14].mxu0  ;;  %v2603_v56 = vpop.permute.xlu0 %2602  ;;  %v6487_v17 = vld [vmem:[#allocation2 + $0xb0] sm:$0xff] }
 0x2f2   : > { %7148 = vst [vmem:[#allocation3 + $0x78] sm:$0xff] %v8214_v34  ;;  %v6719_v43 = vpop.f32.mrb[15].mxu0  ;;  %2642 = vst.msk [vmem:[#allocation2 + $0xc0] sm:$0xff] %vm2456_vm9, %v2603_v56  ;;  %8243 = vmatprep.mubr.msk.bf16.mxu1 %vm6533_vm0, %v6487_v17  ;;  %v7011_v57 = vmul.f32 %v8214_v34, %v8214_v34 }
 0x2f3   : > { %v7071_v44 = vadd.f32 %v7070_v36, %v7008_v29  ;;  %v6936_v46 = vadd.f32 %v6935_v42, %v6719_v43  ;;  %v7009_v47 = vmul.f32 %v6719_v43, %v6719_v43  ;;  %7146 = vst [vmem:[#allocation3 + $0x68] sm:$0xff] %v6719_v43  ;;  %v2250_v50 = vpop.permute.xlu1 %2249 }
 0x2f4   : > { %2288 = vst.msk [vmem:[#allocation2 + $0xc8] sm:$0xff] %vm1958_vm8, %v2250_v50 }
 0x2f5   : > { %v6937_v53 = vadd.f32 %v8213_v41, %v6936_v46  ;;  %v7072_v25 = vadd.f32 %v7071_v44, %v7009_v47  ;;  %v3692_v1 = vpop.permute.xlu0 %3691 }
 0x2f6   : > { %3731 = vst.msk [vmem:[#allocation2 + $0xc0] sm:$0xff] %vm3178_vm10, %v3692_v1 }
 0x2f7   : > { %v7073_v58 = vadd.f32 %v7072_v25, %v7010_v51  ;;  %v2605_v59 = vpop.permute.xlu1 %2604  ;;  %v6488_v60 = vld [vmem:[#allocation2 + $0xb8] sm:$0xff]  ;;  %v6938_v61 = vadd.f32 %v8214_v34, %v6937_v53 }
 0x2f8   : > { %2643 = vst.msk [vmem:[#allocation2 + $0xc8] sm:$0xff] %vm2456_vm9, %v2605_v59  ;;  %8244 = vmatmul.mubr.msk.bf16.gmra.mrb[12].mxu1 %vm6533_vm0, %v6488_v60 }
 0x2f9   : > { %v7074_v3 = vadd.f32 %v7073_v58, %v7011_v57  ;;  %v4333_v11 = vpop.permute.xlu0 %4332 }
 0x2fa   : > { %4372 = vst.msk [vmem:[#allocation2 + $0xc0] sm:$0xff] %vm4043_vm11, %v4333_v11 }
 0x2fb   : > { %v3694_v63 = vpop.permute.xlu1 %3693 }
 0x2fc   : > { %3732 = vst.msk [vmem:[#allocation2 + $0xc8] sm:$0xff] %vm3178_vm10, %v3694_v63 }
 0x2fd   : > { %v4688_v13 = vpop.permute.xlu0 %4687 }
 0x2fe   : > { %4727 = vst.msk [vmem:[#allocation2 + $0xc0] sm:$0xff] %vm4541_vm12, %v4688_v13 }
 0x2ff   : > { %v4335_v22 = vpop.permute.xlu1 %4334 }
 0x300   : > { %4373 = vst.msk [vmem:[#allocation2 + $0xc8] sm:$0xff] %vm4043_vm11, %v4335_v22 }
 0x301   : > { %v5777_v10 = vpop.permute.xlu0 %5776 }
 0x302   : > { %5816 = vst.msk [vmem:[#allocation2 + $0xc0] sm:$0xff] %vm5263_vm13, %v5777_v10 }
 0x303   : > { %v4690_v12 = vpop.permute.xlu1 %4689 }
 0x304   : > { %4728 = vst.msk [vmem:[#allocation2 + $0xc8] sm:$0xff] %vm4541_vm12, %v4690_v12 }
 0x305   : > { %v6418_v31 = vpop.permute.xlu0 %6417 }
 0x306   : > { %6457 = vst.msk [vmem:[#allocation2 + $0xc0] sm:$0xff] %vm6128_vm14, %v6418_v31 }
 0x307   : > { %v5779_v5 = vpop.permute.xlu1 %5778  ;;  %v8217_v8 = vpop.f32.mrb[16].mxu0 }
 0x308   : > { %5817 = vst.msk [vmem:[#allocation2 + $0xc8] sm:$0xff] %vm5263_vm13, %v5779_v5  ;;  %7151 = vst [vmem:[#allocation3 + $0x90] sm:$0xff] %v8217_v8  ;;  %v6732_v45 = vpop.f32.mrb[17].mxu0  ;;  %v7014_v7 = vmul.f32 %v8217_v8, %v8217_v8 }
 0x309   : > { %v6939_v21 = vadd.f32 %v6938_v61, %v6732_v45  ;;  %v7012_v30 = vmul.f32 %v6732_v45, %v6732_v45  ;;  %7149 = vst [vmem:[#allocation3 + $0x80] sm:$0xff] %v6732_v45  ;;  %v8218_v52 = vpop.f32.mrb[18].mxu0  ;;  %v2252_v19 = vpop.permute.xlu0 %2251 }
 0x30a   : > { %7152 = vst [vmem:[#allocation3 + $0x98] sm:$0xff] %v8218_v52  ;;  %v6735_v32 = vpop.f32.mrb[19].mxu0  ;;  %2289 = vst.msk [vmem:[#allocation2 + $0xd0] sm:$0xff] %vm1958_vm8, %v2252_v19  ;;  %v7015_v48 = vmul.f32 %v8218_v52, %v8218_v52 }
 0x30b   : > { %v7075_v23 = vadd.f32 %v7074_v3, %v7012_v30  ;;  %v6940_v49 = vadd.f32 %v6939_v21, %v6735_v32  ;;  %v7013_v20 = vmul.f32 %v6735_v32, %v6735_v32  ;;  %7150 = vst [vmem:[#allocation3 + $0x88] sm:$0xff] %v6735_v32  ;;  %v6420_v27 = vpop.permute.xlu1 %6419 }
 0x30c   : > { %6458 = vst.msk [vmem:[#allocation2 + $0xc8] sm:$0xff] %vm6128_vm14, %v6420_v27 }
 0x30d   : > { %v6941_v9 = vadd.f32 %v8217_v8, %v6940_v49  ;;  %v7076_v16 = vadd.f32 %v7075_v23, %v7013_v20  ;;  %v2607_v33 = vpop.permute.xlu0 %2606  ;;  %v6489_v26 = vld [vmem:[#allocation2 + $0xc0] sm:$0xff] }
 0x30e   : > { %2644 = vst.msk [vmem:[#allocation2 + $0xd0] sm:$0xff] %vm2456_vm9, %v2607_v33  ;;  %8247 = vmatprep.mubr.msk.bf16.mxu1 %vm6533_vm0, %v6489_v26 }
 0x30f   : > { %v7077_v35 = vadd.f32 %v7076_v16, %v7014_v7  ;;  %v2254_v2 = vpop.permute.xlu1 %2253  ;;  %v6942_v14 = vadd.f32 %v8218_v52, %v6941_v9 }
 0x310   : > { %2290 = vst.msk [vmem:[#allocation2 + $0xd8] sm:$0xff] %vm1958_vm8, %v2254_v2 }
 0x311   : > { %v7078_v18 = vadd.f32 %v7077_v35, %v7015_v48  ;;  %v3696_v28 = vpop.permute.xlu0 %3695 }
 0x312   : > { %3733 = vst.msk [vmem:[#allocation2 + $0xd0] sm:$0xff] %vm3178_vm10, %v3696_v28 }
 0x313   : > { %v2609_v54 = vpop.permute.xlu1 %2608  ;;  %v6490_v62 = vld [vmem:[#allocation2 + $0xc8] sm:$0xff] }
 0x314   : > { %2645 = vst.msk [vmem:[#allocation2 + $0xd8] sm:$0xff] %vm2456_vm9, %v2609_v54  ;;  %8248 = vmatmul.mubr.msk.bf16.gmra.mrb[16].mxu1 %vm6533_vm0, %v6490_v62 }
 0x315   : > { %v4337_v24 = vpop.permute.xlu0 %4336 }
 0x316   : > { %4374 = vst.msk [vmem:[#allocation2 + $0xd0] sm:$0xff] %vm4043_vm11, %v4337_v24 }
 0x317   : > { %v3698_v55 = vpop.permute.xlu1 %3697 }
 0x318   : > { %3734 = vst.msk [vmem:[#allocation2 + $0xd8] sm:$0xff] %vm3178_vm10, %v3698_v55 }
 0x319   : > { %v4692_v37 = vpop.permute.xlu0 %4691 }
 0x31a   : > { %4729 = vst.msk [vmem:[#allocation2 + $0xd0] sm:$0xff] %vm4541_vm12, %v4692_v37 }
 0x31b   : > { %v4339_v36 = vpop.permute.xlu1 %4338 }
 0x31c   : > { %4375 = vst.msk [vmem:[#allocation2 + $0xd8] sm:$0xff] %vm4043_vm11, %v4339_v36 }
 0x31d   : > { %v5781_v40 = vpop.permute.xlu0 %5780 }
 0x31e   : > { %5818 = vst.msk [vmem:[#allocation2 + $0xd0] sm:$0xff] %vm5263_vm13, %v5781_v40 }
 0x31f   : > { %v4694_v38 = vpop.permute.xlu1 %4693 }
 0x320   : > { %4730 = vst.msk [vmem:[#allocation2 + $0xd8] sm:$0xff] %vm4541_vm12, %v4694_v38 }
 0x321   : > { %v6422_v29 = vpop.permute.xlu0 %6421 }
 0x322   : > { %6459 = vst.msk [vmem:[#allocation2 + $0xd0] sm:$0xff] %vm6128_vm14, %v6422_v29 }
 0x323   : > { %v5783_v39 = vpop.permute.xlu1 %5782  ;;  %v8221_v4 = vpop.f32.mrb[20].mxu0 }
 0x324   : > { %5819 = vst.msk [vmem:[#allocation2 + $0xd8] sm:$0xff] %vm5263_vm13, %v5783_v39  ;;  %7155 = vst [vmem:[#allocation3 + $0xb0] sm:$0xff] %v8221_v4  ;;  %v6748_v0 = vpop.f32.mrb[21].mxu0  ;;  %v7018_v47 = vmul.f32 %v8221_v4, %v8221_v4 }
 0x325   : > { %v6943_v41 = vadd.f32 %v6942_v14, %v6748_v0  ;;  %v7016_v6 = vmul.f32 %v6748_v0, %v6748_v0  ;;  %7153 = vst [vmem:[#allocation3 + $0xa0] sm:$0xff] %v6748_v0  ;;  %v8222_v42 = vpop.f32.mrb[22].mxu0  ;;  %v2256_v53 = vpop.permute.xlu0 %2255 }
 0x326   : > { %7156 = vst [vmem:[#allocation3 + $0xb8] sm:$0xff] %v8222_v42  ;;  %v6751_v34 = vpop.f32.mrb[23].mxu0  ;;  %2291 = vst.msk [vmem:[#allocation2 + $0xe0] sm:$0xff] %vm1958_vm8, %v2256_v53  ;;  %v7019_v25 = vmul.f32 %v8222_v42, %v8222_v42 }
 0x327   : > { %v7079_v15 = vadd.f32 %v7078_v18, %v7016_v6  ;;  %v6944_v43 = vadd.f32 %v6943_v41, %v6751_v34  ;;  %v7017_v44 = vmul.f32 %v6751_v34, %v6751_v34  ;;  %7154 = vst [vmem:[#allocation3 + $0xa8] sm:$0xff] %v6751_v34  ;;  %v6424_v46 = vpop.permute.xlu1 %6423 }
 0x328   : > { %6460 = vst.msk [vmem:[#allocation2 + $0xd8] sm:$0xff] %vm6128_vm14, %v6424_v46 }
 0x329   : > { %v6945_v50 = vadd.f32 %v8221_v4, %v6944_v43  ;;  %v7080_v51 = vadd.f32 %v7079_v15, %v7017_v44  ;;  %v2611_v58 = vpop.permute.xlu0 %2610  ;;  %v6491_v59 = vld [vmem:[#allocation2 + $0xd0] sm:$0xff] }
 0x32a   : > { %2646 = vst.msk [vmem:[#allocation2 + $0xe0] sm:$0xff] %vm2456_vm9, %v2611_v58  ;;  %8251 = vmatprep.mubr.msk.bf16.mxu1 %vm6533_vm0, %v6491_v59 }
 0x32b   : > { %v7081_v56 = vadd.f32 %v7080_v51, %v7018_v47  ;;  %v2258_v17 = vpop.permute.xlu1 %2257  ;;  %v6946_v57 = vadd.f32 %v8222_v42, %v6945_v50 }
 0x32c   : > { %2292 = vst.msk [vmem:[#allocation2 + $0xe8] sm:$0xff] %vm1958_vm8, %v2258_v17 }
 0x32d   : > { %v7082_v60 = vadd.f32 %v7081_v56, %v7019_v25  ;;  %v3700_v3 = vpop.permute.xlu0 %3699 }
 0x32e   : > { %3735 = vst.msk [vmem:[#allocation2 + $0xe0] sm:$0xff] %vm3178_vm10, %v3700_v3 }
 0x32f   : > { %v2613_v61 = vpop.permute.xlu1 %2612  ;;  %v6492_v1 = vld [vmem:[#allocation2 + $0xd8] sm:$0xff] }
 0x330   : > { %2647 = vst.msk [vmem:[#allocation2 + $0xe8] sm:$0xff] %vm2456_vm9, %v2613_v61  ;;  %8252 = vmatmul.mubr.msk.bf16.gmra.mrb[20].mxu1 %vm6533_vm0, %v6492_v1 }
 0x331   : > { %v4341_v11 = vpop.permute.xlu0 %4340 }
 0x332   : > { %4376 = vst.msk [vmem:[#allocation2 + $0xe0] sm:$0xff] %vm4043_vm11, %v4341_v11 }
 0x333   : > { %v3702_v63 = vpop.permute.xlu1 %3701 }
 0x334   : > { %3736 = vst.msk [vmem:[#allocation2 + $0xe8] sm:$0xff] %vm3178_vm10, %v3702_v63 }
 0x335   : > { %v4696_v13 = vpop.permute.xlu0 %4695 }
 0x336   : > { %4731 = vst.msk [vmem:[#allocation2 + $0xe0] sm:$0xff] %vm4541_vm12, %v4696_v13 }
 0x337   : > { %v4343_v22 = vpop.permute.xlu1 %4342 }
 0x338   : > { %4377 = vst.msk [vmem:[#allocation2 + $0xe8] sm:$0xff] %vm4043_vm11, %v4343_v22 }
 0x339   : > { %v5785_v10 = vpop.permute.xlu0 %5784 }
 0x33a   : > { %5820 = vst.msk [vmem:[#allocation2 + $0xe0] sm:$0xff] %vm5263_vm13, %v5785_v10 }
 0x33b   : > { %v4698_v12 = vpop.permute.xlu1 %4697 }
 0x33c   : > { %4732 = vst.msk [vmem:[#allocation2 + $0xe8] sm:$0xff] %vm4541_vm12, %v4698_v12 }
 0x33d   : > { %v6426_v31 = vpop.permute.xlu0 %6425 }
 0x33e   : > { %6461 = vst.msk [vmem:[#allocation2 + $0xe0] sm:$0xff] %vm6128_vm14, %v6426_v31 }
 0x33f   : > { %v8225_v5 = vpop.f32.mrb[24].mxu0  ;;  %v5787_v45 = vpop.permute.xlu1 %5786 }
 0x340   : > { %7159 = vst [vmem:[#allocation3 + $0xd0] sm:$0xff] %v8225_v5  ;;  %v6764_v8 = vpop.f32.mrb[25].mxu0  ;;  %5821 = vst.msk [vmem:[#allocation2 + $0xe8] sm:$0xff] %vm5263_vm13, %v5787_v45  ;;  %v7022_v27 = vmul.f32 %v8225_v5, %v8225_v5 }
 0x341   : > { %v6947_v21 = vadd.f32 %v6946_v57, %v6764_v8  ;;  %v7020_v30 = vmul.f32 %v6764_v8, %v6764_v8  ;;  %7157 = vst [vmem:[#allocation3 + $0xc0] sm:$0xff] %v6764_v8  ;;  %v8226_v52 = vpop.f32.mrb[26].mxu0  ;;  %v2260_v19 = vpop.permute.xlu0 %2259 }
 0x342   : > { %7160 = vst [vmem:[#allocation3 + $0xd8] sm:$0xff] %v8226_v52  ;;  %v6767_v32 = vpop.f32.mrb[27].mxu0  ;;  %v7023_v48 = vmul.f32 %v8226_v52, %v8226_v52  ;;  %2293 = vst.msk [vmem:[#allocation2 + $0xf0] sm:$0xff] %vm1958_vm8, %v2260_v19 }
 0x343   : > { %v7083_v23 = vadd.f32 %v7082_v60, %v7020_v30  ;;  %v6948_v49 = vadd.f32 %v6947_v21, %v6767_v32  ;;  %v7021_v20 = vmul.f32 %v6767_v32, %v6767_v32  ;;  %7158 = vst [vmem:[#allocation3 + $0xc8] sm:$0xff] %v6767_v32  ;;  %v6428_v16 = vpop.permute.xlu1 %6427 }
 0x344   : > { %6462 = vst.msk [vmem:[#allocation2 + $0xe8] sm:$0xff] %vm6128_vm14, %v6428_v16 }
 0x345   : > { %v6949_v7 = vadd.f32 %v8225_v5, %v6948_v49  ;;  %v7084_v9 = vadd.f32 %v7083_v23, %v7021_v20  ;;  %v2615_v26 = vpop.permute.xlu0 %2614  ;;  %v6493_v18 = vld [vmem:[#allocation2 + $0xe0] sm:$0xff] }
 0x346   : > { %2648 = vst.msk [vmem:[#allocation2 + $0xf0] sm:$0xff] %vm2456_vm9, %v2615_v26  ;;  %8255 = vmatprep.mubr.msk.bf16.mxu1 %vm6533_vm0, %v6493_v18 }
 0x347   : > { %v7085_v35 = vadd.f32 %v7084_v9, %v7022_v27  ;;  %v6950_v2 = vadd.f32 %v8226_v52, %v6949_v7  ;;  %v2262_v14 = vpop.permute.xlu1 %2261 }
 0x348   : > { %2294 = vst.msk [vmem:[#allocation2 + $0xf8] sm:$0xff] %vm1958_vm8, %v2262_v14 }
 0x349   : > { %v7086_v33 = vadd.f32 %v7085_v35, %v7023_v48  ;;  %v3704_v28 = vpop.permute.xlu0 %3703 }
 0x34a   : > { %3737 = vst.msk [vmem:[#allocation2 + $0xf0] sm:$0xff] %vm3178_vm10, %v3704_v28 }
 0x34b   : > { %v2617_v54 = vpop.permute.xlu1 %2616  ;;  %v6494_v62 = vld [vmem:[#allocation2 + $0xe8] sm:$0xff] }
 0x34c   : > { %2649 = vst.msk [vmem:[#allocation2 + $0xf8] sm:$0xff] %vm2456_vm9, %v2617_v54  ;;  %8256 = vmatmul.mubr.msk.bf16.gmra.mrb[24].mxu1 %vm6533_vm0, %v6494_v62 }
 0x34f   : > { %v3706_v55 = vpop.permute.xlu1 %3705  ;;  %v4345_v24 = vpop.permute.xlu0 %4344 }
 0x350   : > { %3738 = vst.msk [vmem:[#allocation2 + $0xf8] sm:$0xff] %vm3178_vm10, %v3706_v55 }
 0x351   : > { %4378 = vst.msk [vmem:[#allocation2 + $0xf0] sm:$0xff] %vm4043_vm11, %v4345_v24 }
 0x353   : > { %v4347_v36 = vpop.permute.xlu1 %4346  ;;  %v4700_v37 = vpop.permute.xlu0 %4699 }
 0x354   : > { %4379 = vst.msk [vmem:[#allocation2 + $0xf8] sm:$0xff] %vm4043_vm11, %v4347_v36 }
 0x355   : > { %4733 = vst.msk [vmem:[#allocation2 + $0xf0] sm:$0xff] %vm4541_vm12, %v4700_v37 }
 0x357   : > { %v4702_v38 = vpop.permute.xlu1 %4701 }
 0x358   : > { %4734 = vst.msk [vmem:[#allocation2 + $0xf8] sm:$0xff] %vm4541_vm12, %v4702_v38  ;;  %v5789_v39 = vpop.permute.xlu0 %5788 }
 0x359   : > { %5822 = vst.msk [vmem:[#allocation2 + $0xf0] sm:$0xff] %vm5263_vm13, %v5789_v39 }
 0x35b   : > { %v8229_v40 = vpop.f32.mrb[28].mxu0  ;;  %v5791_v29 = vpop.permute.xlu1 %5790 }
 0x35c   : > { %7163 = vst [vmem:[#allocation3 + $0xf0] sm:$0xff] %v8229_v40  ;;  %v6780_v4 = vpop.f32.mrb[29].mxu0  ;;  %5823 = vst.msk [vmem:[#allocation2 + $0xf8] sm:$0xff] %vm5263_vm13, %v5791_v29  ;;  %v6430_v44 = vpop.permute.xlu0 %6429  ;;  %v7026_v46 = vmul.f32 %v8229_v40, %v8229_v40 }
 0x35d   : > { %v6951_v0 = vadd.f32 %v6950_v2, %v6780_v4  ;;  %v7024_v41 = vmul.f32 %v6780_v4, %v6780_v4  ;;  %7161 = vst [vmem:[#allocation3 + $0xe0] sm:$0xff] %v6780_v4  ;;  %v8230_v6 = vpop.f32.mrb[30].mxu0  ;;  %6463 = vst.msk [vmem:[#allocation2 + $0xf0] sm:$0xff] %vm6128_vm14, %v6430_v44 }
 0x35e   : > { %7164 = vst [vmem:[#allocation3 + $0xf8] sm:$0xff] %v8230_v6  ;;  %v6783_v42 = vpop.f32.mrb[31].mxu0  ;;  %v7027_v51 = vmul.f32 %v8230_v6, %v8230_v6 }
 0x35f   : > { %v7087_v34 = vadd.f32 %v7086_v33, %v7024_v41  ;;  %v6952_v15 = vadd.f32 %v6951_v0, %v6783_v42  ;;  %v7025_v43 = vmul.f32 %v6783_v42, %v6783_v42  ;;  %7162 = vst [vmem:[#allocation3 + $0xe8] sm:$0xff] %v6783_v42  ;;  %v6432_v25 = vpop.permute.xlu1 %6431 }
 0x360   : > { %6464 = vst.msk [vmem:[#allocation2 + $0xf8] sm:$0xff] %vm6128_vm14, %v6432_v25 }
 0x361   : > { %v6953_v47 = vadd.f32 %v8229_v40, %v6952_v15  ;;  %v7088_v50 = vadd.f32 %v7087_v34, %v7025_v43 }
 0x363   : > { %v7089_v53 = vadd.f32 %v7088_v50, %v7026_v46  ;;  %v6954_v56 = vadd.f32 %v8230_v6, %v6953_v47 }
 0x364   : > { %v6495_v57 = vld [vmem:[#allocation2 + $0xf0] sm:$0xff] }
 0x365   : > { %v7090_v17 = vadd.f32 %v7089_v53, %v7027_v51  ;;  %8259 = vmatprep.mubr.msk.bf16.mxu1 %vm6533_vm0, %v6495_v57 }
 0x367   : > { %v6496_v58 = vld [vmem:[#allocation2 + $0xf8] sm:$0xff] }
 0x368   : > { %8260 = vmatmul.mubr.msk.bf16.gmra.mrb[28].mxu1 %vm6533_vm0, %v6496_v58 }
 0x377   : > { %v8233_v59 = vpop.f32.mrb[0].mxu1 }
 0x378   : > { %7167 = vst [vmem:[#allocation3 + $0x110] sm:$0xff] %v8233_v59  ;;  %v6796_v60 = vpop.f32.mrb[1].mxu1  ;;  %v7030_v12 = vmul.f32 %v8233_v59, %v8233_v59 }
 0x379   : > { %v6955_v61 = vadd.f32 %v6954_v56, %v6796_v60  ;;  %v7028_v1 = vmul.f32 %v6796_v60, %v6796_v60  ;;  %7165 = vst [vmem:[#allocation3 + $0x100] sm:$0xff] %v6796_v60  ;;  %v8234_v3 = vpop.f32.mrb[2].mxu1 }
 0x37a   : > { %7168 = vst [vmem:[#allocation3 + $0x118] sm:$0xff] %v8234_v3  ;;  %v6799_v63 = vpop.f32.mrb[3].mxu1  ;;  %v7031_v8 = vmul.f32 %v8234_v3, %v8234_v3 }
 0x37b   : > { %v7091_v11 = vadd.f32 %v7090_v17, %v7028_v1  ;;  %v6956_v22 = vadd.f32 %v6955_v61, %v6799_v63  ;;  %v7029_v13 = vmul.f32 %v6799_v63, %v6799_v63  ;;  %7166 = vst [vmem:[#allocation3 + $0x108] sm:$0xff] %v6799_v63 }
 0x37d   : > { %v6957_v10 = vadd.f32 %v8233_v59, %v6956_v22  ;;  %v7092_v5 = vadd.f32 %v7091_v11, %v7029_v13 }
 0x37f   : > { %v7093_v45 = vadd.f32 %v7092_v5, %v7030_v12  ;;  %v6958_v21 = vadd.f32 %v8234_v3, %v6957_v10 }
 0x381   : > { %v7094_v30 = vadd.f32 %v7093_v45, %v7031_v8 }
 0x393   : > { %v8237_v52 = vpop.f32.mrb[4].mxu1 }
 0x394   : > { %7171 = vst [vmem:[#allocation3 + $0x130] sm:$0xff] %v8237_v52  ;;  %v6812_v31 = vpop.f32.mrb[5].mxu1  ;;  %v7034_v16 = vmul.f32 %v8237_v52, %v8237_v52 }
 0x395   : > { %v6959_v32 = vadd.f32 %v6958_v21, %v6812_v31  ;;  %v7032_v23 = vmul.f32 %v6812_v31, %v6812_v31  ;;  %7169 = vst [vmem:[#allocation3 + $0x120] sm:$0xff] %v6812_v31  ;;  %v8238_v49 = vpop.f32.mrb[6].mxu1 }
 0x396   : > { %7172 = vst [vmem:[#allocation3 + $0x138] sm:$0xff] %v8238_v49  ;;  %v6815_v20 = vpop.f32.mrb[7].mxu1  ;;  %v7035_v35 = vmul.f32 %v8238_v49, %v8238_v49 }
 0x397   : > { %v7095_v27 = vadd.f32 %v7094_v30, %v7032_v23  ;;  %v6960_v7 = vadd.f32 %v6959_v32, %v6815_v20  ;;  %v7033_v9 = vmul.f32 %v6815_v20, %v6815_v20  ;;  %7170 = vst [vmem:[#allocation3 + $0x128] sm:$0xff] %v6815_v20 }
 0x399   : > { %v6961_v19 = vadd.f32 %v8237_v52, %v6960_v7  ;;  %v7096_v48 = vadd.f32 %v7095_v27, %v7033_v9 }
 0x39b   : > { %v7097_v2 = vadd.f32 %v7096_v48, %v7034_v16  ;;  %v6962_v14 = vadd.f32 %v8238_v49, %v6961_v19 }
 0x39d   : > { %v7098_v33 = vadd.f32 %v7097_v2, %v7035_v35 }
 0x3af   : > { %v8241_v26 = vpop.f32.mrb[8].mxu1 }
 0x3b0   : > { %7175 = vst [vmem:[#allocation3 + $0x150] sm:$0xff] %v8241_v26  ;;  %v6828_v18 = vpop.f32.mrb[9].mxu1  ;;  %v7038_v38 = vmul.f32 %v8241_v26, %v8241_v26 }
 0x3b1   : > { %v6963_v54 = vadd.f32 %v6962_v14, %v6828_v18  ;;  %v7036_v62 = vmul.f32 %v6828_v18, %v6828_v18  ;;  %7173 = vst [vmem:[#allocation3 + $0x140] sm:$0xff] %v6828_v18  ;;  %v8242_v28 = vpop.f32.mrb[10].mxu1 }
 0x3b2   : > { %7176 = vst [vmem:[#allocation3 + $0x158] sm:$0xff] %v8242_v28  ;;  %v6831_v55 = vpop.f32.mrb[11].mxu1  ;;  %v7039_v4 = vmul.f32 %v8242_v28, %v8242_v28 }
 0x3b3   : > { %v7099_v24 = vadd.f32 %v7098_v33, %v7036_v62  ;;  %v6964_v36 = vadd.f32 %v6963_v54, %v6831_v55  ;;  %v7037_v37 = vmul.f32 %v6831_v55, %v6831_v55  ;;  %7174 = vst [vmem:[#allocation3 + $0x148] sm:$0xff] %v6831_v55 }
 0x3b5   : > { %v6965_v40 = vadd.f32 %v8241_v26, %v6964_v36  ;;  %v7100_v39 = vadd.f32 %v7099_v24, %v7037_v37 }
 0x3b7   : > { %v7101_v0 = vadd.f32 %v7100_v39, %v7038_v38  ;;  %v6966_v41 = vadd.f32 %v8242_v28, %v6965_v40 }
 0x3b9   : > { %v7102_v6 = vadd.f32 %v7101_v0, %v7039_v4 }
 0x3cb   : > { %v8245_v42 = vpop.f32.mrb[12].mxu1 }
 0x3cc   : > { %7179 = vst [vmem:[#allocation3 + $0x170] sm:$0xff] %v8245_v42  ;;  %v6844_v29 = vpop.f32.mrb[13].mxu1  ;;  %v7042_v51 = vmul.f32 %v8245_v42, %v8245_v42 }
 0x3cd   : > { %v6967_v34 = vadd.f32 %v6966_v41, %v6844_v29  ;;  %v7040_v15 = vmul.f32 %v6844_v29, %v6844_v29  ;;  %7177 = vst [vmem:[#allocation3 + $0x160] sm:$0xff] %v6844_v29  ;;  %v8246_v43 = vpop.f32.mrb[14].mxu1 }
 0x3ce   : > { %7180 = vst [vmem:[#allocation3 + $0x178] sm:$0xff] %v8246_v43  ;;  %v6847_v44 = vpop.f32.mrb[15].mxu1  ;;  %v7043_v56 = vmul.f32 %v8246_v43, %v8246_v43 }
 0x3cf   : > { %v7103_v46 = vadd.f32 %v7102_v6, %v7040_v15  ;;  %v6968_v47 = vadd.f32 %v6967_v34, %v6847_v44  ;;  %v7041_v50 = vmul.f32 %v6847_v44, %v6847_v44  ;;  %7178 = vst [vmem:[#allocation3 + $0x168] sm:$0xff] %v6847_v44 }
 0x3d1   : > { %v6969_v53 = vadd.f32 %v8245_v42, %v6968_v47  ;;  %v7104_v25 = vadd.f32 %v7103_v46, %v7041_v50 }
 0x3d3   : > { %v7105_v17 = vadd.f32 %v7104_v25, %v7042_v51  ;;  %v6970_v57 = vadd.f32 %v8246_v43, %v6969_v53 }
 0x3d5   : > { %v7106_v58 = vadd.f32 %v7105_v17, %v7043_v56 }
 0x3e7   : > { %v8249_v59 = vpop.f32.mrb[16].mxu1 }
 0x3e8   : > { %7183 = vst [vmem:[#allocation3 + $0x190] sm:$0xff] %v8249_v59  ;;  %v6860_v60 = vpop.f32.mrb[17].mxu1  ;;  %v7046_v12 = vmul.f32 %v8249_v59, %v8249_v59 }
 0x3e9   : > { %v6971_v61 = vadd.f32 %v6970_v57, %v6860_v60  ;;  %v7044_v1 = vmul.f32 %v6860_v60, %v6860_v60  ;;  %7181 = vst [vmem:[#allocation3 + $0x180] sm:$0xff] %v6860_v60  ;;  %v8250_v3 = vpop.f32.mrb[18].mxu1 }
 0x3ea   : > { %7184 = vst [vmem:[#allocation3 + $0x198] sm:$0xff] %v8250_v3  ;;  %v6863_v63 = vpop.f32.mrb[19].mxu1  ;;  %v7047_v8 = vmul.f32 %v8250_v3, %v8250_v3 }
 0x3eb   : > { %v7107_v11 = vadd.f32 %v7106_v58, %v7044_v1  ;;  %v6972_v22 = vadd.f32 %v6971_v61, %v6863_v63  ;;  %v7045_v13 = vmul.f32 %v6863_v63, %v6863_v63  ;;  %7182 = vst [vmem:[#allocation3 + $0x188] sm:$0xff] %v6863_v63 }
 0x3ed   : > { %v6973_v10 = vadd.f32 %v8249_v59, %v6972_v22  ;;  %v7108_v5 = vadd.f32 %v7107_v11, %v7045_v13 }
 0x3ef   : > { %v7109_v45 = vadd.f32 %v7108_v5, %v7046_v12  ;;  %v6974_v21 = vadd.f32 %v8250_v3, %v6973_v10  ;;  %v6923_v12 = vld [vmem:[#allocation4] sm:$0x1] }
 0x3f1   : > { %v7110_v30 = vadd.f32 %v7109_v45, %v7047_v8  ;;  %v6995_v8 = vld [vmem:[#allocation5] sm:$0x1] }
 0x403   : > { %v8253_v52 = vpop.f32.mrb[20].mxu1 }
 0x404   : > { %7187 = vst [vmem:[#allocation3 + $0x1b0] sm:$0xff] %v8253_v52  ;;  %v6876_v31 = vpop.f32.mrb[21].mxu1  ;;  %v7050_v16 = vmul.f32 %v8253_v52, %v8253_v52 }
 0x405   : > { %v6975_v32 = vadd.f32 %v6974_v21, %v6876_v31  ;;  %v7048_v23 = vmul.f32 %v6876_v31, %v6876_v31  ;;  %7185 = vst [vmem:[#allocation3 + $0x1a0] sm:$0xff] %v6876_v31  ;;  %v8254_v49 = vpop.f32.mrb[22].mxu1 }
 0x406   : > { %7188 = vst [vmem:[#allocation3 + $0x1b8] sm:$0xff] %v8254_v49  ;;  %v6879_v20 = vpop.f32.mrb[23].mxu1  ;;  %v7051_v35 = vmul.f32 %v8254_v49, %v8254_v49 }
 0x407   : > { %v7111_v27 = vadd.f32 %v7110_v30, %v7048_v23  ;;  %v6976_v7 = vadd.f32 %v6975_v32, %v6879_v20  ;;  %v7049_v9 = vmul.f32 %v6879_v20, %v6879_v20  ;;  %7186 = vst [vmem:[#allocation3 + $0x1a8] sm:$0xff] %v6879_v20 }
 0x409   : > { %v6977_v19 = vadd.f32 %v8253_v52, %v6976_v7  ;;  %v7112_v48 = vadd.f32 %v7111_v27, %v7049_v9 }
 0x40b   : > { %v7113_v2 = vadd.f32 %v7112_v48, %v7050_v16  ;;  %v6978_v14 = vadd.f32 %v8254_v49, %v6977_v19 }
 0x40d   : > { %v7114_v33 = vadd.f32 %v7113_v2, %v7051_v35 }
 0x41f   : > { %v8257_v26 = vpop.f32.mrb[24].mxu1 }
 0x420   : > { %7191 = vst [vmem:[#allocation3 + $0x1d0] sm:$0xff] %v8257_v26  ;;  %v6892_v18 = vpop.f32.mrb[25].mxu1  ;;  %v7054_v38 = vmul.f32 %v8257_v26, %v8257_v26 }
 0x421   : > { %v6979_v54 = vadd.f32 %v6978_v14, %v6892_v18  ;;  %v7052_v62 = vmul.f32 %v6892_v18, %v6892_v18  ;;  %7189 = vst [vmem:[#allocation3 + $0x1c0] sm:$0xff] %v6892_v18  ;;  %v8258_v28 = vpop.f32.mrb[26].mxu1 }
 0x422   : > { %7192 = vst [vmem:[#allocation3 + $0x1d8] sm:$0xff] %v8258_v28  ;;  %v6895_v55 = vpop.f32.mrb[27].mxu1  ;;  %v7055_v4 = vmul.f32 %v8258_v28, %v8258_v28 }
 0x423   : > { %v7115_v24 = vadd.f32 %v7114_v33, %v7052_v62  ;;  %v6980_v36 = vadd.f32 %v6979_v54, %v6895_v55  ;;  %v7053_v37 = vmul.f32 %v6895_v55, %v6895_v55  ;;  %7190 = vst [vmem:[#allocation3 + $0x1c8] sm:$0xff] %v6895_v55 }
 0x425   : > { %v6981_v40 = vadd.f32 %v8257_v26, %v6980_v36  ;;  %v7116_v39 = vadd.f32 %v7115_v24, %v7053_v37 }
 0x427   : > { %v7117_v0 = vadd.f32 %v7116_v39, %v7054_v38  ;;  %v6982_v41 = vadd.f32 %v8258_v28, %v6981_v40 }
 0x429   : > { %v7118_v6 = vadd.f32 %v7117_v0, %v7055_v4 }
 0x43b   : > { %v8261_v42 = vpop.f32.mrb[28].mxu1 }
 0x43c   : > { %7195 = vst [vmem:[#allocation3 + $0x1f0] sm:$0xff] %v8261_v42  ;;  %v6908_v29 = vpop.f32.mrb[29].mxu1  ;;  %v7058_v51 = vmul.f32 %v8261_v42, %v8261_v42 }
 0x43d   : > { %v6983_v34 = vadd.f32 %v6982_v41, %v6908_v29  ;;  %v7056_v15 = vmul.f32 %v6908_v29, %v6908_v29  ;;  %7193 = vst [vmem:[#allocation3 + $0x1e0] sm:$0xff] %v6908_v29  ;;  %v8262_v43 = vpop.f32.mrb[30].mxu1 }
 0x43e   : > { %7196 = vst [vmem:[#allocation3 + $0x1f8] sm:$0xff] %v8262_v43  ;;  %v6911_v44 = vpop.f32.mrb[31].mxu1  ;;  %v7059_v56 = vmul.f32 %v8262_v43, %v8262_v43 }
 0x43f   : > { %v7119_v46 = vadd.f32 %v7118_v6, %v7056_v15  ;;  %v6984_v47 = vadd.f32 %v6983_v34, %v6911_v44  ;;  %v7057_v50 = vmul.f32 %v6911_v44, %v6911_v44  ;;  %7194 = vst [vmem:[#allocation3 + $0x1e8] sm:$0xff] %v6911_v44 }
 0x441   : > { %v6985_v53 = vadd.f32 %v8261_v42, %v6984_v47  ;;  %v7120_v25 = vadd.f32 %v7119_v46, %v7057_v50 }
 0x443   : > { %v6986_v17 = vadd.f32 %v8262_v43, %v6985_v53  ;;  %v7121_v57 = vadd.f32 %v7120_v25, %v7058_v51 }
 0x445   : > { %v6987_v58 = vrot.slane %v6986_v17, 4  ;;  %v7122_v59 = vadd.f32 %v7121_v57, %v7059_v56 }
 0x447   : > { %v6988_v60 = vadd.f32 %v6987_v58, %v6986_v17  ;;  %v7123_v61 = vrot.slane %v7122_v59, 4 }
 0x449   : > { %v6989_v1 = vrot.slane %v6988_v60, 2  ;;  %v7124_v3 = vadd.f32 %v7123_v61, %v7122_v59 }
 0x44b   : > { %v6990_v63 = vadd.f32 %v6989_v1, %v6988_v60  ;;  %v7125_v11 = vrot.slane %v7124_v3, 2 }
 0x44d   : > { %v6991_v22 = vrot.slane %v6990_v63, 1  ;;  %v7126_v13 = vadd.f32 %v7125_v11, %v7124_v3 }
 0x44f   : > { %v6992_v10 = vadd.f32 %v6991_v22, %v6990_v63  ;;  %v7127_v5 = vrot.slane %v7126_v13, 1 }
 0x451   : > { %v6993_v45 = vadd.f32 %v6992_v10, %v6923_v12  ;;  %v7128_v21 = vadd.f32 %v7127_v5, %v7126_v13 }
 0x453   : > { %6994 = vst [vmem:[#allocation4] sm:$0x1] %v6993_v45  ;;  %v7129_v30 = vadd.f32 %v7128_v21, %v6995_v8 }
 0x455   : > { %7130 = vst [vmem:[#allocation5] sm:$0x1] %v7129_v30 }
 0x456 PF: > { %7198 = sbr.rel (!%p258_p5) target bundleno = 1143 (0x477), region = 64  ;;  %v7208_v9 = vld [vmem:[#allocation13] sm:$0x1] (%p258_p5)  ;;  %v7211_v48 = vld [vmem:[#allocation14] sm:$0x1] (%p258_p5) }
 0x45a   : > { %v7199_v52 = vld [vmem:[#allocation4] sm:$0x1] (%p258_p5) }
 0x45b   : > { %v7200_v32 = vmul.f32 (%p258_p5), 0.001953125, %v7199_v52 }
 0x45c   : > { %v7201_v31 = vld [vmem:[#allocation5] sm:$0x1] (%p258_p5) }
 0x45d   : > { %v7202_v23 = vmul.f32 0.001953125, %v7201_v31  ;;  %v7203_v49 = vmul.f32 %v7200_v32, %v7200_v32 }
 0x45f   : > { %v7204_v20 = vsub.f32 %v7202_v23, %v7203_v49 }
 0x461   : > { %v7205_v27 = vmax.f32 %v7204_v20, 0.0 }
 0x463   : > { %v7206_v7 = vadd.f32 1e-05, %v7205_v27 }
 0x465   : > { %8466 = vrsqrt.f32 %v7206_v7 }
 0x46f   : > { %v8467_v16 = vpop.eup %8466 }
 0x470   : > { %v7209_v19 = vmul.f32 %v8467_v16, %v7208_v9 }
 0x472   : > { %7210 = vst [vmem:[#allocation6] sm:$0x1] %v7209_v19  ;;  %v7212_v35 = vmul.f32 %v7209_v19, %v7200_v32 }
 0x474   : > { %v7213_v2 = vsub.f32 %v7211_v48, %v7212_v35 }
 0x476   : > { %7214 = vst [vmem:[#allocation7] sm:$0x1] %v7213_v2 }
 0x477 PF: > { %p8112_p6 = scmp.ne.s32.totalorder %s8636_s15, 1 }
 0x478   : > { %v7221_v14 = vld [vmem:[#allocation3] sm:$0xff] (!%p8112_p6)  ;;  %v7222_v54 = vld [vmem:[#allocation3 + $0x8] sm:$0xff] (!%p8112_p6)  ;;  %v7223_v62 = vld [vmem:[#allocation3 + $0x10] sm:$0xff] (!%p8112_p6) }
 0x479   : > { %7218 = sbr.rel (%p8112_p6) target bundleno = 1201 (0x4b1), region = 68  ;;  %v10611_v33 = vld [vmem:[#allocation6] ss:$0 sm:$0xff] (!%p8112_p6)  ;;  %v7224_v28 = vld [vmem:[#allocation3 + $0x18] sm:$0xff] (!%p8112_p6)  ;;  %v7226_v38 = vld [vmem:[#allocation3 + $0x28] sm:$0xff] (!%p8112_p6) }
 0x47a   : > { %v7293_v18 = vmul.f32 (!%p8112_p6), %v10611_v33, %v7221_v14  ;;  %v7294_v55 = vmul.f32 (!%p8112_p6), %v10611_v33, %v7222_v54  ;;  %v7295_v24 = vmul.f32 (!%p8112_p6), %v10611_v33, %v7223_v62  ;;  %v7296_v36 = vmul.f32 (!%p8112_p6), %v10611_v33, %v7224_v28  ;;  %v7225_v37 = vld [vmem:[#allocation3 + $0x20] sm:$0xff] (!%p8112_p6)  ;;  %v7227_v40 = vld [vmem:[#allocation3 + $0x30] sm:$0xff] (!%p8112_p6)  ;;  %v7228_v6 = vld [vmem:[#allocation3 + $0x38] sm:$0xff] (!%p8112_p6) }
 0x47b   : > { %v7297_v4 = vmul.f32 (!%p8112_p6), %v10611_v33, %v7225_v37  ;;  %v7298_v0 = vmul.f32 (!%p8112_p6), %v10611_v33, %v7226_v38  ;;  %v7299_v41 = vmul.f32 (!%p8112_p6), %v10611_v33, %v7227_v40  ;;  %v7300_v15 = vmul.f32 (!%p8112_p6), %v10611_v33, %v7228_v6  ;;  %v7229_v43 = vld [vmem:[#allocation3 + $0x40] sm:$0xff] (!%p8112_p6)  ;;  %v7230_v51 = vld [vmem:[#allocation3 + $0x48] sm:$0xff] (!%p8112_p6)  ;;  %v7231_v53 = vld [vmem:[#allocation3 + $0x50] sm:$0xff] (!%p8112_p6) }
 0x47c   : > { %v7232_v25 = vld [vmem:[#allocation3 + $0x58] sm:$0xff] (!%p8112_p6)  ;;  %v7233_v59 = vld [vmem:[#allocation3 + $0x60] sm:$0xff] (!%p8112_p6)  ;;  %v7234_v60 = vld [vmem:[#allocation3 + $0x68] sm:$0xff] (!%p8112_p6)  ;;  %v7301_v11 = vmul.f32 (!%p8112_p6), %v10611_v33, %v7229_v43  ;;  %v7302_v12 = vmul.f32 (!%p8112_p6), %v10611_v33, %v7230_v51  ;;  %v7303_v10 = vmul.f32 (!%p8112_p6), %v10611_v33, %v7231_v53 }
 0x47d   : > { %v10613_v26 = vld [vmem:[#allocation7] ss:$0 sm:$0xff] (!%p8112_p6)  ;;  %v7235_v61 = vld [vmem:[#allocation3 + $0x70] sm:$0xff] (!%p8112_p6)  ;;  %v7236_v22 = vld [vmem:[#allocation3 + $0x78] sm:$0xff] (!%p8112_p6)  ;;  %v7304_v5 = vmul.f32 (!%p8112_p6), %v10611_v33, %v7232_v25  ;;  %v7305_v45 = vmul.f32 (!%p8112_p6), %v10611_v33, %v7233_v59  ;;  %v7306_v21 = vmul.f32 (!%p8112_p6), %v10611_v33, %v7234_v60 }
 0x47e   : > { %v7331_v39 = vadd.f32 (!%p8112_p6), %v10613_v26, %v7293_v18  ;;  %v7332_v42 = vadd.f32 (!%p8112_p6), %v10613_v26, %v7294_v55  ;;  %v7333_v29 = vadd.f32 (!%p8112_p6), %v10613_v26, %v7295_v24  ;;  %v7334_v34 = vadd.f32 (!%p8112_p6), %v10613_v26, %v7296_v36  ;;  %v7237_v49 = vld [vmem:[#allocation3 + $0x80] sm:$0xff] (!%p8112_p6)  ;;  %v7238_v16 = vld [vmem:[#allocation3 + $0x88] sm:$0xff] (!%p8112_p6)  ;;  %v7239_v19 = vld [vmem:[#allocation3 + $0x90] sm:$0xff] (!%p8112_p6) }
 0x47f   : > { %v7335_v46 = vadd.f32 (!%p8112_p6), %v10613_v26, %v7297_v4  ;;  %v7336_v47 = vadd.f32 (!%p8112_p6), %v10613_v26, %v7298_v0  ;;  %v7337_v50 = vadd.f32 (!%p8112_p6), %v10613_v26, %v7299_v41  ;;  %v7338_v58 = vadd.f32 (!%p8112_p6), %v10613_v26, %v7300_v15  ;;  %v7240_v48 = vld [vmem:[#allocation3 + $0x98] sm:$0xff] (!%p8112_p6)  ;;  %v7241_v54 = vld [vmem:[#allocation3 + $0xa0] sm:$0xff] (!%p8112_p6)  ;;  %v7242_v62 = vld [vmem:[#allocation3 + $0xa8] sm:$0xff] (!%p8112_p6) }
 0x480   : > { %v7363_v44 = vmax.f32 %v7331_v39, 0.0  ;;  %v7364_v56 = vmax.f32 %v7332_v42, 0.0  ;;  %v7365_v17 = vmax.f32 %v7333_v29, 0.0  ;;  %v7366_v57 = vmax.f32 %v7334_v34, 0.0  ;;  %v7243_v28 = vld [vmem:[#allocation3 + $0xb0] sm:$0xff]  ;;  %v7244_v38 = vld [vmem:[#allocation3 + $0xb8] sm:$0xff] }
 0x481   : > { %v7367_v1 = vmax.f32 %v7335_v46, 0.0  ;;  %v7368_v3 = vmax.f32 %v7336_v47, 0.0  ;;  %v7369_v63 = vmax.f32 %v7337_v50, 0.0  ;;  %v7370_v13 = vmax.f32 %v7338_v58, 0.0  ;;  %v7245_v46 = vld [vmem:[#allocation3 + $0xc0] sm:$0xff]  ;;  %v7246_v25 = vld [vmem:[#allocation3 + $0xc8] sm:$0xff] }
 0x482   : > { %7395 = vst [vmem:[#allocation16] sm:$0xff] %v7363_v44  ;;  %7396 = vst [vmem:[#allocation16 + $0x8] sm:$0xff] %v7364_v56  ;;  %v7339_v8 = vadd.f32 %v10613_v26, %v7301_v11  ;;  %v7307_v30 = vmul.f32 %v10611_v33, %v7235_v61  ;;  %v7340_v52 = vadd.f32 %v10613_v26, %v7302_v12  ;;  %v7247_v56 = vld [vmem:[#allocation3 + $0xd0] sm:$0xff]  ;;  %v7249_v61 = vld [vmem:[#allocation3 + $0xe0] sm:$0xff] }
 0x483   : > { %7397 = vst [vmem:[#allocation16 + $0x10] sm:$0xff] %v7365_v17  ;;  %7398 = vst [vmem:[#allocation16 + $0x18] sm:$0xff] %v7366_v57  ;;  %v7341_v31 = vadd.f32 %v10613_v26, %v7303_v10  ;;  %v7342_v32 = vadd.f32 %v10613_v26, %v7304_v5  ;;  %v7308_v23 = vmul.f32 %v10611_v33, %v7236_v22  ;;  %v7248_v17 = vld [vmem:[#allocation3 + $0xd8] sm:$0xff] }
 0x484   : > { %7399 = vst [vmem:[#allocation16 + $0x20] sm:$0xff] %v7367_v1  ;;  %7400 = vst [vmem:[#allocation16 + $0x28] sm:$0xff] %v7368_v3  ;;  %v7371_v20 = vmax.f32 %v7339_v8, 0.0  ;;  %v7343_v27 = vadd.f32 %v10613_v26, %v7305_v45  ;;  %v7344_v7 = vadd.f32 %v10613_v26, %v7306_v21  ;;  %v7345_v9 = vadd.f32 %v10613_v26, %v7307_v30  ;;  %v7250_v1 = vld [vmem:[#allocation3 + $0xe8] sm:$0xff]  ;;  %v7251_v3 = vld [vmem:[#allocation3 + $0xf0] sm:$0xff] }
 0x485   : > { %7401 = vst [vmem:[#allocation16 + $0x30] sm:$0xff] %v7369_v63  ;;  %7402 = vst [vmem:[#allocation16 + $0x38] sm:$0xff] %v7370_v13  ;;  %v7372_v35 = vmax.f32 %v7340_v52, 0.0  ;;  %v7373_v2 = vmax.f32 %v7341_v31, 0.0  ;;  %v7374_v14 = vmax.f32 %v7342_v32, 0.0  ;;  %v7346_v18 = vadd.f32 %v10613_v26, %v7308_v23  ;;  %v7252_v12 = vld [vmem:[#allocation3 + $0xf8] sm:$0xff] }
 0x486   : > { %7403 = vst [vmem:[#allocation16 + $0x40] sm:$0xff] %v7371_v20  ;;  %v7375_v55 = vmax.f32 %v7343_v27, 0.0  ;;  %v7376_v24 = vmax.f32 %v7344_v7, 0.0  ;;  %v7377_v36 = vmax.f32 %v7345_v9, 0.0  ;;  %v7309_v37 = vmul.f32 %v10611_v33, %v7237_v49  ;;  %v7253_v27 = vld [vmem:[#allocation3 + $0x100] sm:$0xff] }
 0x487   : > { %7404 = vst [vmem:[#allocation16 + $0x48] sm:$0xff] %v7372_v35  ;;  %7405 = vst [vmem:[#allocation16 + $0x50] sm:$0xff] %v7373_v2  ;;  %v7378_v40 = vmax.f32 %v7346_v18, 0.0  ;;  %v7310_v39 = vmul.f32 %v10611_v33, %v7238_v16  ;;  %v7311_v4 = vmul.f32 %v10611_v33, %v7239_v19  ;;  %v7312_v0 = vmul.f32 %v10611_v33, %v7240_v48  ;;  %v7254_v48 = vld [vmem:[#allocation3 + $0x108] sm:$0xff]  ;;  %v7255_v35 = vld [vmem:[#allocation3 + $0x110] sm:$0xff] }
 0x488   : > { %7406 = vst [vmem:[#allocation16 + $0x58] sm:$0xff] %v7374_v14  ;;  %7407 = vst [vmem:[#allocation16 + $0x60] sm:$0xff] %v7375_v55  ;;  %v7347_v41 = vadd.f32 %v10613_v26, %v7309_v37  ;;  %v7313_v6 = vmul.f32 %v10611_v33, %v7241_v54  ;;  %v7314_v42 = vmul.f32 %v10611_v33, %v7242_v62  ;;  %v7256_v2 = vld [vmem:[#allocation3 + $0x118] sm:$0xff]  ;;  %v7258_v55 = vld [vmem:[#allocation3 + $0x128] sm:$0xff] }
 0x489   : > { %7408 = vst [vmem:[#allocation16 + $0x68] sm:$0xff] %v7376_v24  ;;  %7409 = vst [vmem:[#allocation16 + $0x70] sm:$0xff] %v7377_v36  ;;  %v7315_v29 = vmul.f32 %v10611_v33, %v7243_v28  ;;  %v7348_v34 = vadd.f32 %v10613_v26, %v7310_v39  ;;  %v7349_v15 = vadd.f32 %v10613_v26, %v7311_v4  ;;  %v7257_v28 = vld [vmem:[#allocation3 + $0x120] sm:$0xff]  ;;  %v7259_v24 = vld [vmem:[#allocation3 + $0x130] sm:$0xff] }
 0x48a   : > { %7410 = vst [vmem:[#allocation16 + $0x78] sm:$0xff] %v7378_v40  ;;  %v7350_v43 = vadd.f32 %v10613_v26, %v7312_v0  ;;  %v7316_v44 = vmul.f32 %v10611_v33, %v7244_v38  ;;  %v7379_v47 = vmax.f32 %v7347_v41, 0.0  ;;  %v7351_v50 = vadd.f32 %v10613_v26, %v7313_v6  ;;  %v7260_v39 = vld [vmem:[#allocation3 + $0x138] sm:$0xff] }
 0x48b   : > { %v7352_v51 = vadd.f32 %v10613_v26, %v7314_v42  ;;  %v7353_v53 = vadd.f32 %v10613_v26, %v7315_v29  ;;  %v7380_v57 = vmax.f32 %v7348_v34, 0.0  ;;  %v7381_v58 = vmax.f32 %v7349_v15, 0.0 }
 0x48c   : > { %v7382_v59 = vmax.f32 %v7350_v43, 0.0  ;;  %v7354_v60 = vadd.f32 %v10613_v26, %v7316_v44  ;;  %7411 = vst [vmem:[#allocation16 + $0x80] sm:$0xff] %v7379_v47  ;;  %v7383_v63 = vmax.f32 %v7351_v50, 0.0  ;;  %v7317_v13 = vmul.f32 %v10611_v33, %v7245_v46  ;;  %v7261_v50 = vld [vmem:[#allocation3 + $0x140] sm:$0xff] }
 0x48d   : > { %v7384_v11 = vmax.f32 %v7352_v51, 0.0  ;;  %v7385_v22 = vmax.f32 %v7353_v53, 0.0  ;;  %7412 = vst [vmem:[#allocation16 + $0x88] sm:$0xff] %v7380_v57  ;;  %7413 = vst [vmem:[#allocation16 + $0x90] sm:$0xff] %v7381_v58  ;;  %v7318_v5 = vmul.f32 %v10611_v33, %v7246_v25  ;;  %v7319_v8 = vmul.f32 %v10611_v33, %v7247_v56  ;;  %v7263_v57 = vld [vmem:[#allocation3 + $0x150] sm:$0xff]  ;;  %v7264_v58 = vld [vmem:[#allocation3 + $0x158] sm:$0xff] }
 0x48e   : > { %7414 = vst [vmem:[#allocation16 + $0x98] sm:$0xff] %v7382_v59  ;;  %v7386_v10 = vmax.f32 %v7354_v60, 0.0  ;;  %v7320_v45 = vmul.f32 %v10611_v33, %v7248_v17  ;;  %7415 = vst [vmem:[#allocation16 + $0xa0] sm:$0xff] %v7383_v63  ;;  %v7355_v21 = vadd.f32 %v10613_v26, %v7317_v13  ;;  %v7321_v30 = vmul.f32 %v10611_v33, %v7249_v61  ;;  %v7262_v17 = vld [vmem:[#allocation3 + $0x148] sm:$0xff] }
 0x48f   : > { %7416 = vst [vmem:[#allocation16 + $0xa8] sm:$0xff] %v7384_v11  ;;  %7417 = vst [vmem:[#allocation16 + $0xb0] sm:$0xff] %v7385_v22  ;;  %v7322_v52 = vmul.f32 %v10611_v33, %v7250_v1  ;;  %v7323_v31 = vmul.f32 %v10611_v33, %v7251_v3  ;;  %v7356_v32 = vadd.f32 %v10613_v26, %v7318_v5  ;;  %v7265_v3 = vld [vmem:[#allocation3 + $0x160] sm:$0xff]  ;;  %v7266_v63 = vld [vmem:[#allocation3 + $0x168] sm:$0xff] }
 0x490   : > { %7418 = vst [vmem:[#allocation16 + $0xb8] sm:$0xff] %v7386_v10  ;;  %v7357_v23 = vadd.f32 %v10613_v26, %v7319_v8  ;;  %v7358_v49 = vadd.f32 %v10613_v26, %v7320_v45  ;;  %v7324_v20 = vmul.f32 %v10611_v33, %v7252_v12  ;;  %v7387_v7 = vmax.f32 %v7355_v21, 0.0  ;;  %v7267_v11 = vld [vmem:[#allocation3 + $0x170] sm:$0xff]  ;;  %v7268_v5 = vld [vmem:[#allocation3 + $0x178] sm:$0xff] }
 0x491   : > { %v7359_v9 = vadd.f32 %v10613_v26, %v7321_v30  ;;  %v7360_v16 = vadd.f32 %v10613_v26, %v7322_v52  ;;  %v7361_v19 = vadd.f32 %v10613_v26, %v7323_v31  ;;  %v7388_v14 = vmax.f32 %v7356_v32, 0.0 }
 0x492   : > { %v7389_v18 = vmax.f32 %v7357_v23, 0.0  ;;  %v7390_v54 = vmax.f32 %v7358_v49, 0.0  ;;  %v7362_v62 = vadd.f32 %v10613_v26, %v7324_v20  ;;  %7419 = vst [vmem:[#allocation16 + $0xc0] sm:$0xff] %v7387_v7  ;;  %v7427_v40 = vmul.f32 %v10611_v33, %v7253_v27 }
 0x493   : > { %v7391_v36 = vmax.f32 %v7359_v9, 0.0  ;;  %v7392_v37 = vmax.f32 %v7360_v16, 0.0  ;;  %v7393_v38 = vmax.f32 %v7361_v19, 0.0  ;;  %7420 = vst [vmem:[#allocation16 + $0xc8] sm:$0xff] %v7388_v14  ;;  %v7428_v0 = vmul.f32 %v10611_v33, %v7254_v48  ;;  %v7269_v9 = vld [vmem:[#allocation3 + $0x180] sm:$0xff]  ;;  %v7271_v14 = vld [vmem:[#allocation3 + $0x190] sm:$0xff] }
 0x494   : > { %7421 = vst [vmem:[#allocation16 + $0xd0] sm:$0xff] %v7389_v18  ;;  %7422 = vst [vmem:[#allocation16 + $0xd8] sm:$0xff] %v7390_v54  ;;  %v7394_v4 = vmax.f32 %v7362_v62, 0.0  ;;  %v7429_v41 = vmul.f32 %v10611_v33, %v7255_v35  ;;  %v7430_v6 = vmul.f32 %v10611_v33, %v7256_v2  ;;  %v7459_v42 = vadd.f32 %v10613_v26, %v7427_v40  ;;  %v7270_v2 = vld [vmem:[#allocation3 + $0x188] sm:$0xff]  ;;  %v7272_v18 = vld [vmem:[#allocation3 + $0x198] sm:$0xff] }
 0x495   : > { %7423 = vst [vmem:[#allocation16 + $0xe0] sm:$0xff] %v7391_v36  ;;  %7424 = vst [vmem:[#allocation16 + $0xe8] sm:$0xff] %v7392_v37  ;;  %v7431_v29 = vmul.f32 %v10611_v33, %v7257_v28  ;;  %v7432_v34 = vmul.f32 %v10611_v33, %v7258_v55  ;;  %v7433_v15 = vmul.f32 %v10611_v33, %v7259_v24  ;;  %v7273_v24 = vld [vmem:[#allocation3 + $0x1a0] sm:$0xff]  ;;  %v7274_v36 = vld [vmem:[#allocation3 + $0x1a8] sm:$0xff] }
 0x496   : > { %7425 = vst [vmem:[#allocation16 + $0xf0] sm:$0xff] %v7393_v38  ;;  %7426 = vst [vmem:[#allocation16 + $0xf8] sm:$0xff] %v7394_v4  ;;  %v7460_v43 = vadd.f32 %v10613_v26, %v7428_v0  ;;  %v7461_v44 = vadd.f32 %v10613_v26, %v7429_v41  ;;  %v7462_v46 = vadd.f32 %v10613_v26, %v7430_v6  ;;  %v7491_v51 = vmax.f32 %v7459_v42, 0.0  ;;  %v7275_v37 = vld [vmem:[#allocation3 + $0x1b0] sm:$0xff]  ;;  %v7276_v0 = vld [vmem:[#allocation3 + $0x1b8] sm:$0xff] }
 0x497   : > { %v7434_v47 = vmul.f32 %v10611_v33, %v7260_v39  ;;  %v7463_v53 = vadd.f32 %v10613_v26, %v7431_v29  ;;  %v7464_v25 = vadd.f32 %v10613_v26, %v7432_v34  ;;  %v7465_v56 = vadd.f32 %v10613_v26, %v7433_v15 }
 0x498   : > { %v7492_v59 = vmax.f32 %v7460_v43, 0.0  ;;  %v7493_v60 = vmax.f32 %v7461_v44, 0.0  ;;  %v7494_v61 = vmax.f32 %v7462_v46, 0.0  ;;  %8115 = vst [vmem:[#allocation16 + $0x100] sm:$0xff] %v7491_v51  ;;  %v7435_v10 = vmul.f32 %v10611_v33, %v7261_v50 }
 0x499   : > { %v7466_v1 = vadd.f32 %v10613_v26, %v7434_v47  ;;  %v7495_v22 = vmax.f32 %v7463_v53, 0.0  ;;  %v7496_v13 = vmax.f32 %v7464_v25, 0.0  ;;  %v7497_v12 = vmax.f32 %v7465_v56, 0.0  ;;  %v7277_v53 = vld [vmem:[#allocation3 + $0x1c0] sm:$0xff] }
 0x49a   : > { %8116 = vst [vmem:[#allocation16 + $0x108] sm:$0xff] %v7492_v59  ;;  %8117 = vst [vmem:[#allocation16 + $0x110] sm:$0xff] %v7493_v60  ;;  %v7436_v45 = vmul.f32 %v10611_v33, %v7262_v17  ;;  %v7437_v21 = vmul.f32 %v10611_v33, %v7263_v57  ;;  %v7438_v30 = vmul.f32 %v10611_v33, %v7264_v58  ;;  %v7278_v58 = vld [vmem:[#allocation3 + $0x1c8] sm:$0xff]  ;;  %v7279_v59 = vld [vmem:[#allocation3 + $0x1d0] sm:$0xff] }
 0x49b   : > { %8118 = vst [vmem:[#allocation16 + $0x118] sm:$0xff] %v7494_v61  ;;  %v7498_v8 = vmax.f32 %v7466_v1, 0.0  ;;  %8119 = vst [vmem:[#allocation16 + $0x120] sm:$0xff] %v7495_v22  ;;  %v7467_v52 = vadd.f32 %v10613_v26, %v7435_v10  ;;  %v7439_v31 = vmul.f32 %v10611_v33, %v7265_v3  ;;  %v7440_v32 = vmul.f32 %v10611_v33, %v7266_v63  ;;  %v7280_v60 = vld [vmem:[#allocation3 + $0x1d8] sm:$0xff]  ;;  %v7282_v22 = vld [vmem:[#allocation3 + $0x1e8] sm:$0xff] }
 0x49c   : > { %8120 = vst [vmem:[#allocation16 + $0x128] sm:$0xff] %v7496_v13  ;;  %8121 = vst [vmem:[#allocation16 + $0x130] sm:$0xff] %v7497_v12  ;;  %v7441_v23 = vmul.f32 %v10611_v33, %v7267_v11  ;;  %v7468_v49 = vadd.f32 %v10613_v26, %v7436_v45  ;;  %v7469_v20 = vadd.f32 %v10613_v26, %v7437_v21  ;;  %v7281_v11 = vld [vmem:[#allocation3 + $0x1e0] sm:$0xff]  ;;  %v7283_v13 = vld [vmem:[#allocation3 + $0x1f0] sm:$0xff] }
 0x49d   : > { %8122 = vst [vmem:[#allocation16 + $0x138] sm:$0xff] %v7498_v8  ;;  %v7470_v27 = vadd.f32 %v10613_v26, %v7438_v30  ;;  %v7442_v7 = vmul.f32 %v10611_v33, %v7268_v5  ;;  %v7499_v16 = vmax.f32 %v7467_v52, 0.0  ;;  %v7471_v19 = vadd.f32 %v10613_v26, %v7439_v31  ;;  %v7284_v45 = vld [vmem:[#allocation3 + $0x1f8] sm:$0xff] }
 0x49e   : > { %v7472_v48 = vadd.f32 %v10613_v26, %v7440_v32  ;;  %v7473_v35 = vadd.f32 %v10613_v26, %v7441_v23  ;;  %v7500_v54 = vmax.f32 %v7468_v49, 0.0  ;;  %v7501_v62 = vmax.f32 %v7469_v20, 0.0 }
 0x49f   : > { %v7502_v28 = vmax.f32 %v7470_v27, 0.0  ;;  %v7474_v55 = vadd.f32 %v10613_v26, %v7442_v7  ;;  %8123 = vst [vmem:[#allocation16 + $0x140] sm:$0xff] %v7499_v16  ;;  %v7503_v38 = vmax.f32 %v7471_v19, 0.0  ;;  %v7443_v4 = vmul.f32 %v10611_v33, %v7269_v9 }
 0x4a0   : > { %v7504_v40 = vmax.f32 %v7472_v48, 0.0  ;;  %v7505_v39 = vmax.f32 %v7473_v35, 0.0  ;;  %8124 = vst [vmem:[#allocation16 + $0x148] sm:$0xff] %v7500_v54  ;;  %8125 = vst [vmem:[#allocation16 + $0x150] sm:$0xff] %v7501_v62  ;;  %v7444_v6 = vmul.f32 %v10611_v33, %v7270_v2  ;;  %v7445_v42 = vmul.f32 %v10611_v33, %v7271_v14 }
 0x4a1   : > { %8126 = vst [vmem:[#allocation16 + $0x158] sm:$0xff] %v7502_v28  ;;  %v7506_v41 = vmax.f32 %v7474_v55, 0.0  ;;  %v7446_v29 = vmul.f32 %v10611_v33, %v7272_v18  ;;  %8127 = vst [vmem:[#allocation16 + $0x160] sm:$0xff] %v7503_v38  ;;  %v7475_v34 = vadd.f32 %v10613_v26, %v7443_v4  ;;  %v7447_v15 = vmul.f32 %v10611_v33, %v7273_v24 }
 0x4a2   : > { %8128 = vst [vmem:[#allocation16 + $0x168] sm:$0xff] %v7504_v40  ;;  %8129 = vst [vmem:[#allocation16 + $0x170] sm:$0xff] %v7505_v39  ;;  %v7448_v43 = vmul.f32 %v10611_v33, %v7274_v36  ;;  %v7449_v44 = vmul.f32 %v10611_v33, %v7275_v37  ;;  %v7476_v46 = vadd.f32 %v10613_v26, %v7444_v6 }
 0x4a3   : > { %8130 = vst [vmem:[#allocation16 + $0x178] sm:$0xff] %v7506_v41  ;;  %v7477_v47 = vadd.f32 %v10613_v26, %v7445_v42  ;;  %v7478_v50 = vadd.f32 %v10613_v26, %v7446_v29  ;;  %v7450_v51 = vmul.f32 %v10611_v33, %v7276_v0  ;;  %v7507_v25 = vmax.f32 %v7475_v34, 0.0 }
 0x4a4   : > { %v7479_v56 = vadd.f32 %v10613_v26, %v7447_v15  ;;  %v7480_v17 = vadd.f32 %v10613_v26, %v7448_v43  ;;  %v7481_v57 = vadd.f32 %v10613_v26, %v7449_v44  ;;  %v7508_v61 = vmax.f32 %v7476_v46, 0.0 }
 0x4a5   : > { %v7509_v1 = vmax.f32 %v7477_v47, 0.0  ;;  %v7510_v3 = vmax.f32 %v7478_v50, 0.0  ;;  %v7482_v63 = vadd.f32 %v10613_v26, %v7450_v51  ;;  %8131 = vst [vmem:[#allocation16 + $0x180] sm:$0xff] %v7507_v25  ;;  %v7451_v8 = vmul.f32 %v10611_v33, %v7277_v53 }
 0x4a6   : > { %v7511_v12 = vmax.f32 %v7479_v56, 0.0  ;;  %v7512_v10 = vmax.f32 %v7480_v17, 0.0  ;;  %v7513_v5 = vmax.f32 %v7481_v57, 0.0  ;;  %8132 = vst [vmem:[#allocation16 + $0x188] sm:$0xff] %v7508_v61  ;;  %v7452_v30 = vmul.f32 %v10611_v33, %v7278_v58 }
 0x4a7   : > { %8133 = vst [vmem:[#allocation16 + $0x190] sm:$0xff] %v7509_v1  ;;  %8134 = vst [vmem:[#allocation16 + $0x198] sm:$0xff] %v7510_v3  ;;  %v7514_v21 = vmax.f32 %v7482_v63, 0.0  ;;  %v7453_v52 = vmul.f32 %v10611_v33, %v7279_v59  ;;  %v7454_v31 = vmul.f32 %v10611_v33, %v7280_v60  ;;  %v7483_v32 = vadd.f32 %v10613_v26, %v7451_v8 }
 0x4a8   : > { %8135 = vst [vmem:[#allocation16 + $0x1a0] sm:$0xff] %v7511_v12  ;;  %8136 = vst [vmem:[#allocation16 + $0x1a8] sm:$0xff] %v7512_v10  ;;  %v7455_v23 = vmul.f32 %v10611_v33, %v7281_v11  ;;  %v7456_v49 = vmul.f32 %v10611_v33, %v7282_v22  ;;  %v7457_v20 = vmul.f32 %v10611_v33, %v7283_v13 }
 0x4a9   : > { %8137 = vst [vmem:[#allocation16 + $0x1b0] sm:$0xff] %v7513_v5  ;;  %8138 = vst [vmem:[#allocation16 + $0x1b8] sm:$0xff] %v7514_v21  ;;  %v7484_v27 = vadd.f32 %v10613_v26, %v7452_v30  ;;  %v7485_v7 = vadd.f32 %v10613_v26, %v7453_v52  ;;  %v7486_v9 = vadd.f32 %v10613_v26, %v7454_v31  ;;  %v7515_v19 = vmax.f32 %v7483_v32, 0.0 }
 0x4aa   : > { %v7458_v16 = vmul.f32 %v10611_v33, %v7284_v45  ;;  %v7487_v48 = vadd.f32 %v10613_v26, %v7455_v23  ;;  %v7488_v35 = vadd.f32 %v10613_v26, %v7456_v49  ;;  %v7489_v2 = vadd.f32 %v10613_v26, %v7457_v20 }
 0x4ab   : > { %v7516_v14 = vmax.f32 %v7484_v27, 0.0  ;;  %v7517_v18 = vmax.f32 %v7485_v7, 0.0  ;;  %v7518_v54 = vmax.f32 %v7486_v9, 0.0  ;;  %8139 = vst [vmem:[#allocation16 + $0x1c0] sm:$0xff] %v7515_v19 }
 0x4ac   : > { %v7490_v62 = vadd.f32 %v10613_v26, %v7458_v16  ;;  %v7519_v28 = vmax.f32 %v7487_v48, 0.0  ;;  %v7520_v55 = vmax.f32 %v7488_v35, 0.0  ;;  %v7521_v24 = vmax.f32 %v7489_v2, 0.0 }
 0x4ad   : > { %8140 = vst [vmem:[#allocation16 + $0x1c8] sm:$0xff] %v7516_v14  ;;  %8141 = vst [vmem:[#allocation16 + $0x1d0] sm:$0xff] %v7517_v18 }
 0x4ae   : > { %8142 = vst [vmem:[#allocation16 + $0x1d8] sm:$0xff] %v7518_v54  ;;  %v7522_v33 = vmax.f32 %v7490_v62, 0.0  ;;  %8143 = vst [vmem:[#allocation16 + $0x1e0] sm:$0xff] %v7519_v28 }
 0x4af   : > { %8144 = vst [vmem:[#allocation16 + $0x1e8] sm:$0xff] %v7520_v55  ;;  %8145 = vst [vmem:[#allocation16 + $0x1f0] sm:$0xff] %v7521_v24 }
 0x4b0   : > { %8146 = vst [vmem:[#allocation16 + $0x1f8] sm:$0xff] %v7522_v33 }
 0x4b1 PF: > { %p10745_p9 = scmp.eq.s32.totalorder %s7677_s18, 1  ;;  %s8661_s9 = smov [#allocation16]  }
 0x4b2   : > { %s7572_s12 = sshll.u32 %s8661_s9, 4  ;;  %s7573_s12 = int_to_ptr.vmem [resolvable:$true] %s7572_s12 }
 0x4b3   : > { %s8580_s13 = scalar_lea.vmem %s7573_s12, 8192  ;;  %s8586_s14 = scalar_lea.vmem %s7573_s12, 16384 }
 0x4b4   : > { %p8581_p10 = scmp.ne.s32.totalorder %s7573_s12, %s8580_s13  ;;  %p8587_p13 = scmp.lt.s32.totalorder %s7573_s12, %s7573_s12 }
 0x4b5   : > { %p8588_p0 = scmp.lt.s32.totalorder %s8586_s14, %s8580_s13 }
 0x4b6   : > { %p8582_p11 = pnand %p8581_p10, %p10745_p9 }
 0x4b7   : > { %p8589_p1 = por %p8588_p0, %p8587_p13 }
 0x4b8   : > { %p8583_p12 = pneg %p8582_p11 }
 0x4ba   : > { %p8590_p4 = pnand %p8589_p1, %p8583_p12 }
 0x4bc   : > { %8593 = shalt.err (!%p8590_p4)
}
 0x4bd   : > { %s8594_s29 = scalar_lea.hbm %s10783_s4, 8192 }
 0x4be   : > { %p8595_p7 = scmp.ne.s32.totalorder %s10783_s4, %s8594_s29  ;;  %p8600_p5 = scmp.lt.u32.totalorder %s8594_s29, %s10783_s4 }
 0x4c0   : > { %p8596_p2 = pnand %p8595_p7, %p10745_p9 }
 0x4c2   : > { %p8597_p3 = pneg %p8596_p2 }
 0x4c4   : > { %p8602_p8 = pnand %p8600_p5, %p8597_p3 }
 0x4c6   : > { %8605 = shalt.err (!%p8602_p8)
}
 0x4c7   : > { %s8662_s8 = smov 128   ;;  %s8663_s23 = smov 8  }
 0x4c8   : > { %8292 = dma.vmem_to_hbm [thread:$0]  (%p10745_p9), %s7573_s12, 8192, %s10783_s4, [#allocation10], %s8662_s8, %s8662_s8, %s8663_s23  }
 0x4c9 PF: > { %p8321_p6 = scmp.ge.s32.totalorder %s8644_s17, 2  ;;  %p8322_p10 = scmp.eq.s32.totalorder %s7678_s19, 1 }
 0x4cb   : > { %p8309_p11 = pnand %p8322_p10, %p8321_p6 }
 0x4cd   : > { %8631 = dma.done.wait (!%p8309_p11), [#allocation10], 8192  }
 0x4ce   : > { %8633 = vsyncadd (!%p8309_p11), [#allocation10], 4294959104  ;;  %s20_s17 = sadd.s32 1, %s8644_s17   ;;  %s10830_s15 = smov %s8640_s16 }
 0x4cf   : > { %p17_p12 = scmp.ge.s32.totalorder %s20_s17, 4   ;;  %s10831_s16 = smov %s10833_s25 }
 0x4d1   :  { %19 = sbr.rel (!%p17_p12) target bundleno = 6 (0x6), region = 110 }
 0x4d8   :  { %7593 = vsyncpa [#allocation9], 1 }
 0x4d9   :  { %7595 = vsyncpa [#allocation9 + $0x1], 1 }
 0x4da   :  { %7596 = vsyncpa [#allocation12], 1 }
 0x4db   :  { %7597 = vsyncpa [#allocation15], 1 }
 0x4dc   :  { %7598 = vsyncpa [#allocation10], 1 }
 0x4dd   :  { %7600 = vsyncpa [#allocation10 + $0x1], 1 }

</bundles_post_ra>
